<compile_context>
chip_gen: v7x
topology: tpu7x:2x2x1
jax: 0.10.0
libtpu: 0.0.40
codegen_flags: <defaults>
</compile_context>

<pallas_src>
import functools

import jax
import jax.numpy as jnp
import numpy as np
from jax.experimental import pallas as pl
from jax.experimental.pallas import tpu as pltpu

BN_EPS = 1e-5


def _vmem_limit(block_byte_sizes, cap=40 * 1024 * 1024):
    """Scoped-VMEM hint derived from the actual per-step block bytes.

    Blocks are double-buffered and padded to (8,128)/(16,128) tiles, so a
    generous padding factor + fixed headroom is applied.  Capped at 40 MiB to
    stay inside v7x's 64 MiB/TC physical VMEM (on v5e/v6e with 128 MiB the cap
    could be raised to ~96 MiB for larger tiles).
    """
    need = 8 * sum(int(b) for b in block_byte_sizes) + (4 << 20)
    return int(min(max(need, 16 << 20), cap))


# ----------------------------- Pallas kernels ------------------------------

def _conv3d_stats_kernel(x0_ref, x1_ref, x2_ref, w_ref, b_ref,
                         y_ref, ps_ref, *, H, W):
    """One (n, d) output plane of a 3x3x3 'same' conv + bias, plus partial BN stats.

    x{0,1,2}_ref : (H+2, W+2, Ci) bf16   spatially padded input at depth d+{0,1,2}
    w_ref        : (27*Ci, Co)    bf16   taps folded into the contraction dim
    b_ref        : (1, Co)        f32
    y_ref        : (H*W, Co)      bf16   conv output plane (pre-BN)
    ps_ref       : (2, Co)        f32    [sum(y), sum(y*y)] over this plane
    """
    HW = H * W
    # Build the im2col patch once in VMEM: 27 shifted windows concatenated on
    # the channel (lane) axis -> a single K = 27*Ci MXU matmul.
    cols = []
    for slab in (x0_ref, x1_ref, x2_ref):          # kd = 0, 1, 2
        ci = slab.shape[-1]
        for kh in range(3):
            for kw in range(3):
                cols.append(slab[kh:kh + H, kw:kw + W, :].reshape(HW, ci))
    patch = jnp.concatenate(cols, axis=-1)          # (HW, 27*Ci) bf16

    y = jnp.dot(patch, w_ref[...],
                preferred_element_type=jnp.float32) + b_ref[...]   # f32

    # Exact f32 per-plane partial BatchNorm statistics (reduced across the grid
    # outside the kernel) -- computed before the bf16 writeback cast.
    ps_ref[...] = jnp.concatenate(
        [jnp.sum(y, axis=0, keepdims=True),
         jnp.sum(y * y, axis=0, keepdims=True)], axis=0)
    y_ref[...] = y.astype(y_ref.dtype)              # bf16 writeback


def _bn_relu_kernel(y_ref, scale_ref, shift_ref, o_ref):
    """Fused BatchNorm (pre-folded per-lane scale/shift) + ReLU, f32 math."""
    y = y_ref[...].astype(jnp.float32)
    o_ref[...] = jnp.maximum(
        y * scale_ref[...] + shift_ref[...], 0.0).astype(o_ref.dtype)


# ------------------------------ wrappers ------------------------------------

def conv3d_bn_relu(x, w_pt, b, gamma, beta, *, out_dtype=jnp.float32):
    """Conv3d(k=3, s=1, p=1) + bias + BatchNorm3d(batch stats) + ReLU, NDHWC.

    x      : (N, D, H, W, Ci)  float32 or bfloat16
    w_pt   : (Co, Ci, 3, 3, 3) PyTorch Conv3d weight layout
    b, gamma, beta : (Co,)
    """
    N, D, H, W, Ci = x.shape
    Co = w_pt.shape[0]
    HW = H * W

    # ---- pass 1: conv + bias + per-plane partial BN stats (Pallas) ----------
    xp = jnp.pad(x.astype(jnp.bfloat16),
                 ((0, 0), (1, 1), (1, 1), (1, 1), (0, 0)))  # (N, D+2, H+2, W+2, Ci)
    # Taps ordered (kd, kh, kw, ci) along the folded contraction dim.
    w_folded = jnp.transpose(w_pt, (2, 3, 4, 1, 0)).reshape(27 * Ci, Co)
    w_folded = w_folded.astype(jnp.bfloat16)
    b2d = b.reshape(1, Co).astype(jnp.float32)

    def slab_spec(kd):
        # Depth tap kd: block index d+kd into the depth-padded array.
        return pl.BlockSpec((None, None, H + 2, W + 2, Ci),
                            lambda n, d, kd=kd: (n, d + kd, 0, 0, 0))

    slab_bytes = (H + 2) * (W + 2) * Ci * 2
    vmem1 = _vmem_limit([3 * slab_bytes, 27 * Ci * Co * 2,
                         HW * Co * 2, HW * Co * 4])

    y, pstats = pl.pallas_call(
        functools.partial(_conv3d_stats_kernel, H=H, W=W),
        grid=(N, D),
        in_specs=[slab_spec(0), slab_spec(1), slab_spec(2),
                  pl.BlockSpec((27 * Ci, Co), lambda n, d: (0, 0)),  # resident W
                  pl.BlockSpec((1, Co), lambda n, d: (0, 0))],       # resident b
        out_specs=[pl.BlockSpec((None, None, HW, Co), lambda n, d: (n, d, 0, 0)),
                   pl.BlockSpec((None, None, 2, Co), lambda n, d: (n, d, 0, 0))],
        out_shape=[jax.ShapeDtypeStruct((N, D, HW, Co), jnp.bfloat16),
                   jax.ShapeDtypeStruct((N, D, 2, Co), jnp.float32)],
        compiler_params=pltpu.CompilerParams(
            dimension_semantics=("parallel", "parallel"),
            vmem_limit_bytes=vmem1),
    )(xp, xp, xp, w_folded, b2d)

    # ---- finalize BN stats (tiny O(N*D*Co) math), fold into scale/shift -----
    m_total = N * D * HW
    sums = jnp.sum(pstats, axis=(0, 1))                 # (2, Co)
    mean = sums[0] / m_total
    var = jnp.maximum(sums[1] / m_total - mean * mean, 0.0)  # clamped, biased var
    scale = gamma.astype(jnp.float32) * jax.lax.rsqrt(var + BN_EPS)
    shift = beta.astype(jnp.float32) - mean * scale

    # ---- pass 2: lane-dense BatchNorm + ReLU sweep (Pallas) ------------------
    total = N * D * HW * Co
    if total % 128 == 0 and 128 % Co == 0:
        # Lane-dense path: pure row-major reinterpretation to (rows, 128);
        # per-channel scale/shift become per-lane vectors (period Co).
        L = 128
        reps = 128 // Co
        scale_l = jnp.tile(scale, reps).reshape(1, L)
        shift_l = jnp.tile(shift, reps).reshape(1, L)
    else:
        # Lane-sparse fallback (correct for any Co, e.g. 96/192; masked stores).
        L = Co
        scale_l = scale.reshape(1, L)
        shift_l = shift.reshape(1, L)
    rows = total // L
    y2d = y.reshape(rows, L)

    TR = 1024 if rows > 1024 else rows               # fixed block; cdiv grid below
    vmem2 = _vmem_limit([TR * L * 2, TR * L * jnp.dtype(out_dtype).itemsize])
    out2d = pl.pallas_call(
        _bn_relu_kernel,
        grid=(pl.cdiv(rows, TR),),
        in_specs=[pl.BlockSpec((TR, L), lambda i: (i, 0)),
                  pl.BlockSpec((1, L), lambda i: (0, 0)),
                  pl.BlockSpec((1, L), lambda i: (0, 0))],
        out_specs=pl.BlockSpec((TR, L), lambda i: (i, 0)),
        out_shape=jax.ShapeDtypeStruct((rows, L), out_dtype),
        compiler_params=pltpu.CompilerParams(
            dimension_semantics=("parallel",),
            vmem_limit_bytes=vmem2),
    )(y2d, scale_l, shift_l)
    return out2d.reshape(N, D, H, W, Co)


# ----------------------------- DoubleConv ------------------------------------

def init_params(key, in_channels, out_channels):
    ci, co = in_channels, out_channels
    ks = jax.random.split(key, 8)
    return {
        "c1_w": 0.1 * jax.random.normal(ks[0], (co, ci, 3, 3, 3), jnp.float32),
        "c1_b": 0.1 * jax.random.normal(ks[1], (co,), jnp.float32),
        "bn1_g": 1.0 + 0.1 * jax.random.normal(ks[2], (co,), jnp.float32),
        "bn1_b": 0.1 * jax.random.normal(ks[3], (co,), jnp.float32),
        "c2_w": 0.1 * jax.random.normal(ks[4], (co, co, 3, 3, 3), jnp.float32),
        "c2_b": 0.1 * jax.random.normal(ks[5], (co,), jnp.float32),
        "bn2_g": 1.0 + 0.1 * jax.random.normal(ks[6], (co,), jnp.float32),
        "bn2_b": 0.1 * jax.random.normal(ks[7], (co,), jnp.float32),
    }


def double_conv_forward(p, x):
    """DoubleConv forward: NCDHW in, NCDHW out (PyTorch training-mode BN)."""
    x = jnp.transpose(x, (0, 2, 3, 4, 1))                      # NCDHW -> NDHWC
    x = conv3d_bn_relu(x, p["c1_w"], p["c1_b"], p["bn1_g"], p["bn1_b"],
                       out_dtype=jnp.bfloat16)                 # bf16 feeds conv2's MXU
    x = conv3d_bn_relu(x, p["c2_w"], p["c2_b"], p["bn2_g"], p["bn2_b"],
                       out_dtype=jnp.float32)
    return jnp.transpose(x, (0, 4, 1, 2, 3))                   # NDHWC -> NCDHW


# -------------------------- pure-JAX reference -------------------------------

def _ref_conv_bn_relu(x, w_pt, b, g, beta):
    w = jnp.transpose(w_pt, (2, 3, 4, 1, 0))                   # DHWIO
    y = jax.lax.conv_general_dilated(
        x, w, window_strides=(1, 1, 1),
        padding=((1, 1), (1, 1), (1, 1)),
        dimension_numbers=("NDHWC", "DHWIO", "NDHWC"))
    y = y + b
    mean = jnp.mean(y, axis=(0, 1, 2, 3), keepdims=True)
    var = jnp.mean(jnp.square(y - mean), axis=(0, 1, 2, 3), keepdims=True)
    return jnp.maximum((y - mean) * jax.lax.rsqrt(var + BN_EPS) * g + beta, 0.0)


def ref_forward(p, x):
    x = jnp.transpose(x, (0, 2, 3, 4, 1))
    x = _ref_conv_bn_relu(x, p["c1_w"], p["c1_b"], p["bn1_g"], p["bn1_b"])
    x = _ref_conv_bn_relu(x, p["c2_w"], p["c2_b"], p["bn2_g"], p["bn2_b"])
    return jnp.transpose(x, (0, 4, 1, 2, 3))


# --------------------------------- main ---------------------------------------

if __name__ == "__main__":
    key = jax.random.PRNGKey(0)
    k_x, k_p = jax.random.split(key)

    N, C_IN, C_OUT, D, H, W = 2, 4, 8, 8, 8, 8
    x = jax.random.normal(k_x, (N, C_IN, D, H, W), jnp.float32)
    params = init_params(k_p, C_IN, C_OUT)

    out = jax.jit(double_conv_forward)(params, x)
    out = jax.block_until_ready(out)
    assert out.shape == (N, C_OUT, D, H, W), out.shape

    # Kernel uses bf16 MXU operands and bf16 intermediate activations; compare
    # against the f32 reference with a bf16-appropriate tolerance.
    ref = ref_forward(params, x)
    np.testing.assert_allclose(np.asarray(out), np.asarray(ref),
                               rtol=5e-2, atol=5e-2)
    print("KERNEL_OK")
</pallas_src>

<mosaic_0001>
module attributes {stable_mosaic.version = 11 : i64} {
  func.func @_conv3d_stats_kernel(%arg0: i32, %arg1: i32, %arg2: memref<1x1x10x10x4xbf16, #tpu.memory_space<vmem>>, %arg3: memref<1x1x10x10x4xbf16, #tpu.memory_space<vmem>>, %arg4: memref<1x1x10x10x4xbf16, #tpu.memory_space<vmem>>, %arg5: memref<108x8xbf16, #tpu.memory_space<vmem>>, %arg6: memref<1x8xf32, #tpu.memory_space<vmem>>, %arg7: memref<1x1x64x8xbf16, #tpu.memory_space<vmem>>, %arg8: memref<1x1x2x8xf32, #tpu.memory_space<vmem>>) attributes {dimension_semantics = [#tpu.dimension_semantics<parallel>, #tpu.dimension_semantics<parallel>], iteration_bounds = array<i64: 2, 8>, scalar_prefetch = 0 : i64, scratch_operands = 0 : i64, tpu.core_type = #tpu.core_type<tc>, window_params = [{transform_indices = @transform_0, window_bounds = array<i64: 1, 1, 10, 10, 4>}, {transform_indices = @transform_1, window_bounds = array<i64: 1, 1, 10, 10, 4>}, {transform_indices = @transform_2, window_bounds = array<i64: 1, 1, 10, 10, 4>}, {pipeline_mode = #tpu.pipeline_mode<synchronous>, transform_indices = @transform_3, window_bounds = array<i64: 108, 8>}, {pipeline_mode = #tpu.pipeline_mode<synchronous>, transform_indices = @transform_4, window_bounds = array<i64: 1, 8>}, {transform_indices = @transform_5, window_bounds = array<i64: 1, 1, 64, 8>}, {transform_indices = @transform_6, window_bounds = array<i64: 1, 1, 2, 8>}]} {
    %c0 = arith.constant 0 : index
    %c0_0 = arith.constant 0 : index
    %c0_1 = arith.constant 0 : index
    %c0_2 = arith.constant 0 : index
    %c0_3 = arith.constant 0 : index
    %0 = vector.load %arg2[%c0, %c0_0, %c0_1, %c0_2, %c0_3] : memref<1x1x10x10x4xbf16, #tpu.memory_space<vmem>>, vector<1x1x8x8x4xbf16>
    %1 = vector.shape_cast %0 : vector<1x1x8x8x4xbf16> to vector<8x8x4xbf16>
    %2 = vector.shape_cast %1 : vector<8x8x4xbf16> to vector<64x4xbf16>
    %c0_4 = arith.constant 0 : index
    %c0_5 = arith.constant 0 : index
    %c0_6 = arith.constant 0 : index
    %c1 = arith.constant 1 : index
    %c0_7 = arith.constant 0 : index
    %3 = vector.load %arg2[%c0_4, %c0_5, %c0_6, %c1, %c0_7] : memref<1x1x10x10x4xbf16, #tpu.memory_space<vmem>>, vector<1x1x8x8x4xbf16>
    %4 = vector.shape_cast %3 : vector<1x1x8x8x4xbf16> to vector<8x8x4xbf16>
    %5 = vector.shape_cast %4 : vector<8x8x4xbf16> to vector<64x4xbf16>
    %c0_8 = arith.constant 0 : index
    %c0_9 = arith.constant 0 : index
    %c0_10 = arith.constant 0 : index
    %c2 = arith.constant 2 : index
    %c0_11 = arith.constant 0 : index
    %6 = vector.load %arg2[%c0_8, %c0_9, %c0_10, %c2, %c0_11] : memref<1x1x10x10x4xbf16, #tpu.memory_space<vmem>>, vector<1x1x8x8x4xbf16>
    %7 = vector.shape_cast %6 : vector<1x1x8x8x4xbf16> to vector<8x8x4xbf16>
    %8 = vector.shape_cast %7 : vector<8x8x4xbf16> to vector<64x4xbf16>
    %c0_12 = arith.constant 0 : index
    %c0_13 = arith.constant 0 : index
    %c1_14 = arith.constant 1 : index
    %c0_15 = arith.constant 0 : index
    %c0_16 = arith.constant 0 : index
    %9 = vector.load %arg2[%c0_12, %c0_13, %c1_14, %c0_15, %c0_16] : memref<1x1x10x10x4xbf16, #tpu.memory_space<vmem>>, vector<1x1x8x8x4xbf16>
    %10 = vector.shape_cast %9 : vector<1x1x8x8x4xbf16> to vector<8x8x4xbf16>
    %11 = vector.shape_cast %10 : vector<8x8x4xbf16> to vector<64x4xbf16>
    %c0_17 = arith.constant 0 : index
    %c0_18 = arith.constant 0 : index
    %c1_19 = arith.constant 1 : index
    %c1_20 = arith.constant 1 : index
    %c0_21 = arith.constant 0 : index
    %12 = vector.load %arg2[%c0_17, %c0_18, %c1_19, %c1_20, %c0_21] : memref<1x1x10x10x4xbf16, #tpu.memory_space<vmem>>, vector<1x1x8x8x4xbf16>
    %13 = vector.shape_cast %12 : vector<1x1x8x8x4xbf16> to vector<8x8x4xbf16>
    %14 = vector.shape_cast %13 : vector<8x8x4xbf16> to vector<64x4xbf16>
    %c0_22 = arith.constant 0 : index
    %c0_23 = arith.constant 0 : index
    %c1_24 = arith.constant 1 : index
    %c2_25 = arith.constant 2 : index
    %c0_26 = arith.constant 0 : index
    %15 = vector.load %arg2[%c0_22, %c0_23, %c1_24, %c2_25, %c0_26] : memref<1x1x10x10x4xbf16, #tpu.memory_space<vmem>>, vector<1x1x8x8x4xbf16>
    %16 = vector.shape_cast %15 : vector<1x1x8x8x4xbf16> to vector<8x8x4xbf16>
    %17 = vector.shape_cast %16 : vector<8x8x4xbf16> to vector<64x4xbf16>
    %c0_27 = arith.constant 0 : index
    %c0_28 = arith.constant 0 : index
    %c2_29 = arith.constant 2 : index
    %c0_30 = arith.constant 0 : index
    %c0_31 = arith.constant 0 : index
    %18 = vector.load %arg2[%c0_27, %c0_28, %c2_29, %c0_30, %c0_31] : memref<1x1x10x10x4xbf16, #tpu.memory_space<vmem>>, vector<1x1x8x8x4xbf16>
    %19 = vector.shape_cast %18 : vector<1x1x8x8x4xbf16> to vector<8x8x4xbf16>
    %20 = vector.shape_cast %19 : vector<8x8x4xbf16> to vector<64x4xbf16>
    %c0_32 = arith.constant 0 : index
    %c0_33 = arith.constant 0 : index
    %c2_34 = arith.constant 2 : index
    %c1_35 = arith.constant 1 : index
    %c0_36 = arith.constant 0 : index
    %21 = vector.load %arg2[%c0_32, %c0_33, %c2_34, %c1_35, %c0_36] : memref<1x1x10x10x4xbf16, #tpu.memory_space<vmem>>, vector<1x1x8x8x4xbf16>
    %22 = vector.shape_cast %21 : vector<1x1x8x8x4xbf16> to vector<8x8x4xbf16>
    %23 = vector.shape_cast %22 : vector<8x8x4xbf16> to vector<64x4xbf16>
    %c0_37 = arith.constant 0 : index
    %c0_38 = arith.constant 0 : index
    %c2_39 = arith.constant 2 : index
    %c2_40 = arith.constant 2 : index
    %c0_41 = arith.constant 0 : index
    %24 = vector.load %arg2[%c0_37, %c0_38, %c2_39, %c2_40, %c0_41] : memref<1x1x10x10x4xbf16, #tpu.memory_space<vmem>>, vector<1x1x8x8x4xbf16>
    %25 = vector.shape_cast %24 : vector<1x1x8x8x4xbf16> to vector<8x8x4xbf16>
    %26 = vector.shape_cast %25 : vector<8x8x4xbf16> to vector<64x4xbf16>
    %c0_42 = arith.constant 0 : index
    %c0_43 = arith.constant 0 : index
    %c0_44 = arith.constant 0 : index
    %c0_45 = arith.constant 0 : index
    %c0_46 = arith.constant 0 : index
    %27 = vector.load %arg3[%c0_42, %c0_43, %c0_44, %c0_45, %c0_46] : memref<1x1x10x10x4xbf16, #tpu.memory_space<vmem>>, vector<1x1x8x8x4xbf16>
    %28 = vector.shape_cast %27 : vector<1x1x8x8x4xbf16> to vector<8x8x4xbf16>
    %29 = vector.shape_cast %28 : vector<8x8x4xbf16> to vector<64x4xbf16>
    %c0_47 = arith.constant 0 : index
    %c0_48 = arith.constant 0 : index
    %c0_49 = arith.constant 0 : index
    %c1_50 = arith.constant 1 : index
    %c0_51 = arith.constant 0 : index
    %30 = vector.load %arg3[%c0_47, %c0_48, %c0_49, %c1_50, %c0_51] : memref<1x1x10x10x4xbf16, #tpu.memory_space<vmem>>, vector<1x1x8x8x4xbf16>
    %31 = vector.shape_cast %30 : vector<1x1x8x8x4xbf16> to vector<8x8x4xbf16>
    %32 = vector.shape_cast %31 : vector<8x8x4xbf16> to vector<64x4xbf16>
    %c0_52 = arith.constant 0 : index
    %c0_53 = arith.constant 0 : index
    %c0_54 = arith.constant 0 : index
    %c2_55 = arith.constant 2 : index
    %c0_56 = arith.constant 0 : index
    %33 = vector.load %arg3[%c0_52, %c0_53, %c0_54, %c2_55, %c0_56] : memref<1x1x10x10x4xbf16, #tpu.memory_space<vmem>>, vector<1x1x8x8x4xbf16>
    %34 = vector.shape_cast %33 : vector<1x1x8x8x4xbf16> to vector<8x8x4xbf16>
    %35 = vector.shape_cast %34 : vector<8x8x4xbf16> to vector<64x4xbf16>
    %c0_57 = arith.constant 0 : index
    %c0_58 = arith.constant 0 : index
    %c1_59 = arith.constant 1 : index
    %c0_60 = arith.constant 0 : index
    %c0_61 = arith.constant 0 : index
    %36 = vector.load %arg3[%c0_57, %c0_58, %c1_59, %c0_60, %c0_61] : memref<1x1x10x10x4xbf16, #tpu.memory_space<vmem>>, vector<1x1x8x8x4xbf16>
    %37 = vector.shape_cast %36 : vector<1x1x8x8x4xbf16> to vector<8x8x4xbf16>
    %38 = vector.shape_cast %37 : vector<8x8x4xbf16> to vector<64x4xbf16>
    %c0_62 = arith.constant 0 : index
    %c0_63 = arith.constant 0 : index
    %c1_64 = arith.constant 1 : index
    %c1_65 = arith.constant 1 : index
    %c0_66 = arith.constant 0 : index
    %39 = vector.load %arg3[%c0_62, %c0_63, %c1_64, %c1_65, %c0_66] : memref<1x1x10x10x4xbf16, #tpu.memory_space<vmem>>, vector<1x1x8x8x4xbf16>
    %40 = vector.shape_cast %39 : vector<1x1x8x8x4xbf16> to vector<8x8x4xbf16>
    %41 = vector.shape_cast %40 : vector<8x8x4xbf16> to vector<64x4xbf16>
    %c0_67 = arith.constant 0 : index
    %c0_68 = arith.constant 0 : index
    %c1_69 = arith.constant 1 : index
    %c2_70 = arith.constant 2 : index
    %c0_71 = arith.constant 0 : index
    %42 = vector.load %arg3[%c0_67, %c0_68, %c1_69, %c2_70, %c0_71] : memref<1x1x10x10x4xbf16, #tpu.memory_space<vmem>>, vector<1x1x8x8x4xbf16>
    %43 = vector.shape_cast %42 : vector<1x1x8x8x4xbf16> to vector<8x8x4xbf16>
    %44 = vector.shape_cast %43 : vector<8x8x4xbf16> to vector<64x4xbf16>
    %c0_72 = arith.constant 0 : index
    %c0_73 = arith.constant 0 : index
    %c2_74 = arith.constant 2 : index
    %c0_75 = arith.constant 0 : index
    %c0_76 = arith.constant 0 : index
    %45 = vector.load %arg3[%c0_72, %c0_73, %c2_74, %c0_75, %c0_76] : memref<1x1x10x10x4xbf16, #tpu.memory_space<vmem>>, vector<1x1x8x8x4xbf16>
    %46 = vector.shape_cast %45 : vector<1x1x8x8x4xbf16> to vector<8x8x4xbf16>
    %47 = vector.shape_cast %46 : vector<8x8x4xbf16> to vector<64x4xbf16>
    %c0_77 = arith.constant 0 : index
    %c0_78 = arith.constant 0 : index
    %c2_79 = arith.constant 2 : index
    %c1_80 = arith.constant 1 : index
    %c0_81 = arith.constant 0 : index
    %48 = vector.load %arg3[%c0_77, %c0_78, %c2_79, %c1_80, %c0_81] : memref<1x1x10x10x4xbf16, #tpu.memory_space<vmem>>, vector<1x1x8x8x4xbf16>
    %49 = vector.shape_cast %48 : vector<1x1x8x8x4xbf16> to vector<8x8x4xbf16>
    %50 = vector.shape_cast %49 : vector<8x8x4xbf16> to vector<64x4xbf16>
    %c0_82 = arith.constant 0 : index
    %c0_83 = arith.constant 0 : index
    %c2_84 = arith.constant 2 : index
    %c2_85 = arith.constant 2 : index
    %c0_86 = arith.constant 0 : index
    %51 = vector.load %arg3[%c0_82, %c0_83, %c2_84, %c2_85, %c0_86] : memref<1x1x10x10x4xbf16, #tpu.memory_space<vmem>>, vector<1x1x8x8x4xbf16>
    %52 = vector.shape_cast %51 : vector<1x1x8x8x4xbf16> to vector<8x8x4xbf16>
    %53 = vector.shape_cast %52 : vector<8x8x4xbf16> to vector<64x4xbf16>
    %c0_87 = arith.constant 0 : index
    %c0_88 = arith.constant 0 : index
    %c0_89 = arith.constant 0 : index
    %c0_90 = arith.constant 0 : index
    %c0_91 = arith.constant 0 : index
    %54 = vector.load %arg4[%c0_87, %c0_88, %c0_89, %c0_90, %c0_91] : memref<1x1x10x10x4xbf16, #tpu.memory_space<vmem>>, vector<1x1x8x8x4xbf16>
    %55 = vector.shape_cast %54 : vector<1x1x8x8x4xbf16> to vector<8x8x4xbf16>
    %56 = vector.shape_cast %55 : vector<8x8x4xbf16> to vector<64x4xbf16>
    %c0_92 = arith.constant 0 : index
    %c0_93 = arith.constant 0 : index
    %c0_94 = arith.constant 0 : index
    %c1_95 = arith.constant 1 : index
    %c0_96 = arith.constant 0 : index
    %57 = vector.load %arg4[%c0_92, %c0_93, %c0_94, %c1_95, %c0_96] : memref<1x1x10x10x4xbf16, #tpu.memory_space<vmem>>, vector<1x1x8x8x4xbf16>
    %58 = vector.shape_cast %57 : vector<1x1x8x8x4xbf16> to vector<8x8x4xbf16>
    %59 = vector.shape_cast %58 : vector<8x8x4xbf16> to vector<64x4xbf16>
    %c0_97 = arith.constant 0 : index
    %c0_98 = arith.constant 0 : index
    %c0_99 = arith.constant 0 : index
    %c2_100 = arith.constant 2 : index
    %c0_101 = arith.constant 0 : index
    %60 = vector.load %arg4[%c0_97, %c0_98, %c0_99, %c2_100, %c0_101] : memref<1x1x10x10x4xbf16, #tpu.memory_space<vmem>>, vector<1x1x8x8x4xbf16>
    %61 = vector.shape_cast %60 : vector<1x1x8x8x4xbf16> to vector<8x8x4xbf16>
    %62 = vector.shape_cast %61 : vector<8x8x4xbf16> to vector<64x4xbf16>
    %c0_102 = arith.constant 0 : index
    %c0_103 = arith.constant 0 : index
    %c1_104 = arith.constant 1 : index
    %c0_105 = arith.constant 0 : index
    %c0_106 = arith.constant 0 : index
    %63 = vector.load %arg4[%c0_102, %c0_103, %c1_104, %c0_105, %c0_106] : memref<1x1x10x10x4xbf16, #tpu.memory_space<vmem>>, vector<1x1x8x8x4xbf16>
    %64 = vector.shape_cast %63 : vector<1x1x8x8x4xbf16> to vector<8x8x4xbf16>
    %65 = vector.shape_cast %64 : vector<8x8x4xbf16> to vector<64x4xbf16>
    %c0_107 = arith.constant 0 : index
    %c0_108 = arith.constant 0 : index
    %c1_109 = arith.constant 1 : index
    %c1_110 = arith.constant 1 : index
    %c0_111 = arith.constant 0 : index
    %66 = vector.load %arg4[%c0_107, %c0_108, %c1_109, %c1_110, %c0_111] : memref<1x1x10x10x4xbf16, #tpu.memory_space<vmem>>, vector<1x1x8x8x4xbf16>
    %67 = vector.shape_cast %66 : vector<1x1x8x8x4xbf16> to vector<8x8x4xbf16>
    %68 = vector.shape_cast %67 : vector<8x8x4xbf16> to vector<64x4xbf16>
    %c0_112 = arith.constant 0 : index
    %c0_113 = arith.constant 0 : index
    %c1_114 = arith.constant 1 : index
    %c2_115 = arith.constant 2 : index
    %c0_116 = arith.constant 0 : index
    %69 = vector.load %arg4[%c0_112, %c0_113, %c1_114, %c2_115, %c0_116] : memref<1x1x10x10x4xbf16, #tpu.memory_space<vmem>>, vector<1x1x8x8x4xbf16>
    %70 = vector.shape_cast %69 : vector<1x1x8x8x4xbf16> to vector<8x8x4xbf16>
    %71 = vector.shape_cast %70 : vector<8x8x4xbf16> to vector<64x4xbf16>
    %c0_117 = arith.constant 0 : index
    %c0_118 = arith.constant 0 : index
    %c2_119 = arith.constant 2 : index
    %c0_120 = arith.constant 0 : index
    %c0_121 = arith.constant 0 : index
    %72 = vector.load %arg4[%c0_117, %c0_118, %c2_119, %c0_120, %c0_121] : memref<1x1x10x10x4xbf16, #tpu.memory_space<vmem>>, vector<1x1x8x8x4xbf16>
    %73 = vector.shape_cast %72 : vector<1x1x8x8x4xbf16> to vector<8x8x4xbf16>
    %74 = vector.shape_cast %73 : vector<8x8x4xbf16> to vector<64x4xbf16>
    %c0_122 = arith.constant 0 : index
    %c0_123 = arith.constant 0 : index
    %c2_124 = arith.constant 2 : index
    %c1_125 = arith.constant 1 : index
    %c0_126 = arith.constant 0 : index
    %75 = vector.load %arg4[%c0_122, %c0_123, %c2_124, %c1_125, %c0_126] : memref<1x1x10x10x4xbf16, #tpu.memory_space<vmem>>, vector<1x1x8x8x4xbf16>
    %76 = vector.shape_cast %75 : vector<1x1x8x8x4xbf16> to vector<8x8x4xbf16>
    %77 = vector.shape_cast %76 : vector<8x8x4xbf16> to vector<64x4xbf16>
    %c0_127 = arith.constant 0 : index
    %c0_128 = arith.constant 0 : index
    %c2_129 = arith.constant 2 : index
    %c2_130 = arith.constant 2 : index
    %c0_131 = arith.constant 0 : index
    %78 = vector.load %arg4[%c0_127, %c0_128, %c2_129, %c2_130, %c0_131] : memref<1x1x10x10x4xbf16, #tpu.memory_space<vmem>>, vector<1x1x8x8x4xbf16>
    %79 = vector.shape_cast %78 : vector<1x1x8x8x4xbf16> to vector<8x8x4xbf16>
    %80 = vector.shape_cast %79 : vector<8x8x4xbf16> to vector<64x4xbf16>
    %81 = tpu.concatenate %2, %5, %8, %11, %14, %17, %20, %23, %26, %29, %32, %35, %38, %41, %44, %47 in 1 : vector<64x4xbf16>, vector<64x4xbf16>, vector<64x4xbf16>, vector<64x4xbf16>, vector<64x4xbf16>, vector<64x4xbf16>, vector<64x4xbf16>, vector<64x4xbf16>, vector<64x4xbf16>, vector<64x4xbf16>, vector<64x4xbf16>, vector<64x4xbf16>, vector<64x4xbf16>, vector<64x4xbf16>, vector<64x4xbf16>, vector<64x4xbf16> -> vector<64x64xbf16>
    %82 = tpu.concatenate %50, %53, %56, %59, %62, %65, %68, %71, %74, %77, %80 in 1 : vector<64x4xbf16>, vector<64x4xbf16>, vector<64x4xbf16>, vector<64x4xbf16>, vector<64x4xbf16>, vector<64x4xbf16>, vector<64x4xbf16>, vector<64x4xbf16>, vector<64x4xbf16>, vector<64x4xbf16>, vector<64x4xbf16> -> vector<64x44xbf16>
    %83 = tpu.concatenate %81, %82 in 1 : vector<64x64xbf16>, vector<64x44xbf16> -> vector<64x108xbf16>
    %c0_132 = arith.constant 0 : index
    %c0_133 = arith.constant 0 : index
    %84 = vector.load %arg5[%c0_132, %c0_133] : memref<108x8xbf16, #tpu.memory_space<vmem>>, vector<108x8xbf16>
    %cst = arith.constant dense<0.000000e+00> : vector<64x8xf32>
    %85 = tpu.matmul %83, %84, %cst {dimension_numbers = #tpu.dot_dimension_numbers<[1], [0], [0], [1], [0, 0, 1, 1], [], []>} : vector<64x108xbf16>, vector<108x8xbf16>, vector<64x8xf32> -> vector<64x8xf32>
    %c0_134 = arith.constant 0 : index
    %c0_135 = arith.constant 0 : index
    %86 = vector.load %arg6[%c0_134, %c0_135] : memref<1x8xf32, #tpu.memory_space<vmem>>, vector<1x8xf32>
    %87 = vector.broadcast %86 : vector<1x8xf32> to vector<64x8xf32>
    %88 = arith.addf %85, %87 : vector<64x8xf32>
    %cst_136 = arith.constant dense<0.000000e+00> : vector<8xf32>
    %89 = vector.multi_reduction <add>, %88, %cst_136 [0] : vector<64x8xf32> to vector<8xf32>
    %90 = vector.shape_cast %89 : vector<8xf32> to vector<1x8xf32>
    %91 = arith.mulf %88, %88 : vector<64x8xf32>
    %cst_137 = arith.constant dense<0.000000e+00> : vector<8xf32>
    %92 = vector.multi_reduction <add>, %91, %cst_137 [0] : vector<64x8xf32> to vector<8xf32>
    %93 = vector.shape_cast %92 : vector<8xf32> to vector<1x8xf32>
    %94 = tpu.concatenate %90, %93 in 0 : vector<1x8xf32>, vector<1x8xf32> -> vector<2x8xf32>
    %c0_138 = arith.constant 0 : index
    %c0_139 = arith.constant 0 : index
    %c0_140 = arith.constant 0 : index
    %c0_141 = arith.constant 0 : index
    %95 = vector.load %arg8[%c0_138, %c0_139, %c0_140, %c0_141] : memref<1x1x2x8xf32, #tpu.memory_space<vmem>>, vector<1x1x2x8xf32>
    %96 = vector.shape_cast %95 : vector<1x1x2x8xf32> to vector<2x8xf32>
    %97 = vector.shape_cast %94 : vector<2x8xf32> to vector<1x1x2x8xf32>
    tpu.vector_store %arg8[%c0_138, %c0_139, %c0_140, %c0_141], %97 {strides = array<i32>} : memref<1x1x2x8xf32, #tpu.memory_space<vmem>>, vector<1x1x2x8xf32>,
    %98 = arith.truncf %88 : vector<64x8xf32> to vector<64x8xbf16>
    %c0_142 = arith.constant 0 : index
    %c0_143 = arith.constant 0 : index
    %c0_144 = arith.constant 0 : index
    %c0_145 = arith.constant 0 : index
    %99 = vector.load %arg7[%c0_142, %c0_143, %c0_144, %c0_145] : memref<1x1x64x8xbf16, #tpu.memory_space<vmem>>, vector<1x1x64x8xbf16>
    %100 = vector.shape_cast %99 : vector<1x1x64x8xbf16> to vector<64x8xbf16>
    %101 = vector.shape_cast %98 : vector<64x8xbf16> to vector<1x1x64x8xbf16>
    tpu.vector_store %arg7[%c0_142, %c0_143, %c0_144, %c0_145], %101 {strides = array<i32>} : memref<1x1x64x8xbf16, #tpu.memory_space<vmem>>, vector<1x1x64x8xbf16>,
    return
  }
  func.func @transform_0(%arg0: i32, %arg1: i32) -> (i32, i32, i32, i32, i32) {
    %c0_i32 = arith.constant 0 : i32
    %0 = arith.addi %arg1, %c0_i32 : i32
    %c0_i32_0 = arith.constant 0 : i32
    %c0_i32_1 = arith.constant 0 : i32
    %c0_i32_2 = arith.constant 0 : i32
    %c0_i32_3 = arith.constant 0 : i32
    return %arg0, %0, %c0_i32_0, %c0_i32_1, %c0_i32_2 : i32, i32, i32, i32, i32
  }
  func.func @transform_1(%arg0: i32, %arg1: i32) -> (i32, i32, i32, i32, i32) {
    %c1_i32 = arith.constant 1 : i32
    %0 = arith.addi %arg1, %c1_i32 : i32
    %c0_i32 = arith.constant 0 : i32
    %c0_i32_0 = arith.constant 0 : i32
    %c0_i32_1 = arith.constant 0 : i32
    %c0_i32_2 = arith.constant 0 : i32
    return %arg0, %0, %c0_i32, %c0_i32_0, %c0_i32_1 : i32, i32, i32, i32, i32
  }
  func.func @transform_2(%arg0: i32, %arg1: i32) -> (i32, i32, i32, i32, i32) {
    %c2_i32 = arith.constant 2 : i32
    %0 = arith.addi %arg1, %c2_i32 : i32
    %c0_i32 = arith.constant 0 : i32
    %c0_i32_0 = arith.constant 0 : i32
    %c0_i32_1 = arith.constant 0 : i32
    %c0_i32_2 = arith.constant 0 : i32
    return %arg0, %0, %c0_i32, %c0_i32_0, %c0_i32_1 : i32, i32, i32, i32, i32
  }
  func.func @transform_3(%arg0: i32, %arg1: i32) -> (i32, i32) {
    %c0_i32 = arith.constant 0 : i32
    %c0_i32_0 = arith.constant 0 : i32
    %c0_i32_1 = arith.constant 0 : i32
    return %c0_i32, %c0_i32_0 : i32, i32
  }
  func.func @transform_4(%arg0: i32, %arg1: i32) -> (i32, i32) {
    %c0_i32 = arith.constant 0 : i32
    %c0_i32_0 = arith.constant 0 : i32
    %c0_i32_1 = arith.constant 0 : i32
    return %c0_i32, %c0_i32_0 : i32, i32
  }
  func.func @transform_5(%arg0: i32, %arg1: i32) -> (i32, i32, i32, i32) {
    %c0_i32 = arith.constant 0 : i32
    %c0_i32_0 = arith.constant 0 : i32
    %c0_i32_1 = arith.constant 0 : i32
    return %arg0, %arg1, %c0_i32, %c0_i32_0 : i32, i32, i32, i32
  }
  func.func @transform_6(%arg0: i32, %arg1: i32) -> (i32, i32, i32, i32) {
    %c0_i32 = arith.constant 0 : i32
    %c0_i32_0 = arith.constant 0 : i32
    %c0_i32_1 = arith.constant 0 : i32
    return %arg0, %arg1, %c0_i32, %c0_i32_0 : i32, i32, i32, i32
  }
}

module attributes {stable_mosaic.version = 11 : i64} {
  func.func @_bn_relu_kernel(%arg0: i32, %arg1: memref<64x128xbf16, #tpu.memory_space<vmem>>, %arg2: memref<1x128xf32, #tpu.memory_space<vmem>>, %arg3: memref<1x128xf32, #tpu.memory_space<vmem>>, %arg4: memref<64x128xbf16, #tpu.memory_space<vmem>>) attributes {dimension_semantics = [#tpu.dimension_semantics<parallel>], iteration_bounds = array<i64: 1>, scalar_prefetch = 0 : i64, scratch_operands = 0 : i64, tpu.core_type = #tpu.core_type<tc>, window_params = [{transform_indices = @transform_0, window_bounds = array<i64: 64, 128>}, {pipeline_mode = #tpu.pipeline_mode<synchronous>, transform_indices = @transform_1, window_bounds = array<i64: 1, 128>}, {pipeline_mode = #tpu.pipeline_mode<synchronous>, transform_indices = @transform_2, window_bounds = array<i64: 1, 128>}, {transform_indices = @transform_3, window_bounds = array<i64: 64, 128>}]} {
    %c0 = arith.constant 0 : index
    %c0_0 = arith.constant 0 : index
    %0 = vector.load %arg1[%c0, %c0_0] : memref<64x128xbf16, #tpu.memory_space<vmem>>, vector<64x128xbf16>
    %1 = arith.extf %0 : vector<64x128xbf16> to vector<64x128xf32>
    %c0_1 = arith.constant 0 : index
    %c0_2 = arith.constant 0 : index
    %2 = vector.load %arg2[%c0_1, %c0_2] : memref<1x128xf32, #tpu.memory_space<vmem>>, vector<1x128xf32>
    %3 = vector.broadcast %2 : vector<1x128xf32> to vector<64x128xf32>
    %4 = arith.mulf %1, %3 : vector<64x128xf32>
    %c0_3 = arith.constant 0 : index
    %c0_4 = arith.constant 0 : index
    %5 = vector.load %arg3[%c0_3, %c0_4] : memref<1x128xf32, #tpu.memory_space<vmem>>, vector<1x128xf32>
    %6 = vector.broadcast %5 : vector<1x128xf32> to vector<64x128xf32>
    %7 = arith.addf %4, %6 : vector<64x128xf32>
    %cst = arith.constant 0.000000e+00 : f32
    %8 = vector.broadcast %cst : f32 to vector<64x128xf32>
    %9 = arith.maximumf %7, %8 : vector<64x128xf32>
    %10 = arith.truncf %9 : vector<64x128xf32> to vector<64x128xbf16>
    %c0_5 = arith.constant 0 : index
    %c0_6 = arith.constant 0 : index
    %11 = vector.load %arg4[%c0_5, %c0_6] : memref<64x128xbf16, #tpu.memory_space<vmem>>, vector<64x128xbf16>
    tpu.vector_store %arg4[%c0_5, %c0_6], %10 {strides = array<i32>} : memref<64x128xbf16, #tpu.memory_space<vmem>>, vector<64x128xbf16>,
    return
  }
  func.func @transform_0(%arg0: i32) -> (i32, i32) {
    %c0_i32 = arith.constant 0 : i32
    %c0_i32_0 = arith.constant 0 : i32
    return %arg0, %c0_i32 : i32, i32
  }
  func.func @transform_1(%arg0: i32) -> (i32, i32) {
    %c0_i32 = arith.constant 0 : i32
    %c0_i32_0 = arith.constant 0 : i32
    %c0_i32_1 = arith.constant 0 : i32
    return %c0_i32, %c0_i32_0 : i32, i32
  }
  func.func @transform_2(%arg0: i32) -> (i32, i32) {
    %c0_i32 = arith.constant 0 : i32
    %c0_i32_0 = arith.constant 0 : i32
    %c0_i32_1 = arith.constant 0 : i32
    return %c0_i32, %c0_i32_0 : i32, i32
  }
  func.func @transform_3(%arg0: i32) -> (i32, i32) {
    %c0_i32 = arith.constant 0 : i32
    %c0_i32_0 = arith.constant 0 : i32
    return %arg0, %c0_i32 : i32, i32
  }
}

module attributes {stable_mosaic.version = 11 : i64} {
  func.func @_bn_relu_kernel(%arg0: i32, %arg1: memref<64x128xbf16, #tpu.memory_space<vmem>>, %arg2: memref<1x128xf32, #tpu.memory_space<vmem>>, %arg3: memref<1x128xf32, #tpu.memory_space<vmem>>, %arg4: memref<64x128xf32, #tpu.memory_space<vmem>>) attributes {dimension_semantics = [#tpu.dimension_semantics<parallel>], iteration_bounds = array<i64: 1>, scalar_prefetch = 0 : i64, scratch_operands = 0 : i64, tpu.core_type = #tpu.core_type<tc>, window_params = [{transform_indices = @transform_0, window_bounds = array<i64: 64, 128>}, {pipeline_mode = #tpu.pipeline_mode<synchronous>, transform_indices = @transform_1, window_bounds = array<i64: 1, 128>}, {pipeline_mode = #tpu.pipeline_mode<synchronous>, transform_indices = @transform_2, window_bounds = array<i64: 1, 128>}, {transform_indices = @transform_3, window_bounds = array<i64: 64, 128>}]} {
    %c0 = arith.constant 0 : index
    %c0_0 = arith.constant 0 : index
    %0 = vector.load %arg1[%c0, %c0_0] : memref<64x128xbf16, #tpu.memory_space<vmem>>, vector<64x128xbf16>
    %1 = arith.extf %0 : vector<64x128xbf16> to vector<64x128xf32>
    %c0_1 = arith.constant 0 : index
    %c0_2 = arith.constant 0 : index
    %2 = vector.load %arg2[%c0_1, %c0_2] : memref<1x128xf32, #tpu.memory_space<vmem>>, vector<1x128xf32>
    %3 = vector.broadcast %2 : vector<1x128xf32> to vector<64x128xf32>
    %4 = arith.mulf %1, %3 : vector<64x128xf32>
    %c0_3 = arith.constant 0 : index
    %c0_4 = arith.constant 0 : index
    %5 = vector.load %arg3[%c0_3, %c0_4] : memref<1x128xf32, #tpu.memory_space<vmem>>, vector<1x128xf32>
    %6 = vector.broadcast %5 : vector<1x128xf32> to vector<64x128xf32>
    %7 = arith.addf %4, %6 : vector<64x128xf32>
    %cst = arith.constant 0.000000e+00 : f32
    %8 = vector.broadcast %cst : f32 to vector<64x128xf32>
    %9 = arith.maximumf %7, %8 : vector<64x128xf32>
    %c0_5 = arith.constant 0 : index
    %c0_6 = arith.constant 0 : index
    %10 = vector.load %arg4[%c0_5, %c0_6] : memref<64x128xf32, #tpu.memory_space<vmem>>, vector<64x128xf32>
    tpu.vector_store %arg4[%c0_5, %c0_6], %9 {strides = array<i32>} : memref<64x128xf32, #tpu.memory_space<vmem>>, vector<64x128xf32>,
    return
  }
  func.func @transform_0(%arg0: i32) -> (i32, i32) {
    %c0_i32 = arith.constant 0 : i32
    %c0_i32_0 = arith.constant 0 : i32
    return %arg0, %c0_i32 : i32, i32
  }
  func.func @transform_1(%arg0: i32) -> (i32, i32) {
    %c0_i32 = arith.constant 0 : i32
    %c0_i32_0 = arith.constant 0 : i32
    %c0_i32_1 = arith.constant 0 : i32
    return %c0_i32, %c0_i32_0 : i32, i32
  }
  func.func @transform_2(%arg0: i32) -> (i32, i32) {
    %c0_i32 = arith.constant 0 : i32
    %c0_i32_0 = arith.constant 0 : i32
    %c0_i32_1 = arith.constant 0 : i32
    return %c0_i32, %c0_i32_0 : i32, i32
  }
  func.func @transform_3(%arg0: i32) -> (i32, i32) {
    %c0_i32 = arith.constant 0 : i32
    %c0_i32_0 = arith.constant 0 : i32
    return %arg0, %c0_i32 : i32, i32
  }
}

module attributes {stable_mosaic.version = 11 : i64} {
  func.func @_conv3d_stats_kernel(%arg0: i32, %arg1: i32, %arg2: memref<1x1x10x10x8xbf16, #tpu.memory_space<vmem>>, %arg3: memref<1x1x10x10x8xbf16, #tpu.memory_space<vmem>>, %arg4: memref<1x1x10x10x8xbf16, #tpu.memory_space<vmem>>, %arg5: memref<216x8xbf16, #tpu.memory_space<vmem>>, %arg6: memref<1x8xf32, #tpu.memory_space<vmem>>, %arg7: memref<1x1x64x8xbf16, #tpu.memory_space<vmem>>, %arg8: memref<1x1x2x8xf32, #tpu.memory_space<vmem>>) attributes {dimension_semantics = [#tpu.dimension_semantics<parallel>, #tpu.dimension_semantics<parallel>], iteration_bounds = array<i64: 2, 8>, scalar_prefetch = 0 : i64, scratch_operands = 0 : i64, tpu.core_type = #tpu.core_type<tc>, window_params = [{transform_indices = @transform_0, window_bounds = array<i64: 1, 1, 10, 10, 8>}, {transform_indices = @transform_1, window_bounds = array<i64: 1, 1, 10, 10, 8>}, {transform_indices = @transform_2, window_bounds = array<i64: 1, 1, 10, 10, 8>}, {pipeline_mode = #tpu.pipeline_mode<synchronous>, transform_indices = @transform_3, window_bounds = array<i64: 216, 8>}, {pipeline_mode = #tpu.pipeline_mode<synchronous>, transform_indices = @transform_4, window_bounds = array<i64: 1, 8>}, {transform_indices = @transform_5, window_bounds = array<i64: 1, 1, 64, 8>}, {transform_indices = @transform_6, window_bounds = array<i64: 1, 1, 2, 8>}]} {
    %c0 = arith.constant 0 : index
    %c0_0 = arith.constant 0 : index
    %c0_1 = arith.constant 0 : index
    %c0_2 = arith.constant 0 : index
    %c0_3 = arith.constant 0 : index
    %0 = vector.load %arg2[%c0, %c0_0, %c0_1, %c0_2, %c0_3] : memref<1x1x10x10x8xbf16, #tpu.memory_space<vmem>>, vector<1x1x8x8x8xbf16>
    %1 = vector.shape_cast %0 : vector<1x1x8x8x8xbf16> to vector<8x8x8xbf16>
    %2 = vector.shape_cast %1 : vector<8x8x8xbf16> to vector<64x8xbf16>
    %c0_4 = arith.constant 0 : index
    %c0_5 = arith.constant 0 : index
    %c0_6 = arith.constant 0 : index
    %c1 = arith.constant 1 : index
    %c0_7 = arith.constant 0 : index
    %3 = vector.load %arg2[%c0_4, %c0_5, %c0_6, %c1, %c0_7] : memref<1x1x10x10x8xbf16, #tpu.memory_space<vmem>>, vector<1x1x8x8x8xbf16>
    %4 = vector.shape_cast %3 : vector<1x1x8x8x8xbf16> to vector<8x8x8xbf16>
    %5 = vector.shape_cast %4 : vector<8x8x8xbf16> to vector<64x8xbf16>
    %c0_8 = arith.constant 0 : index
    %c0_9 = arith.constant 0 : index
    %c0_10 = arith.constant 0 : index
    %c2 = arith.constant 2 : index
    %c0_11 = arith.constant 0 : index
    %6 = vector.load %arg2[%c0_8, %c0_9, %c0_10, %c2, %c0_11] : memref<1x1x10x10x8xbf16, #tpu.memory_space<vmem>>, vector<1x1x8x8x8xbf16>
    %7 = vector.shape_cast %6 : vector<1x1x8x8x8xbf16> to vector<8x8x8xbf16>
    %8 = vector.shape_cast %7 : vector<8x8x8xbf16> to vector<64x8xbf16>
    %c0_12 = arith.constant 0 : index
    %c0_13 = arith.constant 0 : index
    %c1_14 = arith.constant 1 : index
    %c0_15 = arith.constant 0 : index
    %c0_16 = arith.constant 0 : index
    %9 = vector.load %arg2[%c0_12, %c0_13, %c1_14, %c0_15, %c0_16] : memref<1x1x10x10x8xbf16, #tpu.memory_space<vmem>>, vector<1x1x8x8x8xbf16>
    %10 = vector.shape_cast %9 : vector<1x1x8x8x8xbf16> to vector<8x8x8xbf16>
    %11 = vector.shape_cast %10 : vector<8x8x8xbf16> to vector<64x8xbf16>
    %c0_17 = arith.constant 0 : index
    %c0_18 = arith.constant 0 : index
    %c1_19 = arith.constant 1 : index
    %c1_20 = arith.constant 1 : index
    %c0_21 = arith.constant 0 : index
    %12 = vector.load %arg2[%c0_17, %c0_18, %c1_19, %c1_20, %c0_21] : memref<1x1x10x10x8xbf16, #tpu.memory_space<vmem>>, vector<1x1x8x8x8xbf16>
    %13 = vector.shape_cast %12 : vector<1x1x8x8x8xbf16> to vector<8x8x8xbf16>
    %14 = vector.shape_cast %13 : vector<8x8x8xbf16> to vector<64x8xbf16>
    %c0_22 = arith.constant 0 : index
    %c0_23 = arith.constant 0 : index
    %c1_24 = arith.constant 1 : index
    %c2_25 = arith.constant 2 : index
    %c0_26 = arith.constant 0 : index
    %15 = vector.load %arg2[%c0_22, %c0_23, %c1_24, %c2_25, %c0_26] : memref<1x1x10x10x8xbf16, #tpu.memory_space<vmem>>, vector<1x1x8x8x8xbf16>
    %16 = vector.shape_cast %15 : vector<1x1x8x8x8xbf16> to vector<8x8x8xbf16>
    %17 = vector.shape_cast %16 : vector<8x8x8xbf16> to vector<64x8xbf16>
    %c0_27 = arith.constant 0 : index
    %c0_28 = arith.constant 0 : index
    %c2_29 = arith.constant 2 : index
    %c0_30 = arith.constant 0 : index
    %c0_31 = arith.constant 0 : index
    %18 = vector.load %arg2[%c0_27, %c0_28, %c2_29, %c0_30, %c0_31] : memref<1x1x10x10x8xbf16, #tpu.memory_space<vmem>>, vector<1x1x8x8x8xbf16>
    %19 = vector.shape_cast %18 : vector<1x1x8x8x8xbf16> to vector<8x8x8xbf16>
    %20 = vector.shape_cast %19 : vector<8x8x8xbf16> to vector<64x8xbf16>
    %c0_32 = arith.constant 0 : index
    %c0_33 = arith.constant 0 : index
    %c2_34 = arith.constant 2 : index
    %c1_35 = arith.constant 1 : index
    %c0_36 = arith.constant 0 : index
    %21 = vector.load %arg2[%c0_32, %c0_33, %c2_34, %c1_35, %c0_36] : memref<1x1x10x10x8xbf16, #tpu.memory_space<vmem>>, vector<1x1x8x8x8xbf16>
    %22 = vector.shape_cast %21 : vector<1x1x8x8x8xbf16> to vector<8x8x8xbf16>
    %23 = vector.shape_cast %22 : vector<8x8x8xbf16> to vector<64x8xbf16>
    %c0_37 = arith.constant 0 : index
    %c0_38 = arith.constant 0 : index
    %c2_39 = arith.constant 2 : index
    %c2_40 = arith.constant 2 : index
    %c0_41 = arith.constant 0 : index
    %24 = vector.load %arg2[%c0_37, %c0_38, %c2_39, %c2_40, %c0_41] : memref<1x1x10x10x8xbf16, #tpu.memory_space<vmem>>, vector<1x1x8x8x8xbf16>
    %25 = vector.shape_cast %24 : vector<1x1x8x8x8xbf16> to vector<8x8x8xbf16>
    %26 = vector.shape_cast %25 : vector<8x8x8xbf16> to vector<64x8xbf16>
    %c0_42 = arith.constant 0 : index
    %c0_43 = arith.constant 0 : index
    %c0_44 = arith.constant 0 : index
    %c0_45 = arith.constant 0 : index
    %c0_46 = arith.constant 0 : index
    %27 = vector.load %arg3[%c0_42, %c0_43, %c0_44, %c0_45, %c0_46] : memref<1x1x10x10x8xbf16, #tpu.memory_space<vmem>>, vector<1x1x8x8x8xbf16>
    %28 = vector.shape_cast %27 : vector<1x1x8x8x8xbf16> to vector<8x8x8xbf16>
    %29 = vector.shape_cast %28 : vector<8x8x8xbf16> to vector<64x8xbf16>
    %c0_47 = arith.constant 0 : index
    %c0_48 = arith.constant 0 : index
    %c0_49 = arith.constant 0 : index
    %c1_50 = arith.constant 1 : index
    %c0_51 = arith.constant 0 : index
    %30 = vector.load %arg3[%c0_47, %c0_48, %c0_49, %c1_50, %c0_51] : memref<1x1x10x10x8xbf16, #tpu.memory_space<vmem>>, vector<1x1x8x8x8xbf16>
    %31 = vector.shape_cast %30 : vector<1x1x8x8x8xbf16> to vector<8x8x8xbf16>
    %32 = vector.shape_cast %31 : vector<8x8x8xbf16> to vector<64x8xbf16>
    %c0_52 = arith.constant 0 : index
    %c0_53 = arith.constant 0 : index
    %c0_54 = arith.constant 0 : index
    %c2_55 = arith.constant 2 : index
    %c0_56 = arith.constant 0 : index
    %33 = vector.load %arg3[%c0_52, %c0_53, %c0_54, %c2_55, %c0_56] : memref<1x1x10x10x8xbf16, #tpu.memory_space<vmem>>, vector<1x1x8x8x8xbf16>
    %34 = vector.shape_cast %33 : vector<1x1x8x8x8xbf16> to vector<8x8x8xbf16>
    %35 = vector.shape_cast %34 : vector<8x8x8xbf16> to vector<64x8xbf16>
    %c0_57 = arith.constant 0 : index
    %c0_58 = arith.constant 0 : index
    %c1_59 = arith.constant 1 : index
    %c0_60 = arith.constant 0 : index
    %c0_61 = arith.constant 0 : index
    %36 = vector.load %arg3[%c0_57, %c0_58, %c1_59, %c0_60, %c0_61] : memref<1x1x10x10x8xbf16, #tpu.memory_space<vmem>>, vector<1x1x8x8x8xbf16>
    %37 = vector.shape_cast %36 : vector<1x1x8x8x8xbf16> to vector<8x8x8xbf16>
    %38 = vector.shape_cast %37 : vector<8x8x8xbf16> to vector<64x8xbf16>
    %c0_62 = arith.constant 0 : index
    %c0_63 = arith.constant 0 : index
    %c1_64 = arith.constant 1 : index
    %c1_65 = arith.constant 1 : index
    %c0_66 = arith.constant 0 : index
    %39 = vector.load %arg3[%c0_62, %c0_63, %c1_64, %c1_65, %c0_66] : memref<1x1x10x10x8xbf16, #tpu.memory_space<vmem>>, vector<1x1x8x8x8xbf16>
    %40 = vector.shape_cast %39 : vector<1x1x8x8x8xbf16> to vector<8x8x8xbf16>
    %41 = vector.shape_cast %40 : vector<8x8x8xbf16> to vector<64x8xbf16>
    %c0_67 = arith.constant 0 : index
    %c0_68 = arith.constant 0 : index
    %c1_69 = arith.constant 1 : index
    %c2_70 = arith.constant 2 : index
    %c0_71 = arith.constant 0 : index
    %42 = vector.load %arg3[%c0_67, %c0_68, %c1_69, %c2_70, %c0_71] : memref<1x1x10x10x8xbf16, #tpu.memory_space<vmem>>, vector<1x1x8x8x8xbf16>
    %43 = vector.shape_cast %42 : vector<1x1x8x8x8xbf16> to vector<8x8x8xbf16>
    %44 = vector.shape_cast %43 : vector<8x8x8xbf16> to vector<64x8xbf16>
    %c0_72 = arith.constant 0 : index
    %c0_73 = arith.constant 0 : index
    %c2_74 = arith.constant 2 : index
    %c0_75 = arith.constant 0 : index
    %c0_76 = arith.constant 0 : index
    %45 = vector.load %arg3[%c0_72, %c0_73, %c2_74, %c0_75, %c0_76] : memref<1x1x10x10x8xbf16, #tpu.memory_space<vmem>>, vector<1x1x8x8x8xbf16>
    %46 = vector.shape_cast %45 : vector<1x1x8x8x8xbf16> to vector<8x8x8xbf16>
    %47 = vector.shape_cast %46 : vector<8x8x8xbf16> to vector<64x8xbf16>
    %c0_77 = arith.constant 0 : index
    %c0_78 = arith.constant 0 : index
    %c2_79 = arith.constant 2 : index
    %c1_80 = arith.constant 1 : index
    %c0_81 = arith.constant 0 : index
    %48 = vector.load %arg3[%c0_77, %c0_78, %c2_79, %c1_80, %c0_81] : memref<1x1x10x10x8xbf16, #tpu.memory_space<vmem>>, vector<1x1x8x8x8xbf16>
    %49 = vector.shape_cast %48 : vector<1x1x8x8x8xbf16> to vector<8x8x8xbf16>
    %50 = vector.shape_cast %49 : vector<8x8x8xbf16> to vector<64x8xbf16>
    %c0_82 = arith.constant 0 : index
    %c0_83 = arith.constant 0 : index
    %c2_84 = arith.constant 2 : index
    %c2_85 = arith.constant 2 : index
    %c0_86 = arith.constant 0 : index
    %51 = vector.load %arg3[%c0_82, %c0_83, %c2_84, %c2_85, %c0_86] : memref<1x1x10x10x8xbf16, #tpu.memory_space<vmem>>, vector<1x1x8x8x8xbf16>
    %52 = vector.shape_cast %51 : vector<1x1x8x8x8xbf16> to vector<8x8x8xbf16>
    %53 = vector.shape_cast %52 : vector<8x8x8xbf16> to vector<64x8xbf16>
    %c0_87 = arith.constant 0 : index
    %c0_88 = arith.constant 0 : index
    %c0_89 = arith.constant 0 : index
    %c0_90 = arith.constant 0 : index
    %c0_91 = arith.constant 0 : index
    %54 = vector.load %arg4[%c0_87, %c0_88, %c0_89, %c0_90, %c0_91] : memref<1x1x10x10x8xbf16, #tpu.memory_space<vmem>>, vector<1x1x8x8x8xbf16>
    %55 = vector.shape_cast %54 : vector<1x1x8x8x8xbf16> to vector<8x8x8xbf16>
    %56 = vector.shape_cast %55 : vector<8x8x8xbf16> to vector<64x8xbf16>
    %c0_92 = arith.constant 0 : index
    %c0_93 = arith.constant 0 : index
    %c0_94 = arith.constant 0 : index
    %c1_95 = arith.constant 1 : index
    %c0_96 = arith.constant 0 : index
    %57 = vector.load %arg4[%c0_92, %c0_93, %c0_94, %c1_95, %c0_96] : memref<1x1x10x10x8xbf16, #tpu.memory_space<vmem>>, vector<1x1x8x8x8xbf16>
    %58 = vector.shape_cast %57 : vector<1x1x8x8x8xbf16> to vector<8x8x8xbf16>
    %59 = vector.shape_cast %58 : vector<8x8x8xbf16> to vector<64x8xbf16>
    %c0_97 = arith.constant 0 : index
    %c0_98 = arith.constant 0 : index
    %c0_99 = arith.constant 0 : index
    %c2_100 = arith.constant 2 : index
    %c0_101 = arith.constant 0 : index
    %60 = vector.load %arg4[%c0_97, %c0_98, %c0_99, %c2_100, %c0_101] : memref<1x1x10x10x8xbf16, #tpu.memory_space<vmem>>, vector<1x1x8x8x8xbf16>
    %61 = vector.shape_cast %60 : vector<1x1x8x8x8xbf16> to vector<8x8x8xbf16>
    %62 = vector.shape_cast %61 : vector<8x8x8xbf16> to vector<64x8xbf16>
    %c0_102 = arith.constant 0 : index
    %c0_103 = arith.constant 0 : index
    %c1_104 = arith.constant 1 : index
    %c0_105 = arith.constant 0 : index
    %c0_106 = arith.constant 0 : index
    %63 = vector.load %arg4[%c0_102, %c0_103, %c1_104, %c0_105, %c0_106] : memref<1x1x10x10x8xbf16, #tpu.memory_space<vmem>>, vector<1x1x8x8x8xbf16>
    %64 = vector.shape_cast %63 : vector<1x1x8x8x8xbf16> to vector<8x8x8xbf16>
    %65 = vector.shape_cast %64 : vector<8x8x8xbf16> to vector<64x8xbf16>
    %c0_107 = arith.constant 0 : index
    %c0_108 = arith.constant 0 : index
    %c1_109 = arith.constant 1 : index
    %c1_110 = arith.constant 1 : index
    %c0_111 = arith.constant 0 : index
    %66 = vector.load %arg4[%c0_107, %c0_108, %c1_109, %c1_110, %c0_111] : memref<1x1x10x10x8xbf16, #tpu.memory_space<vmem>>, vector<1x1x8x8x8xbf16>
    %67 = vector.shape_cast %66 : vector<1x1x8x8x8xbf16> to vector<8x8x8xbf16>
    %68 = vector.shape_cast %67 : vector<8x8x8xbf16> to vector<64x8xbf16>
    %c0_112 = arith.constant 0 : index
    %c0_113 = arith.constant 0 : index
    %c1_114 = arith.constant 1 : index
    %c2_115 = arith.constant 2 : index
    %c0_116 = arith.constant 0 : index
    %69 = vector.load %arg4[%c0_112, %c0_113, %c1_114, %c2_115, %c0_116] : memref<1x1x10x10x8xbf16, #tpu.memory_space<vmem>>, vector<1x1x8x8x8xbf16>
    %70 = vector.shape_cast %69 : vector<1x1x8x8x8xbf16> to vector<8x8x8xbf16>
    %71 = vector.shape_cast %70 : vector<8x8x8xbf16> to vector<64x8xbf16>
    %c0_117 = arith.constant 0 : index
    %c0_118 = arith.constant 0 : index
    %c2_119 = arith.constant 2 : index
    %c0_120 = arith.constant 0 : index
    %c0_121 = arith.constant 0 : index
    %72 = vector.load %arg4[%c0_117, %c0_118, %c2_119, %c0_120, %c0_121] : memref<1x1x10x10x8xbf16, #tpu.memory_space<vmem>>, vector<1x1x8x8x8xbf16>
    %73 = vector.shape_cast %72 : vector<1x1x8x8x8xbf16> to vector<8x8x8xbf16>
    %74 = vector.shape_cast %73 : vector<8x8x8xbf16> to vector<64x8xbf16>
    %c0_122 = arith.constant 0 : index
    %c0_123 = arith.constant 0 : index
    %c2_124 = arith.constant 2 : index
    %c1_125 = arith.constant 1 : index
    %c0_126 = arith.constant 0 : index
    %75 = vector.load %arg4[%c0_122, %c0_123, %c2_124, %c1_125, %c0_126] : memref<1x1x10x10x8xbf16, #tpu.memory_space<vmem>>, vector<1x1x8x8x8xbf16>
    %76 = vector.shape_cast %75 : vector<1x1x8x8x8xbf16> to vector<8x8x8xbf16>
    %77 = vector.shape_cast %76 : vector<8x8x8xbf16> to vector<64x8xbf16>
    %c0_127 = arith.constant 0 : index
    %c0_128 = arith.constant 0 : index
    %c2_129 = arith.constant 2 : index
    %c2_130 = arith.constant 2 : index
    %c0_131 = arith.constant 0 : index
    %78 = vector.load %arg4[%c0_127, %c0_128, %c2_129, %c2_130, %c0_131] : memref<1x1x10x10x8xbf16, #tpu.memory_space<vmem>>, vector<1x1x8x8x8xbf16>
    %79 = vector.shape_cast %78 : vector<1x1x8x8x8xbf16> to vector<8x8x8xbf16>
    %80 = vector.shape_cast %79 : vector<8x8x8xbf16> to vector<64x8xbf16>
    %81 = tpu.concatenate %2, %5, %8, %11, %14, %17, %20, %23, %26, %29, %32, %35, %38, %41, %44, %47 in 1 : vector<64x8xbf16>, vector<64x8xbf16>, vector<64x8xbf16>, vector<64x8xbf16>, vector<64x8xbf16>, vector<64x8xbf16>, vector<64x8xbf16>, vector<64x8xbf16>, vector<64x8xbf16>, vector<64x8xbf16>, vector<64x8xbf16>, vector<64x8xbf16>, vector<64x8xbf16>, vector<64x8xbf16>, vector<64x8xbf16>, vector<64x8xbf16> -> vector<64x128xbf16>
    %82 = tpu.concatenate %50, %53, %56, %59, %62, %65, %68, %71, %74, %77, %80 in 1 : vector<64x8xbf16>, vector<64x8xbf16>, vector<64x8xbf16>, vector<64x8xbf16>, vector<64x8xbf16>, vector<64x8xbf16>, vector<64x8xbf16>, vector<64x8xbf16>, vector<64x8xbf16>, vector<64x8xbf16>, vector<64x8xbf16> -> vector<64x88xbf16>
    %83 = tpu.concatenate %81, %82 in 1 : vector<64x128xbf16>, vector<64x88xbf16> -> vector<64x216xbf16>
    %c0_132 = arith.constant 0 : index
    %c0_133 = arith.constant 0 : index
    %84 = vector.load %arg5[%c0_132, %c0_133] : memref<216x8xbf16, #tpu.memory_space<vmem>>, vector<216x8xbf16>
    %cst = arith.constant dense<0.000000e+00> : vector<64x8xf32>
    %85 = tpu.matmul %83, %84, %cst {dimension_numbers = #tpu.dot_dimension_numbers<[1], [0], [0], [1], [0, 0, 1, 1], [], []>} : vector<64x216xbf16>, vector<216x8xbf16>, vector<64x8xf32> -> vector<64x8xf32>
    %c0_134 = arith.constant 0 : index
    %c0_135 = arith.constant 0 : index
    %86 = vector.load %arg6[%c0_134, %c0_135] : memref<1x8xf32, #tpu.memory_space<vmem>>, vector<1x8xf32>
    %87 = vector.broadcast %86 : vector<1x8xf32> to vector<64x8xf32>
    %88 = arith.addf %85, %87 : vector<64x8xf32>
    %cst_136 = arith.constant dense<0.000000e+00> : vector<8xf32>
    %89 = vector.multi_reduction <add>, %88, %cst_136 [0] : vector<64x8xf32> to vector<8xf32>
    %90 = vector.shape_cast %89 : vector<8xf32> to vector<1x8xf32>
    %91 = arith.mulf %88, %88 : vector<64x8xf32>
    %cst_137 = arith.constant dense<0.000000e+00> : vector<8xf32>
    %92 = vector.multi_reduction <add>, %91, %cst_137 [0] : vector<64x8xf32> to vector<8xf32>
    %93 = vector.shape_cast %92 : vector<8xf32> to vector<1x8xf32>
    %94 = tpu.concatenate %90, %93 in 0 : vector<1x8xf32>, vector<1x8xf32> -> vector<2x8xf32>
    %c0_138 = arith.constant 0 : index
    %c0_139 = arith.constant 0 : index
    %c0_140 = arith.constant 0 : index
    %c0_141 = arith.constant 0 : index
    %95 = vector.load %arg8[%c0_138, %c0_139, %c0_140, %c0_141] : memref<1x1x2x8xf32, #tpu.memory_space<vmem>>, vector<1x1x2x8xf32>
    %96 = vector.shape_cast %95 : vector<1x1x2x8xf32> to vector<2x8xf32>
    %97 = vector.shape_cast %94 : vector<2x8xf32> to vector<1x1x2x8xf32>
    tpu.vector_store %arg8[%c0_138, %c0_139, %c0_140, %c0_141], %97 {strides = array<i32>} : memref<1x1x2x8xf32, #tpu.memory_space<vmem>>, vector<1x1x2x8xf32>,
    %98 = arith.truncf %88 : vector<64x8xf32> to vector<64x8xbf16>
    %c0_142 = arith.constant 0 : index
    %c0_143 = arith.constant 0 : index
    %c0_144 = arith.constant 0 : index
    %c0_145 = arith.constant 0 : index
    %99 = vector.load %arg7[%c0_142, %c0_143, %c0_144, %c0_145] : memref<1x1x64x8xbf16, #tpu.memory_space<vmem>>, vector<1x1x64x8xbf16>
    %100 = vector.shape_cast %99 : vector<1x1x64x8xbf16> to vector<64x8xbf16>
    %101 = vector.shape_cast %98 : vector<64x8xbf16> to vector<1x1x64x8xbf16>
    tpu.vector_store %arg7[%c0_142, %c0_143, %c0_144, %c0_145], %101 {strides = array<i32>} : memref<1x1x64x8xbf16, #tpu.memory_space<vmem>>, vector<1x1x64x8xbf16>,
    return
  }
  func.func @transform_0(%arg0: i32, %arg1: i32) -> (i32, i32, i32, i32, i32) {
    %c0_i32 = arith.constant 0 : i32
    %0 = arith.addi %arg1, %c0_i32 : i32
    %c0_i32_0 = arith.constant 0 : i32
    %c0_i32_1 = arith.constant 0 : i32
    %c0_i32_2 = arith.constant 0 : i32
    %c0_i32_3 = arith.constant 0 : i32
    return %arg0, %0, %c0_i32_0, %c0_i32_1, %c0_i32_2 : i32, i32, i32, i32, i32
  }
  func.func @transform_1(%arg0: i32, %arg1: i32) -> (i32, i32, i32, i32, i32) {
    %c1_i32 = arith.constant 1 : i32
    %0 = arith.addi %arg1, %c1_i32 : i32
    %c0_i32 = arith.constant 0 : i32
    %c0_i32_0 = arith.constant 0 : i32
    %c0_i32_1 = arith.constant 0 : i32
    %c0_i32_2 = arith.constant 0 : i32
    return %arg0, %0, %c0_i32, %c0_i32_0, %c0_i32_1 : i32, i32, i32, i32, i32
  }
  func.func @transform_2(%arg0: i32, %arg1: i32) -> (i32, i32, i32, i32, i32) {
    %c2_i32 = arith.constant 2 : i32
    %0 = arith.addi %arg1, %c2_i32 : i32
    %c0_i32 = arith.constant 0 : i32
    %c0_i32_0 = arith.constant 0 : i32
    %c0_i32_1 = arith.constant 0 : i32
    %c0_i32_2 = arith.constant 0 : i32
    return %arg0, %0, %c0_i32, %c0_i32_0, %c0_i32_1 : i32, i32, i32, i32, i32
  }
  func.func @transform_3(%arg0: i32, %arg1: i32) -> (i32, i32) {
    %c0_i32 = arith.constant 0 : i32
    %c0_i32_0 = arith.constant 0 : i32
    %c0_i32_1 = arith.constant 0 : i32
    return %c0_i32, %c0_i32_0 : i32, i32
  }
  func.func @transform_4(%arg0: i32, %arg1: i32) -> (i32, i32) {
    %c0_i32 = arith.constant 0 : i32
    %c0_i32_0 = arith.constant 0 : i32
    %c0_i32_1 = arith.constant 0 : i32
    return %c0_i32, %c0_i32_0 : i32, i32
  }
  func.func @transform_5(%arg0: i32, %arg1: i32) -> (i32, i32, i32, i32) {
    %c0_i32 = arith.constant 0 : i32
    %c0_i32_0 = arith.constant 0 : i32
    %c0_i32_1 = arith.constant 0 : i32
    return %arg0, %arg1, %c0_i32, %c0_i32_0 : i32, i32, i32, i32
  }
  func.func @transform_6(%arg0: i32, %arg1: i32) -> (i32, i32, i32, i32) {
    %c0_i32 = arith.constant 0 : i32
    %c0_i32_0 = arith.constant 0 : i32
    %c0_i32_1 = arith.constant 0 : i32
    return %arg0, %arg1, %c0_i32, %c0_i32_0 : i32, i32, i32, i32
  }
}

</mosaic_0001>

<bundles_post_ra>
// kernel: tile.23
= control target key start
LH: loop header
LB: loop body
LE: loop exit
PB: predicated region body
PF: predicated region fallthrough
CT: control target
= control target key end

     0   :  { %s28_s0 = inlined_call_operand.vmem [shape: f32[8], index: 0, kind: input, shape index: {}]   ;;  %s29_s1 = inlined_call_operand.vmem [shape: f32[16,8], index: 1, kind: output, shape index: {}]  }
   0x1   :  { %v4_v0 = vld [vmem:[%s28_s0] ss:$0 sm:$0xff] }
   0x2   :  { %5 = vst [vmem:[%s29_s1] sm:$0xff] %v4_v0  ;;  %8 = vst [vmem:[%s29_s1 + $0x8] sm:$0xff] %v4_v0 }

// kernel: tile.24
= control target key start
LH: loop header
LB: loop body
LE: loop exit
PB: predicated region body
PF: predicated region fallthrough
CT: control target
= control target key end

     0   :  { %s131_s10 = smov 120   ;;  %s132_s11 = smov 104   ;;  %vm3_vm0 = vcmask 64512   ;;  %vm9_vm1 = vcmask 1048512   ;;  %vm15_vm2 = vcmask 982912   ;;  %vm21_vm3 = vcmask 917312   ;;  %s207_s0 = inlined_call_operand.vmem [shape: f32[16,8], index: 0, kind: input, shape index: {}]   ;;  %s208_s1 = inlined_call_operand.vmem [shape: f32[1,128], index: 1, kind: output, shape index: {}]  }
   0x1   :  { %v101_v0 = vld [vmem:[%s207_s0 + $0xf] sm:$0x1]   ;;  %v103_v1 = vld [vmem:[%s207_s0 + $0xd] sm:$0x1]   ;;  %v102_v2 = vld [vmem:[%s207_s0 + $0xe] sm:$0x1]  }
   0x2   :  { %7 = vrot.lane.b32.xlu0 %v101_v0, %s131_s10  ;;  %19 = vrot.lane.b32.xlu1 %v103_v1, %s132_s11  ;;  %v104_v3 = vld [vmem:[%s207_s0 + $0xc] sm:$0x1]   ;;  %s133_s16 = smov 112   ;;  %s134_s17 = smov 96   ;;  %v105_v4 = vld [vmem:[%s207_s0 + $0xb] sm:$0x1]  }
   0x3   :  { %v106_v5 = vld [vmem:[%s207_s0 + $0xa] sm:$0x1]   ;;  %v2_v6 = vld [vmem:[%s207_s0] sm:$0x1]   ;;  %s135_s24 = smov 88   ;;  %s136_s25 = smov 80  }
   0x4   :  { %4 = vst.msk [vmem:[#allocation0] sm:$0x1] %vm3_vm0, %v2_v6   ;;  %v107_v7 = vld [vmem:[%s207_s0 + $0x9] sm:$0x1]   ;;  %v108_v8 = vld [vmem:[%s207_s0 + $0x8] sm:$0x1]  }
   0x5   :  { %s137_s30 = smov 72   ;;  %s138_s2 = smov 64   ;;  %v109_v9 = vld [vmem:[%s207_s0 + $0x7] sm:$0x1]   ;;  %v110_v10 = vld [vmem:[%s207_s0 + $0x6] sm:$0x1]  }
   0x6   :  { %13 = vrot.lane.b32.xlu0 %v102_v2, %s133_s16  ;;  %25 = vrot.lane.b32.xlu1 %v104_v3, %s134_s17  ;;  %s139_s7 = smov 56   ;;  %s140_s8 = smov 48   ;;  %v111_v11 = vld [vmem:[%s207_s0 + $0x5] sm:$0x1]   ;;  %v112_v12 = vld [vmem:[%s207_s0 + $0x4] sm:$0x1]  }
   0x7   :  { %s141_s13 = smov 40   ;;  %s142_s14 = smov 32   ;;  %v113_v13 = vld [vmem:[%s207_s0 + $0x3] sm:$0x1]   ;;  %v114_v14 = vld [vmem:[%s207_s0 + $0x2] sm:$0x1]  }
   0x8   :  { %s143_s19 = smov 24   ;;  %s144_s20 = smov 16   ;;  %v115_v15 = vld [vmem:[%s207_s0 + $0x1] sm:$0x1]   ;;  %vm27_vm4 = vcmask 851712   ;;  %vm33_vm5 = vcmask 786112  }
   0x9   :  { %s145_s0 = smov 8   ;;  %vm39_vm6 = vcmask 720512   ;;  %vm45_vm7 = vcmask 654912   ;;  %vm51_vm8 = vcmask 589312   ;;  %vm57_vm9 = vcmask 523712  }
   0xa   :  { %31 = vrot.lane.b32.xlu0 %v105_v4, %s135_s24  ;;  %37 = vrot.lane.b32.xlu1 %v106_v5, %s136_s25  ;;  %vm63_vm10 = vcmask 458112   ;;  %vm69_vm11 = vcmask 392512   ;;  %vm75_vm12 = vcmask 326912   ;;  %vm81_vm13 = vcmask 261312  }
   0xb   :  { %vm87_vm14 = vcmask 195712   ;;  %vm93_vm15 = vcmask 130112  }
   0xe   :  { %43 = vrot.lane.b32.xlu0 %v107_v7, %s137_s30  ;;  %49 = vrot.lane.b32.xlu1 %v108_v8, %s138_s2 }
  0x12   :  { %55 = vrot.lane.b32.xlu0 %v109_v9, %s139_s7  ;;  %61 = vrot.lane.b32.xlu1 %v110_v10, %s140_s8 }
  0x16   :  { %67 = vrot.lane.b32.xlu0 %v111_v11, %s141_s13  ;;  %73 = vrot.lane.b32.xlu1 %v112_v12, %s142_s14 }
  0x1a   :  { %79 = vrot.lane.b32.xlu0 %v113_v13, %s143_s19  ;;  %85 = vrot.lane.b32.xlu1 %v114_v14, %s144_s20 }
  0x1e   :  { %91 = vrot.lane.b32.xlu0 %v115_v15, %s145_s0 }
  0x74   :  { %v8_v16 = vpop.permute.xlu0 %7   ;;  %v20_v17 = vpop.permute.xlu1 %19  }
  0x75   :  { %10 = vst.msk [vmem:[#allocation0] sm:$0x1] %vm9_vm1, %v8_v16  }
  0x78   :  { %v14_v18 = vpop.permute.xlu0 %13   ;;  %v26_v19 = vpop.permute.xlu1 %25  }
  0x79   :  { %16 = vst.msk [vmem:[#allocation0] sm:$0x1] %vm15_vm2, %v14_v18  }
  0x7a   :  { %22 = vst.msk [vmem:[#allocation0] sm:$0x1] %vm21_vm3, %v20_v17  }
  0x7b   :  { %28 = vst.msk [vmem:[#allocation0] sm:$0x1] %vm27_vm4, %v26_v19  }
  0x7c   :  { %v32_v20 = vpop.permute.xlu0 %31   ;;  %v38_v21 = vpop.permute.xlu1 %37  }
  0x7d   :  { %34 = vst.msk [vmem:[#allocation0] sm:$0x1] %vm33_vm5, %v32_v20  }
  0x7e   :  { %40 = vst.msk [vmem:[#allocation0] sm:$0x1] %vm39_vm6, %v38_v21  }
  0x80   :  { %v44_v22 = vpop.permute.xlu0 %43   ;;  %v50_v23 = vpop.permute.xlu1 %49  }
  0x81   :  { %46 = vst.msk [vmem:[#allocation0] sm:$0x1] %vm45_vm7, %v44_v22  }
  0x82   :  { %52 = vst.msk [vmem:[#allocation0] sm:$0x1] %vm51_vm8, %v50_v23  }
  0x84   :  { %v56_v24 = vpop.permute.xlu0 %55   ;;  %v62_v25 = vpop.permute.xlu1 %61  }
  0x85   :  { %58 = vst.msk [vmem:[#allocation0] sm:$0x1] %vm57_vm9, %v56_v24  }
  0x86   :  { %64 = vst.msk [vmem:[#allocation0] sm:$0x1] %vm63_vm10, %v62_v25  }
  0x88   :  { %v68_v26 = vpop.permute.xlu0 %67   ;;  %v74_v27 = vpop.permute.xlu1 %73  }
  0x89   :  { %70 = vst.msk [vmem:[#allocation0] sm:$0x1] %vm69_vm11, %v68_v26  }
  0x8a   :  { %76 = vst.msk [vmem:[#allocation0] sm:$0x1] %vm75_vm12, %v74_v27  }
  0x8c   :  { %v80_v28 = vpop.permute.xlu0 %79   ;;  %v86_v29 = vpop.permute.xlu1 %85  }
  0x8d   :  { %82 = vst.msk [vmem:[#allocation0] sm:$0x1] %vm81_vm13, %v80_v28  }
  0x8e   :  { %88 = vst.msk [vmem:[#allocation0] sm:$0x1] %vm87_vm14, %v86_v29  }
  0x90   :  { %v92_v30 = vpop.permute.xlu0 %91  }
  0x91   :  { %94 = vst.msk [vmem:[#allocation0] sm:$0x1] %vm93_vm15, %v92_v30  }
  0x98   :  { %v98_v31 = vld [vmem:[#allocation0] sm:$0x1] }
  0x99   :  { %100 = vst [vmem:[%s208_s1] sm:$0x1] %v98_v31 }

// kernel: double_conv_forward.5
= control target key start
LH: loop header
LB: loop body
LE: loop exit
PB: predicated region body
PF: predicated region fallthrough
CT: control target
= control target key end

     0   :  { %s222_s0 = inlined_call_operand.vmem [shape: bf16[64,128], index: 0, kind: input, shape index: {}]   ;;  %s223_s1 = inlined_call_operand.vmem [shape: f32[1,128], index: 1, kind: input, shape index: {}]   ;;  %s224_s2 = inlined_call_operand.vmem [shape: f32[1,128], index: 2, kind: input, shape index: {}]   ;;  %s225_s3 = inlined_call_operand.vmem [shape: bf16[64,128], index: 3, kind: output, shape index: {}]  }
   0x1   :  { %v131_v0 = vld [vmem:[%s222_s0] sm:$0xff]   ;;  %v166_v4 = vld [vmem:[%s222_s0 + $0x8] sm:$0xff]   ;;  %v167_v5 = vld [vmem:[%s222_s0 + $0x10] sm:$0xff]  }
   0x2   :  { %v112_v1 = vld [vmem:[%s223_s1] ss:$0 sm:$0xff]  ;;  %v132_v2 = vunpack.c.l.bf16 %v131_v0  ;;  %v133_v3 = vunpack.c.h.bf16 %v131_v0  ;;  %v168_v6 = vld [vmem:[%s222_s0 + $0x18] sm:$0xff]   ;;  %v136_v8 = vunpack.c.l.bf16 %v166_v4  ;;  %v137_v9 = vunpack.c.h.bf16 %v166_v4 }
   0x3   :  { %v113_v7 = vld [vmem:[%s224_s2] ss:$0 sm:$0xff]  ;;  %v140_v10 = vunpack.c.l.bf16 %v167_v5  ;;  %v141_v11 = vunpack.c.h.bf16 %v167_v5  ;;  %v144_v14 = vunpack.c.l.bf16 %v168_v6  ;;  %v145_v15 = vunpack.c.h.bf16 %v168_v6 }
   0x4   :  { %v37_v12 = vmul.f32 %v132_v2, %v112_v1  ;;  %v38_v13 = vmul.f32 %v133_v3, %v112_v1  ;;  %v39_v16 = vmul.f32 %v136_v8, %v112_v1  ;;  %v40_v17 = vmul.f32 %v137_v9, %v112_v1 }
   0x5   :  { %v41_v18 = vmul.f32 %v140_v10, %v112_v1  ;;  %v42_v19 = vmul.f32 %v141_v11, %v112_v1  ;;  %v43_v22 = vmul.f32 %v144_v14, %v112_v1  ;;  %v44_v23 = vmul.f32 %v145_v15, %v112_v1 }
   0x6   :  { %v52_v20 = vadd.f32 %v113_v7, %v37_v12  ;;  %v53_v21 = vadd.f32 %v113_v7, %v38_v13  ;;  %v54_v24 = vadd.f32 %v113_v7, %v39_v16  ;;  %v55_v25 = vadd.f32 %v113_v7, %v40_v17 }
   0x7   :  { %v56_v26 = vadd.f32 %v113_v7, %v41_v18  ;;  %v57_v27 = vadd.f32 %v113_v7, %v42_v19  ;;  %v58_v30 = vadd.f32 %v113_v7, %v43_v22  ;;  %v59_v31 = vadd.f32 %v113_v7, %v44_v23 }
   0x8   :  { %v60_v28 = vmax.f32 %v52_v20, 0.0  ;;  %v61_v29 = vmax.f32 %v53_v21, 0.0  ;;  %v62_v32 = vmax.f32 %v54_v24, 0.0  ;;  %v63_v33 = vmax.f32 %v55_v25, 0.0 }
   0x9   :  { %v64_v34 = vmax.f32 %v56_v26, 0.0  ;;  %v65_v35 = vmax.f32 %v57_v27, 0.0  ;;  %v66_v37 = vmax.f32 %v58_v30, 0.0  ;;  %v67_v38 = vmax.f32 %v59_v31, 0.0 }
   0xa   :  { %v149_v36 = vpack.c.bf16 %v61_v29, %v60_v28  ;;  %v154_v39 = vpack.c.bf16 %v63_v33, %v62_v32 }
   0xb   :  { %v159_v40 = vpack.c.bf16 %v65_v35, %v64_v34  ;;  %v164_v41 = vpack.c.bf16 %v67_v38, %v66_v37 }
   0xc   :  { %150 = vst [vmem:[%s225_s3] sm:$0xff] %v149_v36   ;;  %169 = vst [vmem:[%s225_s3 + $0x8] sm:$0xff] %v154_v39  }
   0xd   :  { %170 = vst [vmem:[%s225_s3 + $0x10] sm:$0xff] %v159_v40   ;;  %171 = vst [vmem:[%s225_s3 + $0x18] sm:$0xff] %v164_v41  }

// kernel: double_conv_forward.4
= control target key start
LH: loop header
LB: loop body
LE: loop exit
PB: predicated region body
PF: predicated region fallthrough
CT: control target
= control target key end

     0   :  { %s3944_s21 = smov 0   ;;  %s3946_s22 = smov 0   ;;  %s5345_s0 = inlined_call_operand.vmem [shape: bf16[2,10,10,10,4], index: 0, kind: input, shape index: {}, may-alias: {0,1,2}]   ;;  %s5346_s1 = inlined_call_operand.vmem [shape: bf16[2,10,10,10,4], index: 1, kind: input, shape index: {}, may-alias: {0,1,2}]   ;;  %s5347_s2 = inlined_call_operand.vmem [shape: bf16[2,10,10,10,4], index: 2, kind: input, shape index: {}, may-alias: {0,1,2}]   ;;  %s5348_s3 = inlined_call_operand.vmem [shape: bf16[108,8], index: 3, kind: input, shape index: {}]   ;;  %s5349_s4 = inlined_call_operand.vmem [shape: f32[1,8], index: 4, kind: input, shape index: {}]   ;;  %s5350_s5 = inlined_call_operand.vmem [shape: bf16[2,8,64,8], index: 5, kind: output, shape index: {0}]   ;;  %s5351_s6 = inlined_call_operand.vmem [shape: f32[2,8,2,8], index: 6, kind: output, shape index: {1}]  }
   0x1   :  { %s3948_s23 = smov 0   ;;  %s3950_s24 = smov 0  }
   0x2   :  { %s3952_s25 = smov 0  }
   0x3 LB: > { %s26_s26 = sadd.s32 1, %s3883_s23  ;;  %s29_s27 = sadd.s32 1, %s3887_s24  ;;  %s3891_s25 = sphi %s3952_s25, %s17_s25   ;;  %s3887_s24 = sphi %s3950_s24, %s5376_s24   ;;  %s3883_s23 = sphi %s3948_s23, %s5375_s23   ;;  %s3879_s22 = sphi %s3946_s22, %s5374_s22   ;;  %s3875_s21 = sphi %s3944_s21, %s5373_s21  }
   0x4   : > { %p27_p0 = scmp.ge.s32.totalorder %s26_s26, 8  ;;  %p3323_p1 = scmp.ge.s32.totalorder %s3891_s25, 1 }
   0x5   : > { %p277_p2 = scmp.lt.s32.totalorder %s3891_s25, 17 }
   0x6   : > { %s5378_s26 = smov (%p27_p0, %s26_s26), 0  ;;  %s5380_s27 = smov (!%p27_p0, %s29_s27), %s3887_s24 }
   0x7   : > { %p278_p3 = pnand %p3323_p1, %p277_p2  ;;  %p31_p4 = scmp.ge.s32.totalorder %s5380_s27, 2 }
   0x9   : > { %s5382_s27 = smov (%p31_p4, %s5380_s27), 0  ;;  %281 = sbr.rel (%p278_p3) target bundleno = 643 (0x283), region = 40 }
  0x10   : > { %p343_p5 = scmp.lt.s32.totalorder %s3879_s22, 1  ;;  %s363_s28 = sadd.s32 2, %s3875_s21  ;;  %vm547_vm0 = vcmask 1042432   ;;  %vm548_vm1 = vcmask 1046532   ;;  %vm408_vm3 = vsmask.f32 3328 }
  0x11   : > { %p366_p6 = scmp.lt.s32.totalorder %s363_s28, 9  ;;  %s352_s7 = sadd.s32 1, %s3875_s21  ;;  %vm4030_vm2 = vmor %vm547_vm0, %vm548_vm1  ;;  %vm409_vm4 = vsmask.f32 7440  ;;  %vm2420_vm6 = vcmask 31744   ;;  %vm2442_vm7 = vcmask 97280  }
  0x12   : > { %s5384_s22 = smov (!%p343_p5, %s3879_s22), 1  ;;  %p355_p7 = scmp.lt.s32.totalorder %s352_s7, 9  ;;  %vm4078_vm5 = vmor %vm408_vm3, %vm409_vm4  ;;  %vm2433_vm8 = vcmask 64512   ;;  %vm2451_vm9 = vcmask 130048   ;;  %vm2460_vm10 = vcmask 162816   ;;  %vm2469_vm11 = vcmask 195584  }
  0x13   : > { %s5386_s28 = smov (!%p366_p6, %s363_s28), 9  ;;  %s3980_s29 = smul.u32 200, %s5384_s22  ;;  %vm2478_vm12 = vcmask 228352   ;;  %vm2487_vm13 = vcmask 261120   ;;  %vm2496_vm14 = vcmask 293888   ;;  %vm2505_vm15 = vcmask 326656  }
  0x14   : > { %s3738_s30 = smul.u32 20, %s5386_s28  ;;  %s5388_s7 = smov (!%p355_p7, %s352_s7), 9  ;;  %vm2971_vm0 = vcmask 1045504   ;;  %vm2514_vm1 = vcmask 359424   ;;  %vm2532_vm3 = vcmask 424960   ;;  %vm2541_vm4 = vcmask 457728  }
  0x15   : > { %s3893_s13 = smov 20   ;;  %s3894_s14 = smov 8  }
  0x16   : > { %s370_s8 = sadd.s32 %s3738_s30, %s3980_s29  ;;  %s3737_s15 = smul.u32 20, %s5388_s7 }
  0x17   : > { %s3326_s9 = sshll.u32 %s370_s8, 2  ;;  %s3895_s28 = smov 4  }
  0x18   : > { %s3987_s12 = scalar_lea.vmem %s5347_s2, %s3326_s9  ;;  %s359_s16 = sadd.s32 %s3737_s15, %s3980_s29 }
  0x19   : > { %v3484_v0 = vld [vmem:[%s3987_s12 + $0x8] sm:$0xf]  ;;  %v3485_v1 = vld [vmem:[%s3987_s12 + $0x10] sm:$0xf]  ;;  %v1506_v2 = vld [vmem:[%s3987_s12] sm:$0xf] }
  0x1a   : > { %v1722_v3 = vshrl.u32 %v3485_v1, 16  ;;  %v1725_v4 = vshll.u32 %v3485_v1, 16  ;;  %v3632_v5 = vcombine.low %v3484_v0, %v3485_v1  ;;  %v1708_v6 = vshrl.u32 %v3484_v0, 16  ;;  %v1507_v7 = vld [vmem:[%s3987_s12 + $0x8] sm:$0xf]  ;;  %s3325_s17 = sshll.u32 %s359_s16, 2 }
  0x1b   : > { %v1711_v8 = vshll.u32 %v3484_v0, 16  ;;  %v1537_v9 = vshrl.u32 %v1507_v7, 16  ;;  %v1540_v10 = vshll.u32 %v1507_v7, 16  ;;  %v3620_v11 = vcombine.low %v1506_v2, %v1507_v7  ;;  %v1508_v16 = vld [vmem:[%s3987_s12 + $0x10] sm:$0xf]  ;;  %s4016_s20 = scalar_lea.vmem %s5346_s1, %s3325_s17  ;;  %s3896_s30 = smov 16  }
  0x1c   : > { %v1724_v12 = vrot.slane %v1722_v3, 4  ;;  %v1727_v13 = vrot.slane %v1725_v4, 5  ;;  %2679 = vrot.lane.b32.xlu0 %v3632_v5, %s3893_s13  ;;  %v1710_v14 = vrot.slane %v1708_v6, 4  ;;  %v1523_v15 = vshrl.u32 %v1506_v2, 16  ;;  %v1509_v23 = vld [vmem:[%s3987_s12 + $0x18] sm:$0xf] }
  0x1d   : > { %v1713_v17 = vrot.slane %v1711_v8, 5  ;;  %v1539_v18 = vrot.slane %v1537_v9, 4  ;;  %v1542_v19 = vrot.slane %v1540_v10, 5  ;;  %2611 = vrot.lane.b32.xlu1 %v3620_v11, %s3894_s14  ;;  %v1526_v20 = vshll.u32 %v1506_v2, 16  ;;  %v3486_v30 = vld [vmem:[%s3987_s12 + $0x18] sm:$0xf] }
  0x1e   : > { %v1728_v21 = vor.u32 %v1727_v13, %v1724_v12  ;;  %v1525_v22 = vrot.slane %v1523_v15, 4  ;;  %v1551_v24 = vshrl.u32 %v1508_v16, 16  ;;  %v1554_v25 = vshll.u32 %v1508_v16, 16  ;;  %v3487_v34 = vld [vmem:[%s3987_s12 + $0x20] sm:$0xf]  ;;  %s3897_s7 = smov 12  }
  0x1f   : > { %v1714_v26 = vor.u32 %v1713_v17, %v1710_v14  ;;  %v1543_v27 = vor.u32 %v1542_v19, %v1539_v18  ;;  %v1528_v28 = vrot.slane %v1526_v20, 5  ;;  %v1565_v29 = vshrl.u32 %v1509_v23, 16  ;;  %v3452_v42 = vld [vmem:[%s4016_s20 + $0x14] sm:$0x1]  ;;  %v4024_v43 = vld [vmem:[%s4016_s20 + $0x1c] sm:$0x1] }
  0x20   : > { %v4002_v31 = vrot.slane %v1728_v21, 4  ;;  %v4004_v32 = vrot.slane %v1551_v24, 4  ;;  %v1568_v33 = vshll.u32 %v1509_v23, 16  ;;  %v4011_v38 = vrot.slane %v1554_v25, 5  ;;  %v3460_v46 = vld [vmem:[%s4016_s20 + $0x10] sm:$0xe] }
  0x21   : > { %v4007_v35 = vrot.slane %v1714_v26, 4  ;;  %v4009_v36 = vrot.slane %v1543_v27, 4  ;;  %v1529_v37 = vor.u32 %v1528_v28, %v1525_v22  ;;  %v4018_v39 = vrot.slane %v1565_v29, 4  ;;  %v3461_v47 = vld [vmem:[%s4016_s20 + $0x18] sm:$0xe]  ;;  %s3898_s8 = smov 24  }
  0x22   : > { %v4020_v40 = vrot.slane %v1568_v33, 5  ;;  %v3621_v41 = vcombine.low %v1508_v16, %v1509_v23  ;;  %v1736_v48 = vshrl.u32 %v3486_v30, 16  ;;  %v3633_v49 = vcombine.low %v3486_v30, %v3487_v34  ;;  %v1516_v54 = vld [vmem:[%s3987_s12 + $0x14] sm:$0x1]  ;;  %v3454_v57 = vld [vmem:[%s4016_s20 + $0x24] sm:$0x1] }
  0x23   : > { %v4026_v44 = vrot.slane %v1529_v37, 4  ;;  %v3468_v50 = vrot.slane %v3460_v46, 9  ;;  %v1476_v51 = vrot.slane %v3452_v42, 5  ;;  %v3469_v52 = vrot.slane %v3461_v47, 9  ;;  %v3455_v58 = vld [vmem:[%s4016_s20 + $0x2c] sm:$0x1] }
  0x24   : > { %2613 = vrot.lane.b32.xlu1 %v3621_v41, %s3894_s14  ;;  %v1480_v53 = vrot.slane %v4024_v43, 5  ;;  %v1739_v55 = vshll.u32 %v3486_v30, 16  ;;  %v1750_v56 = vshrl.u32 %v3487_v34, 16  ;;  %v1517_v59 = vld [vmem:[%s3987_s12 + $0x1c] sm:$0x1]  ;;  %v1753_v62 = vshll.u32 %v3487_v34, 16 }
  0x25   : > { %v1477_v60 = vsel %vm4030_vm2, %v3468_v50, %v1476_v51  ;;  %v3462_v63 = vld [vmem:[%s4016_s20 + $0x20] sm:$0xe]  ;;  %v3463_v0 = vld [vmem:[%s4016_s20 + $0x28] sm:$0xe]  ;;  %v1557_v1 = vor.u32 %v4011_v38, %v4004_v32  ;;  %v1738_v3 = vrot.slane %v1736_v48, 4  ;;  %v1484_v9 = vrot.slane %v3454_v57, 5 }
  0x26   : > { %v1481_v61 = vsel %vm4030_vm2, %v3469_v52, %v1480_v53  ;;  %v1741_v4 = vrot.slane %v1739_v55, 5  ;;  %v4050_v5 = vrot.slane %v1750_v56, 4  ;;  %v1636_v6 = vld [vmem:[%s3987_s12 + $0x10] sm:$0xe]  ;;  %v1755_v7 = vrot.slane %v1753_v62, 5  ;;  %s3899_s9 = smov 28  }
  0x27   : > { %v3616_v2 = vcombine.low %v1477_v60, %v1481_v61  ;;  %v3470_v8 = vrot.slane %v3462_v63, 9  ;;  %v3471_v10 = vrot.slane %v3463_v0, 9  ;;  %v1637_v11 = vld [vmem:[%s3987_s12 + $0x18] sm:$0xe]  ;;  %v1488_v12 = vrot.slane %v3455_v58, 5  ;;  %s3900_s10 = smov 32  }
  0x28   : > { %2681 = vrot.lane.b32.xlu1 %v3633_v49, %s3893_s13  ;;  %v3478_v13 = vrot.slane %v1636_v6, 9  ;;  %v1668_v14 = vrot.slane %v1516_v54, 5  ;;  %v3479_v15 = vrot.slane %v1637_v11, 9  ;;  %v1514_v16 = vld [vmem:[%s3987_s12 + $0x4] sm:$0x1]  ;;  %v1672_v18 = vrot.slane %v1517_v59, 5 }
  0x29   : > { %2583 = vrot.lane.b32.xlu0 %v3616_v2, %s3895_s28  ;;  %v1485_v17 = vsel %vm4030_vm2, %v3470_v8, %v1484_v9  ;;  %v1515_v19 = vld [vmem:[%s3987_s12 + $0xc] sm:$0x1]  ;;  %v1634_v20 = vld [vmem:[%s3987_s12] sm:$0xe]  ;;  %v1660_v21 = vrot.slane %v1514_v16, 5  ;;  %v1571_v22 = vor.u32 %v4020_v40, %v4018_v39  ;;  %v1489_v23 = vsel %vm4030_vm2, %v3471_v10, %v1488_v12  ;;  %s3901_s11 = smov 36  }
  0x2a   : > { %v1669_v24 = vsel %vm4030_vm2, %v3478_v13, %v1668_v14  ;;  %v1635_v25 = vld [vmem:[%s3987_s12 + $0x8] sm:$0xe]  ;;  %v3476_v26 = vrot.slane %v1634_v20, 9  ;;  %v1664_v27 = vrot.slane %v1515_v19, 5  ;;  %v3617_v28 = vcombine.low %v1485_v17, %v1489_v23  ;;  %v3494_v33 = vld [vmem:[%s3987_s12 + $0x1c] sm:$0x1] }
  0x2b   : > { %v1673_v29 = vsel %vm4030_vm2, %v3479_v15, %v1672_v18  ;;  %v3477_v30 = vrot.slane %v1635_v25, 9  ;;  %v1558_v32 = vrot.slane %v1557_v1, 4  ;;  %v1560_v38 = vshll.u32 %v1516_v54, 16  ;;  %v3495_v48 = vld [vmem:[%s3987_s12 + $0x24] sm:$0x1]  ;;  %s3902_s15 = smov 40  }
  0x2c   : > { %v3629_v34 = vcombine.low %v1669_v24, %v1673_v29  ;;  %v1661_v37 = vsel %vm4030_vm2, %v3476_v26, %v1660_v21  ;;  %v1572_v39 = vrot.slane %v1571_v22, 4  ;;  %v1574_v42 = vshll.u32 %v1517_v59, 16  ;;  %v3492_v53 = vld [vmem:[%s3987_s12 + $0xc] sm:$0x1]  ;;  %v3493_v58 = vld [vmem:[%s3987_s12 + $0x14] sm:$0x1] }
  0x2d   : > { %2585 = vrot.lane.b32.xlu0 %v3617_v28, %s3895_s28  ;;  %v1665_v40 = vsel %vm4030_vm2, %v3477_v30, %v1664_v27  ;;  %v1532_v46 = vshll.u32 %v1514_v16, 16  ;;  %v1546_v47 = vshll.u32 %v1515_v19, 16  ;;  %v1562_v50 = vrot.slane %v1560_v38, 5  ;;  %v3502_v63 = vld [vmem:[%s3987_s12 + $0x18] sm:$0xe]  ;;  %p345_p8 = scmp.lt.s32.totalorder %s3875_s21, 9 }
  0x2e   : > { %2653 = vrot.lane.b32.xlu1 %v3629_v34, %s3896_s30  ;;  %v3628_v49 = vcombine.low %v1661_v37, %v1665_v40  ;;  %v1742_v51 = vor.u32 %v1741_v4, %v1738_v3  ;;  %v1745_v52 = vshll.u32 %v3494_v33, 16  ;;  %v1576_v54 = vrot.slane %v1574_v42, 5  ;;  %v3503_v4 = vld [vmem:[%s3987_s12 + $0x20] sm:$0xe]  ;;  %v3501_v13 = vld [vmem:[%s3987_s12 + $0x10] sm:$0xe] }
  0x2f   : > { %v1534_v55 = vrot.slane %v1532_v46, 5  ;;  %v1548_v56 = vrot.slane %v1546_v47, 5  ;;  %v1756_v57 = vor.u32 %v1755_v7, %v4050_v5  ;;  %v1563_v59 = vsel %vm4078_vm5, %v1558_v32, %v1562_v50  ;;  %v3500_v5 = vld [vmem:[%s3987_s12 + $0x8] sm:$0xe]  ;;  %v3456_v17 = vld [vmem:[%s4016_s20 + $0x34] sm:$0x1] }
  0x30   : > { %v1743_v60 = vrot.slane %v1742_v51, 4  ;;  %v1747_v61 = vrot.slane %v1745_v52, 5  ;;  %v1759_v62 = vshll.u32 %v3495_v48, 16  ;;  %v1577_v0 = vsel %vm4078_vm5, %v1572_v39, %v1576_v54  ;;  %v3457_v22 = vld [vmem:[%s4016_s20 + $0x3c] sm:$0x1]  ;;  %s4261_s16 = scalar_select %p345_p8, %s3875_s21, 9 }
  0x31   : > { %2651 = vrot.lane.b32.xlu0 %v3628_v49, %s3896_s30  ;;  %v1535_v1 = vsel %vm4078_vm5, %v4026_v44, %v1534_v55  ;;  %v1549_v2 = vsel %vm4078_vm5, %v4009_v36, %v1548_v56  ;;  %v1757_v3 = vrot.slane %v1756_v57, 4  ;;  %v3625_v6 = vcombine.low %v1563_v59, %v1577_v0  ;;  %v3464_v23 = vld [vmem:[%s4016_s20 + $0x30] sm:$0xe]  ;;  %v3465_v28 = vld [vmem:[%s4016_s20 + $0x38] sm:$0xe]  ;;  %p376_p9 = scmp.lt.s32.totalorder %s3875_s21, 7 }
  0x32   : > { %v3624_v7 = vcombine.low %v1535_v1, %v1549_v2  ;;  %v1748_v8 = vsel %vm4078_vm5, %v1743_v60, %v1747_v61  ;;  %v1761_v9 = vrot.slane %v1759_v62, 5  ;;  %v1717_v10 = vshll.u32 %v3492_v53, 16  ;;  %v3517_v34 = vld [vmem:[%s3987_s12 + $0x18] sm:$0xf]  ;;  %v4130_v40 = vld [vmem:[%s3987_s12 + $0x14] sm:$0x1] }
  0x33   : > { %v1731_v11 = vshll.u32 %v3493_v58, 16  ;;  %v3510_v12 = vrot.slane %v3502_v63, 9  ;;  %v1853_v44 = vrot.slane %v3494_v33, 5  ;;  %2633 = vrot.lane.b32.xlu1 %v3625_v6, %s3897_s7  ;;  %v3511_v14 = vrot.slane %v3503_v4, 9  ;;  %v3516_v33 = vld [vmem:[%s3987_s12 + $0x10] sm:$0xf] }
  0x34   : > { %v1762_v36 = vsel %vm4078_vm5, %v1757_v3, %v1761_v9  ;;  %v1857_v15 = vrot.slane %v3495_v48, 5  ;;  %v3508_v16 = vrot.slane %v3500_v5, 9  ;;  %v1719_v19 = vrot.slane %v1717_v10, 5  ;;  %v4133_v47 = vld [vmem:[%s3987_s12 + $0x1c] sm:$0x1]  ;;  %s3735_s17 = smul.u32 20, %s4261_s16 }
  0x35   : > { %2631 = vrot.lane.b32.xlu0 %v3624_v7, %s3897_s7  ;;  %v3637_v18 = vcombine.low %v1748_v8, %v1762_v36  ;;  %v1733_v20 = vrot.slane %v1731_v11, 5  ;;  %v1854_v21 = vsel %vm4030_vm2, %v3510_v12, %v1853_v44  ;;  %v1845_v25 = vrot.slane %v3492_v53, 5  ;;  %v3518_v52 = vld [vmem:[%s3987_s12 + $0x20] sm:$0xf]  ;;  %v3519_v56 = vld [vmem:[%s3987_s12 + $0x28] sm:$0xf] }
  0x36   : > { %v1858_v24 = vsel %vm4030_vm2, %v3511_v14, %v1857_v15  ;;  %v3509_v26 = vrot.slane %v3501_v13, 9  ;;  %v1849_v27 = vrot.slane %v3493_v58, 5  ;;  %v1720_v29 = vsel %vm4078_vm5, %v4007_v35, %v1719_v19  ;;  %v4147_v5 = vld [vmem:[%s3987_s12 + $0x20] sm:$0xf]  ;;  %v1511_v10 = vld [vmem:[%s3987_s12 + $0x28] sm:$0xf]  ;;  %s4297_s18 = sadd.s32 %s3980_s29, %s3735_s17 }
  0x37   : > { %v1734_v30 = vsel %vm4078_vm5, %v4002_v31, %v1733_v20  ;;  %v3641_v32 = vcombine.low %v1854_v21, %v1858_v24  ;;  %2701 = vrot.lane.b32.xlu1 %v3637_v18, %s3898_s8  ;;  %v1846_v38 = vsel %vm4030_vm2, %v3508_v16, %v1845_v25  ;;  %v3472_v35 = vrot.slane %v3464_v23, 9  ;;  %v3458_v36 = vld [vmem:[%s4016_s20 + $0x44] sm:$0x1]  ;;  %v3459_v18 = vld [vmem:[%s4016_s20 + $0x4c] sm:$0x1]  ;;  %s3324_s29 = sshll.u32 %s4297_s18, 2 }
  0x38   : > { %v3636_v37 = vcombine.low %v1720_v29, %v1734_v30  ;;  %v1850_v39 = vsel %vm4030_vm2, %v3509_v26, %v1849_v27  ;;  %v1492_v42 = vrot.slane %v3456_v17, 5  ;;  %v3473_v31 = vrot.slane %v3465_v28, 9  ;;  %v3466_v23 = vld [vmem:[%s4016_s20 + $0x40] sm:$0xe]  ;;  %v3467_v24 = vld [vmem:[%s4016_s20 + $0x48] sm:$0xe]  ;;  %s4311_s17 = scalar_lea.vmem %s5345_s0, %s3324_s29 }
  0x39   : > { %v1496_v46 = vrot.slane %v3457_v22, 5  ;;  %v3640_v48 = vcombine.low %v1846_v38, %v1850_v39  ;;  %v1893_v49 = vshrl.u32 %v3516_v33, 16  ;;  %v1896_v50 = vshll.u32 %v3516_v33, 16  ;;  %v3532_v29 = vld [vmem:[%s3987_s12 + $0x10] sm:$0xe]  ;;  %s3907_s16 = smov 60  }
  0x3a   : > { %2699 = vrot.lane.b32.xlu0 %v3636_v37, %s3898_s8  ;;  %v1907_v51 = vshrl.u32 %v3517_v34, 16  ;;  %v1493_v53 = vsel %vm4030_vm2, %v3472_v35, %v1492_v42  ;;  %v1910_v55 = vshll.u32 %v3517_v34, 16  ;;  %v1902_v62 = vshll.u32 %v4130_v40, 16  ;;  %v3533_v30 = vld [vmem:[%s3987_s12 + $0x18] sm:$0xe]  ;;  %s5390_s21 = smov (!%p376_p9, %s3875_s21), 7 }
  0x3b   : > { %v1497_v54 = vsel %vm4030_vm2, %v3473_v31, %v1496_v46  ;;  %2721 = vrot.lane.b32.xlu1 %v3641_v32, %s3899_s9  ;;  %v1895_v58 = vrot.slane %v1893_v49, 4  ;;  %v1898_v59 = vrot.slane %v1896_v50, 5  ;;  %v1916_v63 = vshll.u32 %v4133_v47, 16  ;;  %v4167_v38 = vld [vmem:[%s3987_s12 + $0x24] sm:$0x1]  ;;  %s3330_s18 = sshll.u32 %s5384_s22, 3 }
  0x3c   : > { %v3618_v57 = vcombine.low %v1493_v53, %v1497_v54  ;;  %v1909_v60 = vrot.slane %v1907_v51, 4  ;;  %v1912_v61 = vrot.slane %v1910_v55, 5  ;;  %v1921_v0 = vshrl.u32 %v3518_v52, 16  ;;  %v4174_v51 = vld [vmem:[%s3987_s12 + $0x2c] sm:$0x1]  ;;  %s388_s29 = sadd.s32 %s3330_s18, %s5390_s21 }
  0x3d   : > { %v3644_v1 = vcombine.low %v3516_v33, %v3517_v34  ;;  %v1899_v2 = vor.u32 %v1898_v59, %v1895_v58  ;;  %v1924_v3 = vshll.u32 %v3518_v52, 16  ;;  %v1935_v4 = vshrl.u32 %v3519_v56, 16  ;;  %v4189_v59 = vld [vmem:[%s3987_s12 + $0x2c] sm:$0x1] }
  0x3e   : > { %2719 = vrot.lane.b32.xlu0 %v3640_v48, %s3899_s9  ;;  %v1904_v6 = vrot.slane %v1902_v62, 5  ;;  %v1913_v7 = vor.u32 %v1912_v61, %v1909_v60  ;;  %v1918_v8 = vrot.slane %v1916_v63, 5  ;;  %v1938_v9 = vshll.u32 %v3519_v56, 16  ;;  %v1512_v60 = vld [vmem:[%s3987_s12 + $0x30] sm:$0xf] }
  0x3f   : > { %v1362_v11 = vshll.u32 %v4024_v43, 16  ;;  %2587 = vrot.lane.b32.xlu1 %v3618_v57, %s3895_s28  ;;  %v1900_v12 = vrot.slane %v1899_v2, 4  ;;  %v1923_v44 = vrot.slane %v1921_v0, 4  ;;  %v1926_v13 = vrot.slane %v1924_v3, 5 }
  0x40   : > { %v1914_v14 = vrot.slane %v1913_v7, 4  ;;  %v1937_v15 = vrot.slane %v1935_v4, 4  ;;  %v1579_v16 = vshrl.u32 %v4147_v5, 16  ;;  %v1582_v17 = vshll.u32 %v4147_v5, 16 }
  0x41   : > { %v1905_v19 = vsel %vm4078_vm5, %v1900_v12, %v1904_v6  ;;  %v3645_v20 = vcombine.low %v3518_v52, %v3519_v56  ;;  %v1593_v21 = vshrl.u32 %v1511_v10, 16  ;;  %v1596_v22 = vshll.u32 %v1511_v10, 16  ;;  %v4182_v56 = vld [vmem:[%s3987_s12 + $0x24] sm:$0x1] }
  0x42   : > { %2747 = vrot.lane.b32.xlu0 %v3644_v1, %s3900_s10  ;;  %v1919_v25 = vsel %vm4078_vm5, %v1914_v14, %v1918_v8  ;;  %v1940_v26 = vrot.slane %v1938_v9, 5  ;;  %v1581_v27 = vrot.slane %v1579_v16, 4  ;;  %v3622_v28 = vcombine.low %v4147_v5, %v1511_v10  ;;  %v1513_v5 = vld [vmem:[%s3987_s12 + $0x38] sm:$0xf] }
  0x43   : > { %v3648_v32 = vcombine.low %v1905_v19, %v1919_v25  ;;  %v1584_v33 = vrot.slane %v1582_v17, 5  ;;  %v1595_v34 = vrot.slane %v1593_v21, 4  ;;  %v1598_v37 = vrot.slane %v1596_v22, 5 }
  0x44   : > { %v3474_v39 = vrot.slane %v3466_v23, 9  ;;  %v1500_v35 = vrot.slane %v3458_v36, 5  ;;  %v3475_v42 = vrot.slane %v3467_v24, 9  ;;  %v1504_v31 = vrot.slane %v3459_v18, 5  ;;  %v1520_v36 = vld [vmem:[%s3987_s12 + $0x34] sm:$0x1] }
  0x45   : > { %2767 = vrot.lane.b32.xlu1 %v3648_v32, %s3901_s11  ;;  %v3540_v46 = vrot.slane %v3532_v29, 9  ;;  %v2030_v48 = vrot.slane %v4130_v40, 5  ;;  %v3541_v49 = vrot.slane %v3533_v30, 9  ;;  %v2034_v50 = vrot.slane %v4133_v47, 5  ;;  %v1521_v18 = vld [vmem:[%s3987_s12 + $0x3c] sm:$0x1] }
  0x46   : > { %2749 = vrot.lane.b32.xlu0 %v3645_v20, %s3900_s10  ;;  %v1501_v52 = vsel %vm4030_vm2, %v3474_v39, %v1500_v35  ;;  %v1505_v53 = vsel %vm4030_vm2, %v3475_v42, %v1504_v31  ;;  %v1927_v54 = vor.u32 %v1926_v13, %v1923_v44  ;;  %v1930_v55 = vshll.u32 %v4167_v38, 16  ;;  %v3534_v23 = vld [vmem:[%s3987_s12 + $0x20] sm:$0xe]  ;;  %v3535_v24 = vld [vmem:[%s3987_s12 + $0x28] sm:$0xe] }
  0x47   : > { %v3619_v57 = vcombine.low %v1501_v52, %v1505_v53  ;;  %v2031_v40 = vsel %vm4030_vm2, %v3540_v46, %v2030_v48  ;;  %v2035_v47 = vsel %vm4030_vm2, %v3541_v49, %v2034_v50  ;;  %v1941_v58 = vor.u32 %v1940_v26, %v1937_v15  ;;  %v1638_v52 = vld [vmem:[%s3987_s12 + $0x20] sm:$0xe] }
  0x48   : > { %v3652_v61 = vcombine.low %v2031_v40, %v2035_v47  ;;  %v1928_v62 = vrot.slane %v1927_v54, 4  ;;  %v1932_v63 = vrot.slane %v1930_v55, 5  ;;  %v1944_v0 = vshll.u32 %v4174_v51, 16  ;;  %v1639_v40 = vld [vmem:[%s3987_s12 + $0x28] sm:$0xe] }
  0x49   : > { %2615 = vrot.lane.b32.xlu1 %v3622_v28, %s3894_s14  ;;  %v1942_v1 = vrot.slane %v1941_v58, 4  ;;  %v1585_v2 = vor.u32 %v1584_v33, %v1581_v27  ;;  %v1588_v3 = vshll.u32 %v4182_v56, 16  ;;  %v1599_v4 = vor.u32 %v1598_v37, %v1595_v34  ;;  %v1640_v34 = vld [vmem:[%s3987_s12 + $0x30] sm:$0xe]  ;;  %v1641_v37 = vld [vmem:[%s3987_s12 + $0x38] sm:$0xe] }
  0x4a   : > { %2589 = vrot.lane.b32.xlu0 %v3619_v57, %s3895_s28  ;;  %v1933_v6 = vsel %vm4078_vm5, %v1928_v62, %v1932_v63  ;;  %v1946_v7 = vrot.slane %v1944_v0, 5  ;;  %v1602_v8 = vshll.u32 %v4189_v59, 16  ;;  %v1607_v9 = vshrl.u32 %v1512_v60, 16 }
  0x4b   : > { %v1586_v10 = vrot.slane %v1585_v2, 4  ;;  %v1590_v12 = vrot.slane %v1588_v3, 5  ;;  %v1600_v44 = vrot.slane %v1599_v4, 4  ;;  %v1610_v13 = vshll.u32 %v1512_v60, 16 }
  0x4c   : > { %v1947_v14 = vsel %vm4078_vm5, %v1942_v1, %v1946_v7  ;;  %v1604_v15 = vrot.slane %v1602_v8, 5  ;;  %v1609_v16 = vrot.slane %v1607_v9, 4  ;;  %v1621_v17 = vshrl.u32 %v1513_v5, 16  ;;  %v3491_v1 = vld [vmem:[%s3987_s12 + $0x40] sm:$0xf] }
  0x4d   : > { %2787 = vrot.lane.b32.xlu1 %v3652_v61, %s3902_s15  ;;  %v3649_v19 = vcombine.low %v1933_v6, %v1947_v14  ;;  %v1591_v20 = vsel %vm4078_vm5, %v1586_v10, %v1590_v12  ;;  %v1612_v21 = vrot.slane %v1610_v13, 5  ;;  %v1624_v22 = vshll.u32 %v1513_v5, 16  ;;  %v3488_v6 = vld [vmem:[%s3987_s12 + $0x28] sm:$0xf]  ;;  %v3489_v13 = vld [vmem:[%s3987_s12 + $0x30] sm:$0xf] }
  0x4e   : > { %v1605_v25 = vsel %vm4078_vm5, %v1600_v44, %v1604_v15  ;;  %v1623_v26 = vrot.slane %v1621_v17, 4  ;;  %v3623_v27 = vcombine.low %v1512_v60, %v1513_v5  ;;  %v1616_v28 = vshll.u32 %v1520_v36, 16  ;;  %v4227_v60 = vld [vmem:[%s3987_s12 + $0x38] sm:$0xf]  ;;  %v3498_v17 = vld [vmem:[%s3987_s12 + $0x3c] sm:$0x1] }
  0x4f   : > { %2769 = vrot.lane.b32.xlu0 %v3649_v19, %s3901_s11  ;;  %v3626_v29 = vcombine.low %v1591_v20, %v1605_v25  ;;  %v1626_v30 = vrot.slane %v1624_v22, 5  ;;  %v1613_v32 = vor.u32 %v1612_v21, %v1609_v16  ;;  %v1630_v33 = vshll.u32 %v1521_v18, 16 }
  0x50   : > { %v1618_v39 = vrot.slane %v1616_v28, 5  ;;  %v3542_v35 = vrot.slane %v3534_v23, 9  ;;  %v2038_v42 = vrot.slane %v4167_v38, 5  ;;  %v3543_v31 = vrot.slane %v3535_v24, 9  ;;  %v3496_v23 = vld [vmem:[%s3987_s12 + $0x2c] sm:$0x1] }
  0x51   : > { %2635 = vrot.lane.b32.xlu1 %v3626_v29, %s3897_s7  ;;  %v1614_v46 = vrot.slane %v1613_v32, 4  ;;  %v1627_v48 = vor.u32 %v1626_v30, %v1623_v26  ;;  %v1632_v49 = vrot.slane %v1630_v33, 5  ;;  %v2042_v50 = vrot.slane %v4174_v51, 5  ;;  %v3497_v33 = vld [vmem:[%s3987_s12 + $0x34] sm:$0x1] }
  0x52   : > { %v2039_v53 = vsel %vm4030_vm2, %v3542_v35, %v2038_v42  ;;  %v3482_v54 = vrot.slane %v1640_v34, 9  ;;  %v1684_v55 = vrot.slane %v1520_v36, 5  ;;  %v3483_v57 = vrot.slane %v1641_v37, 9  ;;  %v3506_v42 = vld [vmem:[%s3987_s12 + $0x38] sm:$0xe] }
  0x53   : > { %2617 = vrot.lane.b32.xlu0 %v3623_v27, %s3894_s14  ;;  %v1619_v38 = vsel %vm4078_vm5, %v1614_v46, %v1618_v39  ;;  %v1628_v47 = vrot.slane %v1627_v48, 4  ;;  %v2043_v58 = vsel %vm4030_vm2, %v3543_v31, %v2042_v50  ;;  %v1688_v51 = vrot.slane %v1521_v18, 5  ;;  %v3499_v18 = vld [vmem:[%s3987_s12 + $0x44] sm:$0x1]  ;;  %v3507_v50 = vld [vmem:[%s3987_s12 + $0x40] sm:$0xe] }
  0x54   : > { %v3653_v61 = vcombine.low %v2039_v53, %v2043_v58  ;;  %v1685_v62 = vsel %vm4030_vm2, %v3482_v54, %v1684_v55  ;;  %v3480_v63 = vrot.slane %v1638_v52, 9  ;;  %v1676_v0 = vrot.slane %v4182_v56, 5 }
  0x55   : > { %v1633_v2 = vsel %vm4078_vm5, %v1628_v47, %v1632_v49  ;;  %v1689_v3 = vsel %vm4030_vm2, %v3483_v57, %v1688_v51  ;;  %v3481_v4 = vrot.slane %v1639_v40, 9  ;;  %v1680_v5 = vrot.slane %v4189_v59, 5  ;;  %v3504_v57 = vld [vmem:[%s3987_s12 + $0x28] sm:$0xe]  ;;  %v3505_v51 = vld [vmem:[%s3987_s12 + $0x30] sm:$0xe] }
  0x56   : > { %v3627_v7 = vcombine.low %v1619_v38, %v1633_v2  ;;  %v3631_v8 = vcombine.low %v1685_v62, %v1689_v3  ;;  %v1677_v56 = vsel %vm4030_vm2, %v3480_v63, %v1676_v0  ;;  %v1792_v9 = vshrl.u32 %v4227_v60, 16  ;;  %v4272_v0 = vld [vmem:[%s3987_s12 + $0x40] sm:$0xf] }
  0x57   : > { %2789 = vrot.lane.b32.xlu0 %v3653_v61, %s3902_s15  ;;  %v1681_v10 = vsel %vm4030_vm2, %v3481_v4, %v1680_v5  ;;  %v1795_v12 = vshll.u32 %v4227_v60, 16  ;;  %v1806_v44 = vshrl.u32 %v3491_v1, 16  ;;  %v1809_v59 = vshll.u32 %v3491_v1, 16  ;;  %v3523_v5 = vld [vmem:[%s3987_s12 + $0x48] sm:$0xf] }
  0x58   : > { %2637 = vrot.lane.b32.xlu1 %v3627_v7, %s3897_s7  ;;  %v3630_v36 = vcombine.low %v1677_v56, %v1681_v10  ;;  %v1794_v14 = vrot.slane %v1792_v9, 4  ;;  %v3635_v15 = vcombine.low %v4227_v60, %v3491_v1  ;;  %v1764_v16 = vshrl.u32 %v3488_v6, 16 }
  0x59   : > { %v1797_v19 = vrot.slane %v1795_v12, 5  ;;  %v1808_v20 = vrot.slane %v1806_v44, 4  ;;  %v1811_v21 = vrot.slane %v1809_v59, 5  ;;  %v1767_v22 = vshll.u32 %v3488_v6, 16  ;;  %v3520_v59 = vld [vmem:[%s3987_s12 + $0x30] sm:$0xf] }
  0x5a   : > { %v1766_v24 = vrot.slane %v1764_v16, 4  ;;  %v1778_v25 = vshrl.u32 %v3489_v13, 16  ;;  %v1781_v26 = vshll.u32 %v3489_v13, 16  ;;  %v3634_v27 = vcombine.low %v3488_v6, %v3489_v13  ;;  %v3521_v16 = vld [vmem:[%s3987_s12 + $0x38] sm:$0xf] }
  0x5b   : > { %2655 = vrot.lane.b32.xlu0 %v3630_v36, %s3896_s30  ;;  %v1769_v28 = vrot.slane %v1767_v22, 5  ;;  %v1798_v29 = vor.u32 %v1797_v19, %v1794_v14  ;;  %v1801_v30 = vshll.u32 %v3498_v17, 16  ;;  %v1812_v32 = vor.u32 %v1811_v21, %v1808_v20  ;;  %v3530_v21 = vld [vmem:[%s3987_s12 + $0x44] sm:$0x1] }
  0x5c   : > { %2657 = vrot.lane.b32.xlu1 %v3631_v8, %s3896_s30  ;;  %v1780_v34 = vrot.slane %v1778_v25, 4  ;;  %v1783_v37 = vrot.slane %v1781_v26, 5  ;;  %v1815_v39 = vshll.u32 %v3499_v18, 16  ;;  %v1773_v35 = vshll.u32 %v3496_v23, 16  ;;  %v3531_v26 = vld [vmem:[%s3987_s12 + $0x4c] sm:$0x1] }
  0x5d   : > { %v1799_v31 = vrot.slane %v1798_v29, 4  ;;  %v1803_v46 = vrot.slane %v1801_v30, 5  ;;  %v1813_v48 = vrot.slane %v1812_v32, 4  ;;  %v1770_v49 = vor.u32 %v1769_v28, %v1766_v24  ;;  %v3528_v32 = vld [vmem:[%s3987_s12 + $0x34] sm:$0x1] }
  0x5e   : > { %v1817_v52 = vrot.slane %v1815_v39, 5  ;;  %v1775_v53 = vrot.slane %v1773_v35, 5  ;;  %v1784_v54 = vor.u32 %v1783_v37, %v1780_v34  ;;  %v1787_v55 = vshll.u32 %v3497_v33, 16  ;;  %v3529_v35 = vld [vmem:[%s3987_s12 + $0x3c] sm:$0x1] }
  0x5f   : > { %2683 = vrot.lane.b32.xlu0 %v3634_v27, %s3893_s13  ;;  %v1804_v40 = vsel %vm4078_vm5, %v1799_v31, %v1803_v46  ;;  %v1771_v38 = vrot.slane %v1770_v49, 4  ;;  %v3514_v47 = vrot.slane %v3506_v42, 9  ;;  %v1869_v58 = vrot.slane %v3498_v17, 5  ;;  %v3538_v49 = vld [vmem:[%s3987_s12 + $0x40] sm:$0xe] }
  0x60   : > { %2685 = vrot.lane.b32.xlu1 %v3635_v15, %s3893_s13  ;;  %v1818_v60 = vsel %vm4078_vm5, %v1813_v48, %v1817_v52  ;;  %v1785_v61 = vrot.slane %v1784_v54, 4  ;;  %v1789_v62 = vrot.slane %v1787_v55, 5  ;;  %v3515_v63 = vrot.slane %v3507_v50, 9 }
  0x61   : > { %v3639_v1 = vcombine.low %v1804_v40, %v1818_v60  ;;  %v1776_v2 = vsel %vm4078_vm5, %v1771_v38, %v1775_v53  ;;  %v1870_v3 = vsel %vm4030_vm2, %v3514_v47, %v1869_v58  ;;  %v1873_v4 = vrot.slane %v3499_v18, 5  ;;  %v3539_v47 = vld [vmem:[%s3987_s12 + $0x48] sm:$0xe]  ;;  %v3536_v58 = vld [vmem:[%s3987_s12 + $0x30] sm:$0xe] }
  0x62   : > { %v1790_v6 = vsel %vm4078_vm5, %v1785_v61, %v1789_v62  ;;  %v3512_v7 = vrot.slane %v3504_v57, 9  ;;  %v1861_v8 = vrot.slane %v3496_v23, 5  ;;  %v3513_v56 = vrot.slane %v3505_v51, 9 }
  0x63   : > { %v3638_v9 = vcombine.low %v1776_v2, %v1790_v6  ;;  %v1874_v10 = vsel %vm4030_vm2, %v3515_v63, %v1873_v4  ;;  %v1865_v12 = vrot.slane %v3497_v33, 5  ;;  %v1977_v44 = vshrl.u32 %v4272_v0, 16 }
  0x64   : > { %2705 = vrot.lane.b32.xlu1 %v3639_v1, %s3898_s8  ;;  %v3643_v13 = vcombine.low %v1870_v3, %v1874_v10  ;;  %v1862_v36 = vsel %vm4030_vm2, %v3512_v7, %v1861_v8  ;;  %v1980_v14 = vshll.u32 %v4272_v0, 16  ;;  %v1991_v15 = vshrl.u32 %v3523_v5, 16  ;;  %v3537_v3 = vld [vmem:[%s3987_s12 + $0x38] sm:$0xe]  ;;  %v394_v8 = vld [vmem:[%s4311_s17 + $0x10] sm:$0xf] }
  0x65   : > { %2703 = vrot.lane.b32.xlu0 %v3638_v9, %s3898_s8  ;;  %v1866_v17 = vsel %vm4030_vm2, %v3513_v56, %v1865_v12  ;;  %v1979_v18 = vrot.slane %v1977_v44, 4  ;;  %v1994_v19 = vshll.u32 %v3523_v5, 16  ;;  %v3647_v20 = vcombine.low %v4272_v0, %v3523_v5  ;;  %v395_v44 = vld [vmem:[%s4311_s17 + $0x18] sm:$0xf]  ;;  %s3903_s12 = smov 44  }
  0x66   : > { %v3642_v22 = vcombine.low %v1862_v36, %v1866_v17  ;;  %v1982_v23 = vrot.slane %v1980_v14, 5  ;;  %v1993_v24 = vrot.slane %v1991_v15, 4  ;;  %v1949_v25 = vshrl.u32 %v3520_v59, 16 }
  0x67   : > { %v1996_v27 = vrot.slane %v1994_v19, 5  ;;  %v1952_v28 = vshll.u32 %v3520_v59, 16  ;;  %v1963_v29 = vshrl.u32 %v3521_v16, 16  ;;  %v1966_v30 = vshll.u32 %v3521_v16, 16 }
  0x68   : > { %2725 = vrot.lane.b32.xlu1 %v3643_v13, %s3899_s9  ;;  %v1951_v33 = vrot.slane %v1949_v25, 4  ;;  %v3646_v34 = vcombine.low %v3520_v59, %v3521_v16  ;;  %v1983_v37 = vor.u32 %v1982_v23, %v1979_v18  ;;  %v1986_v39 = vshll.u32 %v3530_v21, 16  ;;  %v4329_v59 = vld [vmem:[%s4311_s17 + $0x14] sm:$0x1]  ;;  %v4334_v16 = vld [vmem:[%s4311_s17 + $0x1c] sm:$0x1] }
  0x69   : > { %2723 = vrot.lane.b32.xlu0 %v3642_v22, %s3899_s9  ;;  %v1954_v42 = vrot.slane %v1952_v28, 5  ;;  %v1965_v31 = vrot.slane %v1963_v29, 4  ;;  %v1968_v46 = vrot.slane %v1966_v30, 5  ;;  %v1997_v48 = vor.u32 %v1996_v27, %v1993_v24 }
  0x6a   : > { %v1984_v50 = vrot.slane %v1983_v37, 4  ;;  %v1988_v52 = vrot.slane %v1986_v39, 5  ;;  %v2000_v53 = vshll.u32 %v3531_v26, 16  ;;  %v1958_v54 = vshll.u32 %v3528_v32, 16 }
  0x6b   : > { %v1998_v55 = vrot.slane %v1997_v48, 4  ;;  %v1955_v57 = vor.u32 %v1954_v42, %v1951_v33  ;;  %v1969_v40 = vor.u32 %v1968_v46, %v1965_v31  ;;  %v1972_v38 = vshll.u32 %v3529_v35, 16 }
  0x6c   : > { %2753 = vrot.lane.b32.xlu1 %v3647_v20, %s3900_s10  ;;  %v1989_v51 = vsel %vm4078_vm5, %v1984_v50, %v1988_v52  ;;  %v2002_v60 = vrot.slane %v2000_v53, 5  ;;  %v1960_v61 = vrot.slane %v1958_v54, 5  ;;  %v3546_v62 = vrot.slane %v3538_v49, 9  ;;  %v525_v54 = vld [vmem:[%s4311_s17 + $0x10] sm:$0xe] }
  0x6d   : > { %2751 = vrot.lane.b32.xlu0 %v3646_v34, %s3900_s10  ;;  %v1956_v63 = vrot.slane %v1955_v57, 4  ;;  %v1970_v0 = vrot.slane %v1969_v40, 4  ;;  %v1974_v1 = vrot.slane %v1972_v38, 5  ;;  %v2054_v2 = vrot.slane %v3530_v21, 5  ;;  %v392_v21 = vld [vmem:[%s4311_s17] sm:$0xf] }
  0x6e   : > { %v2003_v4 = vsel %vm4078_vm5, %v1998_v55, %v2002_v60  ;;  %v3547_v5 = vrot.slane %v3539_v47, 9  ;;  %v2058_v6 = vrot.slane %v3531_v26, 5  ;;  %v3544_v7 = vrot.slane %v3536_v58, 9  ;;  %v393_v26 = vld [vmem:[%s4311_s17 + $0x8] sm:$0xf] }
  0x6f   : > { %v3651_v56 = vcombine.low %v1989_v51, %v2003_v4  ;;  %v1961_v9 = vsel %vm4078_vm5, %v1956_v63, %v1960_v61  ;;  %v1975_v10 = vsel %vm4078_vm5, %v1970_v0, %v1974_v1  ;;  %v2055_v12 = vsel %vm4030_vm2, %v3546_v62, %v2054_v2  ;;  %v526_v47 = vld [vmem:[%s4311_s17 + $0x18] sm:$0xe]  ;;  %v523_v62 = vld [vmem:[%s4311_s17] sm:$0xe] }
  0x70   : > { %v3650_v13 = vcombine.low %v1961_v9, %v1975_v10  ;;  %v2059_v36 = vsel %vm4030_vm2, %v3547_v5, %v2058_v6  ;;  %v2046_v14 = vrot.slane %v3528_v32, 5  ;;  %v3545_v15 = vrot.slane %v3537_v3, 9  ;;  %v400_v32 = vld [vmem:[%s4311_s17 + $0x4] sm:$0x1]  ;;  %v524_v3 = vld [vmem:[%s4311_s17 + $0x8] sm:$0xe] }
  0x71   : > { %2773 = vrot.lane.b32.xlu1 %v3651_v56, %s3901_s11  ;;  %v3655_v17 = vcombine.low %v2055_v12, %v2059_v36  ;;  %v2050_v18 = vrot.slane %v3529_v35, 5  ;;  %v440_v19 = vshrl.u32 %v394_v8, 16  ;;  %v443_v20 = vshll.u32 %v394_v8, 16  ;;  %v401_v35 = vld [vmem:[%s4311_s17 + $0xc] sm:$0x1] }
  0x72   : > { %2771 = vrot.lane.b32.xlu0 %v3650_v13, %s3901_s11  ;;  %v2047_v22 = vsel %vm4030_vm2, %v3544_v7, %v2046_v14  ;;  %v449_v23 = vshll.u32 %v4329_v59, 16  ;;  %v454_v24 = vshrl.u32 %v395_v44, 16  ;;  %v457_v25 = vshll.u32 %v395_v44, 16  ;;  %v3342_v8 = vld [vmem:[%s4311_s17 + $0x18] sm:$0xf] }
  0x73   : > { %v2051_v27 = vsel %vm4030_vm2, %v3545_v15, %v2050_v18  ;;  %v442_v28 = vrot.slane %v440_v19, 4  ;;  %v445_v29 = vrot.slane %v443_v20, 5  ;;  %v463_v30 = vshll.u32 %v4334_v16, 16  ;;  %v3343_v15 = vld [vmem:[%s4311_s17 + $0x20] sm:$0xf] }
  0x74   : > { %v3654_v33 = vcombine.low %v2047_v22, %v2051_v27  ;;  %v451_v34 = vrot.slane %v449_v23, 5  ;;  %v456_v37 = vrot.slane %v454_v24, 4  ;;  %v459_v39 = vrot.slane %v457_v25, 5  ;;  %v3340_v23 = vld [vmem:[%s4311_s17 + $0x8] sm:$0xf] }
  0x75   : > { %2793 = vrot.lane.b32.xlu1 %v3655_v17, %s3902_s15  ;;  %v446_v42 = vor.u32 %v445_v29, %v442_v28  ;;  %v465_v31 = vrot.slane %v463_v30, 5  ;;  %v412_v46 = vshrl.u32 %v392_v21, 16  ;;  %v415_v48 = vshll.u32 %v392_v21, 16  ;;  %v3341_v24 = vld [vmem:[%s4311_s17 + $0x10] sm:$0xf] }
  0x76   : > { %2791 = vrot.lane.b32.xlu0 %v3654_v33, %s3902_s15  ;;  %v460_v49 = vor.u32 %v459_v39, %v456_v37  ;;  %v421_v50 = vshll.u32 %v400_v32, 16  ;;  %v426_v52 = vshrl.u32 %v393_v26, 16  ;;  %v429_v53 = vshll.u32 %v393_v26, 16 }
  0x77   : > { %v447_v55 = vrot.slane %v446_v42, 4  ;;  %v414_v57 = vrot.slane %v412_v46, 4  ;;  %v417_v40 = vrot.slane %v415_v48, 5  ;;  %v435_v38 = vshll.u32 %v401_v35, 16 }
  0x78   : > { %v461_v58 = vrot.slane %v460_v49, 4  ;;  %v423_v51 = vrot.slane %v421_v50, 5  ;;  %v428_v60 = vrot.slane %v426_v52, 4  ;;  %v431_v61 = vrot.slane %v429_v53, 5  ;;  %v3348_v52 = vld [vmem:[%s4311_s17 + $0xc] sm:$0x1] }
  0x79   : > { %v452_v63 = vsel %vm4078_vm5, %v447_v55, %v451_v34  ;;  %v418_v0 = vor.u32 %v417_v40, %v414_v57  ;;  %v437_v1 = vrot.slane %v435_v38, 5  ;;  %v3334_v2 = vrot.slane %v525_v54, 9  ;;  %v3350_v34 = vld [vmem:[%s4311_s17 + $0x1c] sm:$0x1]  ;;  %v3349_v53 = vld [vmem:[%s4311_s17 + $0x14] sm:$0x1] }
  0x7a   : > { %v466_v4 = vsel %vm4078_vm5, %v461_v58, %v465_v31  ;;  %v432_v5 = vor.u32 %v431_v61, %v428_v60  ;;  %v560_v6 = vrot.slane %v4329_v59, 5  ;;  %v3335_v7 = vrot.slane %v526_v47, 9  ;;  %v3351_v31 = vld [vmem:[%s4311_s17 + $0x24] sm:$0x1]  ;;  %v3358_v38 = vld [vmem:[%s4311_s17 + $0x18] sm:$0xe] }
  0x7b   : > { %v3553_v56 = vcombine.low %v452_v63, %v466_v4  ;;  %v419_v9 = vrot.slane %v418_v0, 4  ;;  %v564_v10 = vrot.slane %v4334_v16, 5  ;;  %v3332_v12 = vrot.slane %v523_v62, 9 }
  0x7c   : > { %v433_v44 = vrot.slane %v432_v5, 4  ;;  %v561_v13 = vsel %vm4030_vm2, %v3334_v2, %v560_v6  ;;  %v552_v36 = vrot.slane %v400_v32, 5  ;;  %v3333_v14 = vrot.slane %v524_v3, 9  ;;  %v3356_v6 = vld [vmem:[%s4311_s17 + $0x8] sm:$0xe] }
  0x7d   : > { %2094 = vrot.lane.b32.xlu1 %v3553_v56, %s3895_s28  ;;  %v424_v59 = vsel %vm4078_vm5, %v419_v9, %v423_v51  ;;  %v565_v17 = vsel %vm4030_vm2, %v3335_v7, %v564_v10  ;;  %v556_v18 = vrot.slane %v401_v35, 5  ;;  %v628_v16 = vshrl.u32 %v3342_v8, 16  ;;  %v3357_v10 = vld [vmem:[%s4311_s17 + $0x10] sm:$0xe] }
  0x7e   : > { %v438_v19 = vsel %vm4078_vm5, %v433_v44, %v437_v1  ;;  %v3557_v20 = vcombine.low %v561_v13, %v565_v17  ;;  %v553_v21 = vsel %vm4030_vm2, %v3332_v12, %v552_v36  ;;  %v631_v22 = vshll.u32 %v3342_v8, 16  ;;  %v3359_v1 = vld [vmem:[%s4311_s17 + $0x20] sm:$0xe] }
  0x7f   : > { %v3552_v25 = vcombine.low %v424_v59, %v438_v19  ;;  %v557_v26 = vsel %vm4030_vm2, %v3333_v14, %v556_v18  ;;  %v630_v27 = vrot.slane %v628_v16, 4  ;;  %v642_v28 = vshrl.u32 %v3343_v15, 16  ;;  %v3374_v14 = vld [vmem:[%s4311_s17 + $0x20] sm:$0xf]  ;;  %v3375_v16 = vld [vmem:[%s4311_s17 + $0x28] sm:$0xf] }
  0x80   : > { %v3556_v29 = vcombine.low %v553_v21, %v557_v26  ;;  %v633_v30 = vrot.slane %v631_v22, 5  ;;  %v645_v32 = vshll.u32 %v3343_v15, 16  ;;  %v3561_v33 = vcombine.low %v3342_v8, %v3343_v15 }
  0x81   : > { %2092 = vrot.lane.b32.xlu0 %v3552_v25, %s3895_s28  ;;  %2114 = vrot.lane.b32.xlu1 %v3557_v20, %s3894_s14  ;;  %v644_v37 = vrot.slane %v642_v28, 4  ;;  %v600_v39 = vshrl.u32 %v3340_v23, 16  ;;  %v603_v35 = vshll.u32 %v3340_v23, 16  ;;  %v614_v42 = vshrl.u32 %v3341_v24, 16 }
  0x82   : > { %v647_v46 = vrot.slane %v645_v32, 5  ;;  %v617_v48 = vshll.u32 %v3341_v24, 16  ;;  %v3560_v49 = vcombine.low %v3340_v23, %v3341_v24  ;;  %v634_v50 = vor.u32 %v633_v30, %v630_v27  ;;  %v3372_v27 = vld [vmem:[%s4311_s17 + $0x10] sm:$0xf] }
  0x83   : > { %v602_v54 = vrot.slane %v600_v39, 4  ;;  %v605_v55 = vrot.slane %v603_v35, 5  ;;  %v616_v57 = vrot.slane %v614_v42, 4  ;;  %v637_v40 = vshll.u32 %v3350_v34, 16  ;;  %v4413_v42 = vld [vmem:[%s4311_s17 + $0x24] sm:$0x1] }
  0x84   : > { %v619_v47 = vrot.slane %v617_v48, 5  ;;  %v635_v58 = vrot.slane %v634_v50, 4  ;;  %v648_v51 = vor.u32 %v647_v46, %v644_v37  ;;  %v651_v60 = vshll.u32 %v3351_v31, 16  ;;  %v4416_v50 = vld [vmem:[%s4311_s17 + $0x2c] sm:$0x1] }
  0x85   : > { %2112 = vrot.lane.b32.xlu0 %v3556_v29, %s3894_s14  ;;  %2142 = vrot.lane.b32.xlu1 %v3561_v33, %s3897_s7  ;;  %v639_v61 = vrot.slane %v637_v40, 5  ;;  %v606_v62 = vor.u32 %v605_v55, %v602_v54  ;;  %v609_v63 = vshll.u32 %v3348_v52, 16  ;;  %v623_v0 = vshll.u32 %v3349_v53, 16  ;;  %v3373_v33 = vld [vmem:[%s4311_s17 + $0x18] sm:$0xf] }
  0x86   : > { %v649_v2 = vrot.slane %v648_v51, 4  ;;  %v653_v3 = vrot.slane %v651_v60, 5  ;;  %v620_v4 = vor.u32 %v619_v47, %v616_v57  ;;  %v3366_v5 = vrot.slane %v3358_v38, 9  ;;  %v4422_v40 = vld [vmem:[%s4311_s17 + $0x14] sm:$0x1] }
  0x87   : > { %v640_v7 = vsel %vm4078_vm5, %v635_v58, %v639_v61  ;;  %v607_v8 = vrot.slane %v606_v62, 4  ;;  %v611_v56 = vrot.slane %v609_v63, 5  ;;  %v625_v9 = vrot.slane %v623_v0, 5  ;;  %v4426_v60 = vld [vmem:[%s4311_s17 + $0x1c] sm:$0x1] }
  0x88   : > { %v654_v12 = vsel %vm4078_vm5, %v649_v2, %v653_v3  ;;  %v621_v44 = vrot.slane %v620_v4, 4  ;;  %v745_v13 = vrot.slane %v3350_v34, 5  ;;  %v3367_v36 = vrot.slane %v3359_v1, 9  ;;  %v396_v1 = vld [vmem:[%s4311_s17 + $0x20] sm:$0xf] }
  0x89   : > { %2140 = vrot.lane.b32.xlu0 %v3560_v49, %s3897_s7  ;;  %v3565_v15 = vcombine.low %v640_v7, %v654_v12  ;;  %v612_v59 = vsel %vm4078_vm5, %v607_v8, %v611_v56  ;;  %v749_v17 = vrot.slane %v3351_v31, 5  ;;  %v3364_v18 = vrot.slane %v3356_v6, 9 }
  0x8a   : > { %v626_v19 = vsel %vm4078_vm5, %v621_v44, %v625_v9  ;;  %v746_v20 = vsel %vm4030_vm2, %v3366_v5, %v745_v13  ;;  %v737_v21 = vrot.slane %v3348_v52, 5  ;;  %v3365_v22 = vrot.slane %v3357_v10, 9  ;;  %v397_v9 = vld [vmem:[%s4311_s17 + $0x28] sm:$0xf]  ;;  %v4436_v10 = vld [vmem:[%s4311_s17 + $0x24] sm:$0x1] }
  0x8b   : > { %2162 = vrot.lane.b32.xlu1 %v3565_v15, %s3896_s30  ;;  %v3564_v23 = vcombine.low %v612_v59, %v626_v19  ;;  %v750_v24 = vsel %vm4030_vm2, %v3367_v36, %v749_v17  ;;  %v741_v25 = vrot.slane %v3349_v53, 5  ;;  %v813_v26 = vshrl.u32 %v3374_v14, 16 }
  0x8c   : > { %v3569_v28 = vcombine.low %v746_v20, %v750_v24  ;;  %v738_v29 = vsel %vm4030_vm2, %v3364_v18, %v737_v21  ;;  %v816_v30 = vshll.u32 %v3374_v14, 16  ;;  %v827_v32 = vshrl.u32 %v3375_v16, 16  ;;  %v3388_v24 = vld [vmem:[%s4311_s17 + $0x10] sm:$0xe] }
  0x8d   : > { %2160 = vrot.lane.b32.xlu0 %v3564_v23, %s3896_s30  ;;  %v742_v34 = vsel %vm4030_vm2, %v3365_v22, %v741_v25  ;;  %v815_v37 = vrot.slane %v813_v26, 4  ;;  %v830_v39 = vshll.u32 %v3375_v16, 16  ;;  %v3573_v35 = vcombine.low %v3374_v14, %v3375_v16  ;;  %v4446_v16 = vld [vmem:[%s4311_s17 + $0x2c] sm:$0x1] }
  0x8e   : > { %v3568_v31 = vcombine.low %v738_v29, %v742_v34  ;;  %v818_v46 = vrot.slane %v816_v30, 5  ;;  %v829_v48 = vrot.slane %v827_v32, 4  ;;  %v785_v49 = vshrl.u32 %v3372_v27, 16  ;;  %v4438_v12 = vpop.permute.xlu0 %2679  ;;  %v3389_v29 = vld [vmem:[%s4311_s17 + $0x18] sm:$0xe] }
  0x8f   : > { %v4418_v52 = vpop.permute.xlu1 %2611  ;;  %2182 = vrot.lane.b32.xlu1 %v3569_v28, %s3893_s13  ;;  %v832_v53 = vrot.slane %v830_v39, 5  ;;  %v788_v54 = vshll.u32 %v3372_v27, 16  ;;  %v799_v55 = vshrl.u32 %v3373_v33, 16  ;;  %v802_v57 = vshll.u32 %v3373_v33, 16  ;;  %v4458_v30 = vld [vmem:[%s4016_s20] sm:$0xf] }
  0x90   : > { %v787_v38 = vrot.slane %v785_v49, 4  ;;  %v3572_v47 = vcombine.low %v3372_v27, %v3373_v33  ;;  %v819_v58 = vor.u32 %v818_v46, %v815_v37  ;;  %v822_v51 = vshll.u32 %v4413_v42, 16 }
  0x91   : > { %2180 = vrot.lane.b32.xlu0 %v3568_v31, %s3893_s13  ;;  %v790_v61 = vrot.slane %v788_v54, 5  ;;  %v801_v62 = vrot.slane %v799_v55, 4  ;;  %v804_v63 = vrot.slane %v802_v57, 5  ;;  %v833_v0 = vor.u32 %v832_v53, %v829_v48  ;;  %v4464_v48 = vld [vmem:[%s4016_s20 + $0x8] sm:$0xf] }
  0x92   : > { %v820_v2 = vrot.slane %v819_v58, 4  ;;  %v824_v3 = vrot.slane %v822_v51, 5  ;;  %v836_v4 = vshll.u32 %v4416_v50, 16  ;;  %v794_v5 = vshll.u32 %v4422_v40, 16 }
  0x93   : > { %2210 = vrot.lane.b32.xlu1 %v3573_v35, %s3898_s8  ;;  %v834_v6 = vrot.slane %v833_v0, 4  ;;  %v791_v7 = vor.u32 %v790_v61, %v787_v38  ;;  %v805_v8 = vor.u32 %v804_v63, %v801_v62  ;;  %v808_v56 = vshll.u32 %v4426_v60, 16  ;;  %v3390_v62 = vld [vmem:[%s4311_s17 + $0x20] sm:$0xe] }
  0x94   : > { %v825_v44 = vsel %vm4078_vm5, %v820_v2, %v824_v3  ;;  %v838_v13 = vrot.slane %v836_v4, 5  ;;  %v796_v36 = vrot.slane %v794_v5, 5  ;;  %v468_v14 = vshrl.u32 %v396_v1, 16  ;;  %v3391_v2 = vld [vmem:[%s4311_s17 + $0x28] sm:$0xe] }
  0x95   : > { %2208 = vrot.lane.b32.xlu0 %v3572_v47, %s3898_s8  ;;  %v792_v59 = vrot.slane %v791_v7, 4  ;;  %v806_v17 = vrot.slane %v805_v8, 4  ;;  %v810_v18 = vrot.slane %v808_v56, 5  ;;  %v471_v19 = vshll.u32 %v396_v1, 16  ;;  %v4474_v47 = vld [vmem:[%s4016_s20 + $0x14] sm:$0x1] }
  0x96   : > { %v4442_v15 = vpop.permute.xlu1 %2613  ;;  %v839_v20 = vsel %vm4078_vm5, %v834_v6, %v838_v13  ;;  %v470_v21 = vrot.slane %v468_v14, 4  ;;  %v477_v22 = vshll.u32 %v4436_v10, 16  ;;  %v482_v23 = vshrl.u32 %v397_v9, 16  ;;  %v527_v7 = vld [vmem:[%s4311_s17 + $0x20] sm:$0xe] }
  0x97   : > { %v3577_v25 = vcombine.low %v825_v44, %v839_v20  ;;  %v797_v26 = vsel %vm4078_vm5, %v792_v59, %v796_v36  ;;  %v811_v27 = vsel %vm4078_vm5, %v806_v17, %v810_v18  ;;  %v473_v28 = vrot.slane %v471_v19, 5  ;;  %v528_v8 = vld [vmem:[%s4311_s17 + $0x28] sm:$0xe]  ;;  %v398_v36 = vld [vmem:[%s4311_s17 + $0x30] sm:$0xf] }
  0x98   : > { %v3576_v32 = vcombine.low %v797_v26, %v811_v27  ;;  %v479_v33 = vrot.slane %v477_v22, 5  ;;  %v484_v34 = vrot.slane %v482_v23, 4  ;;  %v485_v37 = vshll.u32 %v397_v9, 16  ;;  %v399_v20 = vld [vmem:[%s4311_s17 + $0x38] sm:$0xf] }
  0x99   : > { %2230 = vrot.lane.b32.xlu1 %v3577_v25, %s3899_s9  ;;  %v474_v39 = vor.u32 %v473_v28, %v470_v21  ;;  %v491_v35 = vshll.u32 %v4446_v16, 16  ;;  %v3396_v31 = vrot.slane %v3388_v24, 9  ;;  %v922_v46 = vrot.slane %v4422_v40, 5  ;;  %v4511_v26 = vld [vmem:[%s4311_s17 + $0x34] sm:$0x1] }
  0x9a   : > { %v4468_v53 = vpop.permute.xlu1 %2681  ;;  %2228 = vrot.lane.b32.xlu0 %v3576_v32, %s3899_s9  ;;  %v487_v54 = vrot.slane %v485_v37, 5  ;;  %v3397_v55 = vrot.slane %v3389_v29, 9  ;;  %v926_v57 = vrot.slane %v4426_v60, 5  ;;  %v969_v38 = vshrl.u32 %v4458_v30, 16  ;;  %v4519_v29 = vld [vmem:[%s4311_s17 + $0x3c] sm:$0x1] }
  0x9b   : > { %v4466_v49 = vpop.permute.xlu0 %2583  ;;  %v1348_v40 = vshll.u32 %v4474_v47, 16  ;;  %v475_v58 = vrot.slane %v474_v39, 4  ;;  %v923_v51 = vsel %vm4030_vm2, %v3396_v31, %v922_v46  ;;  %v972_v61 = vshll.u32 %v4458_v30, 16  ;;  %v4530_v31 = vld [vmem:[%s4016_s20 + $0x10] sm:$0xf] }
  0x9c   : > { %v488_v63 = vor.u32 %v487_v54, %v484_v34  ;;  %v493_v0 = vrot.slane %v491_v35, 5  ;;  %v927_v60 = vsel %vm4030_vm2, %v3397_v55, %v926_v57  ;;  %v983_v1 = vshrl.u32 %v4464_v48, 16  ;;  %v4535_v57 = vld [vmem:[%s4016_s20 + $0x18] sm:$0xf] }
  0x9d   : > { %v480_v3 = vsel %vm4078_vm5, %v475_v58, %v479_v33  ;;  %v3580_v4 = vcombine.low %v923_v51, %v927_v60  ;;  %v4487_v5 = vrot.slane %v969_v38, 4  ;;  %v4489_v6 = vrot.slane %v972_v61, 5 }
  0x9e   : > { %v489_v56 = vrot.slane %v488_v63, 4  ;;  %v4493_v9 = vrot.slane %v983_v1, 4  ;;  %v986_v44 = vshll.u32 %v4464_v48, 16  ;;  %v3398_v13 = vrot.slane %v3390_v62, 9 }
  0x9f   : > { %v4497_v14 = vpop.permute.xlu0 %2585  ;;  %2248 = vrot.lane.b32.xlu0 %v3580_v4, %s3900_s10  ;;  %v3584_v59 = vcombine.low %v4458_v30, %v4464_v48  ;;  %v930_v17 = vrot.slane %v4413_v42, 5  ;;  %v3399_v18 = vrot.slane %v3391_v2, 9  ;;  %v934_v19 = vrot.slane %v4416_v50, 5  ;;  %v4543_v2 = vld [vmem:[%s4016_s20 + $0x4] sm:$0x1] }
  0xa0   : > { %v4505_v21 = vpop.permute.xlu1 %2653  ;;  %v494_v22 = vsel %vm4078_vm5, %v489_v56, %v493_v0  ;;  %v3336_v23 = vrot.slane %v527_v7, 9  ;;  %v568_v24 = vrot.slane %v4436_v10, 5  ;;  %v3337_v25 = vrot.slane %v528_v8, 9 }
  0xa1   : > { %v3554_v27 = vcombine.low %v480_v3, %v494_v22  ;;  %v931_v42 = vsel %vm4030_vm2, %v3398_v13, %v930_v17  ;;  %v935_v50 = vsel %vm4030_vm2, %v3399_v18, %v934_v19  ;;  %v572_v28 = vrot.slane %v4446_v16, 5  ;;  %v4554_v13 = vld [vmem:[%s4016_s20 + $0xc] sm:$0x1] }
  0xa2   : > { %v3581_v30 = vcombine.low %v931_v42, %v935_v50  ;;  %v569_v10 = vsel %vm4030_vm2, %v3336_v23, %v568_v24  ;;  %v496_v32 = vshrl.u32 %v398_v36, 16  ;;  %v499_v33 = vshll.u32 %v398_v36, 16  ;;  %v955_v42 = vld [vmem:[%s4016_s20 + $0x18] sm:$0xf] }
  0xa3   : > { %v4523_v34 = vpop.permute.xlu0 %2651  ;;  %2096 = vrot.lane.b32.xlu1 %v3554_v27, %s3895_s28  ;;  %v573_v37 = vsel %vm4030_vm2, %v3337_v25, %v572_v28  ;;  %v505_v39 = vshll.u32 %v4511_v26, 16  ;;  %v510_v35 = vshrl.u32 %v399_v20, 16  ;;  %v513_v16 = vshll.u32 %v399_v20, 16  ;;  %v954_v20 = vld [vmem:[%s4016_s20 + $0x10] sm:$0xf] }
  0xa4   : > { %v988_v46 = vrot.slane %v986_v44, 5  ;;  %2250 = vrot.lane.b32.xlu0 %v3581_v30, %s3900_s10  ;;  %v498_v48 = vrot.slane %v496_v32, 4  ;;  %v501_v54 = vrot.slane %v499_v33, 5  ;;  %v519_v55 = vshll.u32 %v4519_v29, 16 }
  0xa5   : > { %v3558_v38 = vcombine.low %v569_v10, %v573_v37  ;;  %v507_v58 = vrot.slane %v505_v39, 5  ;;  %v512_v51 = vrot.slane %v510_v35, 4  ;;  %v515_v61 = vrot.slane %v513_v16, 5  ;;  %v4537_v62 = vpop.permute.xlu1 %2633  ;;  %v3839_v16 = vld [vmem:[%s4016_s20 + $0x24] sm:$0x1] }
  0xa6   : > { %v502_v63 = vor.u32 %v501_v54, %v498_v48  ;;  %v521_v0 = vrot.slane %v519_v55, 5  ;;  %v1364_v60 = vrot.slane %v1362_v11, 5  ;;  %v1339_v1 = vshrl.u32 %v4530_v31, 16  ;;  %v4579_v55 = vld [vmem:[%s4016_s20 + $0x20] sm:$0xf] }
  0xa7   : > { %v4545_v3 = vpop.permute.xlu0 %2631  ;;  %2276 = vrot.lane.b32.xlu1 %v3584_v59, %s3901_s11  ;;  %v516_v4 = vor.u32 %v515_v61, %v512_v51  ;;  %v1342_v7 = vshll.u32 %v4530_v31, 16  ;;  %v1350_v8 = vrot.slane %v1348_v40, 5  ;;  %v1353_v56 = vshrl.u32 %v4535_v57, 16 }
  0xa8   : > { %v503_v44 = vrot.slane %v502_v63, 4  ;;  %v1341_v43 = vrot.slane %v1339_v1, 4  ;;  %v1356_v11 = vshll.u32 %v4535_v57, 16  ;;  %v975_v36 = vor.u32 %v4489_v6, %v4487_v5  ;;  %v4586_v63 = vld [vmem:[%s4016_s20 + $0x28] sm:$0xf] }
  0xa9   : > { %v517_v17 = vrot.slane %v516_v4, 4  ;;  %v1344_v59 = vrot.slane %v1342_v7, 5  ;;  %v1355_v18 = vrot.slane %v1353_v56, 4  ;;  %v978_v19 = vshll.u32 %v4543_v2, 16  ;;  %v4560_v47 = vpop.permute.xlu1 %2701  ;;  %v3840_v4 = vld [vmem:[%s4016_s20 + $0x2c] sm:$0x1] }
  0xaa   : > { %v508_v40 = vsel %vm4078_vm5, %v503_v44, %v507_v58  ;;  %v1358_v22 = vrot.slane %v1356_v11, 5  ;;  %v976_v23 = vrot.slane %v975_v36, 4  ;;  %v989_v24 = vor.u32 %v988_v46, %v4493_v9 }
  0xab   : > { %2116 = vrot.lane.b32.xlu1 %v3558_v38, %s3894_s14  ;;  %v522_v5 = vsel %vm4078_vm5, %v517_v17, %v521_v0  ;;  %v1345_v6 = vor.u32 %v1344_v59, %v1341_v43  ;;  %v980_v25 = vrot.slane %v978_v19, 5  ;;  %v992_v27 = vshll.u32 %v4554_v13, 16  ;;  %v3344_v0 = vld [vmem:[%s4311_s17 + $0x28] sm:$0xf]  ;;  %v3345_v59 = vld [vmem:[%s4311_s17 + $0x30] sm:$0xf] }
  0xac   : > { %v4570_v50 = vpop.permute.xlu0 %2699  ;;  %v3555_v28 = vcombine.low %v508_v40, %v522_v5  ;;  %v1359_v30 = vor.u32 %v1358_v22, %v1355_v18  ;;  %v990_v10 = vrot.slane %v989_v24, 4  ;;  %v997_v32 = vshrl.u32 %v954_v20, 16  ;;  %v529_v22 = vld [vmem:[%s4311_s17 + $0x30] sm:$0xe] }
  0xad   : > { %v1346_v9 = vrot.slane %v1345_v6, 4  ;;  %v981_v33 = vsel %vm4078_vm5, %v976_v23, %v980_v25  ;;  %v994_v37 = vrot.slane %v992_v27, 5  ;;  %v1000_v39 = vshll.u32 %v954_v20, 16  ;;  %v4574_v35 = vpop.permute.xlu1 %2721  ;;  %v530_v25 = vld [vmem:[%s4311_s17 + $0x38] sm:$0xe] }
  0xae   : > { %v1376_v46 = vshll.u32 %v3839_v16, 16  ;;  %2098 = vrot.lane.b32.xlu0 %v3555_v28, %s3895_s28  ;;  %v1360_v48 = vrot.slane %v1359_v30, 4  ;;  %v1011_v54 = vshrl.u32 %v955_v42, 16  ;;  %v1014_v51 = vshll.u32 %v955_v42, 16  ;;  %s3908_s28 = smov 64  }
  0xaf   : > { %v1351_v38 = vsel %vm4078_vm5, %v1346_v9, %v1350_v8  ;;  %v995_v58 = vsel %vm4078_vm5, %v990_v10, %v994_v37  ;;  %v3585_v61 = vcombine.low %v954_v20, %v955_v42  ;;  %v1390_v7 = vshll.u32 %v3840_v4, 16 }
  0xb0   : > { %v4589_v1 = vpop.permute.xlu0 %2719  ;;  %v1365_v56 = vsel %vm4078_vm5, %v1360_v48, %v1364_v60  ;;  %v3588_v44 = vcombine.low %v981_v33, %v995_v58  ;;  %v999_v43 = vrot.slane %v997_v32, 4  ;;  %v1002_v11 = vrot.slane %v1000_v39, 5  ;;  %v1080_v32 = vld [vmem:[%s4016_s20] sm:$0xe] }
  0xb1   : > { %v4594_v8 = vcombine.low %v1351_v38, %v1365_v56  ;;  %v4596_v36 = vrot.slane %v1011_v54, 4  ;;  %v1367_v17 = vshrl.u32 %v4579_v55, 16  ;;  %v4600_v18 = vpop.permute.xlu1 %2587  ;;  %v1370_v60 = vshll.u32 %v4579_v55, 16  ;;  %v1081_v38 = vld [vmem:[%s4016_s20 + $0x8] sm:$0xe] }
  0xb2   : > { %2296 = vrot.lane.b32.xlu1 %v3588_v44, %s3902_s15  ;;  %2278 = vrot.lane.b32.xlu0 %v3585_v61, %s3901_s11  ;;  %v1381_v19 = vshrl.u32 %v4586_v63, 16  ;;  %v1384_v20 = vshll.u32 %v4586_v63, 16  ;;  %v656_v40 = vshrl.u32 %v3344_v0, 16  ;;  %v1016_v23 = vrot.slane %v1014_v51, 5 }
  0xb3   : > { %v1378_v24 = vrot.slane %v1376_v46, 5  ;;  %v1369_v5 = vrot.slane %v1367_v17, 4  ;;  %v659_v6 = vshll.u32 %v3344_v0, 16  ;;  %v1392_v42 = vrot.slane %v1390_v7, 5 }
  0xb4   : > { %v4609_v27 = vpop.permute.xlu0 %2747  ;;  %v1372_v28 = vrot.slane %v1370_v60, 5  ;;  %v1383_v30 = vrot.slane %v1381_v19, 4  ;;  %v1386_v10 = vrot.slane %v1384_v20, 5  ;;  %v658_v9 = vrot.slane %v656_v40, 4  ;;  %v4624_v60 = vld [vmem:[%s4016_s20 + $0x14] sm:$0x1] }
  0xb5   : > { %v661_v33 = vrot.slane %v659_v6, 5  ;;  %v670_v37 = vshrl.u32 %v3345_v59, 16  ;;  %v3562_v39 = vcombine.low %v3344_v0, %v3345_v59  ;;  %v3338_v54 = vrot.slane %v529_v22, 9  ;;  %v4630_v20 = vld [vmem:[%s4016_s20 + $0x1c] sm:$0x1] }
  0xb6   : > { %v1373_v16 = vor.u32 %v1372_v28, %v1369_v5  ;;  %v1387_v48 = vor.u32 %v1386_v10, %v1383_v30  ;;  %v576_v46 = vrot.slane %v4511_v26, 5  ;;  %v673_v58 = vshll.u32 %v3345_v59, 16 }
  0xb7   : > { %2144 = vrot.lane.b32.xlu1 %v3562_v39, %s3897_s7  ;;  %v3339_v51 = vrot.slane %v530_v25, 9  ;;  %v580_v61 = vrot.slane %v4519_v29, 5  ;;  %v3404_v4 = vrot.slane %v1080_v32, 9  ;;  %v4616_v7 = vpop.permute.xlu1 %2767  ;;  %v1106_v26 = vrot.slane %v4543_v2, 5 }
  0xb8   : > { %v4618_v56 = vpop.permute.xlu0 %2749  ;;  %v1374_v0 = vrot.slane %v1373_v16, 4  ;;  %v1388_v44 = vrot.slane %v1387_v48, 4  ;;  %v577_v17 = vsel %vm4030_vm2, %v3338_v54, %v576_v46  ;;  %v3405_v19 = vrot.slane %v1081_v38, 9  ;;  %v4649_v48 = vld [vmem:[%s4311_s17 + $0x2c] sm:$0x1] }
  0xb9   : > { %v581_v59 = vsel %vm4030_vm2, %v3339_v51, %v580_v61  ;;  %v1110_v29 = vrot.slane %v4554_v13, 5  ;;  %v1003_v40 = vor.u32 %v1002_v11, %v999_v43  ;;  %v1107_v2 = vsel %vm4030_vm2, %v3404_v4, %v1106_v26  ;;  %v4653_v38 = vld [vmem:[%s4311_s17 + $0x34] sm:$0x1]  ;;  %v4656_v51 = vld [vmem:[%s4016_s20 + $0x3c] sm:$0x1] }
  0xba   : > { %v1379_v22 = vsel %vm4078_vm5, %v1374_v0, %v1378_v24  ;;  %v1393_v5 = vsel %vm4078_vm5, %v1388_v44, %v1392_v42  ;;  %v3559_v6 = vcombine.low %v577_v17, %v581_v59  ;;  %v1006_v13 = vshll.u32 %v4624_v60, 16  ;;  %v3346_v44 = vld [vmem:[%s4311_s17 + $0x38] sm:$0xf]  ;;  %v3347_v17 = vld [vmem:[%s4311_s17 + $0x40] sm:$0xf] }
  0xbb   : > { %v3613_v25 = vcombine.low %v1379_v22, %v1393_v5  ;;  %v1111_v28 = vsel %vm4030_vm2, %v3405_v19, %v1110_v29  ;;  %v1004_v30 = vrot.slane %v1003_v40, 4  ;;  %v4641_v43 = vpop.permute.xlu1 %2615  ;;  %v1017_v42 = vor.u32 %v1016_v23, %v4596_v36 }
  0xbc   : > { %v4643_v11 = vpop.permute.xlu0 %2589  ;;  %2118 = vrot.lane.b32.xlu0 %v3559_v6, %s3894_s14  ;;  %v3592_v24 = vcombine.low %v1107_v2, %v1111_v28  ;;  %v1020_v10 = vshll.u32 %v4630_v20, 16  ;;  %v672_v32 = vrot.slane %v670_v37, 4  ;;  %v675_v39 = vrot.slane %v673_v58, 5  ;;  %v3412_v2 = vld [vmem:[%s4016_s20 + $0x8] sm:$0xf]  ;;  %s3904_s14 = smov 48  }
  0xbd   : > { %v1008_v16 = vrot.slane %v1006_v13, 5  ;;  %v1018_v54 = vrot.slane %v1017_v42, 4  ;;  %v1418_v36 = vshll.u32 %v4656_v51, 16  ;;  %v662_v37 = vor.u32 %v661_v33, %v658_v9  ;;  %v3413_v42 = vld [vmem:[%s4016_s20 + $0x10] sm:$0xf] }
  0xbe   : > { %2316 = vrot.lane.b32.xlu1 %v3592_v24, %s3903_s12  ;;  %v1022_v46 = vrot.slane %v1020_v10, 5  ;;  %v2800_v61 = vsel %vm2420_vm6, %v3613_v25, %v4497_v14  ;;  %v665_v0 = vshll.u32 %v4649_v48, 16  ;;  %v676_v19 = vor.u32 %v675_v39, %v672_v32  ;;  %v1082_v10 = vld [vmem:[%s4016_s20 + $0x10] sm:$0xe] }
  0xbf   : > { %v1009_v23 = vsel %vm4078_vm5, %v1004_v30, %v1008_v16  ;;  %v4661_v58 = vpop.permute.xlu1 %2787  ;;  %v663_v59 = vrot.slane %v662_v37, 4  ;;  %v679_v29 = vshll.u32 %v4653_v38, 16  ;;  %v2797_v14 = vsel %vm2420_vm6, %v4594_v8, %v4466_v49  ;;  %v4700_v37 = vld [vmem:[%s4016_s20 + $0x44] sm:$0x1] }
  0xc0   : > { %v1023_v4 = vsel %vm4078_vm5, %v1018_v54, %v1022_v46  ;;  %v667_v33 = vrot.slane %v665_v0, 5  ;;  %v2810_v40 = vsel %vm2433_vm8, %v2800_v61, %v4442_v15  ;;  %v677_v22 = vrot.slane %v676_v19, 4 }
  0xc1   : > { %v3589_v26 = vcombine.low %v1009_v23, %v1023_v4  ;;  %v4671_v9 = vpop.permute.xlu0 %2769  ;;  %v681_v5 = vrot.slane %v679_v29, 5  ;;  %v3563_v6 = vcombine.low %v3346_v44, %v3347_v17  ;;  %v2818_v25 = vsel %vm2442_vm7, %v2810_v40, %v4537_v62  ;;  %v4693_v62 = vld [vmem:[%s4016_s20 + $0x34] sm:$0x1]  ;;  %v1083_v23 = vld [vmem:[%s4016_s20 + $0x18] sm:$0xe] }
  0xc2   : > { %v668_v49 = vsel %vm4078_vm5, %v663_v59, %v667_v33  ;;  %v684_v8 = vshrl.u32 %v3346_v44, 16  ;;  %v687_v28 = vshll.u32 %v3346_v44, 16  ;;  %v698_v13 = vshrl.u32 %v3347_v17, 16  ;;  %v3361_v40 = vld [vmem:[%s4311_s17 + $0x30] sm:$0xe] }
  0xc3   : > { %2298 = vrot.lane.b32.xlu0 %v3589_v26, %s3902_s15  ;;  %v4684_v30 = vpop.permute.xlu1 %2635  ;;  %v682_v15 = vsel %vm4078_vm5, %v677_v22, %v681_v5  ;;  %v701_v24 = vshll.u32 %v3347_v17, 16  ;;  %v1404_v39 = vshll.u32 %v4693_v62, 16  ;;  %v2808_v16 = vsel %vm2433_vm8, %v2797_v14, %v4418_v52  ;;  %v3360_v52 = vld [vmem:[%s4311_s17 + $0x28] sm:$0xe]  ;;  %v3831_v62 = vld [vmem:[%s5348_s3] sm:$0xff]  }
  0xc4   : > { %v3566_v54 = vcombine.low %v668_v49, %v682_v15  ;;  %v1154_v46 = vshrl.u32 %v3412_v2, 16  ;;  %v4705_v4 = vsel %vm2451_vm9, %v2818_v25, %v4505_v21  ;;  %v4709_v0 = vsel %vm2442_vm7, %v2808_v16, %v4545_v3  ;;  %v4720_v49 = vld [vmem:[%s4311_s17 + $0x3c] sm:$0x1]  ;;  %3697 = vmatprep.subr.bf16.mxu0 %v3831_v62  ;;  %3719 = vmatprep.subr.bf16.mxu1 %v3831_v62 }
  0xc5   : > { %v4690_v32 = vpop.permute.xlu0 %2617  ;;  %v1157_v44 = vshll.u32 %v3412_v2, 16  ;;  %v686_v17 = vrot.slane %v684_v8, 4  ;;  %v689_v26 = vrot.slane %v687_v28, 5  ;;  %v3596_v59 = vcombine.low %v3412_v2, %v3413_v42  ;;  %3698 = vmatpush3.bf16.msra.mxu0 %v3831_v62  ;;  %3726 = vmatpush3.bf16.msra.mxu1 %v3831_v62 }
  0xc6   : > { %2164 = vrot.lane.b32.xlu1 %v3566_v54, %s3896_s30  ;;  %v3406_v19 = vrot.slane %v1082_v10, 9  ;;  %v700_v29 = vrot.slane %v698_v13, 4  ;;  %v703_v14 = vrot.slane %v701_v24, 5  ;;  %v1114_v21 = vrot.slane %v4624_v60, 5  ;;  %v4728_v13 = vld [vmem:[%s4311_s17 + $0x44] sm:$0x1] }
  0xc7   : > { %2146 = vrot.lane.b32.xlu0 %v3563_v6, %s3897_s7  ;;  %v3407_v33 = vrot.slane %v1083_v23, 9  ;;  %v1156_v22 = vrot.slane %v1154_v46, 4  ;;  %v1168_v5 = vshrl.u32 %v3413_v42, 16  ;;  %v1118_v6 = vrot.slane %v4630_v20, 5  ;;  %v4735_v54 = vld [vmem:[%s4016_s20 + $0x30] sm:$0xf] }
  0xc8   : > { %v3368_v25 = vrot.slane %v3360_v52, 9  ;;  %v1159_v2 = vrot.slane %v1157_v44, 5  ;;  %v1171_v28 = vshll.u32 %v3413_v42, 16  ;;  %v1115_v60 = vsel %vm4030_vm2, %v3406_v19, %v1114_v21  ;;  %v4741_v44 = vld [vmem:[%s4016_s20 + $0x38] sm:$0xf] }
  0xc9   : > { %v4716_v3 = vpop.permute.xlu0 %2789  ;;  %v753_v15 = vrot.slane %v4649_v48, 5  ;;  %v1119_v20 = vsel %vm4030_vm2, %v3407_v33, %v1118_v6  ;;  %v3369_v24 = vrot.slane %v3361_v40, 9  ;;  %v757_v10 = vrot.slane %v4653_v38, 5 }
  0xca   : > { %v4722_v8 = vpop.permute.xlu1 %2637  ;;  %2344 = vrot.lane.b32.xlu1 %v3596_v59, %s3904_s14  ;;  %v690_v16 = vor.u32 %v689_v26, %v686_v17  ;;  %v3593_v42 = vcombine.low %v1115_v60, %v1119_v20  ;;  %v693_v48 = vshll.u32 %v4720_v49, 16  ;;  %v704_v23 = vor.u32 %v703_v14, %v700_v29  ;;  %v4755_v60 = vld [vmem:[%s4016_s20 + $0xc] sm:$0x1] }
  0xcb   : > { %v754_v46 = vsel %vm4030_vm2, %v3368_v25, %v753_v15  ;;  %v1170_v59 = vrot.slane %v1168_v5, 4  ;;  %v758_v19 = vsel %vm4030_vm2, %v3369_v24, %v757_v10  ;;  %v707_v17 = vshll.u32 %v4728_v13, 16  ;;  %v4762_v10 = vld [vmem:[%s4016_s20 + $0x14] sm:$0x1] }
  0xcc   : > { %v691_v38 = vrot.slane %v690_v16, 4  ;;  %2318 = vrot.lane.b32.xlu0 %v3593_v42, %s3903_s12  ;;  %v3570_v21 = vcombine.low %v754_v46, %v758_v19  ;;  %v695_v33 = vrot.slane %v693_v48, 5  ;;  %v705_v29 = vrot.slane %v704_v23, 4  ;;  %v3414_v23 = vld [vmem:[%s4016_s20 + $0x18] sm:$0xf] }
  0xcd   : > { %v4743_v52 = vpop.permute.xlu0 %2655  ;;  %v1395_v14 = vshrl.u32 %v4735_v54, 16  ;;  %v1173_v40 = vrot.slane %v1171_v28, 5  ;;  %v709_v6 = vrot.slane %v707_v17, 5  ;;  %v1398_v5 = vshll.u32 %v4735_v54, 16 }
  0xce   : > { %v4748_v26 = vpop.permute.xlu1 %2657  ;;  %v1409_v25 = vshrl.u32 %v4741_v44, 16  ;;  %2184 = vrot.lane.b32.xlu1 %v3570_v21, %s3893_s13  ;;  %v696_v15 = vsel %vm4078_vm5, %v691_v38, %v695_v33  ;;  %v1412_v24 = vshll.u32 %v4741_v44, 16  ;;  %v1420_v42 = vrot.slane %v1418_v36, 5 }
  0xcf   : > { %v1397_v20 = vrot.slane %v1395_v14, 4  ;;  %v710_v16 = vsel %vm4078_vm5, %v705_v29, %v709_v6  ;;  %v1400_v46 = vrot.slane %v1398_v5, 5  ;;  %v1160_v21 = vor.u32 %v1159_v2, %v1156_v22 }
  0xd0   : > { %v1411_v48 = vrot.slane %v1409_v25, 4  ;;  %v3567_v38 = vcombine.low %v696_v15, %v710_v16  ;;  %v1414_v17 = vrot.slane %v1412_v24, 5  ;;  %v1163_v33 = vshll.u32 %v4755_v60, 16  ;;  %v3415_v25 = vld [vmem:[%s4016_s20 + $0x20] sm:$0xf] }
  0xd1   : > { %v4764_v28 = vpop.permute.xlu0 %2683  ;;  %v1401_v14 = vor.u32 %v1400_v46, %v1397_v20  ;;  %v1406_v61 = vrot.slane %v1404_v39, 5  ;;  %v1174_v29 = vor.u32 %v1173_v40, %v1170_v59  ;;  %v1177_v51 = vshll.u32 %v4762_v10, 16  ;;  %v3844_v39 = vld [vmem:[%s4016_s20 + $0x4c] sm:$0x1] }
  0xd2   : > { %5356 = vst [vmem:[#allocation2_spill] sm:$0xff] %v4764_v28  ;;  %v4771_v19 = vpop.permute.xlu1 %2685  ;;  %2166 = vrot.lane.b32.xlu0 %v3567_v38, %s3896_s30  ;;  %v1415_v36 = vor.u32 %v1414_v17, %v1411_v48  ;;  %v1161_v6 = vrot.slane %v1160_v21, 4  ;;  %v1165_v5 = vrot.slane %v1163_v33, 5  ;;  %v1182_v28 = vshrl.u32 %v3414_v23, 16  ;;  %s3905_s30 = smov 52  }
  0xd3   : > { %v1402_v15 = vrot.slane %v1401_v14, 4  ;;  %v1175_v22 = vrot.slane %v1174_v29, 4  ;;  %v1179_v2 = vrot.slane %v1177_v51, 5  ;;  %v1185_v20 = vshll.u32 %v3414_v23, 16  ;;  %v3376_v14 = vld [vmem:[%s4311_s17 + $0x30] sm:$0xf] }
  0xd4   : > { %v1446_v59 = vshll.u32 %v3844_v39, 16  ;;  %v2824_v40 = vsel %vm2451_vm9, %v4709_v0, %v4523_v34  ;;  %v1416_v16 = vrot.slane %v1415_v36, 4  ;;  %v1166_v46 = vsel %vm4078_vm5, %v1161_v6, %v1165_v5  ;;  %v3377_v29 = vld [vmem:[%s4311_s17 + $0x38] sm:$0xf] }
  0xd5   : > { %v1407_v38 = vsel %vm4078_vm5, %v1402_v15, %v1406_v61  ;;  %v1180_v17 = vsel %vm4078_vm5, %v1175_v22, %v1179_v2  ;;  %v1196_v21 = vshrl.u32 %v3415_v25, 16  ;;  %v3597_v33 = vcombine.low %v3414_v23, %v3415_v25  ;;  %v3362_v36 = vld [vmem:[%s4311_s17 + $0x38] sm:$0xe]  ;;  %v4822_v2 = vld [vmem:[%s4016_s20 + $0x40] sm:$0xf] }
  0xd6   : > { %v4779_v24 = vpop.permute.xlu1 %2705  ;;  %v4801_v34 = vsel %vm2460_vm10, %v4705_v4, %v4468_v53  ;;  %v1421_v0 = vsel %vm4078_vm5, %v1416_v16, %v1420_v42  ;;  %v3600_v51 = vcombine.low %v1166_v46, %v1180_v17  ;;  %v1199_v61 = vshll.u32 %v3415_v25, 16  ;;  %v3363_v53 = vld [vmem:[%s4311_s17 + $0x40] sm:$0xe]  ;;  %v4830_v16 = vld [vmem:[%s4016_s20 + $0x48] sm:$0xf] }
  0xd7   : > { %5357 = vst [vmem:[#allocation3_spill] sm:$0xff] %v4779_v24  ;;  %v4790_v48 = vpop.permute.xlu0 %2703  ;;  %v4808_v23 = vsel %vm2460_vm10, %v2824_v40, %v4438_v12  ;;  %v4810_v6 = vcombine.low %v1407_v38, %v1421_v0  ;;  %v4812_v5 = vrot.slane %v1182_v28, 4  ;;  %v4814_v15 = vrot.slane %v1185_v20, 5  ;;  %2346 = vrot.lane.b32.xlu0 %v3597_v33, %s3904_s14  ;;  %v3428_v0 = vld [vmem:[%s4016_s20 + $0x8] sm:$0xe] }
  0xd8   : > { %5358 = vst [vmem:[#allocation4_spill] sm:$0xff] %v4790_v48  ;;  %2364 = vrot.lane.b32.xlu1 %v3600_v51, %s3905_s30  ;;  %v841_v42 = vshrl.u32 %v3376_v14, 16  ;;  %v844_v25 = vshll.u32 %v3376_v14, 16  ;;  %v855_v12 = vshrl.u32 %v3377_v29, 16  ;;  %v858_v22 = vshll.u32 %v3377_v29, 16 }
  0xd9   : > { %v4826_v20 = vrot.slane %v1196_v21, 4  ;;  %v3574_v62 = vcombine.low %v3376_v14, %v3377_v29  ;;  %v3370_v39 = vrot.slane %v3362_v36, 9  ;;  %v761_v40 = vrot.slane %v4720_v49, 5  ;;  %v4868_v48 = vld [vmem:[%s4016_s20 + $0x24] sm:$0x1] }
  0xda   : > { %v4818_v4 = vpop.permute.xlu1 %2725  ;;  %v1201_v46 = vrot.slane %v1199_v61, 5  ;;  %v4832_v38 = vrot.slane %v841_v42, 4  ;;  %v4834_v17 = vrot.slane %v844_v25, 5  ;;  %v4836_v33 = vrot.slane %v855_v12, 4  ;;  %v3832_v61 = vld [vmem:[%s5348_s3 + $0x8] sm:$0xff]  }
  0xdb   : > { %5359 = vst [vmem:[#allocation5_spill] sm:$0xff] %v4818_v4  ;;  %v4824_v28 = vpop.permute.xlu0 %2723  ;;  %v4839_v51 = vrot.slane %v858_v22, 5  ;;  %v762_v21 = vsel %vm4030_vm2, %v3370_v39, %v761_v40  ;;  %v3371_v14 = vrot.slane %v3363_v53, 9  ;;  %v765_v49 = vrot.slane %v4728_v13, 5  ;;  %v3429_v13 = vld [vmem:[%s4016_s20 + $0x10] sm:$0xe]  ;;  %3699 = vmatprep.subr.bf16.mxu0 %v3832_v61  ;;  %3720 = vmatprep.subr.bf16.mxu1 %v3832_v61 }
  0xdc   : > { %5360 = vst [vmem:[#allocation6_spill] sm:$0xff] %v4824_v28  ;;  %2212 = vrot.lane.b32.xlu1 %v3574_v62, %s3898_s8  ;;  %v5362_v36 = vshll.u32 %v4700_v37, 16  ;;  %v4854_v25 = vrot.slane %v1446_v59, 5  ;;  %v1423_v12 = vshrl.u32 %v4822_v2, 16  ;;  %v1426_v53 = vshll.u32 %v4822_v2, 16  ;;  %3700 = vmatpush3.bf16.msra.mxu0 %v3832_v61 }
  0xdd   : > { %v766_v22 = vsel %vm4030_vm2, %v3371_v14, %v765_v49  ;;  %v1437_v39 = vshrl.u32 %v4830_v16, 16  ;;  %v1440_v62 = vshll.u32 %v4830_v16, 16  ;;  %v3436_v40 = vrot.slane %v3428_v0, 9  ;;  %v4864_v37 = vld [vmem:[%s4016_s20 + $0x1c] sm:$0x1]  ;;  %3727 = vmatpush3.bf16.msra.mxu1 %v3832_v61 }
  0xde   : > { %v4844_v29 = vpop.permute.xlu1 %2753  ;;  %v4852_v42 = vrot.slane %v5362_v36, 5  ;;  %v3571_v59 = vcombine.low %v762_v21, %v766_v22  ;;  %v1425_v36 = vrot.slane %v1423_v12, 4  ;;  %v1428_v28 = vrot.slane %v1426_v53, 5  ;;  %v3833_v21 = vld [vmem:[%s5348_s3 + $0x10] sm:$0xff]  }
  0xdf   : > { %5361 = vst [vmem:[#allocation7_spill] sm:$0xff] %v4844_v29  ;;  %v1291_v29 = vrot.slane %v4755_v60, 5  ;;  %v4870_v4 = vpop.permute.xlu0 %2751  ;;  %v1439_v14 = vrot.slane %v1437_v39, 4  ;;  %v1442_v49 = vrot.slane %v1440_v62, 5  ;;  %v3437_v24 = vrot.slane %v3429_v13, 9  ;;  %3701 = vmatprep.subr.bf16.mxu0 %v3833_v21  ;;  %3721 = vmatprep.subr.bf16.mxu1 %v3833_v21 }
  0xe0   : > { %v1295_v0 = vrot.slane %v4762_v10, 5  ;;  %2186 = vrot.lane.b32.xlu0 %v3571_v59, %s3893_s13  ;;  %v1429_v12 = vor.u32 %v1428_v28, %v1425_v36  ;;  %v1188_v61 = vor.u32 %v4814_v15, %v4812_v5  ;;  %v1191_v53 = vshll.u32 %v4864_v37, 16  ;;  %v4889_v28 = vld [vmem:[%s4311_s17 + $0x34] sm:$0x1]  ;;  %v4892_v59 = vld [vmem:[%s4311_s17 + $0x3c] sm:$0x1]  ;;  %3702 = vmatpush3.bf16.msra.mxu0 %v3833_v21 }
  0xe1   : > { %v1292_v60 = vsel %vm4030_vm2, %v3436_v40, %v1291_v29  ;;  %v1443_v13 = vor.u32 %v1442_v49, %v1439_v14  ;;  %v1202_v39 = vor.u32 %v1201_v46, %v4826_v20  ;;  %v1205_v62 = vshll.u32 %v4868_v48, 16  ;;  %3728 = vmatpush3.bf16.msra.mxu1 %v3833_v21  ;;  %s3906_s13 = smov 56   ;;  %v3378_v21 = vld [vmem:[%s4311_s17 + $0x40] sm:$0xf] }
  0xe2   : > { %v1296_v10 = vsel %vm4030_vm2, %v3437_v24, %v1295_v0  ;;  %v1430_v29 = vrot.slane %v1429_v12, 4  ;;  %v1189_v5 = vrot.slane %v1188_v61, 4  ;;  %v1193_v15 = vrot.slane %v1191_v53, 5 }
  0xe3   : > { %v4882_v22 = vpop.permute.xlu1 %2773  ;;  %v3604_v40 = vcombine.low %v1292_v60, %v1296_v10  ;;  %v1444_v36 = vrot.slane %v1443_v13, 4  ;;  %v1203_v24 = vrot.slane %v1202_v39, 4  ;;  %v1207_v20 = vrot.slane %v1205_v62, 5  ;;  %v3834_v60 = vld [vmem:[%s5348_s3 + $0x18] sm:$0xff]  }
  0xe4   : > { %v1435_v46 = vsel %vm4078_vm5, %v1430_v29, %v4852_v42  ;;  %v1194_v14 = vsel %vm4078_vm5, %v1189_v5, %v1193_v15  ;;  %v847_v49 = vor.u32 %v4834_v17, %v4832_v38  ;;  %v850_v0 = vshll.u32 %v4889_v28, 16  ;;  %v4904_v12 = vpop.permute.xlu0 %2771  ;;  %v3379_v17 = vld [vmem:[%s4311_s17 + $0x48] sm:$0xf]  ;;  %3703 = vmatprep.subr.bf16.mxu0 %v3834_v60  ;;  %3722 = vmatprep.subr.bf16.mxu1 %v3834_v60 }
  0xe5   : > { %2384 = vrot.lane.b32.xlu1 %v3604_v40, %s3906_s13  ;;  %v1449_v42 = vsel %vm4078_vm5, %v1444_v36, %v4854_v25  ;;  %v1208_v61 = vsel %vm4078_vm5, %v1203_v24, %v1207_v20  ;;  %v861_v53 = vor.u32 %v4839_v51, %v4836_v33  ;;  %v864_v38 = vshll.u32 %v4892_v59, 16  ;;  %3704 = vmatpush3.bf16.msra.mxu0 %v3834_v60  ;;  %v3430_v20 = vld [vmem:[%s4016_s20 + $0x18] sm:$0xe] }
  0xe6   : > { %v4918_v13 = vcombine.low %v1435_v46, %v1449_v42  ;;  %v3601_v10 = vcombine.low %v1194_v14, %v1208_v61  ;;  %v848_v39 = vrot.slane %v847_v49, 4  ;;  %v852_v62 = vrot.slane %v850_v0, 5  ;;  %3729 = vmatpush3.bf16.msra.mxu1 %v3834_v60  ;;  %v3431_v60 = vld [vmem:[%s4016_s20 + $0x20] sm:$0xe] }
  0xe7   : > { %v4920_v29 = vpop.permute.xlu1 %2793  ;;  %v862_v25 = vrot.slane %v861_v53, 4  ;;  %v866_v40 = vrot.slane %v864_v38, 5  ;;  %v869_v5 = vshrl.u32 %v3378_v21, 16  ;;  %v872_v15 = vshll.u32 %v3378_v21, 16 }
  0xe8   : > { %v2840_v33 = vsel %vm2469_vm11, %v4808_v23, %v4570_v50  ;;  %2366 = vrot.lane.b32.xlu0 %v3601_v10, %s3905_s30  ;;  %v853_v51 = vsel %vm4078_vm5, %v848_v39, %v852_v62  ;;  %v883_v36 = vshrl.u32 %v3379_v17, 16  ;;  %v886_v24 = vshll.u32 %v3379_v17, 16  ;;  %v3392_v50 = vld [vmem:[%s4311_s17 + $0x30] sm:$0xe]  ;;  %v3835_v23 = vld [vmem:[%s5348_s3 + $0x20] sm:$0xff]   ;;  %v4939_v39 = vpop.permute.xlu0 %2791 }
  0xe9   : > { %v2848_v46 = vsel %vm2478_vm12, %v2840_v33, %v4589_v1  ;;  %v867_v14 = vsel %vm4078_vm5, %v862_v25, %v866_v40  ;;  %v871_v49 = vrot.slane %v869_v5, 4  ;;  %v3575_v0 = vcombine.low %v3378_v21, %v3379_v17  ;;  %v3393_v10 = vld [vmem:[%s4311_s17 + $0x38] sm:$0xe]  ;;  %v4943_v21 = vld [vmem:[%s4311_s17 + $0x44] sm:$0x1]  ;;  %3705 = vmatprep.subr.bf16.mxu0 %v3835_v23  ;;  %3723 = vmatprep.subr.bf16.mxu1 %v3835_v23 }
  0xea   : > { %v3578_v42 = vcombine.low %v853_v51, %v867_v14  ;;  %v874_v61 = vrot.slane %v872_v15, 5  ;;  %v885_v53 = vrot.slane %v883_v36, 4  ;;  %v888_v38 = vrot.slane %v886_v24, 5  ;;  %v4951_v15 = vld [vmem:[%s4311_s17 + $0x4c] sm:$0x1]  ;;  %3706 = vmatpush3.bf16.msra.mxu0 %v3835_v23  ;;  %3730 = vmatpush3.bf16.msra.mxu1 %v3835_v23 }
  0xeb   : > { %v3438_v1 = vrot.slane %v3430_v20, 9  ;;  %v1299_v62 = vrot.slane %v4864_v37, 5  ;;  %v3608_v17 = vcombine.low %v4530_v31, %v4535_v57  ;;  %v3439_v25 = vrot.slane %v3431_v60, 9  ;;  %v3836_v31 = vld [vmem:[%s5348_s3 + $0x28] sm:$0xff]  }
  0xec   : > { %2232 = vrot.lane.b32.xlu1 %v3578_v42, %s3899_s9  ;;  %2214 = vrot.lane.b32.xlu0 %v3575_v0, %s3898_s8  ;;  %v1303_v40 = vrot.slane %v4868_v48, 5  ;;  %v3400_v5 = vrot.slane %v3392_v50, 9  ;;  %v938_v51 = vrot.slane %v4889_v28, 5  ;;  %v3401_v36 = vrot.slane %v3393_v10, 9  ;;  %s3331_s8 = sshll.u32 %s388_s29, 1 }
  0xed   : > { %v1300_v37 = vsel %vm4030_vm2, %v3438_v1, %v1299_v62  ;;  %v942_v24 = vrot.slane %v4892_v59, 5  ;;  %v875_v48 = vor.u32 %v874_v61, %v871_v49  ;;  %v878_v20 = vshll.u32 %v4943_v21, 16  ;;  %3707 = vmatprep.subr.bf16.mxu0 %v3836_v31  ;;  %3724 = vmatprep.subr.bf16.mxu1 %v3836_v31  ;;  %v4972_v61 = vld [vmem:[%s4016_s20 + $0x20] sm:$0xf] }
  0xee   : > { %v1304_v57 = vsel %vm4030_vm2, %v3439_v25, %v1303_v40  ;;  %v889_v14 = vor.u32 %v888_v38, %v885_v53  ;;  %v939_v28 = vsel %vm4030_vm2, %v3400_v5, %v938_v51  ;;  %v892_v60 = vshll.u32 %v4951_v15, 16  ;;  %3708 = vmatpush3.bf16.msra.mxu0 %v3836_v31  ;;  %3731 = vmatpush3.bf16.msra.mxu1 %v3836_v31  ;;  %v958_v31 = vld [vmem:[%s4016_s20 + $0x30] sm:$0xf] }
  0xef   : > { %v4953_v33 = vpop.permute.xlu1 %2094  ;;  %v3605_v0 = vcombine.low %v1300_v37, %v1304_v57  ;;  %v943_v59 = vsel %vm4030_vm2, %v3401_v36, %v942_v24  ;;  %v876_v49 = vrot.slane %v875_v48, 4  ;;  %v880_v23 = vrot.slane %v878_v20, 5 }
  0xf0   : > { %2412 = vrot.lane.b32.xlu1 %v3608_v17, %s3907_s16  ;;  %v3582_v50 = vcombine.low %v939_v28, %v943_v59  ;;  %v890_v42 = vrot.slane %v889_v14, 4  ;;  %v2842_v10 = vsel %vm2469_vm11, %v4801_v34, %v4560_v47  ;;  %v2856_v1 = vsel %vm2487_vm13, %v2848_v46, %v4609_v27  ;;  %v957_v17 = vld [vmem:[%s4016_s20 + $0x28] sm:$0xf]  ;;  %v3394_v34 = vld [vmem:[%s4311_s17 + $0x40] sm:$0xe] }
  0xf1   : > { %2386 = vrot.lane.b32.xlu0 %v3605_v0, %s3906_s13  ;;  %v894_v62 = vrot.slane %v892_v60, 5  ;;  %v2850_v25 = vsel %vm2478_vm12, %v2842_v10, %v4574_v35  ;;  %v2864_v40 = vsel %vm2496_vm14, %v2856_v1, %v4616_v7  ;;  %v881_v47 = vsel %vm4078_vm5, %v876_v49, %v880_v23  ;;  %v3395_v35 = vld [vmem:[%s4311_s17 + $0x48] sm:$0xe]  ;;  %v959_v28 = vld [vmem:[%s4016_s20 + $0x38] sm:$0xf] }
  0xf2   : > { %v2858_v27 = vsel %vm2487_vm13, %v2850_v25, %v4618_v56  ;;  %v1025_v5 = vshrl.u32 %v4972_v61, 16  ;;  %v1028_v37 = vshll.u32 %v4972_v61, 16  ;;  %v2872_v51 = vsel %vm2505_vm15, %v2864_v40, %v4661_v58  ;;  %v964_v40 = vld [vmem:[%s4016_s20 + $0x24] sm:$0x1] }
  0xf3   : > { %v4974_v53 = vpop.permute.xlu0 %2092  ;;  %v4976_v38 = vpop.permute.xlu1 %2114  ;;  %v895_v46 = vsel %vm4078_vm5, %v890_v42, %v894_v62  ;;  %v1039_v36 = vshrl.u32 %v957_v17, 16  ;;  %v1042_v24 = vshll.u32 %v957_v17, 16  ;;  %v3609_v48 = vcombine.low %v4579_v55, %v4586_v63  ;;  %v966_v42 = vld [vmem:[%s4016_s20 + $0x34] sm:$0x1]  ;;  %v967_v62 = vld [vmem:[%s4016_s20 + $0x3c] sm:$0x1] }
  0xf4   : > { %2252 = vrot.lane.b32.xlu1 %v3582_v50, %s3900_s10  ;;  %v3579_v7 = vcombine.low %v881_v47, %v895_v46  ;;  %v3586_v20 = vcombine.low %v4972_v61, %v957_v17  ;;  %v3402_v14 = vrot.slane %v3394_v34, 9  ;;  %v946_v0 = vrot.slane %v4943_v21, 5 }
  0xf5   : > { %v1027_v58 = vrot.slane %v1025_v5, 4  ;;  %v1030_v59 = vrot.slane %v1028_v37, 5  ;;  %v3403_v60 = vrot.slane %v3395_v35, 9  ;;  %v950_v50 = vrot.slane %v4951_v15, 5  ;;  %v965_v37 = vld [vmem:[%s4016_s20 + $0x2c] sm:$0x1] }
  0xf6   : > { %2234 = vrot.lane.b32.xlu0 %v3579_v7, %s3899_s9  ;;  %v1041_v49 = vrot.slane %v1039_v36, 4  ;;  %v1044_v23 = vrot.slane %v1042_v24, 5  ;;  %v947_v55 = vsel %vm4030_vm2, %v3402_v14, %v946_v0  ;;  %v1053_v63 = vshrl.u32 %v958_v31, 16 }
  0xf7   : > { %v5003_v57 = vpop.permute.xlu0 %2112  ;;  %v5005_v56 = vpop.permute.xlu1 %2142  ;;  %v951_v21 = vsel %vm4030_vm2, %v3403_v60, %v950_v50  ;;  %v1056_v61 = vshll.u32 %v958_v31, 16  ;;  %v1067_v10 = vshrl.u32 %v959_v28, 16  ;;  %v1070_v1 = vshll.u32 %v959_v28, 16 }
  0xf8   : > { %2883 = vrot.lane.b32.xlu1 %v2872_v51, %s3908_s28  ;;  %v2866_v17 = vsel %vm2496_vm14, %v2858_v27, %v4671_v9  ;;  %v1055_v25 = vrot.slane %v1053_v63, 4  ;;  %v3583_v47 = vcombine.low %v947_v55, %v951_v21  ;;  %v3587_v7 = vcombine.low %v958_v31, %v959_v28 }
  0xf9   : > { %v1058_v34 = vrot.slane %v1056_v61, 5  ;;  %v1069_v46 = vrot.slane %v1067_v10, 4  ;;  %v1072_v5 = vrot.slane %v1070_v1, 5  ;;  %v1062_v51 = vshll.u32 %v966_v42, 16  ;;  %v1084_v10 = vld [vmem:[%s4016_s20 + $0x20] sm:$0xe] }
  0xfa   : > { %2414 = vrot.lane.b32.xlu0 %v3609_v48, %s3907_s16  ;;  %v1076_v36 = vshll.u32 %v967_v62, 16  ;;  %v1031_v24 = vor.u32 %v1030_v59, %v1027_v58  ;;  %v1034_v14 = vshll.u32 %v964_v40, 16  ;;  %v1045_v0 = vor.u32 %v1044_v23, %v1041_v49  ;;  %v1086_v48 = vld [vmem:[%s4016_s20 + $0x30] sm:$0xe]  ;;  %v1087_v59 = vld [vmem:[%s4016_s20 + $0x38] sm:$0xe] }
  0xfb   : > { %v5021_v15 = vpop.permute.xlu0 %2140  ;;  %v1059_v9 = vor.u32 %v1058_v34, %v1055_v25  ;;  %v1073_v27 = vor.u32 %v1072_v5, %v1069_v46  ;;  %v1064_v50 = vrot.slane %v1062_v51, 5  ;;  %v1048_v21 = vshll.u32 %v965_v37, 16  ;;  %v1085_v46 = vld [vmem:[%s4016_s20 + $0x28] sm:$0xe] }
  0xfc   : > { %2280 = vrot.lane.b32.xlu1 %v3586_v20, %s3901_s11  ;;  %v1078_v55 = vrot.slane %v1076_v36, 5  ;;  %v1032_v63 = vrot.slane %v1031_v24, 4  ;;  %v1036_v58 = vrot.slane %v1034_v14, 5  ;;  %v1046_v20 = vrot.slane %v1045_v0, 4  ;;  %v3418_v36 = vld [vmem:[%s4016_s20 + $0x38] sm:$0xf] }
  0xfd   : > { %v5028_v35 = vpop.permute.xlu1 %2162  ;;  %v1060_v31 = vrot.slane %v1059_v9, 4  ;;  %v1074_v28 = vrot.slane %v1073_v27, 4  ;;  %v2874_v49 = vsel %vm2505_vm15, %v2866_v17, %v4716_v3  ;;  %v1050_v23 = vrot.slane %v1048_v21, 5  ;;  %v3419_v0 = vld [vmem:[%s4016_s20 + $0x40] sm:$0xf] }
  0xfe   : > { %2254 = vrot.lane.b32.xlu0 %v3583_v47, %s3900_s10  ;;  %v3410_v61 = vrot.slane %v1086_v48, 9  ;;  %v1037_v47 = vsel %vm4078_vm5, %v1032_v63, %v1036_v58  ;;  %v1130_v34 = vrot.slane %v966_v42, 5  ;;  %v1134_v51 = vrot.slane %v967_v62, 5  ;;  %v3416_v63 = vld [vmem:[%s4016_s20 + $0x28] sm:$0xf]  ;;  %s3327_s10 = sshll.u32 %s5390_s21, 3 }
  0xff   : > { %v5032_v60 = vpop.permute.xlu0 %2160  ;;  %v1065_v1 = vsel %vm4078_vm5, %v1060_v31, %v1064_v50  ;;  %v1079_v25 = vsel %vm4078_vm5, %v1074_v28, %v1078_v55  ;;  %v1051_v17 = vsel %vm4078_vm5, %v1046_v20, %v1050_v23  ;;  %v3408_v42 = vrot.slane %v1084_v10, 9 }
 0x100   : > { %2282 = vrot.lane.b32.xlu1 %v3587_v7, %s3901_s11  ;;  %v3591_v3 = vcombine.low %v1065_v1, %v1079_v25  ;;  %v3411_v7 = vrot.slane %v1087_v59, 9  ;;  %v3590_v9 = vcombine.low %v1037_v47, %v1051_v17  ;;  %v1131_v27 = vsel %vm4030_vm2, %v3410_v61, %v1130_v34  ;;  %v3417_v59 = vld [vmem:[%s4016_s20 + $0x30] sm:$0xf]  ;;  %v5071_v34 = vld [vmem:[%s4016_s20 + $0x3c] sm:$0x1]  ;;  %s3328_s11 = sshll.u32 %s5384_s22, 6 }
 0x101   : > { %v5047_v5 = vpop.permute.xlu1 %2182  ;;  %v1122_v14 = vrot.slane %v964_v40, 5  ;;  %v3409_v50 = vrot.slane %v1085_v46, 9  ;;  %v1126_v55 = vrot.slane %v965_v37, 5  ;;  %v1238_v31 = vshrl.u32 %v3418_v36, 16 }
 0x102   : > { %2885 = vrot.lane.b32.xlu0 %v2874_v49, %s3908_s28  ;;  %v1135_v48 = vsel %vm4030_vm2, %v3411_v7, %v1134_v51  ;;  %v1241_v58 = vshll.u32 %v3418_v36, 16  ;;  %v1252_v40 = vshrl.u32 %v3419_v0, 16  ;;  %v1255_v20 = vshll.u32 %v3419_v0, 16 }
 0x103   : > { %v5052_v24 = vpop.permute.xlu0 %2180  ;;  %v3595_v62 = vcombine.low %v1131_v27, %v1135_v48  ;;  %v1123_v21 = vsel %vm4030_vm2, %v3408_v42, %v1122_v14  ;;  %v1127_v28 = vsel %vm4030_vm2, %v3409_v50, %v1126_v55  ;;  %v1240_v49 = vrot.slane %v1238_v31, 4  ;;  %v3424_v48 = vld [vmem:[%s4016_s20 + $0x2c] sm:$0x1] }
 0x104   : > { %2302 = vrot.lane.b32.xlu1 %v3591_v3, %s3902_s15  ;;  %v3594_v37 = vcombine.low %v1123_v21, %v1127_v28  ;;  %v1210_v23 = vshrl.u32 %v3416_v63, 16  ;;  %v1243_v10 = vrot.slane %v1241_v58, 5  ;;  %v1254_v1 = vrot.slane %v1252_v40, 4  ;;  %v3425_v28 = vld [vmem:[%s4016_s20 + $0x34] sm:$0x1] }
 0x105   : > { %v5068_v61 = vpop.permute.xlu1 %2210  ;;  %v1257_v25 = vrot.slane %v1255_v20, 5  ;;  %v1213_v47 = vshll.u32 %v3416_v63, 16  ;;  %v3599_v3 = vcombine.low %v3418_v36, %v3419_v0  ;;  %v1224_v7 = vshrl.u32 %v3417_v59, 16 }
 0x106   : > { %2300 = vrot.lane.b32.xlu0 %v3590_v9, %s3902_s15  ;;  %v1212_v17 = vrot.slane %v1210_v23, 4  ;;  %v1227_v51 = vshll.u32 %v3417_v59, 16  ;;  %v3427_v9 = vld [vmem:[%s4016_s20 + $0x44] sm:$0x1]  ;;  %v3598_v42 = vcombine.low %v3416_v63, %v3417_v59  ;;  %v1244_v14 = vor.u32 %v1243_v10, %v1240_v49  ;;  %s380_s15 = sadd.s32 %s3328_s11, %s3327_s10 }
 0x107   : > { %v5073_v46 = vpop.permute.xlu0 %2208  ;;  %v1215_v27 = vrot.slane %v1213_v47, 5  ;;  %v1226_v50 = vrot.slane %v1224_v7, 4  ;;  %v1247_v21 = vshll.u32 %v5071_v34, 16  ;;  %v1258_v31 = vor.u32 %v1257_v25, %v1254_v1  ;;  %v3435_v47 = vld [vmem:[%s4016_s20 + $0x40] sm:$0xe] }
 0x108   : > { %5363 = vst [vmem:[#allocation8_spill] sm:$0xff] %v5073_v46  ;;  %2322 = vrot.lane.b32.xlu1 %v3595_v62, %s3903_s12  ;;  %v1229_v55 = vrot.slane %v1227_v51, 5  ;;  %v1245_v62 = vrot.slane %v1244_v14, 4  ;;  %v1261_v36 = vshll.u32 %v3427_v9, 16  ;;  %v1315_v0 = vrot.slane %v5071_v34, 5 }
 0x109   : > { %v1319_v58 = vrot.slane %v3427_v9, 5  ;;  %v1249_v63 = vrot.slane %v1247_v21, 5  ;;  %v1259_v40 = vrot.slane %v1258_v31, 4  ;;  %v1216_v20 = vor.u32 %v1215_v27, %v1212_v17  ;;  %v3432_v9 = vld [vmem:[%s4016_s20 + $0x28] sm:$0xe] }
 0x10a   : > { %2320 = vrot.lane.b32.xlu0 %v3594_v37, %s3903_s12  ;;  %v1219_v59 = vshll.u32 %v3424_v48, 16  ;;  %v3434_v37 = vld [vmem:[%s4016_s20 + $0x38] sm:$0xe]  ;;  %v1263_v23 = vrot.slane %v1261_v36, 5  ;;  %v1230_v10 = vor.u32 %v1229_v55, %v1226_v50  ;;  %v1233_v1 = vshll.u32 %v3425_v28, 16 }
 0x10b   : > { %v5084_v49 = vpop.permute.xlu1 %2230  ;;  %v1307_v25 = vrot.slane %v3424_v48, 5  ;;  %v1217_v17 = vrot.slane %v1216_v20, 4  ;;  %v1311_v51 = vrot.slane %v3425_v28, 5  ;;  %v3845_v48 = vld [vmem:[%s4311_s17 + $0x10] sm:$0xf]  ;;  %v3443_v20 = vrot.slane %v3435_v47, 9 }
 0x10c   : > { %2350 = vrot.lane.b32.xlu1 %v3599_v3, %s3904_s14  ;;  %v5087_v34 = vpop.permute.xlu0 %2228  ;;  %v1250_v3 = vsel %vm4078_vm5, %v1245_v62, %v1249_v63  ;;  %v1221_v7 = vrot.slane %v1219_v59, 5  ;;  %v1264_v27 = vsel %vm4078_vm5, %v1259_v40, %v1263_v23  ;;  %v1231_v14 = vrot.slane %v1230_v10, 4  ;;  %v3846_v55 = vld [vmem:[%s4311_s17 + $0x18] sm:$0xf]  ;;  %v3433_v31 = vld [vmem:[%s4016_s20 + $0x30] sm:$0xe] }
 0x10d   : > { %5364 = vst [vmem:[#allocation9_spill] sm:$0xff] %v5087_v34  ;;  %v1235_v50 = vrot.slane %v1233_v1, 5  ;;  %v3549_v21 = vcombine.low %v3845_v48, %v3846_v55  ;;  %v3603_v36 = vcombine.low %v1250_v3, %v1264_v27  ;;  %v3847_v34 = vld [vmem:[%s4311_s17] sm:$0xf]  ;;  %v3848_v46 = vld [vmem:[%s4311_s17 + $0x8] sm:$0xf]  ;;  %v1320_v41 = vsel %vm4030_vm2, %v3443_v20, %v1319_v58 }
 0x10e   : > { %2348 = vrot.lane.b32.xlu0 %v3598_v42, %s3904_s14  ;;  %v1222_v42 = vsel %vm4078_vm5, %v1217_v17, %v1221_v7  ;;  %v3548_v62 = vcombine.low %v3847_v34, %v3848_v46  ;;  %v3442_v63 = vrot.slane %v3434_v37, 9  ;;  %v3440_v59 = vrot.slane %v3432_v9, 9  ;;  %v5365_v9 = vld [vmem:[#allocation3_spill] sm:$0xff]  ;;  %v5367_v48 = vld [vmem:[#allocation5_spill] sm:$0xff]  ;;  %s3329_s14 = sshll.u32 %s380_s15, 2 }
 0x10f   : > { %v1236_v28 = vsel %vm4078_vm5, %v1231_v14, %v1235_v50  ;;  %v2426_v40 = vsel %vm2420_vm6, %v3549_v21, %v4953_v33  ;;  %v3441_v3 = vrot.slane %v3433_v31, 9  ;;  %v2806_v58 = vsel %vm2420_vm6, %v4918_v13, %v4643_v11  ;;  %v3850_v13 = vld [vmem:[%s4311_s17 + $0x28] sm:$0xf]  ;;  %s5291_s7 = scalar_lea.vmem %s5350_s5, %s3329_s14 }
 0x110   : > { %2370 = vrot.lane.b32.xlu1 %v3603_v36, %s3905_s30  ;;  %v3602_v23 = vcombine.low %v1222_v42, %v1236_v28  ;;  %v2423_v10 = vsel %vm2420_vm6, %v3548_v62, %v4974_v53  ;;  %v1316_v1 = vsel %vm4030_vm2, %v3442_v63, %v1315_v0  ;;  %v1308_v37 = vsel %vm4030_vm2, %v3440_v59, %v1307_v25  ;;  %v5369_v21 = vld [vmem:[#allocation7_spill] sm:$0xff]  ;;  %v5370_v42 = vld [vmem:[#allocation6_spill] sm:$0xff] }
 0x111   : > { %v2437_v33 = vsel %vm2433_vm8, %v2426_v40, %v4976_v38  ;;  %v2435_v47 = vsel %vm2433_vm8, %v2423_v10, %v5003_v57  ;;  %v5119_v53 = vpop.permute.xlu0 %2248  ;;  %v2803_v0 = vsel %vm2420_vm6, %v4810_v6, %v4600_v18  ;;  %v3607_v25 = vcombine.low %v1316_v1, %v1320_v41 }
 0x112   : > { %2368 = vrot.lane.b32.xlu0 %v3602_v23, %s3905_s30  ;;  %v1312_v38 = vsel %vm4030_vm2, %v3441_v3, %v1311_v51  ;;  %v2814_v57 = vsel %vm2433_vm8, %v2806_v58, %v4690_v32  ;;  %v2446_v17 = vsel %vm2442_vm7, %v2437_v33, %v5005_v56  ;;  %v5136_v18 = vsel %vm2442_vm7, %v2435_v47, %v5021_v15  ;;  %v3849_v32 = vld [vmem:[%s4311_s17 + $0x20] sm:$0xf]  ;;  %v3851_v3 = vld [vmem:[%s4311_s17 + $0x30] sm:$0xf] }
 0x113   : > { %v3606_v34 = vcombine.low %v1308_v37, %v1312_v38  ;;  %v2822_v11 = vsel %vm2442_vm7, %v2814_v57, %v4722_v8  ;;  %v3611_v45 = vcombine.low %v4822_v2, %v4830_v16  ;;  %v2455_v6 = vsel %vm2451_vm9, %v2446_v17, %v5028_v35  ;;  %v3837_v2 = vld [vmem:[%s5348_s3 + $0x30] sm:$0x3f]  }
 0x114   : > { %2390 = vrot.lane.b32.xlu1 %v3607_v25, %s3906_s13  ;;  %v3550_v7 = vcombine.low %v3849_v32, %v3850_v13  ;;  %v2812_v56 = vsel %vm2433_vm8, %v2803_v0, %v4641_v43  ;;  %v2830_v15 = vsel %vm2451_vm9, %v2822_v11, %v4748_v26  ;;  %v2464_v8 = vsel %vm2460_vm10, %v2455_v6, %v5047_v5 }
 0x115   : > { %v2097_v46 = vpop.permute.xlu1 %2096  ;;  %v2820_v16 = vsel %vm2442_vm7, %v2812_v56, %v4684_v30  ;;  %v2838_v35 = vsel %vm2460_vm10, %v2830_v15, %v4771_v19  ;;  %v3610_v43 = vcombine.low %v4735_v54, %v4741_v44  ;;  %v2473_v26 = vsel %vm2469_vm11, %v2464_v8, %v5068_v61  ;;  %v5366_v19 = vld [vmem:[#allocation2_spill] sm:$0xff]  ;;  %v5368_v61 = vld [vmem:[#allocation4_spill] sm:$0xff]  ;;  %3733 = vmatprep.subr.msk.bf16.mxu0 %vm2971_vm0, %v3837_v2 }
 0x116   : > { %2388 = vrot.lane.b32.xlu0 %v3606_v34, %s3906_s13  ;;  %v2828_v5 = vsel %vm2451_vm9, %v2820_v16, %v4743_v52  ;;  %v2846_v27 = vsel %vm2469_vm11, %v2838_v35, %v5365_v9  ;;  %v5173_v30 = vsel %vm2478_vm12, %v2473_v26, %v5084_v49  ;;  %v5175_v14 = vpop.permute.xlu0 %2250  ;;  %v2429_v44 = vsel %vm2420_vm6, %v3550_v7, %v2097_v46  ;;  %v5372_v35 = vld [vmem:[#allocation9_spill] sm:$0xff] }
 0x117   : > { %v2836_v50 = vsel %vm2460_vm10, %v2828_v5, %v5366_v19  ;;  %v2854_v54 = vsel %vm2478_vm12, %v2846_v27, %v5367_v48  ;;  %v2973_v36 = vsel %vm2971_vm0, %v3837_v2, 0  ;;  %3734 = vmatprep.subr.msk.bf16.mxu1 %vm2971_vm0, %v3837_v2  ;;  %v2453_v15 = vsel %vm2451_vm9, %v5136_v18, %v5032_v60  ;;  %v5371_v2 = vld [vmem:[#allocation8_spill] sm:$0xff] }
 0x118   : > { %2418 = vrot.lane.b32.xlu1 %v3611_v45, %s3907_s16  ;;  %v2844_v55 = vsel %vm2469_vm11, %v2836_v50, %v5368_v61  ;;  %v2862_v49 = vsel %vm2487_vm13, %v2854_v54, %v5369_v21  ;;  %3710 = vmatpush3.bf16.msra.mxu0 %v2973_v36  ;;  %v2462_v8 = vsel %vm2460_vm10, %v2453_v15, %v5052_v24  ;;  %vm2523_vm2 = vcmask 392192  }
 0x119   : > { %v5147_v51 = vpop.permute.xlu1 %2276  ;;  %v2852_v62 = vsel %vm2478_vm12, %v2844_v55, %v5370_v42  ;;  %v2870_v63 = vsel %vm2496_vm14, %v2862_v49, %v4882_v22  ;;  %3732 = vmatpush3.bf16.msra.mxu1 %v2973_v36  ;;  %v2471_v16 = vsel %vm2469_vm11, %v2462_v8, %v5371_v2  ;;  %vm2550_vm5 = vcmask 490496  }
 0x11a   : > { %2416 = vrot.lane.b32.xlu0 %v3610_v43, %s3907_s16  ;;  %v2860_v28 = vsel %vm2487_vm13, %v2852_v62, %v4870_v4  ;;  %v2878_v40 = vsel %vm2505_vm15, %v2870_v63, %v4920_v29  ;;  %v3852_v4 = vld [vmem:[%s4311_s17 + $0x38] sm:$0xf]  ;;  %v2480_v43 = vsel %vm2478_vm12, %v2471_v16, %v5372_v35  ;;  %vm2962_vm0 = vcmask 883712  }
 0x11b   : > { %v2868_v20 = vsel %vm2496_vm14, %v2860_v28, %v4904_v12  ;;  %v3551_v46 = vcombine.low %v3851_v3, %v3852_v4  ;;  %v2489_v5 = vsel %vm2487_vm13, %v2480_v43, %v5119_v53  ;;  %v2491_v61 = vsel %vm2487_vm13, %v5173_v30, %v5175_v14 }
 0x11c   : > { %2889 = vrot.lane.b32.xlu1 %v2878_v40, %s3908_s28  ;;  %v2876_v59 = vsel %vm2505_vm15, %v2868_v20, %v4939_v39  ;;  %v2498_v27 = vsel %vm2496_vm14, %v2489_v5, %v5147_v51 }
 0x11d   : > { %v2117_v52 = vpop.permute.xlu1 %2116 }
 0x11e   : > { %v2439_v31 = vsel %vm2433_vm8, %v2429_v44, %v2117_v52  ;;  %2887 = vrot.lane.b32.xlu0 %v2876_v59, %s3908_s28  ;;  %s390_s28 = scalar_lea.vmem %s5351_s6, %s3331_s8 }
 0x120   : > { %v2099_v23 = vpop.permute.xlu0 %2098 }
 0x121   : > { %v2432_v41 = vsel %vm2420_vm6, %v3551_v46, %v2099_v23  ;;  %vm2891_vm6 = vcmask 523264  }
 0x124   : > { %v2297_v22 = vpop.permute.xlu1 %2296  ;;  %v2279_v10 = vpop.permute.xlu0 %2278 }
 0x125   : > { %v2507_v60 = vsel %vm2505_vm15, %v2498_v27, %v2297_v22  ;;  %v2500_v55 = vsel %vm2496_vm14, %v2491_v61, %v2279_v10 }
 0x129   : > { %v2145_v1 = vpop.permute.xlu1 %2144 }
 0x12a   : > { %v2448_v29 = vsel %vm2442_vm7, %v2439_v31, %v2145_v1 }
 0x12e   : > { %v2119_v37 = vpop.permute.xlu0 %2118 }
 0x12f   : > { %v5208_v12 = vsel %vm2433_vm8, %v2432_v41, %v2119_v37 }
 0x130   : > { %v2317_v33 = vpop.permute.xlu1 %2316 }
 0x131   : > { %v2516_v24 = vsel %vm2514_vm1, %v2507_v60, %v2317_v33  ;;  %v3656_v60 = vld [vmem:[%s5349_s4] ss:$0 sm:$0xff] }
 0x135   : > { %v2299_v47 = vpop.permute.xlu0 %2298 }
 0x136   : > { %v2509_v49 = vsel %vm2505_vm15, %v2500_v55, %v2299_v47 }
 0x138   : > { %v2165_v39 = vpop.permute.xlu1 %2164 }
 0x139   : > { %v5211_v0 = vsel %vm2451_vm9, %v2448_v29, %v2165_v39  ;;  %v2147_v58 = vpop.permute.xlu0 %2146 }
 0x13a   : > { %v2450_v4 = vsel %vm2442_vm7, %v5208_v12, %v2147_v58  ;;  %vm3126_vm7 = vcmask 60416  }
 0x13c   : > { %v2345_v25 = vpop.permute.xlu1 %2344 }
 0x13d   : > { %v2525_v19 = vsel %vm2523_vm2, %v2516_v24, %v2345_v25 }
 0x13e   : > { %v2319_v38 = vpop.permute.xlu0 %2318 }
 0x13f   : > { %v2518_v31 = vsel %vm2514_vm1, %v2509_v49, %v2319_v38 }
 0x140   : > { %v5213_v57 = vpop.permute.xlu1 %2184 }
 0x141   : > { %v2466_v37 = vsel %vm2460_vm10, %v5211_v0, %v5213_v57 }
 0x144   : > { %v2167_v34 = vpop.permute.xlu0 %2166 }
 0x145   : > { %v2459_v46 = vsel %vm2451_vm9, %v2450_v4, %v2167_v34  ;;  %vm3090_vm9 = vcmask 1040384  }
 0x149   : > { %v2347_v11 = vpop.permute.xlu0 %2346 }
 0x14a   : > { %v2365_v17 = vpop.permute.xlu1 %2364  ;;  %v2527_v42 = vsel %vm2523_vm2, %v2518_v31, %v2347_v11 }
 0x14b   : > { %v2534_v50 = vsel %vm2532_vm3, %v2525_v19, %v2365_v17 }
 0x14e   : > { %v2213_v45 = vpop.permute.xlu1 %2212 }
 0x14f   : > { %v2475_v39 = vsel %vm2469_vm11, %v2466_v37, %v2213_v45 }
 0x152   : > { %v2187_v6 = vpop.permute.xlu0 %2186 }
 0x153   : > { %v2468_v41 = vsel %vm2460_vm10, %v2459_v46, %v2187_v6 }
 0x157   : > { %v2385_v32 = vpop.permute.xlu1 %2384 }
 0x158   : > { %v2543_v53 = vsel %vm2541_vm4, %v2534_v50, %v2385_v32 }
 0x15a   : > { %v2367_v13 = vpop.permute.xlu0 %2366 }
 0x15b   : > { %v2536_v62 = vsel %vm2532_vm3, %v2527_v42, %v2367_v13 }
 0x15e   : > { %v2233_v7 = vpop.permute.xlu1 %2232  ;;  %v2215_v56 = vpop.permute.xlu0 %2214 }
 0x15f   : > { %v2477_v33 = vsel %vm2469_vm11, %v2468_v41, %v2215_v56  ;;  %v2484_v38 = vsel %vm2478_vm12, %v2475_v39, %v2233_v7 }
 0x162   : > { %v2413_v26 = vpop.permute.xlu1 %2412 }
 0x163   : > { %v2387_v9 = vpop.permute.xlu0 %2386  ;;  %v2552_v51 = vsel %vm2550_vm5, %v2543_v53, %v2413_v26 }
 0x164   : > { %v2545_v28 = vsel %vm2541_vm4, %v2536_v62, %v2387_v9 }
 0x166   : > { %v2253_v18 = vpop.permute.xlu1 %2252 }
 0x167   : > { %v2493_v34 = vsel %vm2487_vm13, %v2484_v38, %v2253_v18 }
 0x168   : > { %v2235_v48 = vpop.permute.xlu0 %2234 }
 0x169   : > { %v2486_v25 = vsel %vm2478_vm12, %v2477_v33, %v2235_v48 }
 0x16a   : > { %v2884_v54 = vpop.permute.xlu1 %2883 }
 0x16b   : > { %v2893_v44 = vsel %vm2891_vm6, %v2552_v51, %v2884_v54 }
 0x16c   : > { %v2415_v52 = vpop.permute.xlu0 %2414  ;;  %3711 = vmatprep.mubr.msk.bf16.mxu0 %vm2962_vm0, %v2893_v44 }
 0x16d   : > { %v2554_v40 = vsel %vm2550_vm5, %v2545_v28, %v2415_v52 }
 0x16e   : > { %v2281_v21 = vpop.permute.xlu1 %2280 }
 0x16f   : > { %v2502_v11 = vsel %vm2496_vm14, %v2493_v34, %v2281_v21 }
 0x170   : > { %v2255_v36 = vpop.permute.xlu0 %2254 }
 0x171   : > { %v2495_v12 = vsel %vm2487_vm13, %v2486_v25, %v2255_v36 }
 0x172   : > { %v2283_v63 = vpop.permute.xlu1 %2282 }
 0x173   : > { %v2504_v17 = vsel %vm2496_vm14, %v2495_v12, %v2283_v63 }
 0x174   : > { %v2886_v20 = vpop.permute.xlu0 %2885 }
 0x175   : > { %v2895_v30 = vsel %vm2891_vm6, %v2554_v40, %v2886_v20 }
 0x176   : > { %3712 = vmatmul.mubr.msk.bf16.vlgmr.msra.gmra.mrb[0].mxu0 %vm2962_vm0, %v2895_v30  ;;  %v2303_v14 = vpop.permute.xlu1 %2302 }
 0x177   : > { %v2513_v0 = vsel %vm2505_vm15, %v2504_v17, %v2303_v14 }
 0x178   : > { %v2301_v59 = vpop.permute.xlu0 %2300 }
 0x179   : > { %v2511_v6 = vsel %vm2505_vm15, %v2502_v11, %v2301_v59 }
 0x17a   : > { %v2323_v23 = vpop.permute.xlu1 %2322 }
 0x17b   : > { %v2522_v45 = vsel %vm2514_vm1, %v2513_v0, %v2323_v23 }
 0x17c   : > { %v2321_v22 = vpop.permute.xlu0 %2320 }
 0x17d   : > { %v2520_v32 = vsel %vm2514_vm1, %v2511_v6, %v2321_v22 }
 0x17e   : > { %v2351_v10 = vpop.permute.xlu1 %2350 }
 0x17f   : > { %v2531_v13 = vsel %vm2523_vm2, %v2522_v45, %v2351_v10 }
 0x180   : > { %v2349_v1 = vpop.permute.xlu0 %2348 }
 0x181   : > { %v2529_v56 = vsel %vm2523_vm2, %v2520_v32, %v2349_v1 }
 0x182   : > { %v2371_v3 = vpop.permute.xlu1 %2370 }
 0x183   : > { %v2540_v15 = vsel %vm2532_vm3, %v2531_v13, %v2371_v3 }
 0x184   : > { %v2369_v29 = vpop.permute.xlu0 %2368 }
 0x185   : > { %v2538_v8 = vsel %vm2532_vm3, %v2529_v56, %v2369_v29 }
 0x186   : > { %v2391_v47 = vpop.permute.xlu1 %2390 }
 0x187   : > { %v2549_v2 = vsel %vm2541_vm4, %v2540_v15, %v2391_v47 }
 0x188   : > { %v2389_v58 = vpop.permute.xlu0 %2388 }
 0x189   : > { %v2547_v35 = vsel %vm2541_vm4, %v2538_v8, %v2389_v58 }
 0x18a   : > { %v2419_v57 = vpop.permute.xlu1 %2418 }
 0x18b   : > { %v2558_v43 = vsel %vm2550_vm5, %v2549_v2, %v2419_v57 }
 0x18c   : > { %v2417_v7 = vpop.permute.xlu0 %2416 }
 0x18d   : > { %v2556_v26 = vsel %vm2550_vm5, %v2547_v35, %v2417_v7 }
 0x18e   : > { %v2890_v16 = vpop.permute.xlu1 %2889 }
 0x18f   : > { %v2899_v5 = vsel %vm2891_vm6, %v2558_v43, %v2890_v16 }
 0x190   : > { %v2888_v9 = vpop.permute.xlu0 %2887 }
 0x191   : > { %v2897_v27 = vsel %vm2891_vm6, %v2556_v26, %v2888_v9 }
 0x192   : > { %3715 = vmatprep.mubr.msk.bf16.mxu1 %vm2962_vm0, %v2897_v27 }
 0x193   : > { %3716 = vmatmul.mubr.msk.bf16.vlgmr.msra.gmra.mrb[0].mxu1 %vm2962_vm0, %v2899_v5 }
 0x249   : > { %v3713_v24 = vpop.f32.mrb[0].mxu0 }
 0x24a   : > { %v3018_v18 = vadd.f32 %v3713_v24, %v3656_v60  ;;  %v3009_v19 = vpop.f32.mrb[1].mxu0 }
 0x24b   : > { %v3010_v50 = vadd.f32 %v3656_v60, %v3009_v19  ;;  %v3714_v48 = vpop.f32.mrb[2].mxu0 }
 0x24c   : > { %v3680_v53 = vpack.c.bf16 %v3018_v18, %v3018_v18  ;;  %v3021_v51 = vadd.f32 %v3714_v48, %v3656_v60  ;;  %v3012_v54 = vpop.f32.mrb[3].mxu0  ;;  %v3063_v55 = vmul.f32 %v3018_v18, %v3018_v18  ;;  %v3043_v63 = vsel %vm2433_vm8, %v3018_v18, 0.0 }
 0x24d   : > { %v3061_v44 = vmul.f32 %v3010_v50, %v3010_v50  ;;  %v3678_v52 = vpack.c.bf16 %v3010_v50, %v3010_v50  ;;  %v3013_v61 = vadd.f32 %v3656_v60, %v3012_v54  ;;  %v3040_v49 = vsel %vm2433_vm8, %v3010_v50, 0.0 }
 0x24e   : > { %3129 = vst.msk [vmem:[%s5291_s7 + $0x8] sm:$0xf] %vm3126_vm7, %v3680_v53  ;;  %v3681_v21 = vpack.c.bf16 %v3021_v51, %v3021_v51  ;;  %v3064_v40 = vmul.f32 %v3021_v51, %v3021_v51  ;;  %v3072_v59 = vsel %vm2433_vm8, %v3063_v55, 0.0  ;;  %v3045_v23 = vsel %vm2433_vm8, %v3021_v51, 0.0 }
 0x24f   : > { %3127 = vst.msk [vmem:[%s5291_s7] sm:$0xf] %vm3126_vm7, %v3678_v52  ;;  %v3041_v31 = vsel %vm2433_vm8, %v3013_v61, 0.0  ;;  %v3062_v36 = vmul.f32 %v3013_v61, %v3013_v61  ;;  %v3679_v42 = vpack.c.bf16 %v3013_v61, %v3013_v61  ;;  %v3069_v28 = vsel %vm2433_vm8, %v3061_v44, 0.0 }
 0x250   : > { %3130 = vst.msk [vmem:[%s5291_s7 + $0xc] sm:$0xf] %vm3126_vm7, %v3681_v21  ;;  %v3042_v62 = vadd.f32 %v3041_v31, %v3040_v49  ;;  %v3074_v1 = vsel %vm2433_vm8, %v3064_v40, 0.0 }
 0x251   : > { %v3070_v20 = vsel %vm2433_vm8, %v3062_v36, 0.0  ;;  %3128 = vst.msk [vmem:[%s5291_s7 + $0x4] sm:$0xf] %vm3126_vm7, %v3679_v42 }
 0x252   : > { %v3044_v30 = vadd.f32 %v3043_v63, %v3042_v62  ;;  %v3071_v14 = vadd.f32 %v3070_v20, %v3069_v28 }
 0x254   : > { %v3073_v22 = vadd.f32 %v3072_v59, %v3071_v14  ;;  %v3046_v10 = vadd.f32 %v3045_v23, %v3044_v30 }
 0x256   : > { %v3075_v3 = vadd.f32 %v3074_v1, %v3073_v22 }
 0x266   : > { %v3717_v4 = vpop.f32.mrb[0].mxu1 }
 0x267   : > { %v3034_v46 = vadd.f32 %v3717_v4, %v3656_v60  ;;  %v3025_v29 = vpop.f32.mrb[1].mxu1 }
 0x268   : > { %v3026_v41 = vadd.f32 %v3656_v60, %v3025_v29  ;;  %v3718_v37 = vpop.f32.mrb[2].mxu1 }
 0x269   : > { %v3684_v33 = vpack.c.bf16 %v3034_v46, %v3034_v46  ;;  %v3037_v47 = vadd.f32 %v3718_v37, %v3656_v60  ;;  %v3028_v39 = vpop.f32.mrb[3].mxu1  ;;  %v3067_v34 = vmul.f32 %v3034_v46, %v3034_v46  ;;  %v3051_v7 = vsel %vm2433_vm8, %v3034_v46, 0.0 }
 0x26a   : > { %v3047_v25 = vsel %vm2433_vm8, %v3026_v41, 0.0  ;;  %v3065_v38 = vmul.f32 %v3026_v41, %v3026_v41  ;;  %v3682_v12 = vpack.c.bf16 %v3026_v41, %v3026_v41  ;;  %v3029_v58 = vadd.f32 %v3656_v60, %v3028_v39 }
 0x26b   : > { %3133 = vst.msk [vmem:[%s5291_s7 + $0x18] sm:$0xf] %vm3126_vm7, %v3684_v33  ;;  %v3048_v17 = vadd.f32 %v3047_v25, %v3046_v10  ;;  %v3685_v0 = vpack.c.bf16 %v3037_v47, %v3037_v47  ;;  %v3068_v56 = vmul.f32 %v3037_v47, %v3037_v47  ;;  %v3080_v16 = vsel %vm2433_vm8, %v3067_v34, 0.0 }
 0x26c   : > { %v3076_v11 = vsel %vm2433_vm8, %v3065_v38, 0.0  ;;  %3131 = vst.msk [vmem:[%s5291_s7 + $0x10] sm:$0xf] %vm3126_vm7, %v3682_v12  ;;  %v3049_v57 = vsel %vm2433_vm8, %v3029_v58, 0.0  ;;  %v3066_v6 = vmul.f32 %v3029_v58, %v3029_v58  ;;  %v3683_v13 = vpack.c.bf16 %v3029_v58, %v3029_v58 }
 0x26d   : > { %v3077_v45 = vadd.f32 %v3076_v11, %v3075_v3  ;;  %v3050_v32 = vadd.f32 %v3049_v57, %v3048_v17  ;;  %3134 = vst.msk [vmem:[%s5291_s7 + $0x1c] sm:$0xf] %vm3126_vm7, %v3685_v0  ;;  %v3053_v35 = vsel %vm2433_vm8, %v3037_v47, 0.0  ;;  %v3082_v5 = vsel %vm2433_vm8, %v3068_v56, 0.0 }
 0x26e   : > { %v3078_v15 = vsel %vm2433_vm8, %v3066_v6, 0.0  ;;  %3132 = vst.msk [vmem:[%s5291_s7 + $0x14] sm:$0xf] %vm3126_vm7, %v3683_v13  ;;  %vm3092_vm8 = vcmask 58368  }
 0x26f   : > { %v3052_v8 = vadd.f32 %v3051_v7, %v3050_v32  ;;  %v3079_v2 = vadd.f32 %v3078_v15, %v3077_v45 }
 0x271   : > { %v3054_v43 = vadd.f32 %v3053_v35, %v3052_v8  ;;  %v3081_v26 = vadd.f32 %v3080_v16, %v3079_v2 }
 0x273   : > { %v3055_v9 = vrot.slane %v3054_v43, 4  ;;  %v3083_v27 = vadd.f32 %v3082_v5, %v3081_v26 }
 0x275   : > { %v3056_v60 = vadd.f32 %v3055_v9, %v3054_v43  ;;  %v3084_v24 = vrot.slane %v3083_v27, 4 }
 0x277   : > { %v3057_v18 = vrot.slane %v3056_v60, 2  ;;  %v3085_v19 = vadd.f32 %v3084_v24, %v3083_v27 }
 0x279   : > { %v3058_v50 = vadd.f32 %v3057_v18, %v3056_v60  ;;  %v3086_v48 = vrot.slane %v3085_v19, 2 }
 0x27b   : > { %v3059_v53 = vrot.slane %v3058_v50, 1  ;;  %v3087_v51 = vadd.f32 %v3086_v48, %v3085_v19 }
 0x27d   : > { %v3088_v54 = vrot.slane %v3087_v51, 1  ;;  %v3060_v44 = vadd.f32 %v3059_v53, %v3058_v50 }
 0x27f   : > { %v3089_v52 = vadd.f32 %v3088_v54, %v3087_v51 }
 0x281   : > { %v3091_v61 = vsel %vm3090_vm9, %v3060_v44, %v3089_v52 }
 0x282   : > { %3093 = vst.msk [vmem:[%s390_s28] sm:$0x3] %vm3092_vm8, %v3091_v61 }
 0x283 PF: > { %s17_s25 = sadd.s32 1, %s3891_s25   ;;  %s5373_s21 = smov %s3883_s23 }
 0x284   : > { %p14_p10 = scmp.ge.s32.totalorder %s17_s25, 18   ;;  %s5374_s22 = smov %s3887_s24 }
 0x285   : > { %s5375_s23 = smov %s5378_s26  ;;  %s5376_s24 = smov %s5382_s27 }
 0x286   :  { %16 = sbr.rel (!%p14_p10) target bundleno = 3 (0x3), region = 94 }

// kernel: double_conv_forward.7
= control target key start
LH: loop header
LB: loop body
LE: loop exit
PB: predicated region body
PF: predicated region fallthrough
CT: control target
= control target key end

     0   :  { %s163_s0 = inlined_call_operand.vmem [shape: bf16[64,128], index: 0, kind: input, shape index: {}]   ;;  %s164_s1 = inlined_call_operand.vmem [shape: f32[1,128], index: 1, kind: input, shape index: {}]   ;;  %s165_s2 = inlined_call_operand.vmem [shape: f32[1,128], index: 2, kind: input, shape index: {}]   ;;  %s166_s3 = inlined_call_operand.vmem [shape: f32[64,128], index: 3, kind: output, shape index: {}]  }
   0x1   :  { %v83_v0 = vld [vmem:[%s163_s0] sm:$0xff]   ;;  %v98_v4 = vld [vmem:[%s163_s0 + $0x8] sm:$0xff]   ;;  %v99_v5 = vld [vmem:[%s163_s0 + $0x10] sm:$0xff]  }
   0x2   :  { %v80_v1 = vld [vmem:[%s164_s1] ss:$0 sm:$0xff]  ;;  %v84_v2 = vunpack.c.l.bf16 %v83_v0  ;;  %v85_v3 = vunpack.c.h.bf16 %v83_v0  ;;  %v100_v6 = vld [vmem:[%s163_s0 + $0x18] sm:$0xff]   ;;  %v88_v8 = vunpack.c.l.bf16 %v98_v4  ;;  %v89_v9 = vunpack.c.h.bf16 %v98_v4 }
   0x3   :  { %v81_v7 = vld [vmem:[%s165_s2] ss:$0 sm:$0xff]  ;;  %v92_v10 = vunpack.c.l.bf16 %v99_v5  ;;  %v93_v11 = vunpack.c.h.bf16 %v99_v5  ;;  %v96_v14 = vunpack.c.l.bf16 %v100_v6  ;;  %v97_v15 = vunpack.c.h.bf16 %v100_v6 }
   0x4   :  { %v37_v12 = vmul.f32 %v84_v2, %v80_v1  ;;  %v38_v13 = vmul.f32 %v85_v3, %v80_v1  ;;  %v39_v16 = vmul.f32 %v88_v8, %v80_v1  ;;  %v40_v17 = vmul.f32 %v89_v9, %v80_v1 }
   0x5   :  { %v41_v18 = vmul.f32 %v92_v10, %v80_v1  ;;  %v42_v19 = vmul.f32 %v93_v11, %v80_v1  ;;  %v43_v22 = vmul.f32 %v96_v14, %v80_v1  ;;  %v44_v23 = vmul.f32 %v97_v15, %v80_v1 }
   0x6   :  { %v52_v20 = vadd.f32 %v81_v7, %v37_v12  ;;  %v53_v21 = vadd.f32 %v81_v7, %v38_v13  ;;  %v54_v24 = vadd.f32 %v81_v7, %v39_v16  ;;  %v55_v25 = vadd.f32 %v81_v7, %v40_v17 }
   0x7   :  { %v56_v26 = vadd.f32 %v81_v7, %v41_v18  ;;  %v57_v27 = vadd.f32 %v81_v7, %v42_v19  ;;  %v58_v30 = vadd.f32 %v81_v7, %v43_v22  ;;  %v59_v31 = vadd.f32 %v81_v7, %v44_v23 }
   0x8   :  { %v60_v28 = vmax.f32 %v52_v20, 0.0  ;;  %v61_v29 = vmax.f32 %v53_v21, 0.0  ;;  %v62_v32 = vmax.f32 %v54_v24, 0.0  ;;  %v63_v33 = vmax.f32 %v55_v25, 0.0 }
   0x9   :  { %v64_v34 = vmax.f32 %v56_v26, 0.0  ;;  %v65_v35 = vmax.f32 %v57_v27, 0.0  ;;  %v66_v36 = vmax.f32 %v58_v30, 0.0  ;;  %v67_v37 = vmax.f32 %v59_v31, 0.0 }
   0xa   :  { %68 = vst [vmem:[%s166_s3] sm:$0xff] %v60_v28  ;;  %69 = vst [vmem:[%s166_s3 + $0x8] sm:$0xff] %v61_v29 }
   0xb   :  { %70 = vst [vmem:[%s166_s3 + $0x10] sm:$0xff] %v62_v32  ;;  %71 = vst [vmem:[%s166_s3 + $0x18] sm:$0xff] %v63_v33 }
   0xc   :  { %72 = vst [vmem:[%s166_s3 + $0x20] sm:$0xff] %v64_v34  ;;  %73 = vst [vmem:[%s166_s3 + $0x28] sm:$0xff] %v65_v35 }
   0xd   :  { %74 = vst [vmem:[%s166_s3 + $0x30] sm:$0xff] %v66_v36  ;;  %75 = vst [vmem:[%s166_s3 + $0x38] sm:$0xff] %v67_v37 }

// kernel: double_conv_forward.6
= control target key start
LH: loop header
LB: loop body
LE: loop exit
PB: predicated region body
PF: predicated region fallthrough
CT: control target
= control target key end

     0   :  { %s3965_s21 = smov 0   ;;  %s3967_s22 = smov 0   ;;  %s5645_s0 = inlined_call_operand.vmem [shape: bf16[2,10,10,10,8], index: 0, kind: input, shape index: {}, may-alias: {0,1,2}]   ;;  %s5646_s1 = inlined_call_operand.vmem [shape: bf16[2,10,10,10,8], index: 1, kind: input, shape index: {}, may-alias: {0,1,2}]   ;;  %s5647_s2 = inlined_call_operand.vmem [shape: bf16[2,10,10,10,8], index: 2, kind: input, shape index: {}, may-alias: {0,1,2}]   ;;  %s5648_s3 = inlined_call_operand.vmem [shape: bf16[216,8], index: 3, kind: input, shape index: {}]   ;;  %s5649_s4 = inlined_call_operand.vmem [shape: f32[1,8], index: 4, kind: input, shape index: {}]   ;;  %s5650_s5 = inlined_call_operand.vmem [shape: bf16[2,8,64,8], index: 5, kind: output, shape index: {0}]   ;;  %s5651_s6 = inlined_call_operand.vmem [shape: f32[2,8,2,8], index: 6, kind: output, shape index: {1}]  }
   0x1   :  { %s3969_s23 = smov 0   ;;  %s3971_s24 = smov 0  }
   0x2   :  { %s3973_s25 = smov 0  }
   0x3 LB: > { %s26_s26 = sadd.s32 1, %s3904_s23  ;;  %s29_s27 = sadd.s32 1, %s3908_s24  ;;  %s3912_s25 = sphi %s3973_s25, %s17_s25   ;;  %s3908_s24 = sphi %s3971_s24, %s5678_s24   ;;  %s3904_s23 = sphi %s3969_s23, %s5677_s23   ;;  %s3900_s22 = sphi %s3967_s22, %s5676_s22   ;;  %s3896_s21 = sphi %s3965_s21, %s5675_s21  }
   0x4   : > { %p27_p0 = scmp.ge.s32.totalorder %s26_s26, 8  ;;  %p3358_p1 = scmp.ge.s32.totalorder %s3912_s25, 1 }
   0x5   : > { %p277_p2 = scmp.lt.s32.totalorder %s3912_s25, 17 }
   0x6   : > { %s5680_s26 = smov (%p27_p0, %s26_s26), 0  ;;  %s5682_s27 = smov (!%p27_p0, %s29_s27), %s3908_s24 }
   0x7   : > { %p278_p3 = pnand %p3358_p1, %p277_p2  ;;  %p31_p4 = scmp.ge.s32.totalorder %s5682_s27, 2 }
   0x8   : > { %p343_p5 = scmp.lt.s32.totalorder (!%p278_p3), %s3900_s22, 1  ;;  %p345_p6 = scmp.lt.s32.totalorder (!%p278_p3), %s3896_s21, 9  ;;  %vm547_vm0 = vcmask (!%p278_p3), 1042432   ;;  %vm548_vm1 = vcmask (!%p278_p3), 1046532   ;;  %vm408_vm3 = vsmask.f32 (!%p278_p3), 3328 }
   0x9   : > { %s5684_s27 = smov (%p31_p4, %s5682_s27), 0  ;;  %281 = sbr.rel (%p278_p3) target bundleno = 632 (0x278), region = 40 }
   0xa   : > { %s363_s30 = sadd.s32 (!%p278_p3), 2, %s3896_s21  ;;  %s352_s8 = sadd.s32 (!%p278_p3), 1, %s3896_s21  ;;  %vm4043_vm2 = vmor (!%p278_p3), %vm547_vm0, %vm548_vm1  ;;  %vm409_vm4 = vsmask.f32 (!%p278_p3), 7440  ;;  %vm2420_vm6 = vcmask (!%p278_p3), 64512   ;;  %vm2433_vm7 = vcmask (!%p278_p3), 130048  }
   0xb   : > { %p4007_p7 = scmp.lt.s32.totalorder (!%p278_p3), %s363_s30, 9  ;;  %p4011_p8 = scmp.lt.s32.totalorder (!%p278_p3), %s352_s8, 9  ;;  %vm4153_vm5 = vmor (!%p278_p3), %vm408_vm3, %vm409_vm4  ;;  %vm2442_vm8 = vcmask (!%p278_p3), 195584   ;;  %vm2451_vm9 = vcmask (!%p278_p3), 261120   ;;  %vm5658_vm10 = vcmask (!%p278_p3), 326656   ;;  %vm2469_vm11 = vcmask (!%p278_p3), 392192  }
   0xc   : > { %s3914_s16 = smov (!%p278_p3), 48   ;;  %s3915_s18 = smov (!%p278_p3), 24   ;;  %vm2478_vm12 = vcmask (!%p278_p3), 457728   ;;  %vm2487_vm13 = vcmask (!%p278_p3), 523264   ;;  %vm2496_vm14 = vcmask (!%p278_p3), 588800   ;;  %vm2505_vm15 = vcmask (!%p278_p3), 654336  }
   0xd   : > { %s3916_s13 = smov (!%p278_p3), 16   ;;  %s3917_s14 = smov (!%p278_p3), 8   ;;  %vm2514_vm0 = vcmask (!%p278_p3), 719872   ;;  %vm2523_vm1 = vcmask (!%p278_p3), 785408   ;;  %vm5656_vm3 = vcmask (!%p278_p3), 850944   ;;  %vm5657_vm4 = vcmask (!%p278_p3), 916480  }
   0xe   : > { %s5652_s12 = smov (!%p278_p3), 112   ;;  %p376_p9 = scmp.lt.s32.totalorder (!%p278_p3), %s3896_s21, 7 }
  0x10   : > { %s5686_s22 = smov (!%p343_p5, %s3900_s22), 1  ;;  %s5688_s30 = smov (!%p4007_p7, %s363_s30), 9 }
  0x11   : > { %s346_s28 = scalar_select %p345_p6, %s3896_s21, 9 }
  0x12   : > { %s4002_s29 = smul.u32 200, %s5686_s22  ;;  %s5690_s8 = smov (!%p4011_p8, %s352_s8), 9 }
  0x13   : > { %s3756_s7 = smul.u32 20, %s346_s28  ;;  %s5692_s21 = smov (!%p376_p9, %s3896_s21), 7 }
  0x14   : > { %s3759_s17 = smul.u32 20, %s5688_s30  ;;  %s3922_s30 = smov 72  }
  0x15   : > { %s349_s9 = sadd.s32 %s4002_s29, %s3756_s7  ;;  %s3758_s28 = smul.u32 20, %s5690_s8 }
  0x16   : > { %s3359_s11 = sshll.u32 %s349_s9, 2  ;;  %s370_s19 = sadd.s32 %s3759_s17, %s4002_s29 }
  0x17   : > { %s4018_s15 = scalar_lea.vmem %s5645_s0, %s3359_s11  ;;  %s3361_s20 = sshll.u32 %s370_s19, 2 }
  0x18   : > { %v3407_v0 = vld [vmem:[%s4018_s15 + $0x10] sm:$0xf]  ;;  %v3408_v1 = vld [vmem:[%s4018_s15 + $0x18] sm:$0xf]  ;;  %v3375_v2 = vld [vmem:[%s4018_s15 + $0x8] sm:$0xf]  ;;  %s4055_s9 = scalar_lea.vmem %s5647_s2, %s3361_s20  ;;  %s359_s8 = sadd.s32 %s3758_s28, %s4002_s29 }
  0x19   : > { %v799_v3 = vshrl.u32 %v3408_v1, 16  ;;  %v802_v4 = vshll.u32 %v3408_v1, 16  ;;  %v3607_v5 = vcombine.low %v3407_v0, %v3408_v1  ;;  %v785_v6 = vshrl.u32 %v3407_v0, 16  ;;  %v3376_v7 = vld [vmem:[%s4018_s15 + $0x10] sm:$0xf]  ;;  %s3360_s10 = sshll.u32 %s359_s8, 2 }
  0x1a   : > { %v788_v8 = vshll.u32 %v3407_v0, 16  ;;  %v614_v9 = vshrl.u32 %v3376_v7, 16  ;;  %v617_v10 = vshll.u32 %v3376_v7, 16  ;;  %v3595_v11 = vcombine.low %v3375_v2, %v3376_v7  ;;  %v4027_v12 = vld [vmem:[%s4018_s15 + $0x4] sm:$0x1]  ;;  %s4078_s29 = scalar_lea.vmem %s5646_s1, %s3360_s10  ;;  %s3918_s17 = smov 40  }
  0x1b   : > { %v801_v13 = vrot.slane %v799_v3, 4  ;;  %v804_v14 = vrot.slane %v802_v4, 5  ;;  %2208 = vrot.lane.b32.xlu0 %v3607_v5, %s3914_s16  ;;  %v787_v15 = vrot.slane %v785_v6, 4  ;;  %v600_v16 = vshrl.u32 %v3375_v2, 16  ;;  %v4036_v21 = vld [vmem:[%s4018_s15 + $0xc] sm:$0x1] }
  0x1c   : > { %v790_v17 = vrot.slane %v788_v8, 5  ;;  %v616_v18 = vrot.slane %v614_v9, 4  ;;  %v619_v19 = vrot.slane %v617_v10, 5  ;;  %2140 = vrot.lane.b32.xlu1 %v3595_v11, %s3915_s18  ;;  %v603_v20 = vshll.u32 %v3375_v2, 16  ;;  %v523_v24 = vld [vmem:[%s4018_s15] sm:$0xe] }
  0x1d   : > { %v805_v22 = vor.u32 %v804_v14, %v801_v13  ;;  %v602_v23 = vrot.slane %v600_v16, 4  ;;  %v524_v25 = vld [vmem:[%s4018_s15 + $0x8] sm:$0xe]  ;;  %v552_v27 = vrot.slane %v4027_v12, 5  ;;  %v3367_v31 = vrot.slane %v523_v24, 9  ;;  %s3919_s19 = smov 32  }
  0x1e   : > { %v791_v28 = vor.u32 %v790_v17, %v787_v15  ;;  %v620_v29 = vor.u32 %v619_v19, %v616_v18  ;;  %v605_v30 = vrot.slane %v603_v20, 5  ;;  %v4050_v32 = vld [vmem:[%s4018_s15 + $0xc] sm:$0x1]  ;;  %v3368_v33 = vrot.slane %v524_v25, 9  ;;  %v4059_v35 = vld [vmem:[%s4018_s15 + $0x14] sm:$0x1] }
  0x1f   : > { %v556_v34 = vrot.slane %v4036_v21, 5  ;;  %v4061_v36 = vrot.slane %v805_v22, 4  ;;  %v1506_v38 = vld [vmem:[%s4055_s9] sm:$0xf]  ;;  %v1507_v39 = vld [vmem:[%s4055_s9 + $0x8] sm:$0xf]  ;;  %v553_v40 = vsel %vm4043_vm2, %v3367_v31, %v552_v27 }
  0x20   : > { %v606_v37 = vor.u32 %v605_v30, %v602_v23  ;;  %v737_v41 = vrot.slane %v4050_v32, 5  ;;  %v1523_v42 = vshrl.u32 %v1506_v38, 16  ;;  %v1526_v43 = vshll.u32 %v1506_v38, 16  ;;  %v3391_v50 = vld [vmem:[%s4018_s15 + $0x8] sm:$0xe]  ;;  %s3920_s20 = smov 64  }
  0x21   : > { %v1537_v44 = vshrl.u32 %v1507_v39, 16  ;;  %v1540_v45 = vshll.u32 %v1507_v39, 16  ;;  %v4069_v46 = vrot.slane %v791_v28, 4  ;;  %v4071_v47 = vrot.slane %v620_v29, 4  ;;  %v3392_v51 = vld [vmem:[%s4018_s15 + $0x10] sm:$0xe] }
  0x22   : > { %v3655_v48 = vcombine.low %v1506_v38, %v1507_v39  ;;  %v557_v49 = vsel %vm4043_vm2, %v3368_v33, %v556_v34  ;;  %v4082_v52 = vrot.slane %v1523_v42, 4  ;;  %v4084_v53 = vrot.slane %v1526_v43, 5  ;;  %v4091_v56 = vld [vmem:[%s4078_s29 + $0x14] sm:$0x1]  ;;  %v4095_v58 = vld [vmem:[%s4078_s29 + $0x1c] sm:$0x1] }
  0x23   : > { %v4086_v54 = vrot.slane %v1537_v44, 4  ;;  %v4088_v55 = vrot.slane %v1540_v45, 5  ;;  %v3591_v57 = vcombine.low %v553_v40, %v557_v49  ;;  %v3495_v59 = vld [vmem:[%s4078_s29 + $0x10] sm:$0xe]  ;;  %v1476_v60 = vrot.slane %v4091_v56, 5  ;;  %s3921_s28 = smov 56  }
  0x24   : > { %2615 = vrot.lane.b32.xlu1 %v3655_v48, %s3916_s13  ;;  %v741_v61 = vrot.slane %v4059_v35, 5  ;;  %v4100_v62 = vrot.slane %v606_v37, 4  ;;  %v3496_v63 = vld [vmem:[%s4078_s29 + $0x18] sm:$0xe]  ;;  %v3503_v0 = vrot.slane %v3495_v59, 9  ;;  %v1480_v1 = vrot.slane %v4095_v58, 5 }
  0x25   : > { %v3399_v2 = vrot.slane %v3391_v50, 9  ;;  %2112 = vrot.lane.b32.xlu0 %v3591_v57, %s3916_s13  ;;  %v3504_v3 = vrot.slane %v3496_v63, 9  ;;  %v3400_v4 = vrot.slane %v3392_v51, 9  ;;  %v4106_v5 = vld [vmem:[%s4055_s9 + $0x4] sm:$0x1]  ;;  %v1529_v7 = vor.u32 %v4084_v53, %v4082_v52  ;;  %s3923_s7 = smov 80  }
  0x26   : > { %v4109_v6 = vld [vmem:[%s4055_s9 + $0xc] sm:$0x1]  ;;  %v1543_v8 = vor.u32 %v4088_v55, %v4086_v54  ;;  %v1477_v9 = vsel %vm4043_vm2, %v3503_v0, %v1476_v60  ;;  %v1634_v11 = vld [vmem:[%s4055_s9] sm:$0xe]  ;;  %v1635_v13 = vld [vmem:[%s4055_s9 + $0x8] sm:$0xe] }
  0x27   : > { %v738_v10 = vsel %vm4043_vm2, %v3399_v2, %v737_v41  ;;  %v1660_v14 = vrot.slane %v4106_v5, 5  ;;  %v1664_v15 = vrot.slane %v4109_v6, 5  ;;  %v1481_v16 = vsel %vm4043_vm2, %v3504_v3, %v1480_v1  ;;  %v4128_v20 = vld [vmem:[%s4018_s15 + $0x14] sm:$0x1]  ;;  %v4131_v22 = vld [vmem:[%s4018_s15 + $0x1c] sm:$0x1] }
  0x28   : > { %v742_v17 = vsel %vm4043_vm2, %v3400_v4, %v741_v61  ;;  %v3511_v18 = vrot.slane %v1634_v11, 9  ;;  %v3512_v19 = vrot.slane %v1635_v13, 9  ;;  %v3651_v23 = vcombine.low %v1477_v9, %v1481_v16  ;;  %v3423_v25 = vld [vmem:[%s4018_s15 + $0x10] sm:$0xe]  ;;  %v3424_v27 = vld [vmem:[%s4018_s15 + $0x18] sm:$0xe] }
  0x29   : > { %v3603_v24 = vcombine.low %v738_v10, %v742_v17  ;;  %v922_v28 = vrot.slane %v4128_v20, 5  ;;  %v926_v29 = vrot.slane %v4131_v22, 5  ;;  %v3431_v33 = vrot.slane %v3423_v25, 9  ;;  %v392_v37 = vld [vmem:[%s4018_s15] sm:$0xf]  ;;  %s5655_s8 = smov 88  }
  0x2a   : > { %v1661_v30 = vsel %vm4043_vm2, %v3511_v18, %v1660_v14  ;;  %v1665_v31 = vsel %vm4043_vm2, %v3512_v19, %v1664_v15  ;;  %v3432_v34 = vrot.slane %v3424_v27, 9  ;;  %2587 = vrot.lane.b32.xlu1 %v3651_v23, %s3917_s14  ;;  %v609_v39 = vshll.u32 %v4050_v32, 16  ;;  %v393_v41 = vld [vmem:[%s4018_s15 + $0x8] sm:$0xf]  ;;  %v396_v2 = vld [vmem:[%s4018_s15 + $0x20] sm:$0xf] }
  0x2b   : > { %2180 = vrot.lane.b32.xlu0 %v3603_v24, %s3918_s17  ;;  %v3663_v38 = vcombine.low %v1661_v30, %v1665_v31  ;;  %v623_v40 = vshll.u32 %v4059_v35, 16  ;;  %v412_v42 = vshrl.u32 %v392_v37, 16  ;;  %v923_v43 = vsel %vm4043_vm2, %v3431_v33, %v922_v28  ;;  %v397_v14 = vld [vmem:[%s4018_s15 + $0x28] sm:$0xf]  ;;  %v4177_v18 = vld [vmem:[%s4018_s15 + $0x24] sm:$0x1] }
  0x2c   : > { %v927_v44 = vsel %vm4043_vm2, %v3432_v34, %v926_v29  ;;  %v415_v48 = vshll.u32 %v392_v37, 16  ;;  %v421_v49 = vshll.u32 %v4027_v12, 16  ;;  %v611_v50 = vrot.slane %v609_v39, 5  ;;  %v394_v25 = vld [vmem:[%s4018_s15 + $0x10] sm:$0xf]  ;;  %s5654_s10 = smov 96  }
  0x2d   : > { %v3615_v32 = vcombine.low %v923_v43, %v927_v44  ;;  %v625_v35 = vrot.slane %v623_v40, 5  ;;  %v414_v51 = vrot.slane %v412_v42, 4  ;;  %v426_v54 = vshrl.u32 %v393_v41, 16  ;;  %v4196_v31 = vld [vmem:[%s4018_s15 + $0x14] sm:$0x1]  ;;  %s3926_s11 = smov 104  }
  0x2e   : > { %v417_v52 = vrot.slane %v415_v48, 5  ;;  %v423_v53 = vrot.slane %v421_v49, 5  ;;  %v429_v55 = vshll.u32 %v393_v41, 16  ;;  %2655 = vrot.lane.b32.xlu1 %v3663_v38, %s3919_s19  ;;  %v612_v57 = vsel %vm4153_vm5, %v4100_v62, %v611_v50  ;;  %v395_v39 = vld [vmem:[%s4018_s15 + $0x18] sm:$0xf] }
  0x2f   : > { %2248 = vrot.lane.b32.xlu0 %v3615_v32, %s3920_s20  ;;  %v626_v12 = vsel %vm4153_vm5, %v4071_v47, %v625_v35  ;;  %v435_v59 = vshll.u32 %v4036_v21, 16  ;;  %v1530_v60 = vrot.slane %v1529_v7, 4  ;;  %v428_v0 = vrot.slane %v426_v54, 4  ;;  %v4203_v42 = vld [vmem:[%s4018_s15 + $0x1c] sm:$0x1] }
  0x30   : > { %v3599_v61 = vcombine.low %v612_v57, %v626_v12  ;;  %v418_v63 = vor.u32 %v417_v52, %v414_v51  ;;  %v431_v1 = vrot.slane %v429_v55, 5  ;;  %v1532_v4 = vshll.u32 %v4106_v5, 16  ;;  %v4208_v32 = vld [vmem:[%s4055_s9 + $0x8] sm:$0xf] }
  0x31   : > { %v437_v3 = vrot.slane %v435_v59, 5  ;;  %v1544_v9 = vrot.slane %v1543_v8, 4  ;;  %v1546_v62 = vshll.u32 %v4109_v6, 16  ;;  %v794_v47 = vshll.u32 %v4128_v20, 16 }
  0x32   : > { %v419_v10 = vrot.slane %v418_v63, 4  ;;  %v432_v11 = vor.u32 %v431_v1, %v428_v0  ;;  %v808_v21 = vshll.u32 %v4131_v22, 16  ;;  %2160 = vrot.lane.b32.xlu1 %v3599_v61, %s3919_s19  ;;  %v1534_v7 = vrot.slane %v1532_v4, 5  ;;  %v4184_v22 = vld [vmem:[%s4018_s15 + $0x2c] sm:$0x1] }
  0x33   : > { %v1548_v13 = vrot.slane %v1546_v62, 5  ;;  %v468_v15 = vshrl.u32 %v396_v2, 16  ;;  %v471_v16 = vshll.u32 %v396_v2, 16  ;;  %v796_v8 = vrot.slane %v794_v47, 5  ;;  %v4218_v4 = vld [vmem:[%s4078_s29] sm:$0xf] }
  0x34   : > { %v424_v5 = vsel %vm4153_vm5, %v419_v10, %v423_v53  ;;  %v433_v6 = vrot.slane %v432_v11, 4  ;;  %v810_v17 = vrot.slane %v808_v21, 5  ;;  %v1535_v19 = vsel %vm4153_vm5, %v1530_v60, %v1534_v7  ;;  %v3520_v53 = vld [vmem:[%s4055_s9 + $0x10] sm:$0xf] }
  0x35   : > { %v1549_v20 = vsel %vm4153_vm5, %v1544_v9, %v1548_v13  ;;  %v470_v23 = vrot.slane %v468_v15, 4  ;;  %v473_v24 = vrot.slane %v471_v16, 5  ;;  %v797_v29 = vsel %vm4153_vm5, %v4069_v46, %v796_v8  ;;  %v527_v8 = vld [vmem:[%s4018_s15 + $0x20] sm:$0xe] }
  0x36   : > { %v438_v27 = vsel %vm4153_vm5, %v433_v6, %v437_v3  ;;  %v3659_v28 = vcombine.low %v1535_v19, %v1549_v20  ;;  %v811_v30 = vsel %vm4153_vm5, %v4061_v36, %v810_v17  ;;  %v477_v38 = vshll.u32 %v4177_v18, 16 }
  0x37   : > { %v3587_v33 = vcombine.low %v424_v5, %v438_v27  ;;  %v3611_v34 = vcombine.low %v797_v29, %v811_v30  ;;  %v474_v37 = vor.u32 %v473_v24, %v470_v23  ;;  %v482_v40 = vshrl.u32 %v397_v14, 16  ;;  %v528_v24 = vld [vmem:[%s4018_s15 + $0x28] sm:$0xe] }
  0x38   : > { %2635 = vrot.lane.b32.xlu1 %v3659_v28, %s3915_s18  ;;  %v485_v41 = vshll.u32 %v397_v14, 16  ;;  %v491_v46 = vshll.u32 %v4184_v22, 16  ;;  %v440_v43 = vshrl.u32 %v394_v25, 16  ;;  %v479_v44 = vrot.slane %v477_v38, 5  ;;  %v953_v14 = vld [vmem:[%s4078_s29 + $0x8] sm:$0xf] }
  0x39   : > { %2092 = vrot.lane.b32.xlu0 %v3587_v33, %s3917_s14  ;;  %v475_v36 = vrot.slane %v474_v37, 4  ;;  %v443_v48 = vshll.u32 %v394_v25, 16  ;;  %v449_v49 = vshll.u32 %v4196_v31, 16  ;;  %v484_v50 = vrot.slane %v482_v40, 4  ;;  %v525_v25 = vld [vmem:[%s4018_s15 + $0x10] sm:$0xe] }
  0x3a   : > { %v487_v35 = vrot.slane %v485_v41, 5  ;;  %v493_v51 = vrot.slane %v491_v46, 5  ;;  %v442_v52 = vrot.slane %v440_v43, 4  ;;  %v454_v12 = vshrl.u32 %v395_v39, 16  ;;  %v526_v33 = vld [vmem:[%s4018_s15 + $0x18] sm:$0xe] }
  0x3b   : > { %v480_v54 = vsel %vm4153_vm5, %v475_v36, %v479_v44  ;;  %v445_v55 = vrot.slane %v443_v48, 5  ;;  %v451_v57 = vrot.slane %v449_v49, 5  ;;  %v457_v60 = vshll.u32 %v395_v39, 16  ;;  %v4236_v40 = vld [vmem:[%s4055_s9 + $0xc] sm:$0x1] }
  0x3c   : > { %v488_v59 = vor.u32 %v487_v35, %v484_v50  ;;  %v463_v61 = vshll.u32 %v4203_v42, 16  ;;  %v1708_v63 = vshrl.u32 %v4208_v32, 16  ;;  %v456_v1 = vrot.slane %v454_v12, 4  ;;  %v4241_v44 = vld [vmem:[%s4055_s9 + $0x14] sm:$0x1] }
  0x3d   : > { %2228 = vrot.lane.b32.xlu0 %v3611_v34, %s3921_s28  ;;  %v446_v0 = vor.u32 %v445_v55, %v442_v52  ;;  %v1711_v2 = vshll.u32 %v4208_v32, 16  ;;  %v1722_v3 = vshrl.u32 %v3520_v53, 16  ;;  %v459_v62 = vrot.slane %v457_v60, 5 }
  0x3e   : > { %v489_v9 = vrot.slane %v488_v59, 4  ;;  %v465_v10 = vrot.slane %v463_v61, 5  ;;  %v1710_v11 = vrot.slane %v1708_v63, 4  ;;  %v1725_v13 = vshll.u32 %v3520_v53, 16  ;;  %v3379_v61 = vld [vmem:[%s4018_s15 + $0x28] sm:$0xf] }
  0x3f   : > { %v447_v47 = vrot.slane %v446_v0, 4  ;;  %v1713_v21 = vrot.slane %v1711_v2, 5  ;;  %v1724_v7 = vrot.slane %v1722_v3, 4  ;;  %v460_v16 = vor.u32 %v459_v62, %v456_v1 }
  0x40   : > { %v494_v15 = vsel %vm4153_vm5, %v489_v9, %v493_v51  ;;  %v3667_v5 = vcombine.low %v4208_v32, %v3520_v53  ;;  %v969_v6 = vshrl.u32 %v4218_v4, 16  ;;  %v1727_v20 = vrot.slane %v1725_v13, 5  ;;  %v3377_v13 = vld [vmem:[%s4018_s15 + $0x18] sm:$0xf] }
  0x41   : > { %v3589_v17 = vcombine.low %v480_v54, %v494_v15  ;;  %v452_v19 = vsel %vm4153_vm5, %v447_v47, %v451_v57  ;;  %v972_v23 = vshll.u32 %v4218_v4, 16  ;;  %v461_v27 = vrot.slane %v460_v16, 4  ;;  %v4255_v57 = vld [vmem:[%s4078_s29 + $0x4] sm:$0x1] }
  0x42   : > { %v971_v28 = vrot.slane %v969_v6, 4  ;;  %v983_v29 = vshrl.u32 %v953_v14, 16  ;;  %v986_v30 = vshll.u32 %v953_v14, 16  ;;  %v3619_v37 = vcombine.low %v4218_v4, %v953_v14  ;;  %v3378_v6 = vld [vmem:[%s4018_s15 + $0x20] sm:$0xf] }
  0x43   : > { %2096 = vrot.lane.b32.xlu1 %v3589_v17, %s3917_s14  ;;  %v974_v34 = vrot.slane %v972_v23, 5  ;;  %v3371_v38 = vrot.slane %v527_v8, 9  ;;  %v568_v39 = vrot.slane %v4177_v18, 5  ;;  %v466_v41 = vsel %vm4153_vm5, %v461_v27, %v465_v10  ;;  %v3380_v10 = vld [vmem:[%s4018_s15 + $0x30] sm:$0xf] }
  0x44   : > { %v985_v46 = vrot.slane %v983_v29, 4  ;;  %v988_v43 = vrot.slane %v986_v30, 5  ;;  %v3372_v36 = vrot.slane %v528_v24, 9  ;;  %v3588_v48 = vcombine.low %v452_v19, %v466_v41  ;;  %v3536_v29 = vld [vmem:[%s4055_s9 + $0x10] sm:$0xe] }
  0x45   : > { %v569_v49 = vsel %vm4043_vm2, %v3371_v38, %v568_v39  ;;  %v572_v32 = vrot.slane %v4184_v22, 5  ;;  %v3369_v50 = vrot.slane %v525_v25, 9  ;;  %v560_v18 = vrot.slane %v4196_v31, 5  ;;  %v4258_v31 = vld [vmem:[%s4078_s29 + $0xc] sm:$0x1] }
  0x46   : > { %v3370_v35 = vrot.slane %v526_v33, 9  ;;  %v564_v51 = vrot.slane %v4203_v42, 5  ;;  %v1714_v52 = vor.u32 %v1713_v21, %v1710_v11  ;;  %2094 = vrot.lane.b32.xlu0 %v3588_v48, %s3917_s14  ;;  %v1717_v54 = vshll.u32 %v4236_v40, 16  ;;  %v1080_v38 = vld [vmem:[%s4078_s29] sm:$0xe] }
  0x47   : > { %2683 = vrot.lane.b32.xlu1 %v3667_v5, %s3918_s17  ;;  %v573_v53 = vsel %vm4043_vm2, %v3372_v36, %v572_v32  ;;  %v1728_v55 = vor.u32 %v1727_v20, %v1724_v7  ;;  %v1731_v22 = vshll.u32 %v4241_v44, 16  ;;  %v561_v42 = vsel %vm4043_vm2, %v3369_v50, %v560_v18  ;;  %v1081_v36 = vld [vmem:[%s4078_s29 + $0x8] sm:$0xe]  ;;  %v4287_v18 = vld [vmem:[%s4018_s15 + $0x2c] sm:$0x1] }
  0x48   : > { %v3593_v12 = vcombine.low %v569_v49, %v573_v53  ;;  %v565_v59 = vsel %vm4043_vm2, %v3370_v35, %v564_v51  ;;  %v1715_v60 = vrot.slane %v1714_v52, 4  ;;  %v1719_v0 = vrot.slane %v1717_v54, 5 }
  0x49   : > { %v3592_v63 = vcombine.low %v561_v42, %v565_v59  ;;  %v1729_v1 = vrot.slane %v1728_v55, 4  ;;  %v1733_v2 = vrot.slane %v1731_v22, 5  ;;  %v975_v3 = vor.u32 %v974_v34, %v971_v28  ;;  %v3535_v28 = vld [vmem:[%s4055_s9 + $0x8] sm:$0xe]  ;;  %v4296_v42 = vld [vmem:[%s4018_s15 + $0x34] sm:$0x1] }
  0x4a   : > { %v978_v4 = vshll.u32 %v4255_v57, 16  ;;  %v989_v9 = vor.u32 %v988_v43, %v985_v46  ;;  %v992_v62 = vshll.u32 %v4258_v31, 16  ;;  %2276 = vrot.lane.b32.xlu0 %v3619_v37, %s3922_s30  ;;  %v1720_v11 = vsel %vm4153_vm5, %v1715_v60, %v1719_v0 }
  0x4b   : > { %2116 = vrot.lane.b32.xlu1 %v3593_v12, %s3916_s13  ;;  %v1734_v47 = vsel %vm4153_vm5, %v1729_v1, %v1733_v2  ;;  %v656_v21 = vshrl.u32 %v3379_v61, 16  ;;  %v659_v7 = vshll.u32 %v3379_v61, 16  ;;  %v976_v15 = vrot.slane %v975_v3, 4  ;;  %v4311_v1 = vld [vmem:[%s4018_s15 + $0x24] sm:$0x1] }
  0x4c   : > { %v3671_v14 = vcombine.low %v1720_v11, %v1734_v47  ;;  %v980_v16 = vrot.slane %v978_v4, 5  ;;  %v990_v5 = vrot.slane %v989_v9, 4  ;;  %v994_v8 = vrot.slane %v992_v62, 5 }
  0x4d   : > { %v658_v17 = vrot.slane %v656_v21, 4  ;;  %v661_v19 = vrot.slane %v659_v7, 5  ;;  %v670_v20 = vshrl.u32 %v3380_v10, 16  ;;  %v673_v24 = vshll.u32 %v3380_v10, 16  ;;  %v3551_v21 = vld [vmem:[%s4055_s9 + $0x10] sm:$0xf] }
  0x4e   : > { %v981_v23 = vsel %vm4153_vm5, %v976_v15, %v980_v16  ;;  %v3597_v25 = vcombine.low %v3379_v61, %v3380_v10  ;;  %v628_v27 = vshrl.u32 %v3377_v13, 16  ;;  %2114 = vrot.lane.b32.xlu0 %v3592_v63, %s3916_s13  ;;  %v995_v30 = vsel %vm4153_vm5, %v990_v5, %v994_v8  ;;  %v4304_v61 = vld [vmem:[%s4018_s15 + $0x1c] sm:$0x1]  ;;  %v3552_v15 = vld [vmem:[%s4055_s9 + $0x18] sm:$0xf] }
  0x4f   : > { %2703 = vrot.lane.b32.xlu1 %v3671_v14, %s3914_s16  ;;  %v672_v33 = vrot.slane %v670_v20, 4  ;;  %v631_v34 = vshll.u32 %v3377_v13, 16  ;;  %v642_v37 = vshrl.u32 %v3378_v6, 16  ;;  %v3623_v39 = vcombine.low %v981_v23, %v995_v30 }
  0x50   : > { %v675_v41 = vrot.slane %v673_v24, 5  ;;  %v630_v46 = vrot.slane %v628_v27, 4  ;;  %v645_v43 = vshll.u32 %v3378_v6, 16  ;;  %v3596_v32 = vcombine.low %v3377_v13, %v3378_v6  ;;  %v3448_v27 = vld [vmem:[%s4078_s29 + $0x10] sm:$0xf] }
  0x51   : > { %v633_v48 = vrot.slane %v631_v34, 5  ;;  %v644_v49 = vrot.slane %v642_v37, 4  ;;  %v3543_v50 = vrot.slane %v3535_v28, 9  ;;  %v1845_v51 = vrot.slane %v4236_v40, 5  ;;  %v3395_v34 = vld [vmem:[%s4018_s15 + $0x28] sm:$0xe] }
  0x52   : > { %v647_v35 = vrot.slane %v645_v43, 5  ;;  %v3544_v52 = vrot.slane %v3536_v29, 9  ;;  %v1849_v53 = vrot.slane %v4241_v44, 5  ;;  %2296 = vrot.lane.b32.xlu0 %v3623_v39, %s3923_s7  ;;  %v3439_v54 = vrot.slane %v1080_v38, 9 }
  0x53   : > { %2144 = vrot.lane.b32.xlu1 %v3597_v25, %s3915_s18  ;;  %v1106_v55 = vrot.slane %v4255_v57, 5  ;;  %v3440_v22 = vrot.slane %v1081_v36, 9  ;;  %v1110_v12 = vrot.slane %v4258_v31, 5  ;;  %v1846_v40 = vsel %vm4043_vm2, %v3543_v50, %v1845_v51  ;;  %v3394_v50 = vld [vmem:[%s4018_s15 + $0x20] sm:$0xe] }
  0x54   : > { %v1850_v44 = vsel %vm4043_vm2, %v3544_v52, %v1849_v53  ;;  %v662_v59 = vor.u32 %v661_v19, %v658_v17  ;;  %v665_v60 = vshll.u32 %v4287_v18, 16  ;;  %v676_v0 = vor.u32 %v675_v41, %v672_v33  ;;  %v3447_v19 = vld [vmem:[%s4078_s29 + $0x8] sm:$0xf] }
  0x55   : > { %v3675_v63 = vcombine.low %v1846_v40, %v1850_v44  ;;  %v1107_v57 = vsel %vm4043_vm2, %v3439_v54, %v1106_v55  ;;  %v1111_v31 = vsel %vm4043_vm2, %v3440_v22, %v1110_v12  ;;  %v679_v9 = vshll.u32 %v4296_v42, 16  ;;  %v4345_v54 = vld [vmem:[%s4078_s29 + $0x24] sm:$0x1]  ;;  %v4350_v44 = vld [vmem:[%s4078_s29 + $0x2c] sm:$0x1] }
  0x56   : > { %v3627_v2 = vcombine.low %v1107_v57, %v1111_v31  ;;  %v663_v3 = vrot.slane %v662_v59, 4  ;;  %v667_v4 = vrot.slane %v665_v60, 5  ;;  %2142 = vrot.lane.b32.xlu0 %v3596_v32, %s3915_s18  ;;  %v677_v62 = vrot.slane %v676_v0, 4  ;;  %v3393_v32 = vld [vmem:[%s4018_s15 + $0x18] sm:$0xe] }
  0x57   : > { %2723 = vrot.lane.b32.xlu1 %v3675_v63, %s3921_s28  ;;  %v634_v10 = vor.u32 %v633_v48, %v630_v46  ;;  %v637_v11 = vshll.u32 %v4304_v61, 16  ;;  %v648_v47 = vor.u32 %v647_v35, %v644_v49  ;;  %v681_v13 = vrot.slane %v679_v9, 5  ;;  %v3396_v46 = vld [vmem:[%s4018_s15 + $0x30] sm:$0xe]  ;;  %v3497_v59 = vld [vmem:[%s4078_s29 + $0x20] sm:$0xe] }
  0x58   : > { %v668_v7 = vsel %vm4153_vm5, %v663_v3, %v667_v4  ;;  %v651_v14 = vshll.u32 %v4311_v1, 16  ;;  %v1893_v16 = vshrl.u32 %v3551_v21, 16  ;;  %v1896_v17 = vshll.u32 %v3551_v21, 16  ;;  %v3498_v0 = vld [vmem:[%s4078_s29 + $0x28] sm:$0xe] }
  0x59   : > { %v635_v5 = vrot.slane %v634_v10, 4  ;;  %v639_v6 = vrot.slane %v637_v11, 5  ;;  %v649_v8 = vrot.slane %v648_v47, 4  ;;  %v1348_v20 = vshll.u32 %v4091_v56, 16  ;;  %v4361_v9 = vld [vmem:[%s4078_s29 + $0xc] sm:$0x1] }
  0x5a   : > { %v682_v23 = vsel %vm4153_vm5, %v677_v62, %v681_v13  ;;  %v653_v24 = vrot.slane %v651_v14, 5  ;;  %v1907_v25 = vshrl.u32 %v3552_v15, 16  ;;  %v1362_v28 = vshll.u32 %v4095_v58, 16  ;;  %2316 = vrot.lane.b32.xlu0 %v3627_v2, %s5655_s8  ;;  %v4368_v11 = vld [vmem:[%s4078_s29 + $0x14] sm:$0x1] }
  0x5b   : > { %v3601_v29 = vcombine.low %v668_v7, %v682_v23  ;;  %v640_v30 = vsel %vm4153_vm5, %v635_v5, %v639_v6  ;;  %v4331_v33 = vrot.slane %v1893_v16, 4  ;;  %v4336_v38 = vrot.slane %v1896_v17, 5  ;;  %v4375_v13 = vld [vmem:[%s4055_s9 + $0x14] sm:$0x1] }
  0x5c   : > { %v654_v37 = vsel %vm4153_vm5, %v649_v8, %v653_v24  ;;  %v1910_v39 = vshll.u32 %v3552_v15, 16  ;;  %v1154_v41 = vshrl.u32 %v3447_v19, 16  ;;  %v3679_v36 = vcombine.low %v3551_v21, %v3552_v15 }
  0x5d   : > { %2164 = vrot.lane.b32.xlu1 %v3601_v29, %s3919_s19  ;;  %v3600_v43 = vcombine.low %v640_v30, %v654_v37  ;;  %v1157_v48 = vshll.u32 %v3447_v19, 16  ;;  %v1168_v49 = vshrl.u32 %v3448_v27, 16  ;;  %v4342_v35 = vrot.slane %v1907_v25, 4  ;;  %v3499_v30 = vld [vmem:[%s4078_s29 + $0x30] sm:$0xe] }
  0x5e   : > { %v1156_v51 = vrot.slane %v1154_v41, 4  ;;  %v1171_v52 = vshll.u32 %v3448_v27, 16  ;;  %v3403_v53 = vrot.slane %v3395_v34, 9  ;;  %v3631_v22 = vcombine.low %v3447_v19, %v3448_v27  ;;  %v4384_v19 = vld [vmem:[%s4055_s9 + $0x1c] sm:$0x1] }
  0x5f   : > { %2162 = vrot.lane.b32.xlu0 %v3600_v43, %s3919_s19  ;;  %v1159_v55 = vrot.slane %v1157_v48, 5  ;;  %v753_v12 = vrot.slane %v4287_v18, 5  ;;  %v3404_v40 = vrot.slane %v3396_v46, 9  ;;  %v1170_v60 = vrot.slane %v1168_v49, 4  ;;  %v4394_v46 = vld [vmem:[%s4078_s29 + $0x34] sm:$0x1] }
  0x60   : > { %v757_v63 = vrot.slane %v4296_v42, 5  ;;  %v3401_v57 = vrot.slane %v3393_v32, 9  ;;  %v745_v31 = vrot.slane %v4304_v61, 5  ;;  %v1173_v2 = vrot.slane %v1171_v52, 5  ;;  %v4401_v48 = vld [vmem:[%s4078_s29 + $0x3c] sm:$0x1] }
  0x61   : > { %2751 = vrot.lane.b32.xlu1 %v3679_v36, %s3920_s20  ;;  %v754_v3 = vsel %vm4043_vm2, %v3403_v53, %v753_v12  ;;  %v3402_v18 = vrot.slane %v3394_v50, 9  ;;  %v749_v4 = vrot.slane %v4311_v1, 5  ;;  %v1912_v62 = vrot.slane %v1910_v39, 5  ;;  %v3500_v49 = vld [vmem:[%s4078_s29 + $0x38] sm:$0xe] }
  0x62   : > { %v758_v42 = vsel %vm4043_vm2, %v3404_v40, %v757_v63  ;;  %v746_v61 = vsel %vm4043_vm2, %v3401_v57, %v745_v31  ;;  %v3505_v10 = vrot.slane %v3497_v59, 9  ;;  %v1484_v21 = vrot.slane %v4345_v54, 5  ;;  %v3411_v12 = vld [vmem:[%s4018_s15 + $0x30] sm:$0xf]  ;;  %v3412_v63 = vld [vmem:[%s4018_s15 + $0x38] sm:$0xf] }
  0x63   : > { %2344 = vrot.lane.b32.xlu0 %v3631_v22, %s5654_s10  ;;  %v3605_v47 = vcombine.low %v754_v3, %v758_v42  ;;  %v750_v1 = vsel %vm4043_vm2, %v3402_v18, %v749_v4  ;;  %v3506_v7 = vrot.slane %v3498_v0, 9  ;;  %v1488_v15 = vrot.slane %v4350_v44, 5  ;;  %v3409_v18 = vld [vmem:[%s4018_s15 + $0x20] sm:$0xf] }
  0x64   : > { %v3604_v14 = vcombine.low %v746_v61, %v750_v1  ;;  %v1160_v16 = vor.u32 %v1159_v55, %v1156_v51  ;;  %v1163_v5 = vshll.u32 %v4361_v9, 16  ;;  %v1485_v6 = vsel %vm4043_vm2, %v3505_v10, %v1484_v21  ;;  %v3410_v10 = vld [vmem:[%s4018_s15 + $0x28] sm:$0xf] }
  0x65   : > { %2184 = vrot.lane.b32.xlu1 %v3605_v47, %s3918_s17  ;;  %v1174_v8 = vor.u32 %v1173_v2, %v1170_v60  ;;  %v1177_v17 = vshll.u32 %v4368_v11, 16  ;;  %v1899_v23 = vor.u32 %v4336_v38, %v4331_v33  ;;  %v1489_v24 = vsel %vm4043_vm2, %v3506_v7, %v1488_v15  ;;  %v1508_v47 = vld [vmem:[%s4055_s9 + $0x10] sm:$0xf]  ;;  %v1509_v15 = vld [vmem:[%s4055_s9 + $0x18] sm:$0xf] }
  0x66   : > { %v1161_v25 = vrot.slane %v1160_v16, 4  ;;  %v1165_v27 = vrot.slane %v1163_v5, 5  ;;  %v1902_v29 = vshll.u32 %v4375_v13, 16  ;;  %v3652_v34 = vcombine.low %v1485_v6, %v1489_v24 }
  0x67   : > { %2182 = vrot.lane.b32.xlu0 %v3604_v14, %s3918_s17  ;;  %v1175_v37 = vrot.slane %v1174_v8, 4  ;;  %v1179_v39 = vrot.slane %v1177_v17, 5  ;;  %v1900_v41 = vrot.slane %v1899_v23, 4  ;;  %v1913_v43 = vor.u32 %v1912_v62, %v4342_v35  ;;  %v3463_v17 = vld [vmem:[%s4078_s29 + $0x8] sm:$0xe] }
  0x68   : > { %v1166_v33 = vsel %vm4153_vm5, %v1161_v25, %v1165_v27  ;;  %v1904_v38 = vrot.slane %v1902_v29, 5  ;;  %v1916_v36 = vshll.u32 %v4384_v19, 16  ;;  %v1376_v32 = vshll.u32 %v4345_v54, 16  ;;  %v3464_v29 = vld [vmem:[%s4078_s29 + $0x10] sm:$0xe] }
  0x69   : > { %v1390_v50 = vshll.u32 %v4350_v44, 16  ;;  %2589 = vrot.lane.b32.xlu1 %v3652_v34, %s3917_s14  ;;  %v1180_v51 = vsel %vm4153_vm5, %v1175_v37, %v1179_v39  ;;  %v3507_v52 = vrot.slane %v3499_v30, 9  ;;  %v1914_v55 = vrot.slane %v1913_v43, 4 }
  0x6a   : > { %v3635_v53 = vcombine.low %v1166_v33, %v1180_v51  ;;  %v1905_v35 = vsel %vm4153_vm5, %v1900_v41, %v1904_v38  ;;  %v1918_v22 = vrot.slane %v1916_v36, 5  ;;  %v1492_v40 = vrot.slane %v4394_v46, 5  ;;  %v3567_v41 = vld [vmem:[%s4055_s9 + $0x10] sm:$0xe] }
  0x6b   : > { %v3508_v59 = vrot.slane %v3500_v49, 9  ;;  %v1496_v60 = vrot.slane %v4401_v48, 5  ;;  %v841_v57 = vshrl.u32 %v3411_v12, 16  ;;  %v844_v0 = vshll.u32 %v3411_v12, 16  ;;  %v3568_v49 = vld [vmem:[%s4055_s9 + $0x18] sm:$0xe] }
  0x6c   : > { %2364 = vrot.lane.b32.xlu0 %v3635_v53, %s3926_s11  ;;  %v1919_v31 = vsel %vm4153_vm5, %v1914_v55, %v1918_v22  ;;  %v855_v2 = vshrl.u32 %v3412_v63, 16  ;;  %v858_v3 = vshll.u32 %v3412_v63, 16  ;;  %v1493_v62 = vsel %vm4043_vm2, %v3507_v52, %v1492_v40 }
  0x6d   : > { %v3683_v4 = vcombine.low %v1905_v35, %v1919_v31  ;;  %v1497_v42 = vsel %vm4043_vm2, %v3508_v59, %v1496_v60  ;;  %v4423_v61 = vrot.slane %v841_v57, 4  ;;  %v4427_v21 = vrot.slane %v844_v0, 5  ;;  %v1510_v59 = vld [vmem:[%s4055_s9 + $0x20] sm:$0xf]  ;;  %v1511_v31 = vld [vmem:[%s4055_s9 + $0x28] sm:$0xf] }
  0x6e   : > { %v3653_v1 = vcombine.low %v1493_v62, %v1497_v42  ;;  %v4429_v7 = vrot.slane %v855_v2, 4  ;;  %v4431_v14 = vrot.slane %v858_v3, 5  ;;  %v3609_v16 = vcombine.low %v3411_v12, %v3412_v63  ;;  %v4471_v42 = vld [vmem:[%s4018_s15 + $0x3c] sm:$0x1] }
  0x6f   : > { %2771 = vrot.lane.b32.xlu1 %v3683_v4, %s3922_s30  ;;  %v813_v5 = vshrl.u32 %v3409_v18, 16  ;;  %v816_v6 = vshll.u32 %v3409_v18, 16  ;;  %v827_v8 = vshrl.u32 %v3410_v10, 16  ;;  %v830_v23 = vshll.u32 %v3410_v10, 16 }
  0x70   : > { %2591 = vrot.lane.b32.xlu0 %v3653_v1, %s3917_s14  ;;  %v3608_v24 = vcombine.low %v3409_v18, %v3410_v10  ;;  %v1551_v25 = vshrl.u32 %v1508_v47, 16  ;;  %v1554_v27 = vshll.u32 %v1508_v47, 16  ;;  %v1565_v39 = vshrl.u32 %v1509_v15, 16  ;;  %v4463_v18 = vld [vmem:[%s4018_s15 + $0x34] sm:$0x1] }
  0x71   : > { %v815_v30 = vrot.slane %v813_v5, 4  ;;  %v818_v34 = vrot.slane %v816_v6, 5  ;;  %v4438_v37 = vrot.slane %v827_v8, 4  ;;  %v832_v33 = vrot.slane %v830_v23, 5  ;;  %v4474_v10 = vld [vmem:[%s4018_s15 + $0x24] sm:$0x1] }
  0x72   : > { %v4441_v38 = vrot.slane %v1551_v25, 4  ;;  %v4443_v43 = vrot.slane %v1554_v27, 5  ;;  %v1568_v36 = vshll.u32 %v1509_v15, 16  ;;  %v4447_v51 = vrot.slane %v1565_v39, 4  ;;  %v4483_v5 = vld [vmem:[%s4018_s15 + $0x2c] sm:$0x1] }
  0x73   : > { %2212 = vrot.lane.b32.xlu1 %v3609_v16, %s3914_s16  ;;  %v3656_v52 = vcombine.low %v1508_v47, %v1509_v15  ;;  %v3471_v53 = vrot.slane %v3463_v17, 9  ;;  %v1291_v35 = vrot.slane %v4361_v9, 5  ;;  %v3472_v22 = vrot.slane %v3464_v29, 9 }
  0x74   : > { %2210 = vrot.lane.b32.xlu0 %v3608_v24, %s3914_s16  ;;  %v4451_v55 = vrot.slane %v1568_v36, 5  ;;  %v1295_v12 = vrot.slane %v4368_v11, 5  ;;  %v3575_v40 = vrot.slane %v3567_v41, 9  ;;  %v2030_v63 = vrot.slane %v4375_v13, 5 }
  0x75   : > { %v1292_v60 = vsel %vm4043_vm2, %v3471_v53, %v1291_v35  ;;  %v3576_v57 = vrot.slane %v3568_v49, 9  ;;  %v2034_v9 = vrot.slane %v4384_v19, 5  ;;  %v1579_v2 = vshrl.u32 %v1510_v59, 16 }
  0x76   : > { %v1296_v0 = vsel %vm4043_vm2, %v3472_v22, %v1295_v12  ;;  %v1582_v3 = vshll.u32 %v1510_v59, 16  ;;  %v1593_v11 = vshrl.u32 %v1511_v31, 16  ;;  %v2031_v62 = vsel %vm4043_vm2, %v3575_v40, %v2030_v63 }
  0x77   : > { %2617 = vrot.lane.b32.xlu1 %v3656_v52, %s3916_s13  ;;  %v3639_v4 = vcombine.low %v1292_v60, %v1296_v0  ;;  %v2035_v13 = vsel %vm4043_vm2, %v3576_v57, %v2034_v9  ;;  %v1596_v19 = vshll.u32 %v1511_v31, 16  ;;  %v4476_v1 = vrot.slane %v1579_v2, 4  ;;  %v3425_v9 = vld [vmem:[%s4018_s15 + $0x20] sm:$0xe] }
  0x78   : > { %v3687_v47 = vcombine.low %v2031_v62, %v2035_v13  ;;  %v4478_v15 = vrot.slane %v1582_v3, 5  ;;  %v4480_v16 = vrot.slane %v1593_v11, 4  ;;  %v3657_v8 = vcombine.low %v1510_v59, %v1511_v31  ;;  %v3479_v59 = vld [vmem:[%s4078_s29 + $0x10] sm:$0xf]  ;;  %v3426_v62 = vld [vmem:[%s4018_s15 + $0x28] sm:$0xe] }
  0x79   : > { %2384 = vrot.lane.b32.xlu0 %v3639_v4, %s5652_s12  ;;  %v4486_v6 = vrot.slane %v1596_v19, 5  ;;  %v847_v17 = vor.u32 %v4427_v21, %v4423_v61  ;;  %v850_v23 = vshll.u32 %v4463_v18, 16  ;;  %v861_v24 = vor.u32 %v4431_v14, %v4429_v7  ;;  %v4499_v61 = vld [vmem:[%s4055_s9 + $0x14] sm:$0x1]  ;;  %v4502_v14 = vld [vmem:[%s4055_s9 + $0x1c] sm:$0x1] }
  0x7a   : > { %v864_v25 = vshll.u32 %v4471_v42, 16  ;;  %v819_v27 = vor.u32 %v818_v34, %v815_v30  ;;  %v822_v29 = vshll.u32 %v4474_v10, 16  ;;  %v833_v36 = vor.u32 %v832_v33, %v4438_v37  ;;  %s3928_s12 = smov 120  }
  0x7b   : > { %2791 = vrot.lane.b32.xlu1 %v3687_v47, %s3923_s7  ;;  %v848_v39 = vrot.slane %v847_v17, 4  ;;  %v852_v41 = vrot.slane %v850_v23, 5  ;;  %v836_v49 = vshll.u32 %v4483_v5, 16  ;;  %v862_v21 = vrot.slane %v861_v24, 4  ;;  %v4528_v17 = vld [vmem:[%s4055_s9 + $0x24] sm:$0x1] }
  0x7c   : > { %v866_v52 = vrot.slane %v864_v25, 5  ;;  %v820_v53 = vrot.slane %v819_v27, 4  ;;  %v824_v7 = vrot.slane %v822_v29, 5  ;;  %v834_v34 = vrot.slane %v833_v36, 4  ;;  %v4533_v29 = vld [vmem:[%s4055_s9 + $0x2c] sm:$0x1] }
  0x7d   : > { %2619 = vrot.lane.b32.xlu0 %v3657_v8, %s3916_s13  ;;  %v853_v30 = vsel %vm4153_vm5, %v848_v39, %v852_v41  ;;  %v838_v37 = vrot.slane %v836_v49, 5  ;;  %v1557_v33 = vor.u32 %v4443_v43, %v4441_v38  ;;  %v1560_v12 = vshll.u32 %v4499_v61, 16  ;;  %v3480_v43 = vld [vmem:[%s4078_s29 + $0x18] sm:$0xf] }
  0x7e   : > { %v867_v35 = vsel %vm4153_vm5, %v862_v21, %v866_v52  ;;  %v825_v22 = vsel %vm4153_vm5, %v820_v53, %v824_v7  ;;  %v1571_v40 = vor.u32 %v4451_v55, %v4447_v51  ;;  %v1574_v38 = vshll.u32 %v4502_v14, 16 }
  0x7f   : > { %v3613_v60 = vcombine.low %v853_v30, %v867_v35  ;;  %v839_v63 = vsel %vm4153_vm5, %v834_v34, %v838_v37  ;;  %v1558_v57 = vrot.slane %v1557_v33, 4  ;;  %v1562_v0 = vrot.slane %v1560_v12, 5  ;;  %v1636_v30 = vld [vmem:[%s4055_s9 + $0x10] sm:$0xe] }
  0x80   : > { %v3612_v31 = vcombine.low %v825_v22, %v839_v63  ;;  %v1572_v2 = vrot.slane %v1571_v40, 4  ;;  %v1339_v3 = vshrl.u32 %v3479_v59, 16  ;;  %v1576_v51 = vrot.slane %v1574_v38, 5  ;;  %v3427_v37 = vld [vmem:[%s4018_s15 + $0x30] sm:$0xe] }
  0x81   : > { %2232 = vrot.lane.b32.xlu1 %v3613_v60, %s3921_s28  ;;  %v1342_v55 = vshll.u32 %v3479_v59, 16  ;;  %v1353_v11 = vshrl.u32 %v3480_v43, 16  ;;  %v1356_v4 = vshll.u32 %v3480_v43, 16  ;;  %v1563_v13 = vsel %vm4153_vm5, %v1558_v57, %v1562_v0  ;;  %v3428_v40 = vld [vmem:[%s4018_s15 + $0x38] sm:$0xe] }
  0x82   : > { %2230 = vrot.lane.b32.xlu0 %v3612_v31, %s3921_s28  ;;  %v1341_v19 = vrot.slane %v1339_v3, 4  ;;  %v3643_v47 = vcombine.low %v3479_v59, %v3480_v43  ;;  %v3433_v8 = vrot.slane %v3425_v9, 9  ;;  %v1577_v23 = vsel %vm4153_vm5, %v1572_v2, %v1576_v51  ;;  %v398_v9 = vld [vmem:[%s4018_s15 + $0x30] sm:$0xf]  ;;  %v399_v51 = vld [vmem:[%s4018_s15 + $0x38] sm:$0xf] }
  0x83   : > { %v1344_v24 = vrot.slane %v1342_v55, 5  ;;  %v1355_v25 = vrot.slane %v1353_v11, 4  ;;  %v1358_v27 = vrot.slane %v1356_v4, 5  ;;  %v3660_v39 = vcombine.low %v1563_v13, %v1577_v23 }
  0x84   : > { %v930_v41 = vrot.slane %v4474_v10, 5  ;;  %v3434_v36 = vrot.slane %v3426_v62, 9  ;;  %v934_v49 = vrot.slane %v4483_v5, 5  ;;  %v1585_v53 = vor.u32 %v4478_v15, %v4476_v1  ;;  %v1637_v15 = vld [vmem:[%s4055_s9 + $0x18] sm:$0xe] }
  0x85   : > { %v1345_v21 = vor.u32 %v1344_v24, %v1341_v19  ;;  %v1359_v52 = vor.u32 %v1358_v27, %v1355_v25  ;;  %v1588_v7 = vshll.u32 %v4528_v17, 16  ;;  %2637 = vrot.lane.b32.xlu1 %v3660_v39, %s3915_s18  ;;  %v1599_v34 = vor.u32 %v4486_v6, %v4480_v16  ;;  %v4576_v62 = vld [vmem:[%s4018_s15 + $0x3c] sm:$0x1] }
  0x86   : > { %2412 = vrot.lane.b32.xlu0 %v3643_v47, %s3928_s12  ;;  %v931_v10 = vsel %vm4043_vm2, %v3433_v8, %v930_v41  ;;  %v935_v5 = vsel %vm4043_vm2, %v3434_v36, %v934_v49  ;;  %v1602_v1 = vshll.u32 %v4533_v29, 16  ;;  %v1586_v12 = vrot.slane %v1585_v53, 4  ;;  %v1638_v8 = vld [vmem:[%s4055_s9 + $0x20] sm:$0xe] }
  0x87   : > { %v4552_v33 = vrot.slane %v1345_v21, 4  ;;  %v4554_v35 = vrot.slane %v1359_v52, 4  ;;  %v3616_v22 = vcombine.low %v931_v10, %v935_v5  ;;  %v1590_v59 = vrot.slane %v1588_v7, 5 }
  0x88   : > { %v1600_v60 = vrot.slane %v1599_v34, 4  ;;  %v1604_v63 = vrot.slane %v1602_v1, 5  ;;  %v3513_v57 = vrot.slane %v1636_v30, 9  ;;  %v1668_v16 = vrot.slane %v4499_v61, 5  ;;  %v4568_v61 = vld [vmem:[%s4018_s15 + $0x34] sm:$0x1] }
  0x89   : > { %v3514_v6 = vrot.slane %v1637_v15, 9  ;;  %v1672_v38 = vrot.slane %v4502_v14, 5  ;;  %v3435_v43 = vrot.slane %v3427_v37, 9  ;;  %2250 = vrot.lane.b32.xlu1 %v3616_v22, %s3920_s20  ;;  %v1591_v31 = vsel %vm4153_vm5, %v1586_v12, %v1590_v59  ;;  %v4590_v1 = vld [vmem:[%s4078_s29 + $0x20] sm:$0xf] }
  0x8a   : > { %v1605_v0 = vsel %vm4153_vm5, %v1600_v60, %v1604_v63  ;;  %v938_v2 = vrot.slane %v4463_v18, 5  ;;  %v3436_v3 = vrot.slane %v3428_v40, 9  ;;  %v1669_v14 = vsel %vm4043_vm2, %v3513_v57, %v1668_v16  ;;  %v957_v22 = vld [vmem:[%s4078_s29 + $0x28] sm:$0xf]  ;;  %v954_v16 = vld [vmem:[%s4078_s29 + $0x10] sm:$0xf] }
  0x8b   : > { %v3661_v55 = vcombine.low %v1591_v31, %v1605_v0  ;;  %v1673_v11 = vsel %vm4043_vm2, %v3514_v6, %v1672_v38  ;;  %v942_v4 = vrot.slane %v4471_v42, 5  ;;  %v496_v19 = vshrl.u32 %v398_v9, 16  ;;  %v1639_v42 = vld [vmem:[%s4055_s9 + $0x28] sm:$0xe] }
  0x8c   : > { %v3664_v13 = vcombine.low %v1669_v14, %v1673_v11  ;;  %v939_v18 = vsel %vm4043_vm2, %v3435_v43, %v938_v2  ;;  %v499_v47 = vshll.u32 %v398_v9, 16  ;;  %v505_v24 = vshll.u32 %v4568_v61, 16  ;;  %v955_v9 = vld [vmem:[%s4078_s29 + $0x18] sm:$0xf] }
  0x8d   : > { %2639 = vrot.lane.b32.xlu0 %v3661_v55, %s3915_s18  ;;  %v943_v23 = vsel %vm4043_vm2, %v3436_v3, %v942_v4  ;;  %v510_v25 = vshrl.u32 %v399_v51, 16  ;;  %v513_v27 = vshll.u32 %v399_v51, 16  ;;  %v498_v41 = vrot.slane %v496_v19, 4  ;;  %v3523_v4 = vld [vmem:[%s4055_s9 + $0x28] sm:$0xf] }
  0x8e   : > { %2657 = vrot.lane.b32.xlu1 %v3664_v13, %s3919_s19  ;;  %v3617_v39 = vcombine.low %v939_v18, %v943_v23  ;;  %v501_v36 = vrot.slane %v499_v47, 5  ;;  %v519_v49 = vshll.u32 %v4576_v62, 16  ;;  %v507_v21 = vrot.slane %v505_v24, 5  ;;  %v4597_v59 = vpop.permute.xlu1 %2140  ;;  %v4619_v13 = vpop.permute.xlu0 %2208  ;;  %v3524_v23 = vld [vmem:[%s4055_s9 + $0x30] sm:$0xf] }
  0x8f   : > { %v512_v52 = vrot.slane %v510_v25, 4  ;;  %v515_v53 = vrot.slane %v513_v27, 5  ;;  %v3515_v7 = vrot.slane %v1638_v8, 9  ;;  %v1676_v5 = vrot.slane %v4528_v17, 5  ;;  %v3521_v24 = vld [vmem:[%s4055_s9 + $0x18] sm:$0xf] }
  0x90   : > { %v502_v30 = vor.u32 %v501_v36, %v498_v41  ;;  %v521_v10 = vrot.slane %v519_v49, 5  ;;  %v3516_v34 = vrot.slane %v1639_v42, 9  ;;  %v1680_v37 = vrot.slane %v4533_v29, 5  ;;  %v3522_v41 = vld [vmem:[%s4055_s9 + $0x20] sm:$0xf] }
  0x91   : > { %2252 = vrot.lane.b32.xlu0 %v3617_v39, %s3920_s20  ;;  %v516_v15 = vor.u32 %v515_v53, %v512_v52  ;;  %v1025_v12 = vshrl.u32 %v4590_v1, 16  ;;  %v1028_v40 = vshll.u32 %v4590_v1, 16  ;;  %v1677_v17 = vsel %vm4043_vm2, %v3515_v7, %v1676_v5  ;;  %v4629_v7 = vld [vmem:[%s4078_s29 + $0x14] sm:$0x1] }
  0x92   : > { %v503_v60 = vrot.slane %v502_v30, 4  ;;  %v1039_v63 = vshrl.u32 %v957_v22, 16  ;;  %v1042_v57 = vshll.u32 %v957_v22, 16  ;;  %v1681_v38 = vsel %vm4043_vm2, %v3516_v34, %v1680_v37 }
  0x93   : > { %v517_v6 = vrot.slane %v516_v15, 4  ;;  %v4604_v29 = vrot.slane %v1025_v12, 4  ;;  %v4606_v43 = vrot.slane %v1028_v40, 5  ;;  %v3665_v0 = vcombine.low %v1677_v17, %v1681_v38  ;;  %v529_v40 = vld [vmem:[%s4018_s15 + $0x30] sm:$0xe] }
  0x94   : > { %v508_v31 = vsel %vm4153_vm5, %v503_v60, %v507_v21  ;;  %v4611_v2 = vrot.slane %v1039_v63, 4  ;;  %v4613_v3 = vrot.slane %v1042_v57, 5  ;;  %v3621_v55 = vcombine.low %v4590_v1, %v957_v22  ;;  %v4636_v1 = vld [vmem:[%s4078_s29 + $0x1c] sm:$0x1] }
  0x95   : > { %v522_v51 = vsel %vm4153_vm5, %v517_v6, %v521_v10  ;;  %v997_v14 = vshrl.u32 %v954_v16, 16  ;;  %v1000_v11 = vshll.u32 %v954_v16, 16  ;;  %2659 = vrot.lane.b32.xlu0 %v3665_v0, %s3919_s19  ;;  %v1011_v19 = vshrl.u32 %v955_v9, 16 }
  0x96   : > { %v3590_v18 = vcombine.low %v508_v31, %v522_v51  ;;  %v1014_v47 = vshll.u32 %v955_v9, 16  ;;  %v3620_v8 = vcombine.low %v954_v16, %v955_v9  ;;  %v1764_v42 = vshrl.u32 %v3523_v4, 16  ;;  %v4625_v36 = vpop.permute.xlu1 %2615  ;;  %v530_v16 = vld [vmem:[%s4018_s15 + $0x38] sm:$0xe]  ;;  %v4650_v51 = vld [vmem:[%s4055_s9 + $0x1c] sm:$0x1] }
  0x97   : > { %v999_v25 = vrot.slane %v997_v14, 4  ;;  %v1002_v27 = vrot.slane %v1000_v11, 5  ;;  %v1767_v39 = vshll.u32 %v3523_v4, 16  ;;  %v1013_v49 = vrot.slane %v1011_v19, 4  ;;  %v4645_v6 = vpop.permute.xlu0 %2112  ;;  %v4654_v19 = vld [vmem:[%s4055_s9 + $0x24] sm:$0x1] }
  0x98   : > { %2098 = vrot.lane.b32.xlu1 %v3590_v18, %s3917_s14  ;;  %v1016_v21 = vrot.slane %v1014_v47, 5  ;;  %v1778_v52 = vshrl.u32 %v3524_v23, 16  ;;  %v1781_v53 = vshll.u32 %v3524_v23, 16  ;;  %v4631_v30 = vrot.slane %v1764_v42, 4 }
  0x99   : > { %v4633_v10 = vrot.slane %v1767_v39, 5  ;;  %v3669_v5 = vcombine.low %v3523_v4, %v3524_v23  ;;  %v1736_v34 = vshrl.u32 %v3521_v24, 16  ;;  %2278 = vrot.lane.b32.xlu0 %v3620_v8, %s3922_s30  ;;  %v1739_v22 = vshll.u32 %v3521_v24, 16 }
  0x9a   : > { %v4639_v15 = vrot.slane %v1778_v52, 4  ;;  %v4641_v37 = vrot.slane %v1781_v53, 5  ;;  %v1750_v12 = vshrl.u32 %v3522_v41, 16  ;;  %v1753_v17 = vshll.u32 %v3522_v41, 16  ;;  %v4669_v52 = vld [vmem:[%s4078_s29 + $0x24] sm:$0x1] }
  0x9b   : > { %v1738_v60 = vrot.slane %v1736_v34, 4  ;;  %v3668_v63 = vcombine.low %v3521_v24, %v3522_v41  ;;  %v1003_v57 = vor.u32 %v1002_v27, %v999_v25  ;;  %v1741_v38 = vrot.slane %v1739_v22, 5  ;;  %v4676_v22 = vld [vmem:[%s4078_s29 + $0x2c] sm:$0x1] }
  0x9c   : > { %2280 = vrot.lane.b32.xlu1 %v3621_v55, %s3922_s30  ;;  %v1752_v9 = vrot.slane %v1750_v12, 4  ;;  %v1006_v31 = vshll.u32 %v4629_v7, 16  ;;  %v1017_v0 = vor.u32 %v1016_v21, %v1013_v49  ;;  %v1755_v14 = vrot.slane %v1753_v17, 5  ;;  %v4656_v47 = vpop.permute.xlu1 %2587 }
  0x9d   : > { %v1004_v11 = vrot.slane %v1003_v57, 4  ;;  %v1020_v4 = vshll.u32 %v4636_v1, 16  ;;  %v3373_v18 = vrot.slane %v529_v40, 9  ;;  %2685 = vrot.lane.b32.xlu0 %v3668_v63, %s3918_s17  ;;  %v576_v23 = vrot.slane %v4568_v61, 5  ;;  %v4678_v12 = vpop.permute.xlu0 %2180  ;;  %v3381_v57 = vld [vmem:[%s4018_s15 + $0x38] sm:$0xf] }
  0x9e   : > { %v1008_v55 = vrot.slane %v1006_v31, 5  ;;  %v1018_v8 = vrot.slane %v1017_v0, 4  ;;  %v3374_v24 = vrot.slane %v530_v16, 9  ;;  %v580_v27 = vrot.slane %v4576_v62, 5  ;;  %v3382_v0 = vld [vmem:[%s4018_s15 + $0x40] sm:$0xf] }
  0x9f   : > { %v1022_v25 = vrot.slane %v1020_v4, 5  ;;  %v1742_v42 = vor.u32 %v1741_v38, %v1738_v60  ;;  %v1745_v39 = vshll.u32 %v4650_v51, 16  ;;  %v577_v49 = vsel %vm4043_vm2, %v3373_v18, %v576_v23  ;;  %v4697_v18 = vld [vmem:[%s4055_s9 + $0x2c] sm:$0x1]  ;;  %v4700_v23 = vld [vmem:[%s4055_s9 + $0x34] sm:$0x1] }
  0xa0   : > { %2687 = vrot.lane.b32.xlu1 %v3669_v5, %s3918_s17  ;;  %v1009_v41 = vsel %vm4153_vm5, %v1004_v11, %v1008_v55  ;;  %v1756_v21 = vor.u32 %v1755_v14, %v1752_v9  ;;  %v1759_v61 = vshll.u32 %v4654_v19, 16  ;;  %v581_v53 = vsel %vm4043_vm2, %v3374_v24, %v580_v27  ;;  %v4689_v14 = vpop.permute.xlu1 %2655 }
  0xa1   : > { %v1023_v62 = vsel %vm4153_vm5, %v1018_v8, %v1022_v25  ;;  %v1743_v5 = vrot.slane %v1742_v42, 4  ;;  %v1747_v34 = vrot.slane %v1745_v39, 5  ;;  %v3594_v60 = vcombine.low %v577_v49, %v581_v53  ;;  %v1084_v39 = vld [vmem:[%s4078_s29 + $0x20] sm:$0xe]  ;;  %v4712_v53 = vpop.permute.xlu0 %2248 }
  0xa2   : > { %v3624_v40 = vcombine.low %v1009_v41, %v1023_v62  ;;  %v1757_v17 = vrot.slane %v1756_v21, 4  ;;  %v1761_v63 = vrot.slane %v1759_v61, 5  ;;  %v1031_v38 = vor.u32 %v4606_v43, %v4604_v29  ;;  %v1085_v62 = vld [vmem:[%s4078_s29 + $0x28] sm:$0xe] }
  0xa3   : > { %v1748_v16 = vsel %vm4153_vm5, %v1743_v5, %v1747_v34  ;;  %v1034_v9 = vshll.u32 %v4669_v52, 16  ;;  %v1045_v31 = vor.u32 %v4613_v3, %v4611_v2  ;;  %2118 = vrot.lane.b32.xlu0 %v3594_v60, %s3916_s13  ;;  %v1048_v4 = vshll.u32 %v4676_v22, 16 }
  0xa4   : > { %2298 = vrot.lane.b32.xlu1 %v3624_v40, %s3923_s7  ;;  %v1762_v11 = vsel %vm4153_vm5, %v1757_v17, %v1761_v63  ;;  %v684_v29 = vshrl.u32 %v3381_v57, 16  ;;  %v687_v43 = vshll.u32 %v3381_v57, 16  ;;  %v1032_v2 = vrot.slane %v1031_v38, 4  ;;  %v1082_v17 = vld [vmem:[%s4078_s29 + $0x10] sm:$0xe]  ;;  %v4727_v38 = vpop.permute.xlu1 %2160 }
  0xa5   : > { %v3672_v55 = vcombine.low %v1748_v16, %v1762_v11  ;;  %v1036_v3 = vrot.slane %v1034_v9, 5  ;;  %v1046_v8 = vrot.slane %v1045_v31, 4  ;;  %v1050_v24 = vrot.slane %v1048_v4, 5  ;;  %v1083_v16 = vld [vmem:[%s4078_s29 + $0x18] sm:$0xe] }
  0xa6   : > { %v4702_v25 = vrot.slane %v684_v29, 4  ;;  %v4704_v27 = vrot.slane %v687_v43, 5  ;;  %v698_v42 = vshrl.u32 %v3382_v0, 16  ;;  %v701_v49 = vshll.u32 %v3382_v0, 16  ;;  %v3539_v43 = vld [vmem:[%s4055_s9 + $0x28] sm:$0xe] }
  0xa7   : > { %v1037_v41 = vsel %vm4153_vm5, %v1032_v2, %v1036_v3  ;;  %v3598_v21 = vcombine.low %v3381_v57, %v3382_v0  ;;  %v1770_v61 = vor.u32 %v4633_v10, %v4631_v30  ;;  %v1051_v5 = vsel %vm4153_vm5, %v1046_v8, %v1050_v24 }
  0xa8   : > { %2705 = vrot.lane.b32.xlu1 %v3672_v55, %s3914_s16  ;;  %v4717_v34 = vrot.slane %v698_v42, 4  ;;  %v1773_v40 = vshll.u32 %v4697_v18, 16  ;;  %v1784_v60 = vor.u32 %v4641_v37, %v4639_v15  ;;  %v3625_v63 = vcombine.low %v1037_v41, %v1051_v5  ;;  %v3538_v5 = vld [vmem:[%s4055_s9 + $0x20] sm:$0xe] }
  0xa9   : > { %v4723_v57 = vrot.slane %v701_v49, 5  ;;  %v1771_v30 = vrot.slane %v1770_v61, 4  ;;  %v1787_v10 = vshll.u32 %v4700_v23, 16  ;;  %v3443_v0 = vrot.slane %v1084_v39, 9  ;;  %v3540_v39 = vld [vmem:[%s4055_s9 + $0x30] sm:$0xe] }
  0xaa   : > { %v1775_v9 = vrot.slane %v1773_v40, 5  ;;  %v1785_v31 = vrot.slane %v1784_v60, 4  ;;  %v1122_v11 = vrot.slane %v4669_v52, 5  ;;  %2300 = vrot.lane.b32.xlu0 %v3625_v63, %s3923_s7  ;;  %v3444_v37 = vrot.slane %v1085_v62, 9  ;;  %v3537_v62 = vld [vmem:[%s4055_s9 + $0x18] sm:$0xe]  ;;  %v4760_v40 = vpop.permute.xlu1 %2635 }
  0xab   : > { %v1789_v15 = vrot.slane %v1787_v10, 5  ;;  %v1126_v4 = vrot.slane %v4676_v22, 5  ;;  %v3441_v29 = vrot.slane %v1082_v17, 9  ;;  %v1114_v52 = vrot.slane %v4629_v7, 5  ;;  %v4747_v41 = vpop.permute.xlu0 %2092  ;;  %v3449_v63 = vld [vmem:[%s4078_s29 + $0x18] sm:$0xf] }
  0xac   : > { %2146 = vrot.lane.b32.xlu1 %v3598_v21, %s3915_s18  ;;  %v1776_v55 = vsel %vm4153_vm5, %v1771_v30, %v1775_v9  ;;  %v1123_v2 = vsel %vm4043_vm2, %v3443_v0, %v1122_v11  ;;  %v3442_v3 = vrot.slane %v1083_v16, 9  ;;  %v1118_v24 = vrot.slane %v4636_v1, 5  ;;  %v3450_v9 = vld [vmem:[%s4078_s29 + $0x20] sm:$0xf] }
  0xad   : > { %v1790_v8 = vsel %vm4153_vm5, %v1785_v31, %v1789_v15  ;;  %v1127_v22 = vsel %vm4043_vm2, %v3444_v37, %v1126_v4  ;;  %v1350_v42 = vrot.slane %v1348_v20, 5  ;;  %v1115_v7 = vsel %vm4043_vm2, %v3441_v29, %v1114_v52 }
  0xae   : > { %v3673_v49 = vcombine.low %v1776_v55, %v1790_v8  ;;  %v3629_v21 = vcombine.low %v1123_v2, %v1127_v22  ;;  %v1364_v61 = vrot.slane %v1362_v28, 5  ;;  %v1119_v1 = vsel %vm4043_vm2, %v3442_v3, %v1118_v24  ;;  %v4794_v55 = vld [vmem:[%s4018_s15 + $0x44] sm:$0x1] }
  0xaf   : > { %v1351_v56 = vsel %vm4153_vm5, %v4552_v33, %v1350_v42  ;;  %v3547_v20 = vrot.slane %v3539_v43, 9  ;;  %v3628_v58 = vcombine.low %v1115_v7, %v1119_v1  ;;  %v1861_v60 = vrot.slane %v4697_v18, 5  ;;  %v4786_v4 = vpop.permute.xlu0 %2228 }
  0xb0   : > { %2707 = vrot.lane.b32.xlu0 %v3673_v49, %s3914_s16  ;;  %2320 = vrot.lane.b32.xlu1 %v3629_v21, %s5655_s8  ;;  %v1365_v28 = vsel %vm4153_vm5, %v4554_v35, %v1364_v61  ;;  %v3548_v17 = vrot.slane %v3540_v39, 9  ;;  %v1865_v33 = vrot.slane %v4700_v23, 5  ;;  %v3545_v10 = vrot.slane %v3537_v62, 9  ;;  %v4776_v35 = vld [vmem:[%s4018_s15 + $0x3c] sm:$0x1] }
  0xb1   : > { %v3647_v30 = vcombine.low %v1351_v56, %v1365_v28  ;;  %v1853_v16 = vrot.slane %v4650_v51, 5  ;;  %v1862_v31 = vsel %vm4043_vm2, %v3547_v20, %v1861_v60  ;;  %v3546_v0 = vrot.slane %v3538_v5, 9  ;;  %v3866_v61 = vld [vmem:[%s4018_s15] sm:$0xf]  ;;  %v3867_v62 = vld [vmem:[%s4018_s15 + $0x8] sm:$0xf] }
  0xb2   : > { %v1857_v11 = vrot.slane %v4654_v19, 5  ;;  %v1182_v15 = vshrl.u32 %v3449_v63, 16  ;;  %v1866_v23 = vsel %vm4043_vm2, %v3548_v17, %v1865_v33  ;;  %v1185_v37 = vshll.u32 %v3449_v63, 16 }
  0xb3   : > { %v4780_v18 = vsel %vm2420_vm6, %v3647_v30, %v4656_v47  ;;  %v1854_v51 = vsel %vm4043_vm2, %v3545_v10, %v1853_v16  ;;  %v1404_v29 = vshll.u32 %v4394_v46, 16  ;;  %v1418_v19 = vshll.u32 %v4401_v48, 16  ;;  %v3452_v16 = vld [vmem:[%s4078_s29 + $0x30] sm:$0xf]  ;;  %v5345_v46 = vld [vmem:[%s4055_s9 + $0x44] sm:$0x1] }
  0xb4   : > { %2318 = vrot.lane.b32.xlu0 %v3628_v58, %s5655_s8  ;;  %v3677_v43 = vcombine.low %v1862_v31, %v1866_v23  ;;  %v1858_v47 = vsel %vm4043_vm2, %v3546_v0, %v1857_v11  ;;  %v4796_v52 = vrot.slane %v1182_v15, 4  ;;  %v1196_v3 = vshrl.u32 %v3450_v9, 16 }
  0xb5   : > { %v3676_v2 = vcombine.low %v1854_v51, %v1858_v47  ;;  %v1199_v8 = vshll.u32 %v3450_v9, 16  ;;  %v4798_v22 = vpop.permute.xlu1 %2096  ;;  %v3632_v24 = vcombine.low %v3449_v63, %v3450_v9  ;;  %v690_v42 = vor.u32 %v4704_v27, %v4702_v25  ;;  %v3553_v27 = vld [vmem:[%s4055_s9 + $0x20] sm:$0xf] }
  0xb6   : > { %2727 = vrot.lane.b32.xlu1 %v3677_v43, %s3921_s28  ;;  %v693_v39 = vshll.u32 %v4776_v35, 16  ;;  %v704_v49 = vor.u32 %v4723_v57, %v4717_v34  ;;  %v4806_v21 = vrot.slane %v1185_v37, 5  ;;  %v707_v7 = vshll.u32 %v4794_v55, 16  ;;  %v3554_v57 = vld [vmem:[%s4055_s9 + $0x28] sm:$0xf] }
  0xb7   : > { %v3583_v5 = vcombine.low %v3866_v61, %v3867_v62  ;;  %v691_v1 = vrot.slane %v690_v42, 4  ;;  %v1921_v58 = vshrl.u32 %v3553_v27, 16  ;;  %v1924_v28 = vshll.u32 %v3553_v27, 16  ;;  %v3397_v42 = vld [vmem:[%s4018_s15 + $0x38] sm:$0xe] }
  0xb8   : > { %2725 = vrot.lane.b32.xlu0 %v3676_v2, %s3921_s28  ;;  %v695_v56 = vrot.slane %v693_v39, 5  ;;  %v705_v25 = vrot.slane %v704_v49, 4  ;;  %v709_v20 = vrot.slane %v707_v7, 5  ;;  %v4816_v60 = vpop.permute.xlu0 %2094  ;;  %v4820_v63 = vrot.slane %v1196_v3, 4  ;;  %v3398_v39 = vld [vmem:[%s4018_s15 + $0x40] sm:$0xe] }
  0xb9   : > { %v2423_v34 = vsel %vm2420_vm6, %v3583_v5, %v4747_v41  ;;  %v4818_v17 = vpop.permute.xlu1 %2683  ;;  %v4822_v30 = vrot.slane %v1199_v8, 5  ;;  %v3451_v41 = vld [vmem:[%s4078_s29 + $0x28] sm:$0xf]  ;;  %v1935_v0 = vshrl.u32 %v3554_v57, 16  ;;  %v1938_v11 = vshll.u32 %v3554_v57, 16 }
  0xba   : > { %2346 = vrot.lane.b32.xlu1 %v3632_v24, %s5654_s10  ;;  %v696_v33 = vsel %vm4153_vm5, %v691_v1, %v695_v56  ;;  %v2435_v10 = vsel %vm2433_vm7, %v2423_v34, %v4645_v6  ;;  %v710_v9 = vsel %vm4153_vm5, %v705_v25, %v709_v20  ;;  %v4835_v23 = vrot.slane %v1921_v58, 4  ;;  %v3555_v56 = vld [vmem:[%s4055_s9 + $0x30] sm:$0xf]  ;;  %v3556_v20 = vld [vmem:[%s4055_s9 + $0x38] sm:$0xf] }
  0xbb   : > { %v2444_v31 = vsel %vm2442_vm8, %v2435_v10, %v4597_v59  ;;  %v3602_v15 = vcombine.low %v696_v33, %v710_v9  ;;  %v4837_v51 = vrot.slane %v1924_v28, 5  ;;  %v3680_v37 = vcombine.low %v3553_v27, %v3554_v57 }
  0xbc   : > { %v1210_v43 = vshrl.u32 %v3451_v41, 16  ;;  %v1213_v6 = vshll.u32 %v3451_v41, 16  ;;  %v1224_v47 = vshrl.u32 %v3452_v16, 16  ;;  %v1227_v2 = vshll.u32 %v3452_v16, 16  ;;  %v4839_v3 = vpop.permute.xlu0 %2276 }
  0xbd   : > { %v4841_v8 = vpop.permute.xlu1 %2116  ;;  %2166 = vrot.lane.b32.xlu0 %v3602_v15, %s3919_s19  ;;  %v3633_v59 = vcombine.low %v3451_v41, %v3452_v16  ;;  %v2812_v24 = vsel %vm2433_vm7, %v4780_v18, %v4625_v36  ;;  %v4850_v49 = vrot.slane %v1935_v0, 4  ;;  %v2453_v1 = vsel %vm2451_vm9, %v2444_v31, %v4727_v38  ;;  %v4872_v16 = vld [vmem:[%s4078_s29 + $0x2c] sm:$0x1]  ;;  %v4881_v0 = vld [vmem:[%s4078_s29 + $0x34] sm:$0x1] }
  0xbe   : > { %2753 = vrot.lane.b32.xlu1 %v3680_v37, %s3920_s20  ;;  %v1212_v7 = vrot.slane %v1210_v43, 4  ;;  %v1215_v61 = vrot.slane %v1213_v6, 5  ;;  %v1226_v62 = vrot.slane %v1224_v47, 4  ;;  %v1229_v5 = vrot.slane %v1227_v2, 5 }
  0xbf   : > { %v2462_v36 = vsel %vm5658_vm10, %v2453_v1, %v4678_v12  ;;  %v3405_v18 = vrot.slane %v3397_v42, 9  ;;  %v761_v25 = vrot.slane %v4776_v35, 5  ;;  %v3406_v27 = vrot.slane %v3398_v39, 9  ;;  %v3868_v42 = vld [vmem:[%s4018_s15 + $0x20] sm:$0xf] }
  0xc0   : > { %v4859_v34 = vpop.permute.xlu0 %2114  ;;  %v2471_v38 = vsel %vm2469_vm11, %v2462_v36, %v4619_v13  ;;  %v765_v58 = vrot.slane %v4794_v55, 5  ;;  %v1949_v12 = vshrl.u32 %v3555_v56, 16  ;;  %v1952_v28 = vshll.u32 %v3555_v56, 16  ;;  %v3869_v39 = vld [vmem:[%s4018_s15 + $0x28] sm:$0xf] }
  0xc1   : > { %v4861_v57 = vpop.permute.xlu1 %2703  ;;  %2348 = vrot.lane.b32.xlu0 %v3633_v59, %s5654_s10  ;;  %v2480_v35 = vsel %vm2478_vm12, %v2471_v38, %v4786_v4  ;;  %v762_v33 = vsel %vm4043_vm2, %v3405_v18, %v761_v25  ;;  %v1963_v10 = vshrl.u32 %v3556_v20, 16  ;;  %v1966_v41 = vshll.u32 %v3556_v20, 16  ;;  %v4884_v4 = vld [vmem:[%s4078_s29 + $0x1c] sm:$0x1]  ;;  %v4905_v36 = vld [vmem:[%s4078_s29 + $0x24] sm:$0x1] }
  0xc2   : > { %v4874_v9 = vrot.slane %v1938_v11, 5  ;;  %v2820_v31 = vsel %vm2442_vm8, %v2812_v24, %v4760_v40  ;;  %v766_v13 = vsel %vm4043_vm2, %v3406_v27, %v765_v58  ;;  %v3681_v55 = vcombine.low %v3555_v56, %v3556_v20  ;;  %v3870_v27 = vld [vmem:[%s4018_s15 + $0x10] sm:$0xf]  ;;  %s5665_s10 = smov 112  }
  0xc3   : > { %v3606_v15 = vcombine.low %v762_v33, %v766_v13  ;;  %v4886_v37 = vrot.slane %v1949_v12, 4  ;;  %v4888_v43 = vrot.slane %v1952_v28, 5  ;;  %v4890_v11 = vrot.slane %v1963_v10, 4  ;;  %v4924_v13 = vld [vmem:[%s4055_s9 + $0x24] sm:$0x1] }
  0xc4   : > { %v4892_v40 = vpop.permute.xlu0 %2296  ;;  %v4896_v47 = vrot.slane %v1966_v41, 5  ;;  %v1216_v2 = vor.u32 %v1215_v61, %v1212_v7  ;;  %v1219_v59 = vshll.u32 %v4872_v16, 16  ;;  %v1230_v24 = vor.u32 %v1229_v5, %v1226_v62  ;;  %v3871_v7 = vld [vmem:[%s4018_s15 + $0x18] sm:$0xf] }
  0xc5   : > { %v4894_v6 = vpop.permute.xlu1 %2144  ;;  %2755 = vrot.lane.b32.xlu0 %v3681_v55, %s3920_s20  ;;  %2186 = vrot.lane.b32.xlu1 %v3606_v15, %s3918_s17  ;;  %v3585_v1 = vcombine.low %v3868_v42, %v3869_v39  ;;  %v1233_v56 = vshll.u32 %v4881_v0, 16  ;;  %v1188_v18 = vor.u32 %v4806_v21, %v4796_v52  ;;  %v1191_v25 = vshll.u32 %v4884_v4, 16 }
  0xc6   : > { %v3584_v61 = vcombine.low %v3870_v27, %v3871_v7  ;;  %v1217_v20 = vrot.slane %v1216_v2, 4  ;;  %v1221_v62 = vrot.slane %v1219_v59, 5  ;;  %v1231_v5 = vrot.slane %v1230_v24, 4  ;;  %v4933_v2 = vld [vmem:[%s4055_s9 + $0x2c] sm:$0x1] }
  0xc7   : > { %v1235_v38 = vrot.slane %v1233_v56, 5  ;;  %v1189_v58 = vrot.slane %v1188_v18, 4  ;;  %v1193_v12 = vrot.slane %v1191_v25, 5  ;;  %v1202_v28 = vor.u32 %v4822_v30, %v4820_v63  ;;  %v3501_v56 = vld [vmem:[%s4078_s29 + $0x40] sm:$0xe] }
  0xc8   : > { %v4914_v33 = vpop.permute.xlu0 %2142  ;;  %v1222_v52 = vsel %vm4153_vm5, %v1217_v20, %v1221_v62  ;;  %v1205_v21 = vshll.u32 %v4905_v36, 16  ;;  %v2828_v41 = vsel %vm2451_vm9, %v2820_v31, %v4689_v14  ;;  %v2429_v63 = vsel %vm2420_vm6, %v3585_v1, %v4798_v22  ;;  %v3842_v14 = vld [vmem:[%s5648_s3] sm:$0xff]   ;;  %v4963_v25 = vld [vmem:[%s4078_s29 + $0x4c] sm:$0x1]  ;;  %v3502_v27 = vld [vmem:[%s4078_s29 + $0x48] sm:$0xe] }
  0xc9   : > { %v4916_v10 = vpop.permute.xlu1 %2723  ;;  %v1236_v30 = vsel %vm4153_vm5, %v1231_v5, %v1235_v38  ;;  %v1194_v55 = vsel %vm4153_vm5, %v1189_v58, %v1193_v12  ;;  %v1203_v15 = vrot.slane %v1202_v28, 4  ;;  %v2489_v24 = vsel %vm2487_vm13, %v2480_v35, %v4712_v53  ;;  %v4946_v1 = vld [vmem:[%s4078_s29 + $0x44] sm:$0x1] }
  0xca   : > { %v3637_v31 = vcombine.low %v1222_v52, %v1236_v30  ;;  %v1207_v59 = vrot.slane %v1205_v21, 5  ;;  %v2426_v22 = vsel %vm2420_vm6, %v3584_v61, %v4816_v60  ;;  %v1927_v42 = vor.u32 %v4837_v51, %v4835_v23  ;;  %v3413_v21 = vld [vmem:[%s4018_s15 + $0x40] sm:$0xf] }
  0xcb   : > { %v1930_v39 = vshll.u32 %v4924_v13, 16  ;;  %v4956_v35 = vsel %vm5658_vm10, %v2828_v41, %v4818_v17  ;;  %v3929_v60 = vmov 0   ;;  %v1941_v23 = vor.u32 %v4874_v9, %v4850_v49  ;;  %v3844_v17 = vld [vmem:[%s5648_s3 + $0x8] sm:$0xff]  }
  0xcc   : > { %v4949_v18 = vpop.permute.xlu0 %2316  ;;  %2368 = vrot.lane.b32.xlu1 %v3637_v31, %s3926_s11  ;;  %v1208_v53 = vsel %vm4153_vm5, %v1203_v15, %v1207_v59  ;;  %3010 = vmatprep.subr.bf16.mxu0 %v3929_v60  ;;  %v1944_v51 = vshll.u32 %v4933_v2, 16  ;;  %v4968_v61 = vsel %vm2496_vm14, %v2489_v24, %v4839_v3  ;;  %v1928_v20 = vrot.slane %v1927_v42, 4 }
  0xcd   : > { %v3636_v7 = vcombine.low %v1194_v55, %v1208_v53  ;;  %v1932_v62 = vrot.slane %v1930_v39, 5  ;;  %3011 = vmatpush1.bf16.msra.mxu0 %v3842_v14  ;;  %3728 = vmatprep.subr.bf16.mxu1 %v3929_v60  ;;  %v1942_v49 = vrot.slane %v1941_v23, 4  ;;  %v3509_v38 = vrot.slane %v3501_v56, 9  ;;  %v5005_v39 = vld [vmem:[%s4055_s9 + $0x3c] sm:$0x1] }
  0xce   : > { %v1946_v9 = vrot.slane %v1944_v51, 5  ;;  %v1500_v58 = vrot.slane %v4946_v1, 5  ;;  %3012 = vmatprep.subr.bf16.mxu0 %v3929_v60  ;;  %3742 = vmatpush1.bf16.msra.mxu1 %v3842_v14  ;;  %v3510_v12 = vrot.slane %v3502_v27, 9  ;;  %v1504_v28 = vrot.slane %v4963_v25, 5  ;;  %v3414_v14 = vld [vmem:[%s4018_s15 + $0x48] sm:$0xf] }
  0xcf   : > { %v4973_v5 = vpop.permute.xlu1 %2164  ;;  %2366 = vrot.lane.b32.xlu0 %v3636_v7, %s3926_s11  ;;  %v1933_v3 = vsel %vm4153_vm5, %v1928_v20, %v1932_v62  ;;  %v4984_v52 = vsel %vm2433_vm7, %v2429_v63, %v4841_v8  ;;  %3729 = vmatprep.subr.bf16.mxu1 %v3929_v60  ;;  %v4996_v15 = vsel %vm2433_vm7, %v2426_v22, %v4859_v34  ;;  %v869_v31 = vshrl.u32 %v3413_v21, 16  ;;  %v5000_v8 = vld [vmem:[%s4055_s9 + $0x34] sm:$0x1]  ;;  %v3467_v27 = vld [vmem:[%s4078_s29 + $0x28] sm:$0xe] }
  0xd0   : > { %v1947_v30 = vsel %vm4153_vm5, %v1942_v49, %v1946_v9  ;;  %v1501_v55 = vsel %vm4043_vm2, %v3509_v38, %v1500_v58  ;;  %v1505_v59 = vsel %vm4043_vm2, %v3510_v12, %v1504_v28  ;;  %v872_v24 = vshll.u32 %v3413_v21, 16  ;;  %v3845_v34 = vld [vmem:[%s5648_s3 + $0x10] sm:$0xff]  }
  0xd1   : > { %v4987_v41 = vpop.permute.xlu0 %2162  ;;  %v3684_v63 = vcombine.low %v1933_v3, %v1947_v30  ;;  %v883_v42 = vshrl.u32 %v3414_v14, 16  ;;  %3013 = vmatpush1.bf16.msra.mxu0 %v3844_v17  ;;  %v1432_v56 = vshll.u32 %v4946_v1, 16  ;;  %v1446_v53 = vshll.u32 %v4963_v25, 16  ;;  %v3468_v9 = vld [vmem:[%s4078_s29 + $0x30] sm:$0xe] }
  0xd2   : > { %v3654_v23 = vcombine.low %v1501_v55, %v1505_v59  ;;  %v886_v51 = vshll.u32 %v3414_v14, 16  ;;  %3014 = vmatprep.subr.bf16.mxu0 %v3929_v60  ;;  %3743 = vmatpush1.bf16.msra.mxu1 %v3844_v17  ;;  %v5017_v7 = vrot.slane %v869_v31, 4  ;;  %v3610_v20 = vcombine.low %v3413_v21, %v3414_v14  ;;  %v3466_v14 = vld [vmem:[%s4078_s29 + $0x20] sm:$0xe] }
  0xd3   : > { %v5010_v22 = vpop.permute.xlu1 %2751  ;;  %2773 = vrot.lane.b32.xlu1 %v3684_v63, %s3922_s30  ;;  %v1955_v62 = vor.u32 %v4888_v43, %v4886_v37  ;;  %v1958_v49 = vshll.u32 %v5000_v8, 16  ;;  %3730 = vmatprep.subr.bf16.mxu1 %v3929_v60  ;;  %v5027_v58 = vrot.slane %v872_v24, 5  ;;  %v5029_v17 = vrot.slane %v883_v42, 4  ;;  %v3465_v37 = vld [vmem:[%s4078_s29 + $0x18] sm:$0xe] }
  0xd4   : > { %2593 = vrot.lane.b32.xlu0 %v3654_v23, %s3917_s14  ;;  %v1969_v3 = vor.u32 %v4896_v47, %v4890_v11  ;;  %v1972_v12 = vshll.u32 %v5005_v39, 16  ;;  %v3847_v43 = vld [vmem:[%s5648_s3 + $0x18] sm:$0xff]   ;;  %v5038_v28 = vrot.slane %v886_v51, 5  ;;  %v3475_v55 = vrot.slane %v3467_v27, 9  ;;  %v3569_v51 = vld [vmem:[%s4055_s9 + $0x20] sm:$0xe] }
  0xd5   : > { %v5023_v38 = vpop.permute.xlu0 %2344  ;;  %v1956_v21 = vrot.slane %v1955_v62, 4  ;;  %v1960_v30 = vrot.slane %v1958_v49, 5  ;;  %3015 = vmatpush1.bf16.msra.mxu0 %v3845_v34  ;;  %v1307_v11 = vrot.slane %v4872_v16, 5  ;;  %v3476_v24 = vrot.slane %v3468_v9, 9  ;;  %v3570_v49 = vld [vmem:[%s4055_s9 + $0x28] sm:$0xe] }
  0xd6   : > { %v1970_v63 = vrot.slane %v1969_v3, 4  ;;  %v1974_v59 = vrot.slane %v1972_v12, 5  ;;  %3016 = vmatprep.subr.bf16.mxu0 %v3929_v60  ;;  %3744 = vmatpush1.bf16.msra.mxu1 %v3845_v34  ;;  %v1311_v42 = vrot.slane %v4881_v0, 5  ;;  %v3473_v23 = vrot.slane %v3465_v37, 9  ;;  %v3848_v37 = vld [vmem:[%s5648_s3 + $0x20] sm:$0xff]  }
  0xd7   : > { %v5041_v31 = vpop.permute.xlu1 %2184  ;;  %2214 = vrot.lane.b32.xlu1 %v3610_v20, %s3914_s16  ;;  %v1961_v47 = vsel %vm4153_vm5, %v1956_v21, %v1960_v30  ;;  %3731 = vmatprep.subr.bf16.mxu1 %v3929_v60  ;;  %v1308_v34 = vsel %vm4043_vm2, %v3475_v55, %v1307_v11  ;;  %v1299_v20 = vrot.slane %v4884_v4, 5  ;;  %v3474_v62 = vrot.slane %v3466_v14, 9  ;;  %v1513_v11 = vld [vmem:[%s4055_s9 + $0x38] sm:$0xf] }
  0xd8   : > { %v1975_v16 = vsel %vm4153_vm5, %v1970_v63, %v1974_v59  ;;  %v1312_v0 = vsel %vm4043_vm2, %v3476_v24, %v1311_v42  ;;  %v1303_v3 = vrot.slane %v4905_v36, 5  ;;  %v5065_v12 = vsel %vm2442_vm8, %v4984_v52, %v4894_v6  ;;  %v1512_v6 = vld [vmem:[%s4055_s9 + $0x30] sm:$0xf] }
  0xd9   : > { %v5050_v27 = vpop.permute.xlu0 %2182  ;;  %v3685_v9 = vcombine.low %v1961_v47, %v1975_v16  ;;  %3017 = vmatpush1.bf16.msra.mxu0 %v3847_v43  ;;  %v3641_v21 = vcombine.low %v1308_v34, %v1312_v0  ;;  %v1300_v30 = vsel %vm4043_vm2, %v3473_v23, %v1299_v20  ;;  %v5077_v36 = vsel %vm2442_vm8, %v4996_v15, %v4914_v33  ;;  %v5104_v16 = vld [vmem:[%s4018_s15 + $0x4c] sm:$0x1] }
  0xda   : > { %v3577_v55 = vrot.slane %v3569_v51, 9  ;;  %3018 = vmatprep.subr.bf16.mxu0 %v3929_v60  ;;  %3745 = vmatpush1.bf16.msra.mxu1 %v3847_v43  ;;  %v1304_v52 = vsel %vm4043_vm2, %v3474_v62, %v1303_v3  ;;  %v2038_v14 = vrot.slane %v4924_v13, 5  ;;  %v3578_v63 = vrot.slane %v3570_v49, 9  ;;  %v5101_v51 = vld [vmem:[%s4018_s15 + $0x44] sm:$0x1]  ;;  %v3851_v34 = vld [vmem:[%s5648_s3 + $0x28] sm:$0xff]  }
  0xdb   : > { %v5070_v4 = vpop.permute.xlu1 %2589  ;;  %2775 = vrot.lane.b32.xlu0 %v3685_v9, %s3922_s30  ;;  %v2042_v59 = vrot.slane %v4933_v2, 5  ;;  %3732 = vmatprep.subr.bf16.mxu1 %v3929_v60  ;;  %v3640_v33 = vcombine.low %v1300_v30, %v1304_v52  ;;  %v1607_v15 = vshrl.u32 %v1512_v6, 16  ;;  %v1610_v43 = vshll.u32 %v1512_v6, 16  ;;  %v3571_v49 = vld [vmem:[%s4055_s9 + $0x30] sm:$0xe] }
  0xdc   : > { %2388 = vrot.lane.b32.xlu1 %v3641_v21, %s5665_s10  ;;  %v1621_v47 = vshrl.u32 %v1513_v11, 16  ;;  %v5094_v13 = vsel %vm2469_vm11, %v4956_v35, %v4861_v57  ;;  %v2039_v2 = vsel %vm4043_vm2, %v3577_v55, %v2038_v14  ;;  %v1624_v23 = vshll.u32 %v1513_v11, 16  ;;  %v3572_v9 = vld [vmem:[%s4055_s9 + $0x38] sm:$0xe] }
  0xdd   : > { %v2043_v42 = vsel %vm4043_vm2, %v3578_v63, %v2042_v59  ;;  %3019 = vmatpush1.bf16.msra.mxu0 %v3848_v37  ;;  %v5112_v57 = vsel %vm2505_vm15, %v4968_v61, %v4892_v40  ;;  %v5114_v20 = vrot.slane %v1607_v15, 4  ;;  %v3658_v62 = vcombine.low %v1512_v6, %v1513_v11  ;;  %v3852_v63 = vld [vmem:[%s5648_s3 + $0x30] sm:$0xff]  }
  0xde   : > { %v5089_v24 = vpop.permute.xlu0 %2364  ;;  %v3688_v35 = vcombine.low %v2039_v2, %v2043_v42  ;;  %3020 = vmatprep.subr.bf16.mxu0 %v3929_v60  ;;  %3746 = vmatpush1.bf16.msra.mxu1 %v3848_v37  ;;  %v5120_v0 = vrot.slane %v1610_v43, 5  ;;  %v5122_v3 = vrot.slane %v1621_v47, 4  ;;  %v5124_v21 = vrot.slane %v1624_v23, 5 }
  0xdf   : > { %2386 = vrot.lane.b32.xlu0 %v3640_v33, %s5665_s10  ;;  %v875_v40 = vor.u32 %v5027_v58, %v5017_v7  ;;  %3733 = vmatprep.subr.bf16.mxu1 %v3929_v60  ;;  %v878_v37 = vshll.u32 %v5101_v51, 16  ;;  %v889_v30 = vor.u32 %v5038_v28, %v5029_v17  ;;  %v892_v55 = vshll.u32 %v5104_v16, 16  ;;  %v3483_v28 = vld [vmem:[%s4078_s29 + $0x30] sm:$0xf] }
  0xe0   : > { %2793 = vrot.lane.b32.xlu1 %v3688_v35, %s3923_s7  ;;  %v3579_v14 = vrot.slane %v3571_v49, 9  ;;  %v2046_v7 = vrot.slane %v5000_v8, 5  ;;  %v3580_v58 = vrot.slane %v3572_v9, 9  ;;  %v2050_v17 = vrot.slane %v5005_v39, 5  ;;  %v3484_v39 = vld [vmem:[%s4078_s29 + $0x38] sm:$0xf] }
  0xe1   : > { %v5128_v61 = vpop.permute.xlu1 %2771  ;;  %v876_v52 = vrot.slane %v875_v40, 4  ;;  %3021 = vmatpush1.bf16.msra.mxu0 %v3851_v34  ;;  %v880_v59 = vrot.slane %v878_v37, 5  ;;  %v890_v11 = vrot.slane %v889_v30, 4  ;;  %v894_v33 = vrot.slane %v892_v55, 5  ;;  %v3481_v9 = vld [vmem:[%s4078_s29 + $0x20] sm:$0xf] }
  0xe2   : > { %v5136_v6 = vpop.permute.xlu0 %2591  ;;  %3022 = vmatprep.subr.bf16.mxu0 %v3929_v60  ;;  %3747 = vmatpush1.bf16.msra.mxu1 %v3851_v34  ;;  %v2047_v8 = vsel %vm4043_vm2, %v3579_v14, %v2046_v7  ;;  %v5151_v15 = vsel %vm2451_vm9, %v5065_v12, %v4973_v5  ;;  %v5156_v43 = vsel %vm2451_vm9, %v5077_v36, %v4987_v41  ;;  %v1395_v47 = vshrl.u32 %v3483_v28, 16  ;;  %v3854_v41 = vld [vmem:[%s5648_s3 + $0x38] sm:$0xff]   ;;  %v3482_v40 = vld [vmem:[%s4078_s29 + $0x28] sm:$0xf] }
  0xe3   : > { %2621 = vrot.lane.b32.xlu0 %v3658_v62, %s3916_s13  ;;  %3734 = vmatprep.subr.bf16.mxu1 %v3929_v60  ;;  %v881_v42 = vsel %vm4153_vm5, %v876_v52, %v880_v59  ;;  %v895_v5 = vsel %vm4153_vm5, %v890_v11, %v894_v33  ;;  %v2051_v12 = vsel %vm4043_vm2, %v3580_v58, %v2050_v17  ;;  %v1398_v23 = vshll.u32 %v3483_v28, 16  ;;  %v3429_v11 = vld [vmem:[%s4018_s15 + $0x40] sm:$0xe] }
  0xe4   : > { %v3614_v34 = vcombine.low %v881_v42, %v895_v5  ;;  %v3689_v35 = vcombine.low %v2047_v8, %v2051_v12  ;;  %v1397_v62 = vrot.slane %v1395_v47, 4  ;;  %v1409_v49 = vshrl.u32 %v3484_v39, 16  ;;  %v3430_v12 = vld [vmem:[%s4018_s15 + $0x48] sm:$0xe] }
  0xe5   : > { %v5159_v2 = vpop.permute.xlu1 %2212  ;;  %3023 = vmatpush1.bf16.msra.mxu0 %v3852_v63  ;;  %v1400_v37 = vrot.slane %v1398_v23, 5  ;;  %v1412_v30 = vshll.u32 %v3484_v39, 16  ;;  %v3645_v55 = vcombine.low %v3483_v28, %v3484_v39  ;;  %v1367_v52 = vshrl.u32 %v3481_v9, 16  ;;  %v3856_v23 = vld [vmem:[%s5648_s3 + $0x40] sm:$0xff]  }
  0xe6   : > { %v5171_v36 = vpop.permute.xlu0 %2210  ;;  %3024 = vmatprep.subr.bf16.mxu0 %v3929_v60  ;;  %3748 = vmatpush1.bf16.msra.mxu1 %v3852_v63  ;;  %v5178_v14 = vrot.slane %v1409_v49, 4  ;;  %v1370_v7 = vshll.u32 %v3481_v9, 16  ;;  %v1381_v58 = vshrl.u32 %v3482_v40, 16  ;;  %v1384_v59 = vshll.u32 %v3482_v40, 16  ;;  %v5207_v49 = vld [vmem:[%s4055_s9 + $0x34] sm:$0x1] }
  0xe7   : > { %2234 = vrot.lane.b32.xlu1 %v3614_v34, %s3921_s28  ;;  %2795 = vrot.lane.b32.xlu0 %v3689_v35, %s3923_s7  ;;  %v1401_v17 = vor.u32 %v1400_v37, %v1397_v62  ;;  %v5183_v8 = vrot.slane %v1412_v30, 5  ;;  %v1369_v28 = vrot.slane %v1367_v52, 4  ;;  %v3644_v39 = vcombine.low %v3481_v9, %v3482_v40 }
  0xe8   : > { %3735 = vmatprep.subr.bf16.mxu1 %v3929_v60  ;;  %v2852_v63 = vsel %vm2478_vm12, %v5094_v13, %v4916_v10  ;;  %v1372_v47 = vrot.slane %v1370_v7, 5  ;;  %v1383_v42 = vrot.slane %v1381_v58, 4  ;;  %v1386_v5 = vrot.slane %v1384_v59, 5  ;;  %v958_v59 = vld [vmem:[%s4078_s29 + $0x30] sm:$0xf] }
  0xe9   : > { %v5181_v33 = vpop.permute.xlu1 %2617  ;;  %3025 = vmatpush1.bf16.msra.mxu0 %v3854_v41  ;;  %v5198_v35 = vsel %vm2514_vm0, %v5112_v57, %v4949_v18  ;;  %v5200_v62 = vrot.slane %v1401_v17, 4  ;;  %v5204_v10 = vsel %vm2487_vm13, %v2852_v63, %v5010_v22  ;;  %v3437_v13 = vrot.slane %v3429_v11, 9  ;;  %v5216_v22 = vld [vmem:[%s4055_s9 + $0x3c] sm:$0x1] }
  0xea   : > { %3026 = vmatprep.subr.bf16.mxu0 %v3929_v60  ;;  %3749 = vmatpush1.bf16.msra.mxu1 %v3854_v41  ;;  %v1415_v9 = vor.u32 %v5183_v8, %v5178_v14  ;;  %v1373_v18 = vor.u32 %v1372_v47, %v1369_v28  ;;  %v1387_v57 = vor.u32 %v1386_v5, %v1383_v42  ;;  %v946_v40 = vrot.slane %v5101_v51, 5 }
  0xeb   : > { %v5193_v34 = vpop.permute.xlu0 %2384  ;;  %2416 = vrot.lane.b32.xlu1 %v3645_v55, %s3928_s12  ;;  %2414 = vrot.lane.b32.xlu0 %v3644_v39, %s3928_s12  ;;  %v3438_v30 = vrot.slane %v3430_v12, 9  ;;  %v950_v41 = vrot.slane %v5104_v16, 5  ;;  %v1613_v52 = vor.u32 %v5120_v0, %v5114_v20  ;;  %v1616_v58 = vshll.u32 %v5207_v49, 16  ;;  %v3857_v16 = vld [vmem:[%s5648_s3 + $0x48] sm:$0xff]   ;;  %v959_v39 = vld [vmem:[%s4078_s29 + $0x38] sm:$0xf] }
  0xec   : > { %3736 = vmatprep.subr.bf16.mxu1 %v3929_v60  ;;  %v5224_v55 = vrot.slane %v1373_v18, 4  ;;  %v5226_v7 = vrot.slane %v1387_v57, 4  ;;  %v947_v51 = vsel %vm4043_vm2, %v3437_v13, %v946_v40  ;;  %v1627_v17 = vor.u32 %v5124_v21, %v5122_v3  ;;  %v1640_v3 = vld [vmem:[%s4055_s9 + $0x30] sm:$0xe]  ;;  %v1641_v40 = vld [vmem:[%s4055_s9 + $0x38] sm:$0xe] }
  0xed   : > { %v5218_v37 = vpop.permute.xlu1 %2791  ;;  %3027 = vmatpush1.bf16.msra.mxu0 %v3856_v23  ;;  %v951_v20 = vsel %vm4043_vm2, %v3438_v30, %v950_v41  ;;  %v1614_v0 = vrot.slane %v1613_v52, 4  ;;  %v1630_v28 = vshll.u32 %v5216_v22, 16  ;;  %v1618_v47 = vrot.slane %v1616_v58, 5  ;;  %v3859_v58 = vld [vmem:[%s5648_s3 + $0x50] sm:$0xff]  }
  0xee   : > { %3028 = vmatprep.subr.bf16.mxu0 %v3929_v60  ;;  %3750 = vmatpush1.bf16.msra.mxu1 %v3856_v23  ;;  %v3618_v63 = vcombine.low %v947_v51, %v951_v20  ;;  %v5247_v42 = vsel %vm5658_vm10, %v5151_v15, %v5041_v31  ;;  %v5252_v5 = vsel %vm5658_vm10, %v5156_v43, %v5050_v27  ;;  %v1628_v21 = vrot.slane %v1627_v17, 4  ;;  %v5265_v51 = vld [vmem:[%s4078_s29 + $0x34] sm:$0x1] }
  0xef   : > { %v5235_v11 = vpop.permute.xlu0 %2619  ;;  %3737 = vmatprep.subr.bf16.mxu1 %v3929_v60  ;;  %v1632_v12 = vrot.slane %v1630_v28, 5  ;;  %v1053_v23 = vshrl.u32 %v958_v59, 16  ;;  %v1056_v13 = vshll.u32 %v958_v59, 16  ;;  %v1619_v18 = vsel %vm4153_vm5, %v1614_v0, %v1618_v47 }
  0xf0   : > { %2254 = vrot.lane.b32.xlu1 %v3618_v63, %s3920_s20  ;;  %v1067_v31 = vshrl.u32 %v959_v39, 16  ;;  %v1070_v15 = vshll.u32 %v959_v39, 16  ;;  %v3622_v57 = vcombine.low %v958_v59, %v959_v39  ;;  %v3517_v52 = vrot.slane %v1640_v3, 9 }
  0xf1   : > { %3029 = vmatpush1.bf16.msra.mxu0 %v3857_v16  ;;  %v1633_v43 = vsel %vm4153_vm5, %v1628_v21, %v1632_v12  ;;  %v1055_v30 = vrot.slane %v1053_v23, 4  ;;  %v1058_v41 = vrot.slane %v1056_v13, 5  ;;  %v1684_v28 = vrot.slane %v5207_v49, 5  ;;  %v5290_v21 = vld [vmem:[%s4078_s29 + $0x3c] sm:$0x1] }
  0xf2   : > { %3030 = vmatprep.subr.bf16.mxu0 %v3929_v60  ;;  %3751 = vmatpush1.bf16.msra.mxu1 %v3857_v16  ;;  %v3662_v20 = vcombine.low %v1619_v18, %v1633_v43  ;;  %v1069_v0 = vrot.slane %v1067_v31, 4  ;;  %v1072_v17 = vrot.slane %v1070_v15, 5  ;;  %v3518_v39 = vrot.slane %v1641_v40, 9  ;;  %v3526_v12 = vld [vmem:[%s4055_s9 + $0x40] sm:$0xf]  ;;  %v3861_v23 = vld [vmem:[%s5648_s3 + $0x58] sm:$0xff]  }
  0xf3   : > { %v5260_v27 = vpop.permute.xlu1 %2232  ;;  %3738 = vmatprep.subr.bf16.mxu1 %v3929_v60  ;;  %v1688_v63 = vrot.slane %v5216_v22, 5  ;;  %v1378_v47 = vrot.slane %v1376_v32, 5  ;;  %v1392_v3 = vrot.slane %v1390_v50, 5  ;;  %v5283_v16 = vsel %vm2523_vm1, %v5198_v35, %v5023_v38  ;;  %v3525_v32 = vld [vmem:[%s4055_s9 + $0x38] sm:$0xf] }
  0xf4   : > { %v5271_v59 = vpop.permute.xlu0 %2230  ;;  %2641 = vrot.lane.b32.xlu0 %v3662_v20, %s3915_s18  ;;  %2282 = vrot.lane.b32.xlu1 %v3622_v57, %s3922_s30  ;;  %v1685_v49 = vsel %vm4043_vm2, %v3517_v52, %v1684_v28  ;;  %v1059_v22 = vor.u32 %v1058_v41, %v1055_v30  ;;  %v1062_v54 = vshll.u32 %v5265_v51, 16  ;;  %v1416_v44 = vrot.slane %v1415_v9, 4  ;;  %v1086_v52 = vld [vmem:[%s4078_s29 + $0x30] sm:$0xe]  ;;  %s3365_s18 = sshll.u32 %s5686_s22, 3 }
  0xf5   : > { %v1689_v50 = vsel %vm4043_vm2, %v3518_v39, %v1688_v63  ;;  %v1379_v38 = vsel %vm4153_vm5, %v5224_v55, %v1378_v47  ;;  %v1393_v35 = vsel %vm4153_vm5, %v5226_v7, %v1392_v3  ;;  %3031 = vmatpush1.bf16.msra.mxu0 %v3859_v58  ;;  %v1073_v31 = vor.u32 %v1072_v17, %v1069_v0  ;;  %v1087_v39 = vld [vmem:[%s4078_s29 + $0x38] sm:$0xe]  ;;  %v5329_v3 = vld [vmem:[%s4055_s9 + $0x3c] sm:$0x1]  ;;  %s388_s8 = sadd.s32 %s3365_s18, %s5692_s21 }
  0xf6   : > { %v3666_v14 = vcombine.low %v1685_v49, %v1689_v50  ;;  %v3648_v8 = vcombine.low %v1379_v38, %v1393_v35  ;;  %v1060_v9 = vrot.slane %v1059_v22, 4  ;;  %v1064_v18 = vrot.slane %v1062_v54, 5  ;;  %3032 = vmatprep.subr.bf16.mxu0 %v3929_v60  ;;  %3752 = vmatpush1.bf16.msra.mxu1 %v3859_v58  ;;  %v3862_v58 = vld [vmem:[%s5648_s3 + $0x60] sm:$0xff]   ;;  %s3366_s13 = sshll.u32 %s388_s8, 1 }
  0xf7   : > { %v5309_v13 = vpop.permute.xlu1 %2637  ;;  %v1076_v7 = vshll.u32 %v5290_v21, 16  ;;  %v1792_v15 = vshrl.u32 %v3525_v32, 16  ;;  %v1795_v57 = vshll.u32 %v3525_v32, 16  ;;  %3739 = vmatprep.subr.bf16.mxu1 %v3929_v60  ;;  %v1806_v30 = vshrl.u32 %v3526_v12, 16 }
  0xf8   : > { %v5312_v55 = vpop.permute.xlu0 %2412  ;;  %2661 = vrot.lane.b32.xlu0 %v3666_v14, %s3919_s19  ;;  %v5319_v40 = vsel %vm2420_vm6, %v3648_v8, %v5070_v4  ;;  %v1065_v43 = vsel %vm4153_vm5, %v1060_v9, %v1064_v18  ;;  %v1809_v41 = vshll.u32 %v3526_v12, 16  ;;  %v1074_v20 = vrot.slane %v1073_v31, 4  ;;  %v3453_v31 = vld [vmem:[%s4078_s29 + $0x38] sm:$0xf]  ;;  %s5667_s19 = smov 96  }
  0xf9   : > { %v1078_v0 = vrot.slane %v1076_v7, 5  ;;  %v1794_v17 = vrot.slane %v1792_v15, 4  ;;  %v1797_v28 = vrot.slane %v1795_v57, 5  ;;  %3033 = vmatpush1.bf16.msra.mxu0 %v3861_v23  ;;  %v1808_v4 = vrot.slane %v1806_v30, 4 }
  0xfa   : > { %v1811_v63 = vrot.slane %v1809_v41, 5  ;;  %v3670_v47 = vcombine.low %v3525_v32, %v3526_v12  ;;  %3034 = vmatprep.subr.bf16.mxu0 %v3929_v60  ;;  %3753 = vmatpush1.bf16.msra.mxu1 %v3861_v23  ;;  %v1406_v22 = vrot.slane %v1404_v29, 5  ;;  %v1420_v54 = vrot.slane %v1418_v19, 5 }
  0xfb   : > { %v1079_v49 = vsel %vm4153_vm5, %v1074_v20, %v1078_v0  ;;  %v3445_v50 = vrot.slane %v1086_v52, 9  ;;  %v5338_v38 = vpop.permute.xlu1 %2250  ;;  %3740 = vmatprep.subr.bf16.mxu1 %v3929_v60  ;;  %v1130_v35 = vrot.slane %v5265_v51, 5  ;;  %v3446_v12 = vrot.slane %v1087_v39, 9  ;;  %v3542_v39 = vld [vmem:[%s4055_s9 + $0x40] sm:$0xe] }
  0xfc   : > { %v3626_v32 = vcombine.low %v1065_v43, %v1079_v49  ;;  %2689 = vrot.lane.b32.xlu0 %v3670_v47, %s3918_s17  ;;  %v1134_v23 = vrot.slane %v5290_v21, 5  ;;  %v1407_v48 = vsel %vm4153_vm5, %v5200_v62, %v1406_v22  ;;  %v1421_v19 = vsel %vm4153_vm5, %v1416_v44, %v1420_v54  ;;  %v3454_v62 = vld [vmem:[%s4078_s29 + $0x40] sm:$0xf]  ;;  %v3541_v43 = vld [vmem:[%s4055_s9 + $0x38] sm:$0xe]  ;;  %s5666_s17 = smov 88  }
  0xfd   : > { %v1798_v14 = vor.u32 %v1797_v28, %v1794_v17  ;;  %v1801_v8 = vshll.u32 %v5329_v3, 16  ;;  %3035 = vmatpush1.bf16.msra.mxu0 %v3862_v58  ;;  %v3649_v51 = vcombine.low %v1407_v48, %v1421_v19  ;;  %v1131_v21 = vsel %vm4043_vm2, %v3445_v50, %v1130_v35  ;;  %v3462_v54 = vld [vmem:[%s4078_s29 + $0x44] sm:$0x1] }
  0xfe   : > { %2302 = vrot.lane.b32.xlu1 %v3626_v32, %s3923_s7  ;;  %v1135_v9 = vsel %vm4043_vm2, %v3446_v12, %v1134_v23  ;;  %v1812_v18 = vor.u32 %v1811_v63, %v1808_v4  ;;  %v1815_v57 = vshll.u32 %v5345_v46, 16  ;;  %3036 = vmatprep.subr.bf16.mxu0 %v3929_v60  ;;  %v5370_v52 = vsel %vm2469_vm11, %v5247_v42, %v5159_v2  ;;  %v3461_v63 = vld [vmem:[%s4078_s29 + $0x3c] sm:$0x1]  ;;  %v3557_v23 = vld [vmem:[%s4055_s9 + $0x40] sm:$0xf] }
  0xff   : > { %v5347_v29 = vpop.permute.xlu0 %2639  ;;  %v3630_v7 = vcombine.low %v1131_v21, %v1135_v9  ;;  %v1799_v15 = vrot.slane %v1798_v14, 4  ;;  %v1803_v44 = vrot.slane %v1801_v8, 5  ;;  %3754 = vmatpush1.bf16.msra.mxu1 %v3862_v58  ;;  %v2807_v30 = vsel %vm2420_vm6, %v3649_v51, %v5136_v6 }
 0x100   : > { %v1813_v41 = vrot.slane %v1812_v18, 4  ;;  %v5375_v20 = vsel %vm2469_vm11, %v5252_v5, %v5171_v36  ;;  %3741 = vmatprep.subr.bf16.mxu1 %v3929_v60  ;;  %v1817_v6 = vrot.slane %v1815_v57, 5  ;;  %v1238_v17 = vshrl.u32 %v3453_v31, 16  ;;  %v5383_v4 = vpop.permute.xlu1 %2657 }
 0x101   : > { %v1804_v58 = vsel %vm4153_vm5, %v1799_v15, %v1803_v44  ;;  %v1241_v28 = vshll.u32 %v3453_v31, 16  ;;  %v1252_v2 = vshrl.u32 %v3454_v62, 16  ;;  %v1255_v36 = vshll.u32 %v3454_v62, 16  ;;  %v3469_v15 = vld [vmem:[%s4078_s29 + $0x38] sm:$0xe] }
 0x102   : > { %2322 = vrot.lane.b32.xlu1 %v3630_v7, %s5666_s17  ;;  %v3634_v42 = vcombine.low %v3453_v31, %v3454_v62  ;;  %v3549_v5 = vrot.slane %v3541_v43, 9  ;;  %v1818_v60 = vsel %vm4153_vm5, %v1813_v41, %v1817_v6  ;;  %v1240_v47 = vrot.slane %v1238_v17, 4 }
 0x103   : > { %v5377_v0 = vpop.permute.xlu0 %2252  ;;  %v1243_v49 = vrot.slane %v1241_v28, 5  ;;  %v1869_v22 = vrot.slane %v5329_v3, 5  ;;  %v3674_v50 = vcombine.low %v1804_v58, %v1818_v60  ;;  %v1254_v32 = vrot.slane %v1252_v2, 4  ;;  %v3470_v58 = vld [vmem:[%s4078_s29 + $0x40] sm:$0xe] }
 0x104   : > { %v1257_v35 = vrot.slane %v1255_v36, 5  ;;  %v3550_v12 = vrot.slane %v3542_v39, 9  ;;  %v5395_v48 = vsel %vm5656_vm3, %v5283_v16, %v5089_v24  ;;  %v1873_v14 = vrot.slane %v5345_v46, 5  ;;  %v3558_v46 = vld [vmem:[%s4055_s9 + $0x48] sm:$0xf] }
 0x105   : > { %v1870_v19 = vsel %vm4043_vm2, %v3549_v5, %v1869_v22  ;;  %v5403_v3 = vsel %vm2433_vm7, %v5319_v40, %v5181_v33  ;;  %v2868_v51 = vsel %vm2496_vm14, %v5204_v10, %v5128_v61  ;;  %2709 = vrot.lane.b32.xlu0 %v3674_v50, %s3914_s16  ;;  %v1244_v24 = vor.u32 %v1243_v49, %v1240_v47  ;;  %v3565_v36 = vld [vmem:[%s4055_s9 + $0x44] sm:$0x1]  ;;  %v3566_v49 = vld [vmem:[%s4055_s9 + $0x4c] sm:$0x1] }
 0x106   : > { %2350 = vrot.lane.b32.xlu1 %v3634_v42, %s5667_s19  ;;  %v1247_v16 = vshll.u32 %v3461_v63, 16  ;;  %v1258_v21 = vor.u32 %v1257_v35, %v1254_v32  ;;  %v1874_v33 = vsel %vm4043_vm2, %v3550_v12, %v1873_v14  ;;  %v1261_v40 = vshll.u32 %v3462_v54, 16  ;;  %s390_s19 = scalar_lea.vmem %s5651_s6, %s3366_s13 }
 0x107   : > { %v5405_v8 = vpop.permute.xlu0 %2659  ;;  %v1977_v9 = vshrl.u32 %v3557_v23, 16  ;;  %v1980_v18 = vshll.u32 %v3557_v23, 16  ;;  %v3678_v62 = vcombine.low %v1870_v19, %v1874_v33  ;;  %v1245_v61 = vrot.slane %v1244_v24, 4 }
 0x108   : > { %v1249_v10 = vrot.slane %v1247_v16, 5  ;;  %v1259_v7 = vrot.slane %v1258_v21, 4  ;;  %v1263_v44 = vrot.slane %v1261_v40, 5  ;;  %v1991_v41 = vshrl.u32 %v3558_v46, 16  ;;  %v3485_v16 = vld [vmem:[%s4078_s29 + $0x40] sm:$0xf] }
 0x109   : > { %v1979_v57 = vrot.slane %v1977_v9, 4  ;;  %v1982_v43 = vrot.slane %v1980_v18, 5  ;;  %2729 = vrot.lane.b32.xlu0 %v3678_v62, %s3921_s28  ;;  %v1994_v28 = vshll.u32 %v3558_v46, 16  ;;  %v3682_v39 = vcombine.low %v3557_v23, %v3558_v46  ;;  %v3486_v21 = vld [vmem:[%s4078_s29 + $0x48] sm:$0xf] }
 0x10a   : > { %v5415_v31 = vpop.permute.xlu1 %2098  ;;  %v1250_v17 = vsel %vm4153_vm5, %v1245_v61, %v1249_v10  ;;  %v5426_v2 = vsel %vm2433_vm7, %v2807_v30, %v5235_v11  ;;  %v1264_v42 = vsel %vm4153_vm5, %v1259_v7, %v1263_v44  ;;  %v1993_v5 = vrot.slane %v1991_v41, 4  ;;  %v3573_v9 = vld [vmem:[%s4055_s9 + $0x40] sm:$0xe] }
 0x10b   : > { %v5419_v6 = vpop.permute.xlu0 %2278  ;;  %v3477_v60 = vrot.slane %v3469_v15, 9  ;;  %v1315_v47 = vrot.slane %v3461_v63, 5  ;;  %v3638_v50 = vcombine.low %v1250_v17, %v1264_v42  ;;  %v1996_v32 = vrot.slane %v1994_v28, 5  ;;  %v3574_v15 = vld [vmem:[%s4055_s9 + $0x48] sm:$0xe]  ;;  %s3363_s9 = sshll.u32 %s5686_s22, 6 }
 0x10c   : > { %v3478_v35 = vrot.slane %v3470_v58, 9  ;;  %v1319_v12 = vrot.slane %v3462_v54, 5  ;;  %v2876_v30 = vsel %vm2505_vm15, %v2868_v51, %v5218_v37  ;;  %v1983_v23 = vor.u32 %v1982_v43, %v1979_v57  ;;  %v3864_v58 = vld [vmem:[%s5648_s3 + $0x68] ss:$0 sps:$4 sm:$0xff]  }
 0x10d   : > { %v1316_v11 = vsel %vm4043_vm2, %v3477_v60, %v1315_v47  ;;  %v1986_v19 = vshll.u32 %v3565_v36, 16  ;;  %2370 = vrot.lane.b32.xlu1 %v3638_v50, %s3926_s11  ;;  %2757 = vrot.lane.b32.xlu0 %v3682_v39, %s3920_s20  ;;  %v1997_v14 = vor.u32 %v1996_v32, %v1993_v5  ;;  %v2000_v24 = vshll.u32 %v3566_v49, 16 }
 0x10e   : > { %v5432_v22 = vpop.permute.xlu1 %2280  ;;  %v1320_v63 = vsel %vm4043_vm2, %v3478_v35, %v1319_v12  ;;  %v2054_v54 = vrot.slane %v3565_v36, 5  ;;  %3706 = vmatprep.mubr.msk.bf16.mxu0 %vm2514_vm0, %v2876_v30  ;;  %v1984_v37 = vrot.slane %v1983_v23, 4  ;;  %v2058_v40 = vrot.slane %v3566_v49, 5  ;;  %v3873_v30 = vld [vmem:[%s4018_s15 + $0x38] sm:$0xf] }
 0x10f   : > { %v5444_v46 = vpop.permute.xlu0 %2685  ;;  %v3642_v33 = vcombine.low %v1316_v11, %v1320_v63  ;;  %v1988_v51 = vrot.slane %v1986_v19, 5  ;;  %v1998_v62 = vrot.slane %v1997_v14, 4  ;;  %v2002_v61 = vrot.slane %v2000_v24, 5 }
 0x110   : > { %v2484_v10 = vsel %vm2478_vm12, %v5370_v52, %v5260_v27  ;;  %v2482_v7 = vsel %vm2478_vm12, %v5375_v20, %v5271_v59  ;;  %v1423_v57 = vshrl.u32 %v3485_v16, 16  ;;  %v1426_v43 = vshll.u32 %v3485_v16, 16 }
 0x111   : > { %v1989_v44 = vsel %vm4153_vm5, %v1984_v37, %v1988_v51  ;;  %v1437_v41 = vshrl.u32 %v3486_v21, 16  ;;  %2390 = vrot.lane.b32.xlu1 %v3642_v33, %s5665_s10  ;;  %v2003_v27 = vsel %vm4153_vm5, %v1998_v62, %v2002_v61  ;;  %v1440_v52 = vshll.u32 %v3486_v21, 16 }
 0x112   : > { %v5448_v18 = vpop.permute.xlu1 %2687  ;;  %v3646_v17 = vcombine.low %v3485_v16, %v3486_v21  ;;  %v3581_v28 = vrot.slane %v3573_v9, 9  ;;  %v2543_v59 = vsel %vm5657_vm4, %v5395_v48, %v5193_v34  ;;  %v3686_v20 = vcombine.low %v1989_v44, %v2003_v27 }
 0x113   : > { %v1425_v39 = vrot.slane %v1423_v57, 4  ;;  %v1428_v36 = vrot.slane %v1426_v43, 5  ;;  %v1439_v5 = vrot.slane %v1437_v41, 4  ;;  %v3582_v47 = vrot.slane %v3574_v15, 9 }
 0x114   : > { %v2055_v60 = vsel %vm4043_vm2, %v3581_v28, %v2054_v54  ;;  %vm3006_vm3 = vcmask 1043456   ;;  %2777 = vrot.lane.b32.xlu0 %v3686_v20, %s3922_s30  ;;  %v2822_v34 = vsel %vm2442_vm8, %v5403_v3, %v5309_v13  ;;  %vm2550_vm4 = vcmask 982016  }
 0x115   : > { %v2119_v49 = vpop.permute.xlu0 %2118  ;;  %v3008_v50 = vsel %vm3006_vm3, %v3864_v58, 0  ;;  %v5478_v48 = vsel %vm2487_vm13, %v2482_v7, %v5338_v38  ;;  %v1442_v32 = vrot.slane %v1440_v52, 5  ;;  %2418 = vrot.lane.b32.xlu1 %v3646_v17, %s3928_s12  ;;  %v2059_v35 = vsel %vm4043_vm2, %v3582_v47, %v2058_v40  ;;  %v3872_v38 = vld [vmem:[%s4018_s15 + $0x30] sm:$0xf]  ;;  %s3362_s15 = sshll.u32 %s5692_s21, 3 }
 0x116   : > { %v5468_v42 = vpop.permute.xlu1 %2298  ;;  %3037 = vmatpush1.bf16.msra.mxu0 %v3008_v50  ;;  %v2552_v12 = vsel %vm2550_vm4, %v2543_v59, %v5312_v55  ;;  %v2824_v11 = vsel %vm2442_vm8, %v5426_v2, %v5347_v29  ;;  %v3690_v13 = vcombine.low %v2055_v60, %v2059_v35  ;;  %v2493_v3 = vsel %vm2487_vm13, %v2484_v10, %v5377_v0  ;;  %s380_s20 = sadd.s32 %s3363_s9, %s3362_s15 }
 0x117   : > { %v3586_v23 = vcombine.low %v3872_v38, %v3873_v30  ;;  %3755 = vmatpush1.bf16.msra.mxu1 %v3008_v50  ;;  %v1434_v55 = vrot.slane %v1432_v56, 5  ;;  %v1429_v63 = vor.u32 %v1428_v36, %v1425_v39  ;;  %v1443_v14 = vor.u32 %v1442_v32, %v1439_v5 }
 0x118   : > { %2797 = vrot.lane.b32.xlu0 %v3690_v13, %s3923_s7  ;;  %v1448_v0 = vrot.slane %v1446_v53, 5  ;;  %v2830_v27 = vsel %vm2451_vm9, %v2822_v34, %v5383_v4  ;;  %v2832_v4 = vsel %vm2451_vm9, %v2824_v11, %v5405_v8  ;;  %v2502_v32 = vsel %vm2496_vm14, %v2493_v3, %v5432_v22  ;;  %s3364_s7 = sshll.u32 %s380_s20, 2 }
 0x119   : > { %3043 = vmatmul.mubr.bf16.vlgmr.msra.gmra.mrb[0].mxu0 %v2552_v12  ;;  %v2432_v26 = vsel %vm2420_vm6, %v3586_v23, %v5415_v31  ;;  %v1430_v16 = vrot.slane %v1429_v63, 4  ;;  %v1444_v21 = vrot.slane %v1443_v14, 4  ;;  %v2838_v17 = vsel %vm5658_vm10, %v2830_v27, %v5444_v46  ;;  %s5584_s10 = scalar_lea.vmem %s5650_s5, %s3364_s7 }
 0x11a   : > { %v2706_v19 = vpop.permute.xlu1 %2705  ;;  %v2441_v29 = vsel %vm2433_vm7, %v2432_v26, %v2119_v49  ;;  %v2840_v46 = vsel %vm5658_vm10, %v2832_v4, %v5448_v18  ;;  %v2500_v35 = vsel %vm2496_vm14, %v5478_v48, %v5419_v6  ;;  %vm5668_vm2 = vcmask 850944  }
 0x11b   : > { %v1435_v33 = vsel %vm4153_vm5, %v1430_v16, %v1434_v55  ;;  %v1449_v1 = vsel %vm4153_vm5, %v1444_v21, %v1448_v0  ;;  %v2846_v59 = vsel %vm2469_vm11, %v2838_v17, %v2706_v19  ;;  %v2509_v8 = vsel %vm2505_vm15, %v2500_v35, %v5468_v42  ;;  %vm5669_vm5 = vmmov %vm5668_vm2 }
 0x11c   : > { %v2301_v2 = vpop.permute.xlu0 %2300  ;;  %v5505_v37 = vcombine.low %v1435_v33, %v1449_v1  ;;  %vm5670_vm3 = vcmask 916480  }
 0x11d   : > { %v2511_v11 = vsel %vm2505_vm15, %v2502_v32, %v2301_v2 }
 0x11e   : > { %v2147_v24 = vpop.permute.xlu1 %2146 }
 0x11f   : > { %v2450_v54 = vsel %vm2442_vm8, %v2441_v29, %v2147_v24 }
 0x122   : > { %v2708_v56 = vpop.permute.xlu0 %2707  ;;  %v2321_v31 = vpop.permute.xlu1 %2320 }
 0x123   : > { %v2848_v50 = vsel %vm2469_vm11, %v2840_v46, %v2708_v56  ;;  %v2520_v30 = vsel %vm2514_vm0, %v2511_v11, %v2321_v31 }
 0x126   : > { %v2319_v51 = vpop.permute.xlu0 %2318 }
 0x127   : > { %v2518_v23 = vsel %vm2514_vm0, %v2509_v8, %v2319_v51 }
 0x128   : > { %v2728_v40 = vpop.permute.xlu1 %2727 }
 0x129   : > { %v2856_v34 = vsel %vm2478_vm12, %v2848_v50, %v2728_v40 }
 0x12a   : > { %v2726_v9 = vpop.permute.xlu0 %2725 }
 0x12b   : > { %v2854_v20 = vsel %vm2478_vm12, %v2846_v59, %v2726_v9 }
 0x12c   : > { %v2347_v25 = vpop.permute.xlu1 %2346 }
 0x12d   : > { %v2527_v3 = vsel %vm2523_vm1, %v2518_v23, %v2347_v25 }
 0x12f   : > { %v2167_v53 = vpop.permute.xlu0 %2166 }
 0x130   : > { %v2459_v62 = vsel %vm2451_vm9, %v2450_v54, %v2167_v53  ;;  %v2754_v61 = vpop.permute.xlu1 %2753 }
 0x131   : > { %v2862_v39 = vsel %vm2487_vm13, %v2854_v20, %v2754_v61 }
 0x133   : > { %v2349_v10 = vpop.permute.xlu0 %2348 }
 0x134   : > { %v2529_v6 = vsel %vm2523_vm1, %v2520_v30, %v2349_v10 }
 0x137   : > { %v2187_v7 = vpop.permute.xlu1 %2186  ;;  %v2756_v44 = vpop.permute.xlu0 %2755 }
 0x138   : > { %v2468_v15 = vsel %vm5658_vm10, %v2459_v62, %v2187_v7  ;;  %v2864_v12 = vsel %vm2487_vm13, %v2856_v34, %v2756_v44  ;;  %vm5671_vm10 = vmmov %vm5670_vm3 }
 0x13e   : > { %v2369_v57 = vpop.permute.xlu1 %2368 }
 0x13f   : > { %v2538_v42 = vsel %vm5668_vm2, %v2529_v6, %v2369_v57 }
 0x141   : > { %v2367_v45 = vpop.permute.xlu0 %2366 }
 0x142   : > { %v2536_v48 = vsel %vm5669_vm5, %v2527_v3, %v2367_v45 }
 0x145   : > { %v2774_v43 = vpop.permute.xlu1 %2773 }
 0x146   : > { %v2594_v41 = vpop.permute.xlu0 %2593  ;;  %v2870_v5 = vsel %vm2496_vm14, %v2862_v39, %v2774_v43 }
 0x147   : > { %v2810_v25 = vsel %vm2420_vm6, %v5505_v37, %v2594_v41 }
 0x149   : > { %v2215_v58 = vpop.permute.xlu1 %2214 }
 0x14a   : > { %v2477_v9 = vsel %vm2469_vm11, %v2468_v15, %v2215_v58 }
 0x14d   : > { %v2776_v52 = vpop.permute.xlu0 %2775 }
 0x14e   : > { %v2389_v28 = vpop.permute.xlu1 %2388  ;;  %v2872_v18 = vsel %vm2496_vm14, %v2864_v12, %v2776_v52 }
 0x14f   : > { %v2547_v19 = vsel %vm5670_vm3, %v2538_v42, %v2389_v28 }
 0x151   : > { %v2387_v36 = vpop.permute.xlu0 %2386 }
 0x152   : > { %v2794_v60 = vpop.permute.xlu1 %2793  ;;  %v2545_v26 = vsel %vm5671_vm10, %v2536_v48, %v2387_v36  ;;  %vm5672_vm10 = vcmask 326656  }
 0x153   : > { %v2878_v47 = vsel %vm2505_vm15, %v2870_v5, %v2794_v60  ;;  %v5578_v60 = vld [vmem:[%s5649_s4] ss:$0 sm:$0xff] }
 0x154   : > { %3707 = vmatprep.mubr.msk.bf16.mxu0 %vm2514_vm0, %v2878_v47 }
 0x155   : > { %v2622_v49 = vpop.permute.xlu0 %2621 }
 0x156   : > { %v2818_v62 = vsel %vm2433_vm7, %v2810_v25, %v2622_v49  ;;  %vm5673_vm7 = vmmov %vm5668_vm2 }
 0x159   : > { %v2235_v13 = vpop.permute.xlu1 %2234  ;;  %v2796_v38 = vpop.permute.xlu0 %2795 }
 0x15a   : > { %v2880_v22 = vsel %vm2505_vm15, %v2872_v18, %v2796_v38  ;;  %v2486_v53 = vsel %vm2478_vm12, %v2477_v9, %v2235_v13 }
 0x15b   : > { %3708 = vmatprep.mubr.msk.bf16.mxu1 %vm2514_vm0, %v2880_v22 }
 0x15d   : > { %v2417_v55 = vpop.permute.xlu1 %2416  ;;  %v2415_v29 = vpop.permute.xlu0 %2414 }
 0x15e   : > { %v2555_v2 = vsel %vm2550_vm4, %v2545_v26, %v2415_v29  ;;  %v2558_v63 = vsel %vm2550_vm4, %v2547_v19, %v2417_v55 }
 0x15f   : > { %3051 = vmatmul.mubr.bf16.gmra.mrb[4].mxu0 %v2555_v2  ;;  %3059 = vmatmul.mubr.bf16.vlgmr.msra.gmra.mrb[0].mxu1 %v2558_v63 }
 0x162   : > { %v2255_v14 = vpop.permute.xlu1 %2254 }
 0x163   : > { %v2495_v61 = vsel %vm2487_vm13, %v2486_v53, %v2255_v14 }
 0x166   : > { %v2642_v0 = vpop.permute.xlu0 %2641  ;;  %v2283_v24 = vpop.permute.xlu1 %2282 }
 0x167   : > { %v2826_v7 = vsel %vm2442_vm8, %v2818_v62, %v2642_v0  ;;  %v2504_v44 = vsel %vm2496_vm14, %v2495_v61, %v2283_v24  ;;  %vm5674_vm8 = vmmov %vm5670_vm3 }
 0x16a   : > { %v2662_v54 = vpop.permute.xlu0 %2661 }
 0x16b   : > { %v2834_v57 = vsel %vm2451_vm9, %v2826_v7, %v2662_v54  ;;  %vm3161_vm9 = vcmask 60416  }
 0x16e   : > { %v2690_v21 = vpop.permute.xlu0 %2689 }
 0x16f   : > { %v2842_v15 = vsel %vm5672_vm10, %v2834_v57, %v2690_v21 }
 0x170   : > { %v2303_v16 = vpop.permute.xlu1 %2302 }
 0x171   : > { %v2513_v45 = vsel %vm2505_vm15, %v2504_v44, %v2303_v16 }
 0x174   : > { %v2323_v33 = vpop.permute.xlu1 %2322 }
 0x175   : > { %v2522_v37 = vsel %vm2514_vm0, %v2513_v45, %v2323_v33 }
 0x177   : > { %v2710_v1 = vpop.permute.xlu0 %2709 }
 0x178   : > { %v2351_v56 = vpop.permute.xlu1 %2350  ;;  %v2850_v41 = vsel %vm2469_vm11, %v2842_v15, %v2710_v1  ;;  %vm3125_vm11 = vcmask 1040384  }
 0x179   : > { %v2531_v58 = vsel %vm2523_vm1, %v2522_v37, %v2351_v56 }
 0x17b   : > { %v2730_v31 = vpop.permute.xlu0 %2729 }
 0x17c   : > { %v2858_v52 = vsel %vm2478_vm12, %v2850_v41, %v2730_v31 }
 0x17f   : > { %v2371_v51 = vpop.permute.xlu1 %2370  ;;  %v2758_v40 = vpop.permute.xlu0 %2757 }
 0x180   : > { %v2540_v17 = vsel %vm5673_vm7, %v2531_v58, %v2371_v51  ;;  %v2866_v28 = vsel %vm2487_vm13, %v2858_v52, %v2758_v40 }
 0x183   : > { %v2391_v10 = vpop.permute.xlu1 %2390 }
 0x184   : > { %v2549_v59 = vsel %vm5674_vm8, %v2540_v17, %v2391_v10 }
 0x186   : > { %v2778_v43 = vpop.permute.xlu0 %2777 }
 0x187   : > { %v2419_v27 = vpop.permute.xlu1 %2418  ;;  %v2874_v20 = vsel %vm2496_vm14, %v2866_v28, %v2778_v43 }
 0x188   : > { %v2561_v36 = vsel %vm2550_vm4, %v2549_v59, %v2419_v27 }
 0x18a   : > { %v2798_v39 = vpop.permute.xlu0 %2797 }
 0x18b   : > { %v2882_v5 = vsel %vm2505_vm15, %v2874_v20, %v2798_v39 }
 0x18c   : > { %3709 = vmatprep.mubr.msk.bf16.mxu1 %vm2514_vm0, %v2882_v5 }
 0x18d   : > { %3067 = vmatmul.mubr.bf16.gmra.mrb[4].mxu1 %v2561_v36 }
 0x1ec   : > { %v3044_v47 = vpop.f32.mrb[0].mxu0 }
 0x1ed   : > { %v3045_v4 = vadd.f32 %v5578_v60, %v3044_v47  ;;  %v3046_v46 = vpop.f32.mrb[1].mxu0 }
 0x1ee   : > { %v3047_v49 = vpop.f32.mrb[2].mxu0 }
 0x1ef   : > { %v3096_v50 = vmul.f32 %v3045_v4, %v3045_v4  ;;  %v3720_v34 = vpack.c.bf16 %v3045_v4, %v3045_v4  ;;  %v3048_v32 = vadd.f32 %v5578_v60, %v3047_v49  ;;  %v3049_v35 = vpop.f32.mrb[3].mxu0  ;;  %v3075_v12 = vsel %vm2420_vm6, %v3045_v4, 0.0 }
 0x1f1   : > { %3162 = vst.msk [vmem:[%s5584_s10] sm:$0xf] %vm3161_vm9, %v3720_v34  ;;  %v3076_v8 = vsel %vm2420_vm6, %v3048_v32, 0.0  ;;  %v3097_v11 = vmul.f32 %v3048_v32, %v3048_v32  ;;  %v3721_v18 = vpack.c.bf16 %v3048_v32, %v3048_v32  ;;  %v3104_v38 = vsel %vm2420_vm6, %v3096_v50, 0.0 }
 0x1f2   : > { %v3077_v13 = vadd.f32 %v3076_v8, %v3075_v12 }
 0x1f3   : > { %v3105_v30 = vsel %vm2420_vm6, %v3097_v11, 0.0  ;;  %3163 = vst.msk [vmem:[%s5584_s10 + $0x4] sm:$0xf] %vm3161_vm9, %v3721_v18 }
 0x1f4   : > { %v3106_v23 = vadd.f32 %v3105_v30, %v3104_v38 }
 0x232   : > { %v3052_v22 = vpop.f32.mrb[4].mxu0  ;;  %v3060_v3 = vpop.f32.mrb[0].mxu1 }
 0x233   : > { %v3053_v6 = vadd.f32 %v5578_v60, %v3052_v22  ;;  %v3061_v42 = vadd.f32 %v5578_v60, %v3060_v3  ;;  %v3054_v48 = vpop.f32.mrb[5].mxu0  ;;  %v3062_v19 = vpop.f32.mrb[1].mxu1 }
 0x234   : > { %v3055_v26 = vpop.f32.mrb[6].mxu0  ;;  %v3063_v55 = vpop.f32.mrb[2].mxu1 }
 0x235   : > { %v3078_v29 = vsel %vm2420_vm6, %v3053_v6, 0.0  ;;  %v3098_v2 = vmul.f32 %v3053_v6, %v3053_v6  ;;  %v3722_v63 = vpack.c.bf16 %v3053_v6, %v3053_v6  ;;  %v3057_v14 = vpop.f32.mrb[7].mxu0  ;;  %v3065_v0 = vpop.f32.mrb[3].mxu1  ;;  %v3724_v54 = vpack.c.bf16 %v3061_v42, %v3061_v42 }
 0x236   : > { %v3079_v24 = vadd.f32 %v3078_v29, %v3077_v13  ;;  %v3056_v16 = vadd.f32 %v5578_v60, %v3055_v26  ;;  %v3064_v33 = vadd.f32 %v5578_v60, %v3063_v55  ;;  %v3100_v56 = vmul.f32 %v3061_v42, %v3061_v42 }
 0x237   : > { %v3107_v21 = vsel %vm2420_vm6, %v3098_v2, 0.0  ;;  %3164 = vst.msk [vmem:[%s5584_s10 + $0x8] sm:$0xf] %vm3161_vm9, %v3722_v63  ;;  %3166 = vst.msk [vmem:[%s5584_s10 + $0x10] sm:$0xf] %vm3161_vm9, %v3724_v54  ;;  %v3082_v25 = vsel %vm2420_vm6, %v3061_v42, 0.0 }
 0x238   : > { %v3108_v1 = vadd.f32 %v3107_v21, %v3106_v23  ;;  %v3080_v31 = vsel %vm2420_vm6, %v3056_v16, 0.0  ;;  %v3099_v51 = vmul.f32 %v3056_v16, %v3056_v16  ;;  %v3723_v9 = vpack.c.bf16 %v3056_v16, %v3056_v16 }
 0x239   : > { %v3081_v40 = vadd.f32 %v3080_v31, %v3079_v24  ;;  %v3101_v62 = vmul.f32 %v3064_v33, %v3064_v33  ;;  %v3725_v61 = vpack.c.bf16 %v3064_v33, %v3064_v33  ;;  %v3111_v44 = vsel %vm2420_vm6, %v3100_v56, 0.0 }
 0x23a   : > { %v3109_v53 = vsel %vm2420_vm6, %v3099_v51, 0.0  ;;  %3165 = vst.msk [vmem:[%s5584_s10 + $0xc] sm:$0xf] %vm3161_vm9, %v3723_v9  ;;  %v3084_v57 = vsel %vm2420_vm6, %v3064_v33, 0.0 }
 0x23b   : > { %v3110_v10 = vadd.f32 %v3109_v53, %v3108_v1  ;;  %v3083_v7 = vadd.f32 %v3082_v25, %v3081_v40  ;;  %3167 = vst.msk [vmem:[%s5584_s10 + $0x14] sm:$0xf] %vm3161_vm9, %v3725_v61  ;;  %v3113_v37 = vsel %vm2420_vm6, %v3101_v62, 0.0 }
 0x23d   : > { %v3085_v45 = vadd.f32 %v3084_v57, %v3083_v7  ;;  %v3112_v15 = vadd.f32 %v3111_v44, %v3110_v10 }
 0x23f   : > { %v3114_v43 = vadd.f32 %v3113_v37, %v3112_v15 }
 0x260   : > { %v3068_v41 = vpop.f32.mrb[4].mxu1 }
 0x261   : > { %v3069_v58 = vadd.f32 %v5578_v60, %v3068_v41  ;;  %v3070_v27 = vpop.f32.mrb[5].mxu1 }
 0x262   : > { %v3071_v52 = vpop.f32.mrb[6].mxu1 }
 0x263   : > { %v3086_v17 = vsel %vm2420_vm6, %v3069_v58, 0.0  ;;  %v3102_v28 = vmul.f32 %v3069_v58, %v3069_v58  ;;  %v3726_v59 = vpack.c.bf16 %v3069_v58, %v3069_v58  ;;  %v3072_v20 = vadd.f32 %v5578_v60, %v3071_v52  ;;  %v3073_v39 = vpop.f32.mrb[7].mxu1 }
 0x264   : > { %v3087_v36 = vadd.f32 %v3086_v17, %v3085_v45 }
 0x265   : > { %v3115_v5 = vsel %vm2420_vm6, %v3102_v28, 0.0  ;;  %3168 = vst.msk [vmem:[%s5584_s10 + $0x18] sm:$0xf] %vm3161_vm9, %v3726_v59  ;;  %v3088_v47 = vsel %vm2420_vm6, %v3072_v20, 0.0  ;;  %v3103_v4 = vmul.f32 %v3072_v20, %v3072_v20  ;;  %v3727_v46 = vpack.c.bf16 %v3072_v20, %v3072_v20 }
 0x266   : > { %v3116_v49 = vadd.f32 %v3115_v5, %v3114_v43  ;;  %v3089_v50 = vadd.f32 %v3088_v47, %v3087_v36 }
 0x267   : > { %v3117_v34 = vsel %vm2420_vm6, %v3103_v4, 0.0  ;;  %3169 = vst.msk [vmem:[%s5584_s10 + $0x1c] sm:$0xf] %vm3161_vm9, %v3727_v46  ;;  %vm3127_vm6 = vcmask 58368  }
 0x268   : > { %v3090_v32 = vrot.slane %v3089_v50, 4  ;;  %v3118_v60 = vadd.f32 %v3117_v34, %v3116_v49 }
 0x26a   : > { %v3091_v35 = vadd.f32 %v3090_v32, %v3089_v50  ;;  %v3119_v12 = vrot.slane %v3118_v60, 4 }
 0x26c   : > { %v3092_v8 = vrot.slane %v3091_v35, 2  ;;  %v3120_v11 = vadd.f32 %v3119_v12, %v3118_v60 }
 0x26e   : > { %v3093_v18 = vadd.f32 %v3092_v8, %v3091_v35  ;;  %v3121_v13 = vrot.slane %v3120_v11, 2 }
 0x270   : > { %v3094_v38 = vrot.slane %v3093_v18, 1  ;;  %v3122_v30 = vadd.f32 %v3121_v13, %v3120_v11 }
 0x272   : > { %v3123_v23 = vrot.slane %v3122_v30, 1  ;;  %v3095_v22 = vadd.f32 %v3094_v38, %v3093_v18 }
 0x274   : > { %v3124_v3 = vadd.f32 %v3123_v23, %v3122_v30 }
 0x276   : > { %v3126_v6 = vsel %vm3125_vm11, %v3095_v22, %v3124_v3 }
 0x277   : > { %3128 = vst.msk [vmem:[%s390_s19] sm:$0x3] %vm3127_vm6, %v3126_v6 }
 0x278 PF: > { %s17_s25 = sadd.s32 1, %s3912_s25   ;;  %s5675_s21 = smov %s3904_s23 }
 0x279   : > { %p14_p10 = scmp.ge.s32.totalorder %s17_s25, 18   ;;  %s5676_s22 = smov %s3908_s24 }
 0x27a   : > { %s5677_s23 = smov %s5680_s26  ;;  %s5678_s24 = smov %s5684_s27 }
 0x27b   :  { %16 = sbr.rel (!%p14_p10) target bundleno = 3 (0x3), region = 94 }

</bundles_post_ra>
